<compile_context>
chip_gen: v5e
topology: v5e:2x2
jax: 0.10.0
libtpu: 0.0.40
codegen_flags: <defaults>
</compile_context>

<pallas_src>
import functools

import jax
import jax.numpy as jnp
from jax.experimental import pallas as pl
from jax.experimental.pallas import tpu as pltpu


# Gate pre-activation used for ragged-tail padding: sigmoid(-1e4) == 0 exactly, so padded
# steps keep h = c = 0 and contribute nothing to the pooling sum or the next layer.
_PAD_GATE = -1.0e4


# --------------------------- hardware / feature probes -------------------------

@functools.lru_cache(maxsize=None)
def _vmem_capacity_bytes():
    try:
        return int(pltpu.get_tpu_info().vmem_capacity_bytes)
    except Exception:
        return 64 * 1024 * 1024   # v7x per-TensorCore VMEM (smallest current generation)


@functools.lru_cache(maxsize=None)
def _single_buffered_weights_supported():
    """Feature-probe pipeline_mode=pl.Buffered(1) (single-buffering of constant blocks)."""
    try:
        def _k(a_ref, w_ref, o_ref):
            o_ref[...] = a_ref[...] + w_ref[...]
        probe = pl.pallas_call(
            _k,
            out_shape=jax.ShapeDtypeStruct((16, 128), jnp.float32),
            grid=(2,),
            in_specs=[pl.BlockSpec((8, 128), lambda i: (i, 0)),
                      pl.BlockSpec((8, 128), lambda i: (0, 0),
                                   pipeline_mode=pl.Buffered(1))],
            out_specs=pl.BlockSpec((8, 128), lambda i: (i, 0)))
        jax.jit(probe).lower(jnp.zeros((16, 128), jnp.float32),
                             jnp.zeros((8, 128), jnp.float32)).compile()
        return True
    except Exception:
        return False


def _const_weight_spec(shape, index_map):
    """Constant-index W_hh block: single-buffer it when supported (halves its VMEM
    footprint -- matters on v7x's 64 MiB); plain double-buffered spec otherwise."""
    if _single_buffered_weights_supported():
        return pl.BlockSpec(shape, index_map, pipeline_mode=pl.Buffered(1))
    return pl.BlockSpec(shape, index_map)


# ----------------------------- Pallas kernels --------------------------------

def _lstm_gate(gates, c_prev, H, gate_dtype):
    """Elementwise LSTM gating.  Nonlinearities run in gate_dtype (bf16 on v6e/v7x for
    ~2x EUP/VPU throughput); the cell-state update and h state stay in f32.
    TODO(synk): at production sizes keep H a multiple of 128 and B a multiple of 8 so
    these gate slices are lane-aligned (no XLU relayout / masked stores)."""
    g = gates.astype(gate_dtype)
    i = jax.nn.sigmoid(g[:, 0 * H:1 * H])
    f = jax.nn.sigmoid(g[:, 1 * H:2 * H])
    gg = jnp.tanh(g[:, 2 * H:3 * H])
    o = jax.nn.sigmoid(g[:, 3 * H:4 * H])
    c_new = (f * c_prev + i * gg).astype(jnp.float32)                  # f32 accumulate
    h_new = (o * jnp.tanh(c_new.astype(gate_dtype))).astype(jnp.float32)
    return h_new, c_new


def _run_chunk(gxf_ref, gxb_ref, whh_f_ref, whh_b_ref,
               hf, cf, hb, cb, emit_f, emit_b, gate_dtype):
    """Walk one chunk of Tc timesteps for both directions.

    gx*_ref hold the precomputed input projections (x @ W_ih^T + b); only the recurrent
    h @ W_hh^T matmul and the gating remain in the serial loop.  W_hh is read through its
    ref at each dot site so the MXU streams it from the resident VMEM block (no hoisted
    value copy).  Forward walks local time 0..Tc-1, backward walks Tc-1..0 (its chunk is
    selected in reverse order by the BlockSpec index_map)."""
    Tc = gxf_ref.shape[0]
    H = hf.shape[1]
    cdt = whh_f_ref.dtype

    def body(j, carry):
        # forward direction, local time j
        g = gxf_ref[j] + jnp.dot(hf[...].astype(cdt), whh_f_ref[...],
                                 preferred_element_type=jnp.float32)
        h_new, c_new = _lstm_gate(g, cf[...], H, gate_dtype)
        hf[...] = h_new
        cf[...] = c_new
        emit_f(j, h_new)
        # backward direction, local time Tc-1-j (global time descends)
        jb = Tc - 1 - j
        gb = gxb_ref[jb] + jnp.dot(hb[...].astype(cdt), whh_b_ref[...],
                                   preferred_element_type=jnp.float32)
        hb_new, cb_new = _lstm_gate(gb, cb[...], H, gate_dtype)
        hb[...] = hb_new
        cb[...] = cb_new
        emit_b(jb, hb_new)
        return carry

    # TODO(synk): sweep an integer unroll (e.g. 8) instead of full unroll if bundle dumps
    # show vreg spills at production chunk sizes.
    jax.lax.fori_loop(0, Tc, body, 0, unroll=True)


def _bidir_layer_kernel(gxf_ref, gxb_ref, whh_f_ref, whh_b_ref,
                        of_ref, ob_ref, hf, cf, hb, cb, *, gate_dtype):
    """Intermediate bi-LSTM layer: emits per-timestep hidden states (fwd + bwd)."""
    @pl.when(pl.program_id(1) == 0)              # time axis restart per batch tile
    def _():
        for r in (hf, cf, hb, cb):
            r[...] = jnp.zeros_like(r)

    def emit_f(j, h):
        of_ref[j] = h.astype(of_ref.dtype)

    def emit_b(j, h):
        ob_ref[j] = h.astype(ob_ref.dtype)

    _run_chunk(gxf_ref, gxb_ref, whh_f_ref, whh_b_ref,
               hf, cf, hb, cb, emit_f, emit_b, gate_dtype)


def _bidir_pool_layer_kernel(gxf_ref, gxb_ref, whh_f_ref, whh_b_ref, out_ref,
                             hf, cf, hb, cb, sf, sb, mf, mb,
                             *, seq_len, num_chunks, gate_dtype):
    """Final bi-LSTM layer with fused [mean, max] time pooling; only (B_tile, 4H) ever
    reaches HBM.  Ragged (padded) tails: padded gate rows are _PAD_GATE so padded steps
    keep h = 0 (sum unaffected); the max update is masked on the global time index."""
    c = pl.program_id(1)
    Tc = gxf_ref.shape[0]
    ragged = num_chunks * Tc > seq_len           # static Python bool

    @pl.when(c == 0)
    def _():
        for r in (hf, cf, hb, cb, sf, sb):
            r[...] = jnp.zeros_like(r)
        mf[...] = jnp.full_like(mf, -jnp.inf)
        mb[...] = jnp.full_like(mb, -jnp.inf)

    base_f = c * Tc
    base_b = (num_chunks - 1 - c) * Tc

    def emit_f(j, h):
        sf[...] += h
        if ragged:
            h = jnp.where(base_f + j < seq_len, h, -jnp.inf)
        mf[...] = jnp.maximum(mf[...], h)

    def emit_b(j, h):
        sb[...] += h
        if ragged:
            h = jnp.where(base_b + j < seq_len, h, -jnp.inf)
        mb[...] = jnp.maximum(mb[...], h)

    _run_chunk(gxf_ref, gxb_ref, whh_f_ref, whh_b_ref,
               hf, cf, hb, cb, emit_f, emit_b, gate_dtype)

    @pl.when(c == num_chunks - 1)
    def _():
        inv_t = jnp.float32(1.0 / seq_len)
        # torch: cat([mean(cat[fwd,bwd]), max(cat[fwd,bwd])], 1)
        #      = [mean_fwd, mean_bwd, max_fwd, max_bwd]
        out_ref[...] = jnp.concatenate(
            [sf[...] * inv_t, sb[...] * inv_t, mf[...], mb[...]],
            axis=-1).astype(out_ref.dtype)


# ----------------------------- layer wrapper ----------------------------------

def _pick_chunk(T, B, H, gx_itemsize, out_itemsize, max_chunk=64):
    """Largest chunk of timesteps whose double-buffered gate/output blocks fit a
    per-generation VMEM budget (v7x: 64 MiB, v5e/v6e: 128 MiB)."""
    budget = int(0.35 * _vmem_capacity_bytes())
    per_step = 2 * 2 * B * 4 * H * gx_itemsize + 2 * 2 * B * H * out_itemsize
    chunk = max(1, min(T, max_chunk, budget // per_step))
    div = chunk
    while T % div:
        div -= 1
    # prefer an exact divisor (no ragged tail) unless it shrinks the chunk by >25%
    return div if 4 * div >= 3 * chunk else chunk


def bidir_lstm_layer(gx, lw, *, seq_len, chunk, pool, h_dtype,
                     batch_tile=None, gate_dtype=jnp.float32, gx_buffers=2):
    """One bidirectional LSTM layer over precomputed gate projections.

    gx: (Tp, B, 8H) fused fwd/bwd gate pre-activations (Tp = chunk-padded seq length).
    pool=False -> (h_fwd, h_bwd), each (Tp, B, H); pool=True -> (B, 4H) [mean, max]."""
    Tp, B, G2 = gx.shape
    G = G2 // 2
    H = G // 4
    assert Tp % chunk == 0
    nC = Tp // chunk
    tb = B if batch_tile is None else batch_tile
    assert B % tb == 0
    nB = B // tb

    # Fast path: both directions read from the single fused array (x projected once).
    if G % 128 == 0:
        gx_f_arg, gx_b_arg, bwd_blk = gx, gx, 1
    else:
        # TODO(synk): keep H a multiple of 32 (ideally 128) at production sizes so this
        # lane-misaligned fallback (materializing the two halves) never triggers.
        gx_f_arg, gx_b_arg, bwd_blk = gx[..., :G], gx[..., G:], 0

    in_specs = [
        pl.BlockSpec((chunk, tb, G), lambda b, c: (c, b, 0)),                 # fwd gates
        pl.BlockSpec((chunk, tb, G), lambda b, c: (nC - 1 - c, b, bwd_blk)),  # bwd gates
        _const_weight_spec((H, G), lambda b, c: (0, 0)),                      # W_hh fwd
        _const_weight_spec((H, G), lambda b, c: (0, 0)),                      # W_hh bwd
    ]
    # TODO(synk): on v5e sweep pipeline_mode=pl.Buffered(3) on the two gate streams (its
    # lower HBM BW can expose the next-chunk DMA); keep the default depth on v6e/v7x.
    state_scratch = [pltpu.VMEM((tb, H), jnp.float32) for _ in range(4)]  # h/c fwd/bwd

    # Explicit VMEM limit from the computed footprint (feedback: don't rely on defaults).
    gx_isz = jnp.dtype(gx.dtype).itemsize
    w_isz = jnp.dtype(lw["whh_f"].dtype).itemsize
    h_isz = jnp.dtype(h_dtype).itemsize
    w_bufs = 1 if _single_buffered_weights_supported() else 2
    footprint = (2 * gx_buffers * chunk * tb * G * gx_isz          # gate streams
                 + 2 * w_bufs * H * G * w_isz                      # recurrent weights
                 + 4 * tb * H * 4)                                 # h/c state
    footprint += (2 * tb * 4 * H * 4 + 4 * tb * H * 4) if pool \
        else (2 * 2 * chunk * tb * H * h_isz)
    vmem_limit = min(max(32 << 20, int(footprint * 1.3) + (2 << 20)),
                     _vmem_capacity_bytes())

    compiler_params = pltpu.CompilerParams(
        dimension_semantics=("parallel", "arbitrary"),   # batch tiles across cores (v7x)
        vmem_limit_bytes=int(vmem_limit))

    cost = pl.CostEstimate(
        flops=2 * 2 * Tp * B * H * G + 20 * Tp * B * H,
        transcendentals=2 * 5 * Tp * B * H,
        bytes_accessed=(Tp * B * 2 * G * gx_isz + 2 * H * G * w_isz
                        + (B * 4 * H * 4 if pool else 2 * Tp * B * H * h_isz)),
    )

    if pool:
        return pl.pallas_call(
            functools.partial(_bidir_pool_layer_kernel, seq_len=seq_len,
                              num_chunks=nC, gate_dtype=gate_dtype),
            out_shape=jax.ShapeDtypeStruct((B, 4 * H), jnp.float32),
            grid_spec=pltpu.PrefetchScalarGridSpec(
                num_scalar_prefetch=0,
                grid=(nB, nC),
                in_specs=in_specs,
                out_specs=pl.BlockSpec((tb, 4 * H), lambda b, c: (b, 0)),
                scratch_shapes=state_scratch
                + [pltpu.VMEM((tb, H), jnp.float32) for _ in range(4)],  # sum/max f/b
            ),
            compiler_params=compiler_params,
            cost_estimate=cost,
        )(gx_f_arg, gx_b_arg, lw["whh_f"], lw["whh_b"])

    return pl.pallas_call(
        functools.partial(_bidir_layer_kernel, gate_dtype=gate_dtype),
        out_shape=(jax.ShapeDtypeStruct((Tp, B, H), h_dtype),
                   jax.ShapeDtypeStruct((Tp, B, H), h_dtype)),
        grid_spec=pltpu.PrefetchScalarGridSpec(
            num_scalar_prefetch=0,
            grid=(nB, nC),
            in_specs=in_specs,
            out_specs=[pl.BlockSpec((chunk, tb, H), lambda b, c: (c, b, 0)),
                       pl.BlockSpec((chunk, tb, H), lambda b, c: (nC - 1 - c, b, 0))],
            scratch_shapes=state_scratch,
        ),
        compiler_params=compiler_params,
        cost_estimate=cost,
    )(gx_f_arg, gx_b_arg, lw["whh_f"], lw["whh_b"])


# ----------------------------- model wrapper ----------------------------------

def lstm_extractor_forward(xs, prep, *, chunk=None, batch_tile=None,
                           gx_dtype=None, gate_dtype=None):
    """xs: (B, T) int32 token ids -> (B, 4*hidden) f32.

    gx_dtype:   storage dtype of the hoisted gate projections (bf16 recommended in
                production -- halves the dominant HBM/VMEM stream).  Default: weight dtype.
    gate_dtype: dtype of the gate nonlinearities (bf16 on v6e/v7x which have bf16
                VPU/EUP; keep f32 on v5e).  Default: f32.
    batch_tile: batch-tile size for the leading "parallel" grid axis (set to B // 2,
                a multiple of 8, on v7x to use both TensorCores).  Default: B."""
    layers = prep["lstm"]
    compute_dtype = layers[0]["wih"].dtype
    gx_dtype = compute_dtype if gx_dtype is None else gx_dtype
    gate_dtype = jnp.float32 if gate_dtype is None else gate_dtype
    H = layers[0]["whh_f"].shape[0]

    emb = prep["embedding"][xs]                               # (B, T, E) frozen-embedding gather (XLA glue)
    x = jnp.transpose(emb, (1, 0, 2)).astype(compute_dtype)   # (T, B, E) time-major
    T, B, _ = x.shape

    if chunk is None:
        chunk = _pick_chunk(T, B, H,
                            gx_itemsize=jnp.dtype(gx_dtype).itemsize,
                            out_itemsize=jnp.dtype(compute_dtype).itemsize)
    nC = pl.cdiv(T, chunk)
    Tp = nC * chunk                                           # chunk-padded (ragged) length

    out = None
    pair = None
    for li, lw in enumerate(layers):
        pool = li == len(layers) - 1
        # Hoisted input projection: ONE fused (in_dim, 8H) matmul covering both directions
        # and all timesteps, accumulated in f32 with the f32 bias, then cast to gx_dtype.
        if li == 0:
            gx = jnp.einsum("tbe,eg->tbg", x, lw["wih"],
                            preferred_element_type=jnp.float32) + lw["b"]
        else:
            h_f, h_b = pair        # no concat round trip: project the two halves directly
            gx = (jnp.einsum("tbh,hg->tbg", h_f, lw["wih"][:H],
                             preferred_element_type=jnp.float32)
                  + jnp.einsum("tbh,hg->tbg", h_b, lw["wih"][H:],
                               preferred_element_type=jnp.float32)
                  + lw["b"])
        gx = gx.astype(gx_dtype)
        if Tp > T:                 # ragged tail: gates that freeze the state at zero
            if gx.shape[0] == T:
                gx = jnp.pad(gx, ((0, Tp - T), (0, 0), (0, 0)),
                             constant_values=_PAD_GATE)
            else:
                gx = gx.at[T:].set(_PAD_GATE)
        res = bidir_lstm_layer(gx, lw, seq_len=T, chunk=chunk, pool=pool,
                               h_dtype=compute_dtype, batch_tile=batch_tile,
                               gate_dtype=gate_dtype)
        if pool:
            out = res
        else:
            pair = res
        # TODO(synk): nn.LSTM inter-layer dropout (p=0.2) is train-only; eval forward omits it.
    return out


# ------------------------- deterministic parameters ----------------------------

def init_params(key, vocab, emb_dim, hidden, num_layers):
    """Raw parameters in PyTorch nn.LSTM layout."""
    keys = jax.random.split(key, 1 + num_layers * 8)
    embedding = jax.random.normal(keys[0], (vocab, emb_dim), jnp.float32)
    bound = 1.0 / float(hidden) ** 0.5

    def u(k, shape):
        return jax.random.uniform(k, shape, jnp.float32, -bound, bound)

    layers = []
    ki = 1
    in_dim = emb_dim
    for _ in range(num_layers):
        layers.append({
            "w_ih_f": u(keys[ki + 0], (4 * hidden, in_dim)),
            "w_hh_f": u(keys[ki + 1], (4 * hidden, hidden)),
            "b_ih_f": u(keys[ki + 2], (4 * hidden,)),
            "b_hh_f": u(keys[ki + 3], (4 * hidden,)),
            "w_ih_b": u(keys[ki + 4], (4 * hidden, in_dim)),
            "w_hh_b": u(keys[ki + 5], (4 * hidden, hidden)),
            "b_ih_b": u(keys[ki + 6], (4 * hidden,)),
            "b_hh_b": u(keys[ki + 7], (4 * hidden,)),
        })
        ki += 8
        in_dim = 2 * hidden
    return {"embedding": embedding, "lstm": layers}


def prepare_params(raw, compute_dtype=jnp.float32):
    """One-time weight prep: per-direction W_ih fused into a single (in_dim, 8H) matrix,
    W_hh transposed, biases pre-summed and fused (kept f32 -- added to the f32 gate
    accumulator); optional bf16 MXU operands."""
    layers = []
    for lw in raw["lstm"]:
        wih = jnp.concatenate([lw["w_ih_f"].T, lw["w_ih_b"].T], axis=1)   # (in_dim, 8H)
        b = jnp.concatenate([lw["b_ih_f"] + lw["b_hh_f"],
                             lw["b_ih_b"] + lw["b_hh_b"]])[None, None, :]
        layers.append({
            "wih": jnp.asarray(wih, compute_dtype),
            "whh_f": jnp.asarray(lw["w_hh_f"].T, compute_dtype),
            "whh_b": jnp.asarray(lw["w_hh_b"].T, compute_dtype),
            "b": jnp.asarray(b, jnp.float32),
        })
    return {"embedding": raw["embedding"], "lstm": layers}


# ----------------------------- pure-JAX reference ------------------------------

def _ref_lstm_dir(x_tbe, w_ih, w_hh, b_ih, b_hh, reverse):
    H = w_hh.shape[1]
    wihT, whhT, b = w_ih.T, w_hh.T, b_ih + b_hh
    xs = x_tbe[::-1] if reverse else x_tbe

    def step(carry, x_t):
        h, c = carry
        g = x_t @ wihT + h @ whhT + b
        i = jax.nn.sigmoid(g[:, :H])
        f = jax.nn.sigmoid(g[:, H:2 * H])
        gg = jnp.tanh(g[:, 2 * H:3 * H])
        o = jax.nn.sigmoid(g[:, 3 * H:])
        c = f * c + i * gg
        h = o * jnp.tanh(c)
        return (h, c), h

    B = x_tbe.shape[1]
    init = (jnp.zeros((B, H), jnp.float32), jnp.zeros((B, H), jnp.float32))
    _, hs = jax.lax.scan(step, init, xs)
    return hs[::-1] if reverse else hs


def ref_forward(xs, params):
    x = jnp.transpose(params["embedding"][xs], (1, 0, 2)).astype(jnp.float32)
    for layer in params["lstm"]:
        fwd = _ref_lstm_dir(x, layer["w_ih_f"], layer["w_hh_f"],
                            layer["b_ih_f"], layer["b_hh_f"], False)
        bwd = _ref_lstm_dir(x, layer["w_ih_b"], layer["w_hh_b"],
                            layer["b_ih_b"], layer["b_hh_b"], True)
        x = jnp.concatenate([fwd, bwd], axis=-1)
    return jnp.concatenate([jnp.mean(x, axis=0), jnp.max(x, axis=0)], axis=-1)


# ------------------------------------ main --------------------------------------

if __name__ == "__main__":
    B, T = 2, 8
    VOCAB, EMB_DIM = 50, 16
    HIDDEN, NUM_LAYERS = 32, 2

    key = jax.random.PRNGKey(0)
    k_params, k_ids, k_ids2 = jax.random.split(key, 3)
    raw = init_params(k_params, VOCAB, EMB_DIM, HIDDEN, NUM_LAYERS)
    xs = jax.random.randint(k_ids, (B, T), 0, VOCAB, dtype=jnp.int32)

    _single_buffered_weights_supported()   # run the feature probe once, outside jit tracing

    fwd = jax.jit(lstm_extractor_forward,
                  static_argnames=("chunk", "batch_tile", "gx_dtype", "gate_dtype"))

    # f32 everywhere: tight check against the pure-JAX reference.
    prep_f32 = prepare_params(raw, jnp.float32)
    out = jax.block_until_ready(fwd(xs, prep_f32))
    assert out.shape == (B, 4 * HIDDEN), out.shape
    ref = jax.block_until_ready(ref_forward(xs, raw))
    err = float(jnp.max(jnp.abs(out - ref)))
    assert jnp.allclose(out, ref, atol=1e-4, rtol=1e-4), err

    # Ragged tail: T=13 with an explicit chunk of 4 (Tp=16, 3 padded steps), still f32-tight.
    xs_ragged = jax.random.randint(k_ids2, (B, 13), 0, VOCAB, dtype=jnp.int32)
    out_r = jax.block_until_ready(fwd(xs_ragged, prep_f32, chunk=4))
    ref_r = jax.block_until_ready(ref_forward(xs_ragged, raw))
    err_r = float(jnp.max(jnp.abs(out_r - ref_r)))
    assert jnp.allclose(out_r, ref_r, atol=1e-4, rtol=1e-4), err_r

    # Reduced-precision production path: bf16 MXU operands, bf16 gate-projection storage
    # and bf16 gate nonlinearities (f32 state / cell update / pooling): relaxed tolerance.
    prep_bf16 = prepare_params(raw, jnp.bfloat16)
    out_bf16 = jax.block_until_ready(
        fwd(xs, prep_bf16, gx_dtype=jnp.bfloat16, gate_dtype=jnp.bfloat16))
    err_bf16 = float(jnp.max(jnp.abs(out_bf16 - ref)))
    assert err_bf16 < 1e-1, err_bf16

    print("KERNEL_OK")
</pallas_src>

<mosaic_0001>
module attributes {stable_mosaic.version = 11 : i64} {
  func.func @_bidir_layer_kernel(%arg0: i32, %arg1: i32, %arg2: memref<8x2x128xf32, #tpu.memory_space<vmem>>, %arg3: memref<8x2x128xf32, #tpu.memory_space<vmem>>, %arg4: memref<32x128xf32, #tpu.memory_space<vmem>>, %arg5: memref<32x128xf32, #tpu.memory_space<vmem>>, %arg6: memref<8x2x32xf32, #tpu.memory_space<vmem>>, %arg7: memref<8x2x32xf32, #tpu.memory_space<vmem>>, %arg8: memref<2x32xf32, #tpu.memory_space<vmem>>, %arg9: memref<2x32xf32, #tpu.memory_space<vmem>>, %arg10: memref<2x32xf32, #tpu.memory_space<vmem>>, %arg11: memref<2x32xf32, #tpu.memory_space<vmem>>) attributes {dimension_semantics = [#tpu.dimension_semantics<parallel>, #tpu.dimension_semantics<arbitrary>], iteration_bounds = array<i64: 1, 1>, scalar_prefetch = 0 : i64, scratch_operands = 4 : i64, tpu.core_type = #tpu.core_type<tc>, window_params = [{transform_indices = @transform_0, window_bounds = array<i64: 8, 2, 128>}, {transform_indices = @transform_1, window_bounds = array<i64: 8, 2, 128>}, {pipeline_mode = #tpu.pipeline_mode<synchronous>, transform_indices = @transform_2, window_bounds = array<i64: 32, 128>}, {pipeline_mode = #tpu.pipeline_mode<synchronous>, transform_indices = @transform_3, window_bounds = array<i64: 32, 128>}, {transform_indices = @transform_4, window_bounds = array<i64: 8, 2, 32>}, {transform_indices = @transform_5, window_bounds = array<i64: 8, 2, 32>}]} {
    %c0_i32 = arith.constant 0 : i32
    %0 = arith.cmpi eq, %arg1, %c0_i32 : i32
    %1 = arith.extui %0 : i1 to i32
    %c0_i32_0 = arith.constant 0 : i32
    %2 = arith.cmpi ne, %1, %c0_i32_0 : i32
    scf.if %2 {
      %cst_296 = arith.constant 0.000000e+00 : f32
      %635 = vector.broadcast %cst_296 : f32 to vector<2x32xf32>
      %c0_297 = arith.constant 0 : index
      %c0_298 = arith.constant 0 : index
      %636 = vector.load %arg8[%c0_297, %c0_298] : memref<2x32xf32, #tpu.memory_space<vmem>>, vector<2x32xf32>
      tpu.vector_store %arg8[%c0_297, %c0_298], %635 {strides = array<i32>} : memref<2x32xf32, #tpu.memory_space<vmem>>, vector<2x32xf32>,
      %cst_299 = arith.constant 0.000000e+00 : f32
      %637 = vector.broadcast %cst_299 : f32 to vector<2x32xf32>
      %c0_300 = arith.constant 0 : index
      %c0_301 = arith.constant 0 : index
      %638 = vector.load %arg9[%c0_300, %c0_301] : memref<2x32xf32, #tpu.memory_space<vmem>>, vector<2x32xf32>
      tpu.vector_store %arg9[%c0_300, %c0_301], %637 {strides = array<i32>} : memref<2x32xf32, #tpu.memory_space<vmem>>, vector<2x32xf32>,
      %cst_302 = arith.constant 0.000000e+00 : f32
      %639 = vector.broadcast %cst_302 : f32 to vector<2x32xf32>
      %c0_303 = arith.constant 0 : index
      %c0_304 = arith.constant 0 : index
      %640 = vector.load %arg10[%c0_303, %c0_304] : memref<2x32xf32, #tpu.memory_space<vmem>>, vector<2x32xf32>
      tpu.vector_store %arg10[%c0_303, %c0_304], %639 {strides = array<i32>} : memref<2x32xf32, #tpu.memory_space<vmem>>, vector<2x32xf32>,
      %cst_305 = arith.constant 0.000000e+00 : f32
      %641 = vector.broadcast %cst_305 : f32 to vector<2x32xf32>
      %c0_306 = arith.constant 0 : index
      %c0_307 = arith.constant 0 : index
      %642 = vector.load %arg11[%c0_306, %c0_307] : memref<2x32xf32, #tpu.memory_space<vmem>>, vector<2x32xf32>
      tpu.vector_store %arg11[%c0_306, %c0_307], %641 {strides = array<i32>} : memref<2x32xf32, #tpu.memory_space<vmem>>, vector<2x32xf32>,
    } else {
    }
    %c0_i32_1 = arith.constant 0 : i32
    %3 = arith.index_cast %c0_i32_1 : i32 to index
    %c0 = arith.constant 0 : index
    %c0_2 = arith.constant 0 : index
    %4 = vector.load %arg2[%3, %c0, %c0_2] : memref<8x2x128xf32, #tpu.memory_space<vmem>>, vector<1x2x128xf32>
    %5 = vector.shape_cast %4 : vector<1x2x128xf32> to vector<2x128xf32>
    %c0_3 = arith.constant 0 : index
    %c0_4 = arith.constant 0 : index
    %6 = vector.load %arg8[%c0_3, %c0_4] : memref<2x32xf32, #tpu.memory_space<vmem>>, vector<2x32xf32>
    %c0_5 = arith.constant 0 : index
    %c0_6 = arith.constant 0 : index
    %7 = vector.load %arg4[%c0_5, %c0_6] : memref<32x128xf32, #tpu.memory_space<vmem>>, vector<32x128xf32>
    %cst = arith.constant dense<0.000000e+00> : vector<2x128xf32>
    %8 = tpu.matmul %6, %7, %cst {dimension_numbers = #tpu.dot_dimension_numbers<[1], [0], [0], [1], [0, 0, 1, 1], [], []>} : vector<2x32xf32>, vector<32x128xf32>, vector<2x128xf32> -> vector<2x128xf32>
    %9 = arith.addf %5, %8 : vector<2x128xf32>
    %c0_7 = arith.constant 0 : index
    %c0_8 = arith.constant 0 : index
    %10 = vector.load %arg9[%c0_7, %c0_8] : memref<2x32xf32, #tpu.memory_space<vmem>>, vector<2x32xf32>
    %11 = vector.extract_strided_slice %9 {offsets = [0, 0], sizes = [2, 32], strides = [1, 1]} : vector<2x128xf32> to vector<2x32xf32>
    %12 = arith.negf %11 : vector<2x32xf32>
    %13 = math.exp %12 : vector<2x32xf32>
    %cst_9 = arith.constant 1.000000e+00 : f32
    %14 = vector.broadcast %cst_9 : f32 to vector<2x32xf32>
    %15 = arith.addf %14, %13 : vector<2x32xf32>
    %16 = arith.divf %14, %15 : vector<2x32xf32>
    %17 = vector.extract_strided_slice %9 {offsets = [0, 32], sizes = [2, 32], strides = [1, 1]} : vector<2x128xf32> to vector<2x32xf32>
    %18 = arith.negf %17 : vector<2x32xf32>
    %19 = math.exp %18 : vector<2x32xf32>
    %cst_10 = arith.constant 1.000000e+00 : f32
    %20 = vector.broadcast %cst_10 : f32 to vector<2x32xf32>
    %21 = arith.addf %20, %19 : vector<2x32xf32>
    %22 = arith.divf %20, %21 : vector<2x32xf32>
    %23 = vector.extract_strided_slice %9 {offsets = [0, 64], sizes = [2, 32], strides = [1, 1]} : vector<2x128xf32> to vector<2x32xf32>
    %24 = math.tanh %23 : vector<2x32xf32>
    %25 = vector.extract_strided_slice %9 {offsets = [0, 96], sizes = [2, 32], strides = [1, 1]} : vector<2x128xf32> to vector<2x32xf32>
    %26 = arith.negf %25 : vector<2x32xf32>
    %27 = math.exp %26 : vector<2x32xf32>
    %cst_11 = arith.constant 1.000000e+00 : f32
    %28 = vector.broadcast %cst_11 : f32 to vector<2x32xf32>
    %29 = arith.addf %28, %27 : vector<2x32xf32>
    %30 = arith.divf %28, %29 : vector<2x32xf32>
    %31 = arith.mulf %22, %10 : vector<2x32xf32>
    %32 = arith.mulf %16, %24 : vector<2x32xf32>
    %33 = arith.addf %31, %32 : vector<2x32xf32>
    %34 = math.tanh %33 : vector<2x32xf32>
    %35 = arith.mulf %30, %34 : vector<2x32xf32>
    %c0_12 = arith.constant 0 : index
    %c0_13 = arith.constant 0 : index
    %36 = vector.load %arg8[%c0_12, %c0_13] : memref<2x32xf32, #tpu.memory_space<vmem>>, vector<2x32xf32>
    tpu.vector_store %arg8[%c0_12, %c0_13], %35 {strides = array<i32>} : memref<2x32xf32, #tpu.memory_space<vmem>>, vector<2x32xf32>,
    %c0_14 = arith.constant 0 : index
    %c0_15 = arith.constant 0 : index
    %37 = vector.load %arg9[%c0_14, %c0_15] : memref<2x32xf32, #tpu.memory_space<vmem>>, vector<2x32xf32>
    tpu.vector_store %arg9[%c0_14, %c0_15], %33 {strides = array<i32>} : memref<2x32xf32, #tpu.memory_space<vmem>>, vector<2x32xf32>,
    %38 = arith.index_cast %c0_i32_1 : i32 to index
    %c0_16 = arith.constant 0 : index
    %c0_17 = arith.constant 0 : index
    %39 = vector.load %arg6[%38, %c0_16, %c0_17] : memref<8x2x32xf32, #tpu.memory_space<vmem>>, vector<1x2x32xf32>
    %40 = vector.shape_cast %39 : vector<1x2x32xf32> to vector<2x32xf32>
    %41 = vector.shape_cast %35 : vector<2x32xf32> to vector<1x2x32xf32>
    tpu.vector_store %arg6[%38, %c0_16, %c0_17], %41 {strides = array<i32>} : memref<8x2x32xf32, #tpu.memory_space<vmem>>, vector<1x2x32xf32>,
    %c7_i32 = arith.constant 7 : i32
    %42 = arith.subi %c7_i32, %c0_i32_1 : i32
    %43 = arith.index_cast %42 : i32 to index
    %c0_18 = arith.constant 0 : index
    %c0_19 = arith.constant 0 : index
    %44 = vector.load %arg3[%43, %c0_18, %c0_19] : memref<8x2x128xf32, #tpu.memory_space<vmem>>, vector<1x2x128xf32>
    %45 = vector.shape_cast %44 : vector<1x2x128xf32> to vector<2x128xf32>
    %c0_20 = arith.constant 0 : index
    %c0_21 = arith.constant 0 : index
    %46 = vector.load %arg10[%c0_20, %c0_21] : memref<2x32xf32, #tpu.memory_space<vmem>>, vector<2x32xf32>
    %c0_22 = arith.constant 0 : index
    %c0_23 = arith.constant 0 : index
    %47 = vector.load %arg5[%c0_22, %c0_23] : memref<32x128xf32, #tpu.memory_space<vmem>>, vector<32x128xf32>
    %cst_24 = arith.constant dense<0.000000e+00> : vector<2x128xf32>
    %48 = tpu.matmul %46, %47, %cst_24 {dimension_numbers = #tpu.dot_dimension_numbers<[1], [0], [0], [1], [0, 0, 1, 1], [], []>} : vector<2x32xf32>, vector<32x128xf32>, vector<2x128xf32> -> vector<2x128xf32>
    %49 = arith.addf %45, %48 : vector<2x128xf32>
    %c0_25 = arith.constant 0 : index
    %c0_26 = arith.constant 0 : index
    %50 = vector.load %arg11[%c0_25, %c0_26] : memref<2x32xf32, #tpu.memory_space<vmem>>, vector<2x32xf32>
    %51 = vector.extract_strided_slice %49 {offsets = [0, 0], sizes = [2, 32], strides = [1, 1]} : vector<2x128xf32> to vector<2x32xf32>
    %52 = arith.negf %51 : vector<2x32xf32>
    %53 = math.exp %52 : vector<2x32xf32>
    %cst_27 = arith.constant 1.000000e+00 : f32
    %54 = vector.broadcast %cst_27 : f32 to vector<2x32xf32>
    %55 = arith.addf %54, %53 : vector<2x32xf32>
    %56 = arith.divf %54, %55 : vector<2x32xf32>
    %57 = vector.extract_strided_slice %49 {offsets = [0, 32], sizes = [2, 32], strides = [1, 1]} : vector<2x128xf32> to vector<2x32xf32>
    %58 = arith.negf %57 : vector<2x32xf32>
    %59 = math.exp %58 : vector<2x32xf32>
    %cst_28 = arith.constant 1.000000e+00 : f32
    %60 = vector.broadcast %cst_28 : f32 to vector<2x32xf32>
    %61 = arith.addf %60, %59 : vector<2x32xf32>
    %62 = arith.divf %60, %61 : vector<2x32xf32>
    %63 = vector.extract_strided_slice %49 {offsets = [0, 64], sizes = [2, 32], strides = [1, 1]} : vector<2x128xf32> to vector<2x32xf32>
    %64 = math.tanh %63 : vector<2x32xf32>
    %65 = vector.extract_strided_slice %49 {offsets = [0, 96], sizes = [2, 32], strides = [1, 1]} : vector<2x128xf32> to vector<2x32xf32>
    %66 = arith.negf %65 : vector<2x32xf32>
    %67 = math.exp %66 : vector<2x32xf32>
    %cst_29 = arith.constant 1.000000e+00 : f32
    %68 = vector.broadcast %cst_29 : f32 to vector<2x32xf32>
    %69 = arith.addf %68, %67 : vector<2x32xf32>
    %70 = arith.divf %68, %69 : vector<2x32xf32>
    %71 = arith.mulf %62, %50 : vector<2x32xf32>
    %72 = arith.mulf %56, %64 : vector<2x32xf32>
    %73 = arith.addf %71, %72 : vector<2x32xf32>
    %74 = math.tanh %73 : vector<2x32xf32>
    %75 = arith.mulf %70, %74 : vector<2x32xf32>
    %c0_30 = arith.constant 0 : index
    %c0_31 = arith.constant 0 : index
    %76 = vector.load %arg10[%c0_30, %c0_31] : memref<2x32xf32, #tpu.memory_space<vmem>>, vector<2x32xf32>
    tpu.vector_store %arg10[%c0_30, %c0_31], %75 {strides = array<i32>} : memref<2x32xf32, #tpu.memory_space<vmem>>, vector<2x32xf32>,
    %c0_32 = arith.constant 0 : index
    %c0_33 = arith.constant 0 : index
    %77 = vector.load %arg11[%c0_32, %c0_33] : memref<2x32xf32, #tpu.memory_space<vmem>>, vector<2x32xf32>
    tpu.vector_store %arg11[%c0_32, %c0_33], %73 {strides = array<i32>} : memref<2x32xf32, #tpu.memory_space<vmem>>, vector<2x32xf32>,
    %78 = arith.index_cast %42 : i32 to index
    %c0_34 = arith.constant 0 : index
    %c0_35 = arith.constant 0 : index
    %79 = vector.load %arg7[%78, %c0_34, %c0_35] : memref<8x2x32xf32, #tpu.memory_space<vmem>>, vector<1x2x32xf32>
    %80 = vector.shape_cast %79 : vector<1x2x32xf32> to vector<2x32xf32>
    %81 = vector.shape_cast %75 : vector<2x32xf32> to vector<1x2x32xf32>
    tpu.vector_store %arg7[%78, %c0_34, %c0_35], %81 {strides = array<i32>} : memref<8x2x32xf32, #tpu.memory_space<vmem>>, vector<1x2x32xf32>,
    %c1_i32 = arith.constant 1 : i32
    %82 = arith.index_cast %c1_i32 : i32 to index
    %c0_36 = arith.constant 0 : index
    %c0_37 = arith.constant 0 : index
    %83 = vector.load %arg2[%82, %c0_36, %c0_37] : memref<8x2x128xf32, #tpu.memory_space<vmem>>, vector<1x2x128xf32>
    %84 = vector.shape_cast %83 : vector<1x2x128xf32> to vector<2x128xf32>
    %c0_38 = arith.constant 0 : index
    %c0_39 = arith.constant 0 : index
    %85 = vector.load %arg8[%c0_38, %c0_39] : memref<2x32xf32, #tpu.memory_space<vmem>>, vector<2x32xf32>
    %c0_40 = arith.constant 0 : index
    %c0_41 = arith.constant 0 : index
    %86 = vector.load %arg4[%c0_40, %c0_41] : memref<32x128xf32, #tpu.memory_space<vmem>>, vector<32x128xf32>
    %cst_42 = arith.constant dense<0.000000e+00> : vector<2x128xf32>
    %87 = tpu.matmul %85, %86, %cst_42 {dimension_numbers = #tpu.dot_dimension_numbers<[1], [0], [0], [1], [0, 0, 1, 1], [], []>} : vector<2x32xf32>, vector<32x128xf32>, vector<2x128xf32> -> vector<2x128xf32>
    %88 = arith.addf %84, %87 : vector<2x128xf32>
    %c0_43 = arith.constant 0 : index
    %c0_44 = arith.constant 0 : index
    %89 = vector.load %arg9[%c0_43, %c0_44] : memref<2x32xf32, #tpu.memory_space<vmem>>, vector<2x32xf32>
    %90 = vector.extract_strided_slice %88 {offsets = [0, 0], sizes = [2, 32], strides = [1, 1]} : vector<2x128xf32> to vector<2x32xf32>
    %91 = arith.negf %90 : vector<2x32xf32>
    %92 = math.exp %91 : vector<2x32xf32>
    %cst_45 = arith.constant 1.000000e+00 : f32
    %93 = vector.broadcast %cst_45 : f32 to vector<2x32xf32>
    %94 = arith.addf %93, %92 : vector<2x32xf32>
    %95 = arith.divf %93, %94 : vector<2x32xf32>
    %96 = vector.extract_strided_slice %88 {offsets = [0, 32], sizes = [2, 32], strides = [1, 1]} : vector<2x128xf32> to vector<2x32xf32>
    %97 = arith.negf %96 : vector<2x32xf32>
    %98 = math.exp %97 : vector<2x32xf32>
    %cst_46 = arith.constant 1.000000e+00 : f32
    %99 = vector.broadcast %cst_46 : f32 to vector<2x32xf32>
    %100 = arith.addf %99, %98 : vector<2x32xf32>
    %101 = arith.divf %99, %100 : vector<2x32xf32>
    %102 = vector.extract_strided_slice %88 {offsets = [0, 64], sizes = [2, 32], strides = [1, 1]} : vector<2x128xf32> to vector<2x32xf32>
    %103 = math.tanh %102 : vector<2x32xf32>
    %104 = vector.extract_strided_slice %88 {offsets = [0, 96], sizes = [2, 32], strides = [1, 1]} : vector<2x128xf32> to vector<2x32xf32>
    %105 = arith.negf %104 : vector<2x32xf32>
    %106 = math.exp %105 : vector<2x32xf32>
    %cst_47 = arith.constant 1.000000e+00 : f32
    %107 = vector.broadcast %cst_47 : f32 to vector<2x32xf32>
    %108 = arith.addf %107, %106 : vector<2x32xf32>
    %109 = arith.divf %107, %108 : vector<2x32xf32>
    %110 = arith.mulf %101, %89 : vector<2x32xf32>
    %111 = arith.mulf %95, %103 : vector<2x32xf32>
    %112 = arith.addf %110, %111 : vector<2x32xf32>
    %113 = math.tanh %112 : vector<2x32xf32>
    %114 = arith.mulf %109, %113 : vector<2x32xf32>
    %c0_48 = arith.constant 0 : index
    %c0_49 = arith.constant 0 : index
    %115 = vector.load %arg8[%c0_48, %c0_49] : memref<2x32xf32, #tpu.memory_space<vmem>>, vector<2x32xf32>
    tpu.vector_store %arg8[%c0_48, %c0_49], %114 {strides = array<i32>} : memref<2x32xf32, #tpu.memory_space<vmem>>, vector<2x32xf32>,
    %c0_50 = arith.constant 0 : index
    %c0_51 = arith.constant 0 : index
    %116 = vector.load %arg9[%c0_50, %c0_51] : memref<2x32xf32, #tpu.memory_space<vmem>>, vector<2x32xf32>
    tpu.vector_store %arg9[%c0_50, %c0_51], %112 {strides = array<i32>} : memref<2x32xf32, #tpu.memory_space<vmem>>, vector<2x32xf32>,
    %117 = arith.index_cast %c1_i32 : i32 to index
    %c0_52 = arith.constant 0 : index
    %c0_53 = arith.constant 0 : index
    %118 = vector.load %arg6[%117, %c0_52, %c0_53] : memref<8x2x32xf32, #tpu.memory_space<vmem>>, vector<1x2x32xf32>
    %119 = vector.shape_cast %118 : vector<1x2x32xf32> to vector<2x32xf32>
    %120 = vector.shape_cast %114 : vector<2x32xf32> to vector<1x2x32xf32>
    tpu.vector_store %arg6[%117, %c0_52, %c0_53], %120 {strides = array<i32>} : memref<8x2x32xf32, #tpu.memory_space<vmem>>, vector<1x2x32xf32>,
    %c7_i32_54 = arith.constant 7 : i32
    %121 = arith.subi %c7_i32_54, %c1_i32 : i32
    %122 = arith.index_cast %121 : i32 to index
    %c0_55 = arith.constant 0 : index
    %c0_56 = arith.constant 0 : index
    %123 = vector.load %arg3[%122, %c0_55, %c0_56] : memref<8x2x128xf32, #tpu.memory_space<vmem>>, vector<1x2x128xf32>
    %124 = vector.shape_cast %123 : vector<1x2x128xf32> to vector<2x128xf32>
    %c0_57 = arith.constant 0 : index
    %c0_58 = arith.constant 0 : index
    %125 = vector.load %arg10[%c0_57, %c0_58] : memref<2x32xf32, #tpu.memory_space<vmem>>, vector<2x32xf32>
    %c0_59 = arith.constant 0 : index
    %c0_60 = arith.constant 0 : index
    %126 = vector.load %arg5[%c0_59, %c0_60] : memref<32x128xf32, #tpu.memory_space<vmem>>, vector<32x128xf32>
    %cst_61 = arith.constant dense<0.000000e+00> : vector<2x128xf32>
    %127 = tpu.matmul %125, %126, %cst_61 {dimension_numbers = #tpu.dot_dimension_numbers<[1], [0], [0], [1], [0, 0, 1, 1], [], []>} : vector<2x32xf32>, vector<32x128xf32>, vector<2x128xf32> -> vector<2x128xf32>
    %128 = arith.addf %124, %127 : vector<2x128xf32>
    %c0_62 = arith.constant 0 : index
    %c0_63 = arith.constant 0 : index
    %129 = vector.load %arg11[%c0_62, %c0_63] : memref<2x32xf32, #tpu.memory_space<vmem>>, vector<2x32xf32>
    %130 = vector.extract_strided_slice %128 {offsets = [0, 0], sizes = [2, 32], strides = [1, 1]} : vector<2x128xf32> to vector<2x32xf32>
    %131 = arith.negf %130 : vector<2x32xf32>
    %132 = math.exp %131 : vector<2x32xf32>
    %cst_64 = arith.constant 1.000000e+00 : f32
    %133 = vector.broadcast %cst_64 : f32 to vector<2x32xf32>
    %134 = arith.addf %133, %132 : vector<2x32xf32>
    %135 = arith.divf %133, %134 : vector<2x32xf32>
    %136 = vector.extract_strided_slice %128 {offsets = [0, 32], sizes = [2, 32], strides = [1, 1]} : vector<2x128xf32> to vector<2x32xf32>
    %137 = arith.negf %136 : vector<2x32xf32>
    %138 = math.exp %137 : vector<2x32xf32>
    %cst_65 = arith.constant 1.000000e+00 : f32
    %139 = vector.broadcast %cst_65 : f32 to vector<2x32xf32>
    %140 = arith.addf %139, %138 : vector<2x32xf32>
    %141 = arith.divf %139, %140 : vector<2x32xf32>
    %142 = vector.extract_strided_slice %128 {offsets = [0, 64], sizes = [2, 32], strides = [1, 1]} : vector<2x128xf32> to vector<2x32xf32>
    %143 = math.tanh %142 : vector<2x32xf32>
    %144 = vector.extract_strided_slice %128 {offsets = [0, 96], sizes = [2, 32], strides = [1, 1]} : vector<2x128xf32> to vector<2x32xf32>
    %145 = arith.negf %144 : vector<2x32xf32>
    %146 = math.exp %145 : vector<2x32xf32>
    %cst_66 = arith.constant 1.000000e+00 : f32
    %147 = vector.broadcast %cst_66 : f32 to vector<2x32xf32>
    %148 = arith.addf %147, %146 : vector<2x32xf32>
    %149 = arith.divf %147, %148 : vector<2x32xf32>
    %150 = arith.mulf %141, %129 : vector<2x32xf32>
    %151 = arith.mulf %135, %143 : vector<2x32xf32>
    %152 = arith.addf %150, %151 : vector<2x32xf32>
    %153 = math.tanh %152 : vector<2x32xf32>
    %154 = arith.mulf %149, %153 : vector<2x32xf32>
    %c0_67 = arith.constant 0 : index
    %c0_68 = arith.constant 0 : index
    %155 = vector.load %arg10[%c0_67, %c0_68] : memref<2x32xf32, #tpu.memory_space<vmem>>, vector<2x32xf32>
    tpu.vector_store %arg10[%c0_67, %c0_68], %154 {strides = array<i32>} : memref<2x32xf32, #tpu.memory_space<vmem>>, vector<2x32xf32>,
    %c0_69 = arith.constant 0 : index
    %c0_70 = arith.constant 0 : index
    %156 = vector.load %arg11[%c0_69, %c0_70] : memref<2x32xf32, #tpu.memory_space<vmem>>, vector<2x32xf32>
    tpu.vector_store %arg11[%c0_69, %c0_70], %152 {strides = array<i32>} : memref<2x32xf32, #tpu.memory_space<vmem>>, vector<2x32xf32>,
    %157 = arith.index_cast %121 : i32 to index
    %c0_71 = arith.constant 0 : index
    %c0_72 = arith.constant 0 : index
    %158 = vector.load %arg7[%157, %c0_71, %c0_72] : memref<8x2x32xf32, #tpu.memory_space<vmem>>, vector<1x2x32xf32>
    %159 = vector.shape_cast %158 : vector<1x2x32xf32> to vector<2x32xf32>
    %160 = vector.shape_cast %154 : vector<2x32xf32> to vector<1x2x32xf32>
    tpu.vector_store %arg7[%157, %c0_71, %c0_72], %160 {strides = array<i32>} : memref<8x2x32xf32, #tpu.memory_space<vmem>>, vector<1x2x32xf32>,
    %c2_i32 = arith.constant 2 : i32
    %161 = arith.index_cast %c2_i32 : i32 to index
    %c0_73 = arith.constant 0 : index
    %c0_74 = arith.constant 0 : index
    %162 = vector.load %arg2[%161, %c0_73, %c0_74] : memref<8x2x128xf32, #tpu.memory_space<vmem>>, vector<1x2x128xf32>
    %163 = vector.shape_cast %162 : vector<1x2x128xf32> to vector<2x128xf32>
    %c0_75 = arith.constant 0 : index
    %c0_76 = arith.constant 0 : index
    %164 = vector.load %arg8[%c0_75, %c0_76] : memref<2x32xf32, #tpu.memory_space<vmem>>, vector<2x32xf32>
    %c0_77 = arith.constant 0 : index
    %c0_78 = arith.constant 0 : index
    %165 = vector.load %arg4[%c0_77, %c0_78] : memref<32x128xf32, #tpu.memory_space<vmem>>, vector<32x128xf32>
    %cst_79 = arith.constant dense<0.000000e+00> : vector<2x128xf32>
    %166 = tpu.matmul %164, %165, %cst_79 {dimension_numbers = #tpu.dot_dimension_numbers<[1], [0], [0], [1], [0, 0, 1, 1], [], []>} : vector<2x32xf32>, vector<32x128xf32>, vector<2x128xf32> -> vector<2x128xf32>
    %167 = arith.addf %163, %166 : vector<2x128xf32>
    %c0_80 = arith.constant 0 : index
    %c0_81 = arith.constant 0 : index
    %168 = vector.load %arg9[%c0_80, %c0_81] : memref<2x32xf32, #tpu.memory_space<vmem>>, vector<2x32xf32>
    %169 = vector.extract_strided_slice %167 {offsets = [0, 0], sizes = [2, 32], strides = [1, 1]} : vector<2x128xf32> to vector<2x32xf32>
    %170 = arith.negf %169 : vector<2x32xf32>
    %171 = math.exp %170 : vector<2x32xf32>
    %cst_82 = arith.constant 1.000000e+00 : f32
    %172 = vector.broadcast %cst_82 : f32 to vector<2x32xf32>
    %173 = arith.addf %172, %171 : vector<2x32xf32>
    %174 = arith.divf %172, %173 : vector<2x32xf32>
    %175 = vector.extract_strided_slice %167 {offsets = [0, 32], sizes = [2, 32], strides = [1, 1]} : vector<2x128xf32> to vector<2x32xf32>
    %176 = arith.negf %175 : vector<2x32xf32>
    %177 = math.exp %176 : vector<2x32xf32>
    %cst_83 = arith.constant 1.000000e+00 : f32
    %178 = vector.broadcast %cst_83 : f32 to vector<2x32xf32>
    %179 = arith.addf %178, %177 : vector<2x32xf32>
    %180 = arith.divf %178, %179 : vector<2x32xf32>
    %181 = vector.extract_strided_slice %167 {offsets = [0, 64], sizes = [2, 32], strides = [1, 1]} : vector<2x128xf32> to vector<2x32xf32>
    %182 = math.tanh %181 : vector<2x32xf32>
    %183 = vector.extract_strided_slice %167 {offsets = [0, 96], sizes = [2, 32], strides = [1, 1]} : vector<2x128xf32> to vector<2x32xf32>
    %184 = arith.negf %183 : vector<2x32xf32>
    %185 = math.exp %184 : vector<2x32xf32>
    %cst_84 = arith.constant 1.000000e+00 : f32
    %186 = vector.broadcast %cst_84 : f32 to vector<2x32xf32>
    %187 = arith.addf %186, %185 : vector<2x32xf32>
    %188 = arith.divf %186, %187 : vector<2x32xf32>
    %189 = arith.mulf %180, %168 : vector<2x32xf32>
    %190 = arith.mulf %174, %182 : vector<2x32xf32>
    %191 = arith.addf %189, %190 : vector<2x32xf32>
    %192 = math.tanh %191 : vector<2x32xf32>
    %193 = arith.mulf %188, %192 : vector<2x32xf32>
    %c0_85 = arith.constant 0 : index
    %c0_86 = arith.constant 0 : index
    %194 = vector.load %arg8[%c0_85, %c0_86] : memref<2x32xf32, #tpu.memory_space<vmem>>, vector<2x32xf32>
    tpu.vector_store %arg8[%c0_85, %c0_86], %193 {strides = array<i32>} : memref<2x32xf32, #tpu.memory_space<vmem>>, vector<2x32xf32>,
    %c0_87 = arith.constant 0 : index
    %c0_88 = arith.constant 0 : index
    %195 = vector.load %arg9[%c0_87, %c0_88] : memref<2x32xf32, #tpu.memory_space<vmem>>, vector<2x32xf32>
    tpu.vector_store %arg9[%c0_87, %c0_88], %191 {strides = array<i32>} : memref<2x32xf32, #tpu.memory_space<vmem>>, vector<2x32xf32>,
    %196 = arith.index_cast %c2_i32 : i32 to index
    %c0_89 = arith.constant 0 : index
    %c0_90 = arith.constant 0 : index
    %197 = vector.load %arg6[%196, %c0_89, %c0_90] : memref<8x2x32xf32, #tpu.memory_space<vmem>>, vector<1x2x32xf32>
    %198 = vector.shape_cast %197 : vector<1x2x32xf32> to vector<2x32xf32>
    %199 = vector.shape_cast %193 : vector<2x32xf32> to vector<1x2x32xf32>
    tpu.vector_store %arg6[%196, %c0_89, %c0_90], %199 {strides = array<i32>} : memref<8x2x32xf32, #tpu.memory_space<vmem>>, vector<1x2x32xf32>,
    %c7_i32_91 = arith.constant 7 : i32
    %200 = arith.subi %c7_i32_91, %c2_i32 : i32
    %201 = arith.index_cast %200 : i32 to index
    %c0_92 = arith.constant 0 : index
    %c0_93 = arith.constant 0 : index
    %202 = vector.load %arg3[%201, %c0_92, %c0_93] : memref<8x2x128xf32, #tpu.memory_space<vmem>>, vector<1x2x128xf32>
    %203 = vector.shape_cast %202 : vector<1x2x128xf32> to vector<2x128xf32>
    %c0_94 = arith.constant 0 : index
    %c0_95 = arith.constant 0 : index
    %204 = vector.load %arg10[%c0_94, %c0_95] : memref<2x32xf32, #tpu.memory_space<vmem>>, vector<2x32xf32>
    %c0_96 = arith.constant 0 : index
    %c0_97 = arith.constant 0 : index
    %205 = vector.load %arg5[%c0_96, %c0_97] : memref<32x128xf32, #tpu.memory_space<vmem>>, vector<32x128xf32>
    %cst_98 = arith.constant dense<0.000000e+00> : vector<2x128xf32>
    %206 = tpu.matmul %204, %205, %cst_98 {dimension_numbers = #tpu.dot_dimension_numbers<[1], [0], [0], [1], [0, 0, 1, 1], [], []>} : vector<2x32xf32>, vector<32x128xf32>, vector<2x128xf32> -> vector<2x128xf32>
    %207 = arith.addf %203, %206 : vector<2x128xf32>
    %c0_99 = arith.constant 0 : index
    %c0_100 = arith.constant 0 : index
    %208 = vector.load %arg11[%c0_99, %c0_100] : memref<2x32xf32, #tpu.memory_space<vmem>>, vector<2x32xf32>
    %209 = vector.extract_strided_slice %207 {offsets = [0, 0], sizes = [2, 32], strides = [1, 1]} : vector<2x128xf32> to vector<2x32xf32>
    %210 = arith.negf %209 : vector<2x32xf32>
    %211 = math.exp %210 : vector<2x32xf32>
    %cst_101 = arith.constant 1.000000e+00 : f32
    %212 = vector.broadcast %cst_101 : f32 to vector<2x32xf32>
    %213 = arith.addf %212, %211 : vector<2x32xf32>
    %214 = arith.divf %212, %213 : vector<2x32xf32>
    %215 = vector.extract_strided_slice %207 {offsets = [0, 32], sizes = [2, 32], strides = [1, 1]} : vector<2x128xf32> to vector<2x32xf32>
    %216 = arith.negf %215 : vector<2x32xf32>
    %217 = math.exp %216 : vector<2x32xf32>
    %cst_102 = arith.constant 1.000000e+00 : f32
    %218 = vector.broadcast %cst_102 : f32 to vector<2x32xf32>
    %219 = arith.addf %218, %217 : vector<2x32xf32>
    %220 = arith.divf %218, %219 : vector<2x32xf32>
    %221 = vector.extract_strided_slice %207 {offsets = [0, 64], sizes = [2, 32], strides = [1, 1]} : vector<2x128xf32> to vector<2x32xf32>
    %222 = math.tanh %221 : vector<2x32xf32>
    %223 = vector.extract_strided_slice %207 {offsets = [0, 96], sizes = [2, 32], strides = [1, 1]} : vector<2x128xf32> to vector<2x32xf32>
    %224 = arith.negf %223 : vector<2x32xf32>
    %225 = math.exp %224 : vector<2x32xf32>
    %cst_103 = arith.constant 1.000000e+00 : f32
    %226 = vector.broadcast %cst_103 : f32 to vector<2x32xf32>
    %227 = arith.addf %226, %225 : vector<2x32xf32>
    %228 = arith.divf %226, %227 : vector<2x32xf32>
    %229 = arith.mulf %220, %208 : vector<2x32xf32>
    %230 = arith.mulf %214, %222 : vector<2x32xf32>
    %231 = arith.addf %229, %230 : vector<2x32xf32>
    %232 = math.tanh %231 : vector<2x32xf32>
    %233 = arith.mulf %228, %232 : vector<2x32xf32>
    %c0_104 = arith.constant 0 : index
    %c0_105 = arith.constant 0 : index
    %234 = vector.load %arg10[%c0_104, %c0_105] : memref<2x32xf32, #tpu.memory_space<vmem>>, vector<2x32xf32>
    tpu.vector_store %arg10[%c0_104, %c0_105], %233 {strides = array<i32>} : memref<2x32xf32, #tpu.memory_space<vmem>>, vector<2x32xf32>,
    %c0_106 = arith.constant 0 : index
    %c0_107 = arith.constant 0 : index
    %235 = vector.load %arg11[%c0_106, %c0_107] : memref<2x32xf32, #tpu.memory_space<vmem>>, vector<2x32xf32>
    tpu.vector_store %arg11[%c0_106, %c0_107], %231 {strides = array<i32>} : memref<2x32xf32, #tpu.memory_space<vmem>>, vector<2x32xf32>,
    %236 = arith.index_cast %200 : i32 to index
    %c0_108 = arith.constant 0 : index
    %c0_109 = arith.constant 0 : index
    %237 = vector.load %arg7[%236, %c0_108, %c0_109] : memref<8x2x32xf32, #tpu.memory_space<vmem>>, vector<1x2x32xf32>
    %238 = vector.shape_cast %237 : vector<1x2x32xf32> to vector<2x32xf32>
    %239 = vector.shape_cast %233 : vector<2x32xf32> to vector<1x2x32xf32>
    tpu.vector_store %arg7[%236, %c0_108, %c0_109], %239 {strides = array<i32>} : memref<8x2x32xf32, #tpu.memory_space<vmem>>, vector<1x2x32xf32>,
    %c3_i32 = arith.constant 3 : i32
    %240 = arith.index_cast %c3_i32 : i32 to index
    %c0_110 = arith.constant 0 : index
    %c0_111 = arith.constant 0 : index
    %241 = vector.load %arg2[%240, %c0_110, %c0_111] : memref<8x2x128xf32, #tpu.memory_space<vmem>>, vector<1x2x128xf32>
    %242 = vector.shape_cast %241 : vector<1x2x128xf32> to vector<2x128xf32>
    %c0_112 = arith.constant 0 : index
    %c0_113 = arith.constant 0 : index
    %243 = vector.load %arg8[%c0_112, %c0_113] : memref<2x32xf32, #tpu.memory_space<vmem>>, vector<2x32xf32>
    %c0_114 = arith.constant 0 : index
    %c0_115 = arith.constant 0 : index
    %244 = vector.load %arg4[%c0_114, %c0_115] : memref<32x128xf32, #tpu.memory_space<vmem>>, vector<32x128xf32>
    %cst_116 = arith.constant dense<0.000000e+00> : vector<2x128xf32>
    %245 = tpu.matmul %243, %244, %cst_116 {dimension_numbers = #tpu.dot_dimension_numbers<[1], [0], [0], [1], [0, 0, 1, 1], [], []>} : vector<2x32xf32>, vector<32x128xf32>, vector<2x128xf32> -> vector<2x128xf32>
    %246 = arith.addf %242, %245 : vector<2x128xf32>
    %c0_117 = arith.constant 0 : index
    %c0_118 = arith.constant 0 : index
    %247 = vector.load %arg9[%c0_117, %c0_118] : memref<2x32xf32, #tpu.memory_space<vmem>>, vector<2x32xf32>
    %248 = vector.extract_strided_slice %246 {offsets = [0, 0], sizes = [2, 32], strides = [1, 1]} : vector<2x128xf32> to vector<2x32xf32>
    %249 = arith.negf %248 : vector<2x32xf32>
    %250 = math.exp %249 : vector<2x32xf32>
    %cst_119 = arith.constant 1.000000e+00 : f32
    %251 = vector.broadcast %cst_119 : f32 to vector<2x32xf32>
    %252 = arith.addf %251, %250 : vector<2x32xf32>
    %253 = arith.divf %251, %252 : vector<2x32xf32>
    %254 = vector.extract_strided_slice %246 {offsets = [0, 32], sizes = [2, 32], strides = [1, 1]} : vector<2x128xf32> to vector<2x32xf32>
    %255 = arith.negf %254 : vector<2x32xf32>
    %256 = math.exp %255 : vector<2x32xf32>
    %cst_120 = arith.constant 1.000000e+00 : f32
    %257 = vector.broadcast %cst_120 : f32 to vector<2x32xf32>
    %258 = arith.addf %257, %256 : vector<2x32xf32>
    %259 = arith.divf %257, %258 : vector<2x32xf32>
    %260 = vector.extract_strided_slice %246 {offsets = [0, 64], sizes = [2, 32], strides = [1, 1]} : vector<2x128xf32> to vector<2x32xf32>
    %261 = math.tanh %260 : vector<2x32xf32>
    %262 = vector.extract_strided_slice %246 {offsets = [0, 96], sizes = [2, 32], strides = [1, 1]} : vector<2x128xf32> to vector<2x32xf32>
    %263 = arith.negf %262 : vector<2x32xf32>
    %264 = math.exp %263 : vector<2x32xf32>
    %cst_121 = arith.constant 1.000000e+00 : f32
    %265 = vector.broadcast %cst_121 : f32 to vector<2x32xf32>
    %266 = arith.addf %265, %264 : vector<2x32xf32>
    %267 = arith.divf %265, %266 : vector<2x32xf32>
    %268 = arith.mulf %259, %247 : vector<2x32xf32>
    %269 = arith.mulf %253, %261 : vector<2x32xf32>
    %270 = arith.addf %268, %269 : vector<2x32xf32>
    %271 = math.tanh %270 : vector<2x32xf32>
    %272 = arith.mulf %267, %271 : vector<2x32xf32>
    %c0_122 = arith.constant 0 : index
    %c0_123 = arith.constant 0 : index
    %273 = vector.load %arg8[%c0_122, %c0_123] : memref<2x32xf32, #tpu.memory_space<vmem>>, vector<2x32xf32>
    tpu.vector_store %arg8[%c0_122, %c0_123], %272 {strides = array<i32>} : memref<2x32xf32, #tpu.memory_space<vmem>>, vector<2x32xf32>,
    %c0_124 = arith.constant 0 : index
    %c0_125 = arith.constant 0 : index
    %274 = vector.load %arg9[%c0_124, %c0_125] : memref<2x32xf32, #tpu.memory_space<vmem>>, vector<2x32xf32>
    tpu.vector_store %arg9[%c0_124, %c0_125], %270 {strides = array<i32>} : memref<2x32xf32, #tpu.memory_space<vmem>>, vector<2x32xf32>,
    %275 = arith.index_cast %c3_i32 : i32 to index
    %c0_126 = arith.constant 0 : index
    %c0_127 = arith.constant 0 : index
    %276 = vector.load %arg6[%275, %c0_126, %c0_127] : memref<8x2x32xf32, #tpu.memory_space<vmem>>, vector<1x2x32xf32>
    %277 = vector.shape_cast %276 : vector<1x2x32xf32> to vector<2x32xf32>
    %278 = vector.shape_cast %272 : vector<2x32xf32> to vector<1x2x32xf32>
    tpu.vector_store %arg6[%275, %c0_126, %c0_127], %278 {strides = array<i32>} : memref<8x2x32xf32, #tpu.memory_space<vmem>>, vector<1x2x32xf32>,
    %c7_i32_128 = arith.constant 7 : i32
    %279 = arith.subi %c7_i32_128, %c3_i32 : i32
    %280 = arith.index_cast %279 : i32 to index
    %c0_129 = arith.constant 0 : index
    %c0_130 = arith.constant 0 : index
    %281 = vector.load %arg3[%280, %c0_129, %c0_130] : memref<8x2x128xf32, #tpu.memory_space<vmem>>, vector<1x2x128xf32>
    %282 = vector.shape_cast %281 : vector<1x2x128xf32> to vector<2x128xf32>
    %c0_131 = arith.constant 0 : index
    %c0_132 = arith.constant 0 : index
    %283 = vector.load %arg10[%c0_131, %c0_132] : memref<2x32xf32, #tpu.memory_space<vmem>>, vector<2x32xf32>
    %c0_133 = arith.constant 0 : index
    %c0_134 = arith.constant 0 : index
    %284 = vector.load %arg5[%c0_133, %c0_134] : memref<32x128xf32, #tpu.memory_space<vmem>>, vector<32x128xf32>
    %cst_135 = arith.constant dense<0.000000e+00> : vector<2x128xf32>
    %285 = tpu.matmul %283, %284, %cst_135 {dimension_numbers = #tpu.dot_dimension_numbers<[1], [0], [0], [1], [0, 0, 1, 1], [], []>} : vector<2x32xf32>, vector<32x128xf32>, vector<2x128xf32> -> vector<2x128xf32>
    %286 = arith.addf %282, %285 : vector<2x128xf32>
    %c0_136 = arith.constant 0 : index
    %c0_137 = arith.constant 0 : index
    %287 = vector.load %arg11[%c0_136, %c0_137] : memref<2x32xf32, #tpu.memory_space<vmem>>, vector<2x32xf32>
    %288 = vector.extract_strided_slice %286 {offsets = [0, 0], sizes = [2, 32], strides = [1, 1]} : vector<2x128xf32> to vector<2x32xf32>
    %289 = arith.negf %288 : vector<2x32xf32>
    %290 = math.exp %289 : vector<2x32xf32>
    %cst_138 = arith.constant 1.000000e+00 : f32
    %291 = vector.broadcast %cst_138 : f32 to vector<2x32xf32>
    %292 = arith.addf %291, %290 : vector<2x32xf32>
    %293 = arith.divf %291, %292 : vector<2x32xf32>
    %294 = vector.extract_strided_slice %286 {offsets = [0, 32], sizes = [2, 32], strides = [1, 1]} : vector<2x128xf32> to vector<2x32xf32>
    %295 = arith.negf %294 : vector<2x32xf32>
    %296 = math.exp %295 : vector<2x32xf32>
    %cst_139 = arith.constant 1.000000e+00 : f32
    %297 = vector.broadcast %cst_139 : f32 to vector<2x32xf32>
    %298 = arith.addf %297, %296 : vector<2x32xf32>
    %299 = arith.divf %297, %298 : vector<2x32xf32>
    %300 = vector.extract_strided_slice %286 {offsets = [0, 64], sizes = [2, 32], strides = [1, 1]} : vector<2x128xf32> to vector<2x32xf32>
    %301 = math.tanh %300 : vector<2x32xf32>
    %302 = vector.extract_strided_slice %286 {offsets = [0, 96], sizes = [2, 32], strides = [1, 1]} : vector<2x128xf32> to vector<2x32xf32>
    %303 = arith.negf %302 : vector<2x32xf32>
    %304 = math.exp %303 : vector<2x32xf32>
    %cst_140 = arith.constant 1.000000e+00 : f32
    %305 = vector.broadcast %cst_140 : f32 to vector<2x32xf32>
    %306 = arith.addf %305, %304 : vector<2x32xf32>
    %307 = arith.divf %305, %306 : vector<2x32xf32>
    %308 = arith.mulf %299, %287 : vector<2x32xf32>
    %309 = arith.mulf %293, %301 : vector<2x32xf32>
    %310 = arith.addf %308, %309 : vector<2x32xf32>
    %311 = math.tanh %310 : vector<2x32xf32>
    %312 = arith.mulf %307, %311 : vector<2x32xf32>
    %c0_141 = arith.constant 0 : index
    %c0_142 = arith.constant 0 : index
    %313 = vector.load %arg10[%c0_141, %c0_142] : memref<2x32xf32, #tpu.memory_space<vmem>>, vector<2x32xf32>
    tpu.vector_store %arg10[%c0_141, %c0_142], %312 {strides = array<i32>} : memref<2x32xf32, #tpu.memory_space<vmem>>, vector<2x32xf32>,
    %c0_143 = arith.constant 0 : index
    %c0_144 = arith.constant 0 : index
    %314 = vector.load %arg11[%c0_143, %c0_144] : memref<2x32xf32, #tpu.memory_space<vmem>>, vector<2x32xf32>
    tpu.vector_store %arg11[%c0_143, %c0_144], %310 {strides = array<i32>} : memref<2x32xf32, #tpu.memory_space<vmem>>, vector<2x32xf32>,
    %315 = arith.index_cast %279 : i32 to index
    %c0_145 = arith.constant 0 : index
    %c0_146 = arith.constant 0 : index
    %316 = vector.load %arg7[%315, %c0_145, %c0_146] : memref<8x2x32xf32, #tpu.memory_space<vmem>>, vector<1x2x32xf32>
    %317 = vector.shape_cast %316 : vector<1x2x32xf32> to vector<2x32xf32>
    %318 = vector.shape_cast %312 : vector<2x32xf32> to vector<1x2x32xf32>
    tpu.vector_store %arg7[%315, %c0_145, %c0_146], %318 {strides = array<i32>} : memref<8x2x32xf32, #tpu.memory_space<vmem>>, vector<1x2x32xf32>,
    %c4_i32 = arith.constant 4 : i32
    %319 = arith.index_cast %c4_i32 : i32 to index
    %c0_147 = arith.constant 0 : index
    %c0_148 = arith.constant 0 : index
    %320 = vector.load %arg2[%319, %c0_147, %c0_148] : memref<8x2x128xf32, #tpu.memory_space<vmem>>, vector<1x2x128xf32>
    %321 = vector.shape_cast %320 : vector<1x2x128xf32> to vector<2x128xf32>
    %c0_149 = arith.constant 0 : index
    %c0_150 = arith.constant 0 : index
    %322 = vector.load %arg8[%c0_149, %c0_150] : memref<2x32xf32, #tpu.memory_space<vmem>>, vector<2x32xf32>
    %c0_151 = arith.constant 0 : index
    %c0_152 = arith.constant 0 : index
    %323 = vector.load %arg4[%c0_151, %c0_152] : memref<32x128xf32, #tpu.memory_space<vmem>>, vector<32x128xf32>
    %cst_153 = arith.constant dense<0.000000e+00> : vector<2x128xf32>
    %324 = tpu.matmul %322, %323, %cst_153 {dimension_numbers = #tpu.dot_dimension_numbers<[1], [0], [0], [1], [0, 0, 1, 1], [], []>} : vector<2x32xf32>, vector<32x128xf32>, vector<2x128xf32> -> vector<2x128xf32>
    %325 = arith.addf %321, %324 : vector<2x128xf32>
    %c0_154 = arith.constant 0 : index
    %c0_155 = arith.constant 0 : index
    %326 = vector.load %arg9[%c0_154, %c0_155] : memref<2x32xf32, #tpu.memory_space<vmem>>, vector<2x32xf32>
    %327 = vector.extract_strided_slice %325 {offsets = [0, 0], sizes = [2, 32], strides = [1, 1]} : vector<2x128xf32> to vector<2x32xf32>
    %328 = arith.negf %327 : vector<2x32xf32>
    %329 = math.exp %328 : vector<2x32xf32>
    %cst_156 = arith.constant 1.000000e+00 : f32
    %330 = vector.broadcast %cst_156 : f32 to vector<2x32xf32>
    %331 = arith.addf %330, %329 : vector<2x32xf32>
    %332 = arith.divf %330, %331 : vector<2x32xf32>
    %333 = vector.extract_strided_slice %325 {offsets = [0, 32], sizes = [2, 32], strides = [1, 1]} : vector<2x128xf32> to vector<2x32xf32>
    %334 = arith.negf %333 : vector<2x32xf32>
    %335 = math.exp %334 : vector<2x32xf32>
    %cst_157 = arith.constant 1.000000e+00 : f32
    %336 = vector.broadcast %cst_157 : f32 to vector<2x32xf32>
    %337 = arith.addf %336, %335 : vector<2x32xf32>
    %338 = arith.divf %336, %337 : vector<2x32xf32>
    %339 = vector.extract_strided_slice %325 {offsets = [0, 64], sizes = [2, 32], strides = [1, 1]} : vector<2x128xf32> to vector<2x32xf32>
    %340 = math.tanh %339 : vector<2x32xf32>
    %341 = vector.extract_strided_slice %325 {offsets = [0, 96], sizes = [2, 32], strides = [1, 1]} : vector<2x128xf32> to vector<2x32xf32>
    %342 = arith.negf %341 : vector<2x32xf32>
    %343 = math.exp %342 : vector<2x32xf32>
    %cst_158 = arith.constant 1.000000e+00 : f32
    %344 = vector.broadcast %cst_158 : f32 to vector<2x32xf32>
    %345 = arith.addf %344, %343 : vector<2x32xf32>
    %346 = arith.divf %344, %345 : vector<2x32xf32>
    %347 = arith.mulf %338, %326 : vector<2x32xf32>
    %348 = arith.mulf %332, %340 : vector<2x32xf32>
    %349 = arith.addf %347, %348 : vector<2x32xf32>
    %350 = math.tanh %349 : vector<2x32xf32>
    %351 = arith.mulf %346, %350 : vector<2x32xf32>
    %c0_159 = arith.constant 0 : index
    %c0_160 = arith.constant 0 : index
    %352 = vector.load %arg8[%c0_159, %c0_160] : memref<2x32xf32, #tpu.memory_space<vmem>>, vector<2x32xf32>
    tpu.vector_store %arg8[%c0_159, %c0_160], %351 {strides = array<i32>} : memref<2x32xf32, #tpu.memory_space<vmem>>, vector<2x32xf32>,
    %c0_161 = arith.constant 0 : index
    %c0_162 = arith.constant 0 : index
    %353 = vector.load %arg9[%c0_161, %c0_162] : memref<2x32xf32, #tpu.memory_space<vmem>>, vector<2x32xf32>
    tpu.vector_store %arg9[%c0_161, %c0_162], %349 {strides = array<i32>} : memref<2x32xf32, #tpu.memory_space<vmem>>, vector<2x32xf32>,
    %354 = arith.index_cast %c4_i32 : i32 to index
    %c0_163 = arith.constant 0 : index
    %c0_164 = arith.constant 0 : index
    %355 = vector.load %arg6[%354, %c0_163, %c0_164] : memref<8x2x32xf32, #tpu.memory_space<vmem>>, vector<1x2x32xf32>
    %356 = vector.shape_cast %355 : vector<1x2x32xf32> to vector<2x32xf32>
    %357 = vector.shape_cast %351 : vector<2x32xf32> to vector<1x2x32xf32>
    tpu.vector_store %arg6[%354, %c0_163, %c0_164], %357 {strides = array<i32>} : memref<8x2x32xf32, #tpu.memory_space<vmem>>, vector<1x2x32xf32>,
    %c7_i32_165 = arith.constant 7 : i32
    %358 = arith.subi %c7_i32_165, %c4_i32 : i32
    %359 = arith.index_cast %358 : i32 to index
    %c0_166 = arith.constant 0 : index
    %c0_167 = arith.constant 0 : index
    %360 = vector.load %arg3[%359, %c0_166, %c0_167] : memref<8x2x128xf32, #tpu.memory_space<vmem>>, vector<1x2x128xf32>
    %361 = vector.shape_cast %360 : vector<1x2x128xf32> to vector<2x128xf32>
    %c0_168 = arith.constant 0 : index
    %c0_169 = arith.constant 0 : index
    %362 = vector.load %arg10[%c0_168, %c0_169] : memref<2x32xf32, #tpu.memory_space<vmem>>, vector<2x32xf32>
    %c0_170 = arith.constant 0 : index
    %c0_171 = arith.constant 0 : index
    %363 = vector.load %arg5[%c0_170, %c0_171] : memref<32x128xf32, #tpu.memory_space<vmem>>, vector<32x128xf32>
    %cst_172 = arith.constant dense<0.000000e+00> : vector<2x128xf32>
    %364 = tpu.matmul %362, %363, %cst_172 {dimension_numbers = #tpu.dot_dimension_numbers<[1], [0], [0], [1], [0, 0, 1, 1], [], []>} : vector<2x32xf32>, vector<32x128xf32>, vector<2x128xf32> -> vector<2x128xf32>
    %365 = arith.addf %361, %364 : vector<2x128xf32>
    %c0_173 = arith.constant 0 : index
    %c0_174 = arith.constant 0 : index
    %366 = vector.load %arg11[%c0_173, %c0_174] : memref<2x32xf32, #tpu.memory_space<vmem>>, vector<2x32xf32>
    %367 = vector.extract_strided_slice %365 {offsets = [0, 0], sizes = [2, 32], strides = [1, 1]} : vector<2x128xf32> to vector<2x32xf32>
    %368 = arith.negf %367 : vector<2x32xf32>
    %369 = math.exp %368 : vector<2x32xf32>
    %cst_175 = arith.constant 1.000000e+00 : f32
    %370 = vector.broadcast %cst_175 : f32 to vector<2x32xf32>
    %371 = arith.addf %370, %369 : vector<2x32xf32>
    %372 = arith.divf %370, %371 : vector<2x32xf32>
    %373 = vector.extract_strided_slice %365 {offsets = [0, 32], sizes = [2, 32], strides = [1, 1]} : vector<2x128xf32> to vector<2x32xf32>
    %374 = arith.negf %373 : vector<2x32xf32>
    %375 = math.exp %374 : vector<2x32xf32>
    %cst_176 = arith.constant 1.000000e+00 : f32
    %376 = vector.broadcast %cst_176 : f32 to vector<2x32xf32>
    %377 = arith.addf %376, %375 : vector<2x32xf32>
    %378 = arith.divf %376, %377 : vector<2x32xf32>
    %379 = vector.extract_strided_slice %365 {offsets = [0, 64], sizes = [2, 32], strides = [1, 1]} : vector<2x128xf32> to vector<2x32xf32>
    %380 = math.tanh %379 : vector<2x32xf32>
    %381 = vector.extract_strided_slice %365 {offsets = [0, 96], sizes = [2, 32], strides = [1, 1]} : vector<2x128xf32> to vector<2x32xf32>
    %382 = arith.negf %381 : vector<2x32xf32>
    %383 = math.exp %382 : vector<2x32xf32>
    %cst_177 = arith.constant 1.000000e+00 : f32
    %384 = vector.broadcast %cst_177 : f32 to vector<2x32xf32>
    %385 = arith.addf %384, %383 : vector<2x32xf32>
    %386 = arith.divf %384, %385 : vector<2x32xf32>
    %387 = arith.mulf %378, %366 : vector<2x32xf32>
    %388 = arith.mulf %372, %380 : vector<2x32xf32>
    %389 = arith.addf %387, %388 : vector<2x32xf32>
    %390 = math.tanh %389 : vector<2x32xf32>
    %391 = arith.mulf %386, %390 : vector<2x32xf32>
    %c0_178 = arith.constant 0 : index
    %c0_179 = arith.constant 0 : index
    %392 = vector.load %arg10[%c0_178, %c0_179] : memref<2x32xf32, #tpu.memory_space<vmem>>, vector<2x32xf32>
    tpu.vector_store %arg10[%c0_178, %c0_179], %391 {strides = array<i32>} : memref<2x32xf32, #tpu.memory_space<vmem>>, vector<2x32xf32>,
    %c0_180 = arith.constant 0 : index
    %c0_181 = arith.constant 0 : index
    %393 = vector.load %arg11[%c0_180, %c0_181] : memref<2x32xf32, #tpu.memory_space<vmem>>, vector<2x32xf32>
    tpu.vector_store %arg11[%c0_180, %c0_181], %389 {strides = array<i32>} : memref<2x32xf32, #tpu.memory_space<vmem>>, vector<2x32xf32>,
    %394 = arith.index_cast %358 : i32 to index
    %c0_182 = arith.constant 0 : index
    %c0_183 = arith.constant 0 : index
    %395 = vector.load %arg7[%394, %c0_182, %c0_183] : memref<8x2x32xf32, #tpu.memory_space<vmem>>, vector<1x2x32xf32>
    %396 = vector.shape_cast %395 : vector<1x2x32xf32> to vector<2x32xf32>
    %397 = vector.shape_cast %391 : vector<2x32xf32> to vector<1x2x32xf32>
    tpu.vector_store %arg7[%394, %c0_182, %c0_183], %397 {strides = array<i32>} : memref<8x2x32xf32, #tpu.memory_space<vmem>>, vector<1x2x32xf32>,
    %c5_i32 = arith.constant 5 : i32
    %398 = arith.index_cast %c5_i32 : i32 to index
    %c0_184 = arith.constant 0 : index
    %c0_185 = arith.constant 0 : index
    %399 = vector.load %arg2[%398, %c0_184, %c0_185] : memref<8x2x128xf32, #tpu.memory_space<vmem>>, vector<1x2x128xf32>
    %400 = vector.shape_cast %399 : vector<1x2x128xf32> to vector<2x128xf32>
    %c0_186 = arith.constant 0 : index
    %c0_187 = arith.constant 0 : index
    %401 = vector.load %arg8[%c0_186, %c0_187] : memref<2x32xf32, #tpu.memory_space<vmem>>, vector<2x32xf32>
    %c0_188 = arith.constant 0 : index
    %c0_189 = arith.constant 0 : index
    %402 = vector.load %arg4[%c0_188, %c0_189] : memref<32x128xf32, #tpu.memory_space<vmem>>, vector<32x128xf32>
    %cst_190 = arith.constant dense<0.000000e+00> : vector<2x128xf32>
    %403 = tpu.matmul %401, %402, %cst_190 {dimension_numbers = #tpu.dot_dimension_numbers<[1], [0], [0], [1], [0, 0, 1, 1], [], []>} : vector<2x32xf32>, vector<32x128xf32>, vector<2x128xf32> -> vector<2x128xf32>
    %404 = arith.addf %400, %403 : vector<2x128xf32>
    %c0_191 = arith.constant 0 : index
    %c0_192 = arith.constant 0 : index
    %405 = vector.load %arg9[%c0_191, %c0_192] : memref<2x32xf32, #tpu.memory_space<vmem>>, vector<2x32xf32>
    %406 = vector.extract_strided_slice %404 {offsets = [0, 0], sizes = [2, 32], strides = [1, 1]} : vector<2x128xf32> to vector<2x32xf32>
    %407 = arith.negf %406 : vector<2x32xf32>
    %408 = math.exp %407 : vector<2x32xf32>
    %cst_193 = arith.constant 1.000000e+00 : f32
    %409 = vector.broadcast %cst_193 : f32 to vector<2x32xf32>
    %410 = arith.addf %409, %408 : vector<2x32xf32>
    %411 = arith.divf %409, %410 : vector<2x32xf32>
    %412 = vector.extract_strided_slice %404 {offsets = [0, 32], sizes = [2, 32], strides = [1, 1]} : vector<2x128xf32> to vector<2x32xf32>
    %413 = arith.negf %412 : vector<2x32xf32>
    %414 = math.exp %413 : vector<2x32xf32>
    %cst_194 = arith.constant 1.000000e+00 : f32
    %415 = vector.broadcast %cst_194 : f32 to vector<2x32xf32>
    %416 = arith.addf %415, %414 : vector<2x32xf32>
    %417 = arith.divf %415, %416 : vector<2x32xf32>
    %418 = vector.extract_strided_slice %404 {offsets = [0, 64], sizes = [2, 32], strides = [1, 1]} : vector<2x128xf32> to vector<2x32xf32>
    %419 = math.tanh %418 : vector<2x32xf32>
    %420 = vector.extract_strided_slice %404 {offsets = [0, 96], sizes = [2, 32], strides = [1, 1]} : vector<2x128xf32> to vector<2x32xf32>
    %421 = arith.negf %420 : vector<2x32xf32>
    %422 = math.exp %421 : vector<2x32xf32>
    %cst_195 = arith.constant 1.000000e+00 : f32
    %423 = vector.broadcast %cst_195 : f32 to vector<2x32xf32>
    %424 = arith.addf %423, %422 : vector<2x32xf32>
    %425 = arith.divf %423, %424 : vector<2x32xf32>
    %426 = arith.mulf %417, %405 : vector<2x32xf32>
    %427 = arith.mulf %411, %419 : vector<2x32xf32>
    %428 = arith.addf %426, %427 : vector<2x32xf32>
    %429 = math.tanh %428 : vector<2x32xf32>
    %430 = arith.mulf %425, %429 : vector<2x32xf32>
    %c0_196 = arith.constant 0 : index
    %c0_197 = arith.constant 0 : index
    %431 = vector.load %arg8[%c0_196, %c0_197] : memref<2x32xf32, #tpu.memory_space<vmem>>, vector<2x32xf32>
    tpu.vector_store %arg8[%c0_196, %c0_197], %430 {strides = array<i32>} : memref<2x32xf32, #tpu.memory_space<vmem>>, vector<2x32xf32>,
    %c0_198 = arith.constant 0 : index
    %c0_199 = arith.constant 0 : index
    %432 = vector.load %arg9[%c0_198, %c0_199] : memref<2x32xf32, #tpu.memory_space<vmem>>, vector<2x32xf32>
    tpu.vector_store %arg9[%c0_198, %c0_199], %428 {strides = array<i32>} : memref<2x32xf32, #tpu.memory_space<vmem>>, vector<2x32xf32>,
    %433 = arith.index_cast %c5_i32 : i32 to index
    %c0_200 = arith.constant 0 : index
    %c0_201 = arith.constant 0 : index
    %434 = vector.load %arg6[%433, %c0_200, %c0_201] : memref<8x2x32xf32, #tpu.memory_space<vmem>>, vector<1x2x32xf32>
    %435 = vector.shape_cast %434 : vector<1x2x32xf32> to vector<2x32xf32>
    %436 = vector.shape_cast %430 : vector<2x32xf32> to vector<1x2x32xf32>
    tpu.vector_store %arg6[%433, %c0_200, %c0_201], %436 {strides = array<i32>} : memref<8x2x32xf32, #tpu.memory_space<vmem>>, vector<1x2x32xf32>,
    %c7_i32_202 = arith.constant 7 : i32
    %437 = arith.subi %c7_i32_202, %c5_i32 : i32
    %438 = arith.index_cast %437 : i32 to index
    %c0_203 = arith.constant 0 : index
    %c0_204 = arith.constant 0 : index
    %439 = vector.load %arg3[%438, %c0_203, %c0_204] : memref<8x2x128xf32, #tpu.memory_space<vmem>>, vector<1x2x128xf32>
    %440 = vector.shape_cast %439 : vector<1x2x128xf32> to vector<2x128xf32>
    %c0_205 = arith.constant 0 : index
    %c0_206 = arith.constant 0 : index
    %441 = vector.load %arg10[%c0_205, %c0_206] : memref<2x32xf32, #tpu.memory_space<vmem>>, vector<2x32xf32>
    %c0_207 = arith.constant 0 : index
    %c0_208 = arith.constant 0 : index
    %442 = vector.load %arg5[%c0_207, %c0_208] : memref<32x128xf32, #tpu.memory_space<vmem>>, vector<32x128xf32>
    %cst_209 = arith.constant dense<0.000000e+00> : vector<2x128xf32>
    %443 = tpu.matmul %441, %442, %cst_209 {dimension_numbers = #tpu.dot_dimension_numbers<[1], [0], [0], [1], [0, 0, 1, 1], [], []>} : vector<2x32xf32>, vector<32x128xf32>, vector<2x128xf32> -> vector<2x128xf32>
    %444 = arith.addf %440, %443 : vector<2x128xf32>
    %c0_210 = arith.constant 0 : index
    %c0_211 = arith.constant 0 : index
    %445 = vector.load %arg11[%c0_210, %c0_211] : memref<2x32xf32, #tpu.memory_space<vmem>>, vector<2x32xf32>
    %446 = vector.extract_strided_slice %444 {offsets = [0, 0], sizes = [2, 32], strides = [1, 1]} : vector<2x128xf32> to vector<2x32xf32>
    %447 = arith.negf %446 : vector<2x32xf32>
    %448 = math.exp %447 : vector<2x32xf32>
    %cst_212 = arith.constant 1.000000e+00 : f32
    %449 = vector.broadcast %cst_212 : f32 to vector<2x32xf32>
    %450 = arith.addf %449, %448 : vector<2x32xf32>
    %451 = arith.divf %449, %450 : vector<2x32xf32>
    %452 = vector.extract_strided_slice %444 {offsets = [0, 32], sizes = [2, 32], strides = [1, 1]} : vector<2x128xf32> to vector<2x32xf32>
    %453 = arith.negf %452 : vector<2x32xf32>
    %454 = math.exp %453 : vector<2x32xf32>
    %cst_213 = arith.constant 1.000000e+00 : f32
    %455 = vector.broadcast %cst_213 : f32 to vector<2x32xf32>
    %456 = arith.addf %455, %454 : vector<2x32xf32>
    %457 = arith.divf %455, %456 : vector<2x32xf32>
    %458 = vector.extract_strided_slice %444 {offsets = [0, 64], sizes = [2, 32], strides = [1, 1]} : vector<2x128xf32> to vector<2x32xf32>
    %459 = math.tanh %458 : vector<2x32xf32>
    %460 = vector.extract_strided_slice %444 {offsets = [0, 96], sizes = [2, 32], strides = [1, 1]} : vector<2x128xf32> to vector<2x32xf32>
    %461 = arith.negf %460 : vector<2x32xf32>
    %462 = math.exp %461 : vector<2x32xf32>
    %cst_214 = arith.constant 1.000000e+00 : f32
    %463 = vector.broadcast %cst_214 : f32 to vector<2x32xf32>
    %464 = arith.addf %463, %462 : vector<2x32xf32>
    %465 = arith.divf %463, %464 : vector<2x32xf32>
    %466 = arith.mulf %457, %445 : vector<2x32xf32>
    %467 = arith.mulf %451, %459 : vector<2x32xf32>
    %468 = arith.addf %466, %467 : vector<2x32xf32>
    %469 = math.tanh %468 : vector<2x32xf32>
    %470 = arith.mulf %465, %469 : vector<2x32xf32>
    %c0_215 = arith.constant 0 : index
    %c0_216 = arith.constant 0 : index
    %471 = vector.load %arg10[%c0_215, %c0_216] : memref<2x32xf32, #tpu.memory_space<vmem>>, vector<2x32xf32>
    tpu.vector_store %arg10[%c0_215, %c0_216], %470 {strides = array<i32>} : memref<2x32xf32, #tpu.memory_space<vmem>>, vector<2x32xf32>,
    %c0_217 = arith.constant 0 : index
    %c0_218 = arith.constant 0 : index
    %472 = vector.load %arg11[%c0_217, %c0_218] : memref<2x32xf32, #tpu.memory_space<vmem>>, vector<2x32xf32>
    tpu.vector_store %arg11[%c0_217, %c0_218], %468 {strides = array<i32>} : memref<2x32xf32, #tpu.memory_space<vmem>>, vector<2x32xf32>,
    %473 = arith.index_cast %437 : i32 to index
    %c0_219 = arith.constant 0 : index
    %c0_220 = arith.constant 0 : index
    %474 = vector.load %arg7[%473, %c0_219, %c0_220] : memref<8x2x32xf32, #tpu.memory_space<vmem>>, vector<1x2x32xf32>
    %475 = vector.shape_cast %474 : vector<1x2x32xf32> to vector<2x32xf32>
    %476 = vector.shape_cast %470 : vector<2x32xf32> to vector<1x2x32xf32>
    tpu.vector_store %arg7[%473, %c0_219, %c0_220], %476 {strides = array<i32>} : memref<8x2x32xf32, #tpu.memory_space<vmem>>, vector<1x2x32xf32>,
    %c6_i32 = arith.constant 6 : i32
    %477 = arith.index_cast %c6_i32 : i32 to index
    %c0_221 = arith.constant 0 : index
    %c0_222 = arith.constant 0 : index
    %478 = vector.load %arg2[%477, %c0_221, %c0_222] : memref<8x2x128xf32, #tpu.memory_space<vmem>>, vector<1x2x128xf32>
    %479 = vector.shape_cast %478 : vector<1x2x128xf32> to vector<2x128xf32>
    %c0_223 = arith.constant 0 : index
    %c0_224 = arith.constant 0 : index
    %480 = vector.load %arg8[%c0_223, %c0_224] : memref<2x32xf32, #tpu.memory_space<vmem>>, vector<2x32xf32>
    %c0_225 = arith.constant 0 : index
    %c0_226 = arith.constant 0 : index
    %481 = vector.load %arg4[%c0_225, %c0_226] : memref<32x128xf32, #tpu.memory_space<vmem>>, vector<32x128xf32>
    %cst_227 = arith.constant dense<0.000000e+00> : vector<2x128xf32>
    %482 = tpu.matmul %480, %481, %cst_227 {dimension_numbers = #tpu.dot_dimension_numbers<[1], [0], [0], [1], [0, 0, 1, 1], [], []>} : vector<2x32xf32>, vector<32x128xf32>, vector<2x128xf32> -> vector<2x128xf32>
    %483 = arith.addf %479, %482 : vector<2x128xf32>
    %c0_228 = arith.constant 0 : index
    %c0_229 = arith.constant 0 : index
    %484 = vector.load %arg9[%c0_228, %c0_229] : memref<2x32xf32, #tpu.memory_space<vmem>>, vector<2x32xf32>
    %485 = vector.extract_strided_slice %483 {offsets = [0, 0], sizes = [2, 32], strides = [1, 1]} : vector<2x128xf32> to vector<2x32xf32>
    %486 = arith.negf %485 : vector<2x32xf32>
    %487 = math.exp %486 : vector<2x32xf32>
    %cst_230 = arith.constant 1.000000e+00 : f32
    %488 = vector.broadcast %cst_230 : f32 to vector<2x32xf32>
    %489 = arith.addf %488, %487 : vector<2x32xf32>
    %490 = arith.divf %488, %489 : vector<2x32xf32>
    %491 = vector.extract_strided_slice %483 {offsets = [0, 32], sizes = [2, 32], strides = [1, 1]} : vector<2x128xf32> to vector<2x32xf32>
    %492 = arith.negf %491 : vector<2x32xf32>
    %493 = math.exp %492 : vector<2x32xf32>
    %cst_231 = arith.constant 1.000000e+00 : f32
    %494 = vector.broadcast %cst_231 : f32 to vector<2x32xf32>
    %495 = arith.addf %494, %493 : vector<2x32xf32>
    %496 = arith.divf %494, %495 : vector<2x32xf32>
    %497 = vector.extract_strided_slice %483 {offsets = [0, 64], sizes = [2, 32], strides = [1, 1]} : vector<2x128xf32> to vector<2x32xf32>
    %498 = math.tanh %497 : vector<2x32xf32>
    %499 = vector.extract_strided_slice %483 {offsets = [0, 96], sizes = [2, 32], strides = [1, 1]} : vector<2x128xf32> to vector<2x32xf32>
    %500 = arith.negf %499 : vector<2x32xf32>
    %501 = math.exp %500 : vector<2x32xf32>
    %cst_232 = arith.constant 1.000000e+00 : f32
    %502 = vector.broadcast %cst_232 : f32 to vector<2x32xf32>
    %503 = arith.addf %502, %501 : vector<2x32xf32>
    %504 = arith.divf %502, %503 : vector<2x32xf32>
    %505 = arith.mulf %496, %484 : vector<2x32xf32>
    %506 = arith.mulf %490, %498 : vector<2x32xf32>
    %507 = arith.addf %505, %506 : vector<2x32xf32>
    %508 = math.tanh %507 : vector<2x32xf32>
    %509 = arith.mulf %504, %508 : vector<2x32xf32>
    %c0_233 = arith.constant 0 : index
    %c0_234 = arith.constant 0 : index
    %510 = vector.load %arg8[%c0_233, %c0_234] : memref<2x32xf32, #tpu.memory_space<vmem>>, vector<2x32xf32>
    tpu.vector_store %arg8[%c0_233, %c0_234], %509 {strides = array<i32>} : memref<2x32xf32, #tpu.memory_space<vmem>>, vector<2x32xf32>,
    %c0_235 = arith.constant 0 : index
    %c0_236 = arith.constant 0 : index
    %511 = vector.load %arg9[%c0_235, %c0_236] : memref<2x32xf32, #tpu.memory_space<vmem>>, vector<2x32xf32>
    tpu.vector_store %arg9[%c0_235, %c0_236], %507 {strides = array<i32>} : memref<2x32xf32, #tpu.memory_space<vmem>>, vector<2x32xf32>,
    %512 = arith.index_cast %c6_i32 : i32 to index
    %c0_237 = arith.constant 0 : index
    %c0_238 = arith.constant 0 : index
    %513 = vector.load %arg6[%512, %c0_237, %c0_238] : memref<8x2x32xf32, #tpu.memory_space<vmem>>, vector<1x2x32xf32>
    %514 = vector.shape_cast %513 : vector<1x2x32xf32> to vector<2x32xf32>
    %515 = vector.shape_cast %509 : vector<2x32xf32> to vector<1x2x32xf32>
    tpu.vector_store %arg6[%512, %c0_237, %c0_238], %515 {strides = array<i32>} : memref<8x2x32xf32, #tpu.memory_space<vmem>>, vector<1x2x32xf32>,
    %c7_i32_239 = arith.constant 7 : i32
    %516 = arith.subi %c7_i32_239, %c6_i32 : i32
    %517 = arith.index_cast %516 : i32 to index
    %c0_240 = arith.constant 0 : index
    %c0_241 = arith.constant 0 : index
    %518 = vector.load %arg3[%517, %c0_240, %c0_241] : memref<8x2x128xf32, #tpu.memory_space<vmem>>, vector<1x2x128xf32>
    %519 = vector.shape_cast %518 : vector<1x2x128xf32> to vector<2x128xf32>
    %c0_242 = arith.constant 0 : index
    %c0_243 = arith.constant 0 : index
    %520 = vector.load %arg10[%c0_242, %c0_243] : memref<2x32xf32, #tpu.memory_space<vmem>>, vector<2x32xf32>
    %c0_244 = arith.constant 0 : index
    %c0_245 = arith.constant 0 : index
    %521 = vector.load %arg5[%c0_244, %c0_245] : memref<32x128xf32, #tpu.memory_space<vmem>>, vector<32x128xf32>
    %cst_246 = arith.constant dense<0.000000e+00> : vector<2x128xf32>
    %522 = tpu.matmul %520, %521, %cst_246 {dimension_numbers = #tpu.dot_dimension_numbers<[1], [0], [0], [1], [0, 0, 1, 1], [], []>} : vector<2x32xf32>, vector<32x128xf32>, vector<2x128xf32> -> vector<2x128xf32>
    %523 = arith.addf %519, %522 : vector<2x128xf32>
    %c0_247 = arith.constant 0 : index
    %c0_248 = arith.constant 0 : index
    %524 = vector.load %arg11[%c0_247, %c0_248] : memref<2x32xf32, #tpu.memory_space<vmem>>, vector<2x32xf32>
    %525 = vector.extract_strided_slice %523 {offsets = [0, 0], sizes = [2, 32], strides = [1, 1]} : vector<2x128xf32> to vector<2x32xf32>
    %526 = arith.negf %525 : vector<2x32xf32>
    %527 = math.exp %526 : vector<2x32xf32>
    %cst_249 = arith.constant 1.000000e+00 : f32
    %528 = vector.broadcast %cst_249 : f32 to vector<2x32xf32>
    %529 = arith.addf %528, %527 : vector<2x32xf32>
    %530 = arith.divf %528, %529 : vector<2x32xf32>
    %531 = vector.extract_strided_slice %523 {offsets = [0, 32], sizes = [2, 32], strides = [1, 1]} : vector<2x128xf32> to vector<2x32xf32>
    %532 = arith.negf %531 : vector<2x32xf32>
    %533 = math.exp %532 : vector<2x32xf32>
    %cst_250 = arith.constant 1.000000e+00 : f32
    %534 = vector.broadcast %cst_250 : f32 to vector<2x32xf32>
    %535 = arith.addf %534, %533 : vector<2x32xf32>
    %536 = arith.divf %534, %535 : vector<2x32xf32>
    %537 = vector.extract_strided_slice %523 {offsets = [0, 64], sizes = [2, 32], strides = [1, 1]} : vector<2x128xf32> to vector<2x32xf32>
    %538 = math.tanh %537 : vector<2x32xf32>
    %539 = vector.extract_strided_slice %523 {offsets = [0, 96], sizes = [2, 32], strides = [1, 1]} : vector<2x128xf32> to vector<2x32xf32>
    %540 = arith.negf %539 : vector<2x32xf32>
    %541 = math.exp %540 : vector<2x32xf32>
    %cst_251 = arith.constant 1.000000e+00 : f32
    %542 = vector.broadcast %cst_251 : f32 to vector<2x32xf32>
    %543 = arith.addf %542, %541 : vector<2x32xf32>
    %544 = arith.divf %542, %543 : vector<2x32xf32>
    %545 = arith.mulf %536, %524 : vector<2x32xf32>
    %546 = arith.mulf %530, %538 : vector<2x32xf32>
    %547 = arith.addf %545, %546 : vector<2x32xf32>
    %548 = math.tanh %547 : vector<2x32xf32>
    %549 = arith.mulf %544, %548 : vector<2x32xf32>
    %c0_252 = arith.constant 0 : index
    %c0_253 = arith.constant 0 : index
    %550 = vector.load %arg10[%c0_252, %c0_253] : memref<2x32xf32, #tpu.memory_space<vmem>>, vector<2x32xf32>
    tpu.vector_store %arg10[%c0_252, %c0_253], %549 {strides = array<i32>} : memref<2x32xf32, #tpu.memory_space<vmem>>, vector<2x32xf32>,
    %c0_254 = arith.constant 0 : index
    %c0_255 = arith.constant 0 : index
    %551 = vector.load %arg11[%c0_254, %c0_255] : memref<2x32xf32, #tpu.memory_space<vmem>>, vector<2x32xf32>
    tpu.vector_store %arg11[%c0_254, %c0_255], %547 {strides = array<i32>} : memref<2x32xf32, #tpu.memory_space<vmem>>, vector<2x32xf32>,
    %552 = arith.index_cast %516 : i32 to index
    %c0_256 = arith.constant 0 : index
    %c0_257 = arith.constant 0 : index
    %553 = vector.load %arg7[%552, %c0_256, %c0_257] : memref<8x2x32xf32, #tpu.memory_space<vmem>>, vector<1x2x32xf32>
    %554 = vector.shape_cast %553 : vector<1x2x32xf32> to vector<2x32xf32>
    %555 = vector.shape_cast %549 : vector<2x32xf32> to vector<1x2x32xf32>
    tpu.vector_store %arg7[%552, %c0_256, %c0_257], %555 {strides = array<i32>} : memref<8x2x32xf32, #tpu.memory_space<vmem>>, vector<1x2x32xf32>,
    %c7_i32_258 = arith.constant 7 : i32
    %556 = arith.index_cast %c7_i32_258 : i32 to index
    %c0_259 = arith.constant 0 : index
    %c0_260 = arith.constant 0 : index
    %557 = vector.load %arg2[%556, %c0_259, %c0_260] : memref<8x2x128xf32, #tpu.memory_space<vmem>>, vector<1x2x128xf32>
    %558 = vector.shape_cast %557 : vector<1x2x128xf32> to vector<2x128xf32>
    %c0_261 = arith.constant 0 : index
    %c0_262 = arith.constant 0 : index
    %559 = vector.load %arg8[%c0_261, %c0_262] : memref<2x32xf32, #tpu.memory_space<vmem>>, vector<2x32xf32>
    %c0_263 = arith.constant 0 : index
    %c0_264 = arith.constant 0 : index
    %560 = vector.load %arg4[%c0_263, %c0_264] : memref<32x128xf32, #tpu.memory_space<vmem>>, vector<32x128xf32>
    %cst_265 = arith.constant dense<0.000000e+00> : vector<2x128xf32>
    %561 = tpu.matmul %559, %560, %cst_265 {dimension_numbers = #tpu.dot_dimension_numbers<[1], [0], [0], [1], [0, 0, 1, 1], [], []>} : vector<2x32xf32>, vector<32x128xf32>, vector<2x128xf32> -> vector<2x128xf32>
    %562 = arith.addf %558, %561 : vector<2x128xf32>
    %c0_266 = arith.constant 0 : index
    %c0_267 = arith.constant 0 : index
    %563 = vector.load %arg9[%c0_266, %c0_267] : memref<2x32xf32, #tpu.memory_space<vmem>>, vector<2x32xf32>
    %564 = vector.extract_strided_slice %562 {offsets = [0, 0], sizes = [2, 32], strides = [1, 1]} : vector<2x128xf32> to vector<2x32xf32>
    %565 = arith.negf %564 : vector<2x32xf32>
    %566 = math.exp %565 : vector<2x32xf32>
    %cst_268 = arith.constant 1.000000e+00 : f32
    %567 = vector.broadcast %cst_268 : f32 to vector<2x32xf32>
    %568 = arith.addf %567, %566 : vector<2x32xf32>
    %569 = arith.divf %567, %568 : vector<2x32xf32>
    %570 = vector.extract_strided_slice %562 {offsets = [0, 32], sizes = [2, 32], strides = [1, 1]} : vector<2x128xf32> to vector<2x32xf32>
    %571 = arith.negf %570 : vector<2x32xf32>
    %572 = math.exp %571 : vector<2x32xf32>
    %cst_269 = arith.constant 1.000000e+00 : f32
    %573 = vector.broadcast %cst_269 : f32 to vector<2x32xf32>
    %574 = arith.addf %573, %572 : vector<2x32xf32>
    %575 = arith.divf %573, %574 : vector<2x32xf32>
    %576 = vector.extract_strided_slice %562 {offsets = [0, 64], sizes = [2, 32], strides = [1, 1]} : vector<2x128xf32> to vector<2x32xf32>
    %577 = math.tanh %576 : vector<2x32xf32>
    %578 = vector.extract_strided_slice %562 {offsets = [0, 96], sizes = [2, 32], strides = [1, 1]} : vector<2x128xf32> to vector<2x32xf32>
    %579 = arith.negf %578 : vector<2x32xf32>
    %580 = math.exp %579 : vector<2x32xf32>
    %cst_270 = arith.constant 1.000000e+00 : f32
    %581 = vector.broadcast %cst_270 : f32 to vector<2x32xf32>
    %582 = arith.addf %581, %580 : vector<2x32xf32>
    %583 = arith.divf %581, %582 : vector<2x32xf32>
    %584 = arith.mulf %575, %563 : vector<2x32xf32>
    %585 = arith.mulf %569, %577 : vector<2x32xf32>
    %586 = arith.addf %584, %585 : vector<2x32xf32>
    %587 = math.tanh %586 : vector<2x32xf32>
    %588 = arith.mulf %583, %587 : vector<2x32xf32>
    %c0_271 = arith.constant 0 : index
    %c0_272 = arith.constant 0 : index
    %589 = vector.load %arg8[%c0_271, %c0_272] : memref<2x32xf32, #tpu.memory_space<vmem>>, vector<2x32xf32>
    tpu.vector_store %arg8[%c0_271, %c0_272], %588 {strides = array<i32>} : memref<2x32xf32, #tpu.memory_space<vmem>>, vector<2x32xf32>,
    %c0_273 = arith.constant 0 : index
    %c0_274 = arith.constant 0 : index
    %590 = vector.load %arg9[%c0_273, %c0_274] : memref<2x32xf32, #tpu.memory_space<vmem>>, vector<2x32xf32>
    tpu.vector_store %arg9[%c0_273, %c0_274], %586 {strides = array<i32>} : memref<2x32xf32, #tpu.memory_space<vmem>>, vector<2x32xf32>,
    %591 = arith.index_cast %c7_i32_258 : i32 to index
    %c0_275 = arith.constant 0 : index
    %c0_276 = arith.constant 0 : index
    %592 = vector.load %arg6[%591, %c0_275, %c0_276] : memref<8x2x32xf32, #tpu.memory_space<vmem>>, vector<1x2x32xf32>
    %593 = vector.shape_cast %592 : vector<1x2x32xf32> to vector<2x32xf32>
    %594 = vector.shape_cast %588 : vector<2x32xf32> to vector<1x2x32xf32>
    tpu.vector_store %arg6[%591, %c0_275, %c0_276], %594 {strides = array<i32>} : memref<8x2x32xf32, #tpu.memory_space<vmem>>, vector<1x2x32xf32>,
    %c7_i32_277 = arith.constant 7 : i32
    %595 = arith.subi %c7_i32_277, %c7_i32_258 : i32
    %596 = arith.index_cast %595 : i32 to index
    %c0_278 = arith.constant 0 : index
    %c0_279 = arith.constant 0 : index
    %597 = vector.load %arg3[%596, %c0_278, %c0_279] : memref<8x2x128xf32, #tpu.memory_space<vmem>>, vector<1x2x128xf32>
    %598 = vector.shape_cast %597 : vector<1x2x128xf32> to vector<2x128xf32>
    %c0_280 = arith.constant 0 : index
    %c0_281 = arith.constant 0 : index
    %599 = vector.load %arg10[%c0_280, %c0_281] : memref<2x32xf32, #tpu.memory_space<vmem>>, vector<2x32xf32>
    %c0_282 = arith.constant 0 : index
    %c0_283 = arith.constant 0 : index
    %600 = vector.load %arg5[%c0_282, %c0_283] : memref<32x128xf32, #tpu.memory_space<vmem>>, vector<32x128xf32>
    %cst_284 = arith.constant dense<0.000000e+00> : vector<2x128xf32>
    %601 = tpu.matmul %599, %600, %cst_284 {dimension_numbers = #tpu.dot_dimension_numbers<[1], [0], [0], [1], [0, 0, 1, 1], [], []>} : vector<2x32xf32>, vector<32x128xf32>, vector<2x128xf32> -> vector<2x128xf32>
    %602 = arith.addf %598, %601 : vector<2x128xf32>
    %c0_285 = arith.constant 0 : index
    %c0_286 = arith.constant 0 : index
    %603 = vector.load %arg11[%c0_285, %c0_286] : memref<2x32xf32, #tpu.memory_space<vmem>>, vector<2x32xf32>
    %604 = vector.extract_strided_slice %602 {offsets = [0, 0], sizes = [2, 32], strides = [1, 1]} : vector<2x128xf32> to vector<2x32xf32>
    %605 = arith.negf %604 : vector<2x32xf32>
    %606 = math.exp %605 : vector<2x32xf32>
    %cst_287 = arith.constant 1.000000e+00 : f32
    %607 = vector.broadcast %cst_287 : f32 to vector<2x32xf32>
    %608 = arith.addf %607, %606 : vector<2x32xf32>
    %609 = arith.divf %607, %608 : vector<2x32xf32>
    %610 = vector.extract_strided_slice %602 {offsets = [0, 32], sizes = [2, 32], strides = [1, 1]} : vector<2x128xf32> to vector<2x32xf32>
    %611 = arith.negf %610 : vector<2x32xf32>
    %612 = math.exp %611 : vector<2x32xf32>
    %cst_288 = arith.constant 1.000000e+00 : f32
    %613 = vector.broadcast %cst_288 : f32 to vector<2x32xf32>
    %614 = arith.addf %613, %612 : vector<2x32xf32>
    %615 = arith.divf %613, %614 : vector<2x32xf32>
    %616 = vector.extract_strided_slice %602 {offsets = [0, 64], sizes = [2, 32], strides = [1, 1]} : vector<2x128xf32> to vector<2x32xf32>
    %617 = math.tanh %616 : vector<2x32xf32>
    %618 = vector.extract_strided_slice %602 {offsets = [0, 96], sizes = [2, 32], strides = [1, 1]} : vector<2x128xf32> to vector<2x32xf32>
    %619 = arith.negf %618 : vector<2x32xf32>
    %620 = math.exp %619 : vector<2x32xf32>
    %cst_289 = arith.constant 1.000000e+00 : f32
    %621 = vector.broadcast %cst_289 : f32 to vector<2x32xf32>
    %622 = arith.addf %621, %620 : vector<2x32xf32>
    %623 = arith.divf %621, %622 : vector<2x32xf32>
    %624 = arith.mulf %615, %603 : vector<2x32xf32>
    %625 = arith.mulf %609, %617 : vector<2x32xf32>
    %626 = arith.addf %624, %625 : vector<2x32xf32>
    %627 = math.tanh %626 : vector<2x32xf32>
    %628 = arith.mulf %623, %627 : vector<2x32xf32>
    %c0_290 = arith.constant 0 : index
    %c0_291 = arith.constant 0 : index
    %629 = vector.load %arg10[%c0_290, %c0_291] : memref<2x32xf32, #tpu.memory_space<vmem>>, vector<2x32xf32>
    tpu.vector_store %arg10[%c0_290, %c0_291], %628 {strides = array<i32>} : memref<2x32xf32, #tpu.memory_space<vmem>>, vector<2x32xf32>,
    %c0_292 = arith.constant 0 : index
    %c0_293 = arith.constant 0 : index
    %630 = vector.load %arg11[%c0_292, %c0_293] : memref<2x32xf32, #tpu.memory_space<vmem>>, vector<2x32xf32>
    tpu.vector_store %arg11[%c0_292, %c0_293], %626 {strides = array<i32>} : memref<2x32xf32, #tpu.memory_space<vmem>>, vector<2x32xf32>,
    %631 = arith.index_cast %595 : i32 to index
    %c0_294 = arith.constant 0 : index
    %c0_295 = arith.constant 0 : index
    %632 = vector.load %arg7[%631, %c0_294, %c0_295] : memref<8x2x32xf32, #tpu.memory_space<vmem>>, vector<1x2x32xf32>
    %633 = vector.shape_cast %632 : vector<1x2x32xf32> to vector<2x32xf32>
    %634 = vector.shape_cast %628 : vector<2x32xf32> to vector<1x2x32xf32>
    tpu.vector_store %arg7[%631, %c0_294, %c0_295], %634 {strides = array<i32>} : memref<8x2x32xf32, #tpu.memory_space<vmem>>, vector<1x2x32xf32>,
    %c8_i32 = arith.constant 8 : i32
    return
  }
  func.func @transform_0(%arg0: i32, %arg1: i32) -> (i32, i32, i32) {
    %c0_i32 = arith.constant 0 : i32
    %c0_i32_0 = arith.constant 0 : i32
    return %arg1, %arg0, %c0_i32 : i32, i32, i32
  }
  func.func @transform_1(%arg0: i32, %arg1: i32) -> (i32, i32, i32) {
    %c0_i32 = arith.constant 0 : i32
    %0 = arith.subi %c0_i32, %arg1 : i32
    %c1_i32 = arith.constant 1 : i32
    %c0_i32_0 = arith.constant 0 : i32
    return %0, %arg0, %c1_i32 : i32, i32, i32
  }
  func.func @transform_2(%arg0: i32, %arg1: i32) -> (i32, i32) {
    %c0_i32 = arith.constant 0 : i32
    %c0_i32_0 = arith.constant 0 : i32
    %c0_i32_1 = arith.constant 0 : i32
    return %c0_i32, %c0_i32_0 : i32, i32
  }
  func.func @transform_3(%arg0: i32, %arg1: i32) -> (i32, i32) {
    %c0_i32 = arith.constant 0 : i32
    %c0_i32_0 = arith.constant 0 : i32
    %c0_i32_1 = arith.constant 0 : i32
    return %c0_i32, %c0_i32_0 : i32, i32
  }
  func.func @transform_4(%arg0: i32, %arg1: i32) -> (i32, i32, i32) {
    %c0_i32 = arith.constant 0 : i32
    %c0_i32_0 = arith.constant 0 : i32
    return %arg1, %arg0, %c0_i32 : i32, i32, i32
  }
  func.func @transform_5(%arg0: i32, %arg1: i32) -> (i32, i32, i32) {
    %c0_i32 = arith.constant 0 : i32
    %0 = arith.subi %c0_i32, %arg1 : i32
    %c0_i32_0 = arith.constant 0 : i32
    %c0_i32_1 = arith.constant 0 : i32
    return %0, %arg0, %c0_i32_0 : i32, i32, i32
  }
}

module attributes {stable_mosaic.version = 11 : i64} {
  func.func @_bidir_pool_layer_kernel(%arg0: i32, %arg1: i32, %arg2: memref<8x2x128xf32, #tpu.memory_space<vmem>>, %arg3: memref<8x2x128xf32, #tpu.memory_space<vmem>>, %arg4: memref<32x128xf32, #tpu.memory_space<vmem>>, %arg5: memref<32x128xf32, #tpu.memory_space<vmem>>, %arg6: memref<2x128xf32, #tpu.memory_space<vmem>>, %arg7: memref<2x32xf32, #tpu.memory_space<vmem>>, %arg8: memref<2x32xf32, #tpu.memory_space<vmem>>, %arg9: memref<2x32xf32, #tpu.memory_space<vmem>>, %arg10: memref<2x32xf32, #tpu.memory_space<vmem>>, %arg11: memref<2x32xf32, #tpu.memory_space<vmem>>, %arg12: memref<2x32xf32, #tpu.memory_space<vmem>>, %arg13: memref<2x32xf32, #tpu.memory_space<vmem>>, %arg14: memref<2x32xf32, #tpu.memory_space<vmem>>) attributes {dimension_semantics = [#tpu.dimension_semantics<parallel>, #tpu.dimension_semantics<arbitrary>], iteration_bounds = array<i64: 1, 1>, scalar_prefetch = 0 : i64, scratch_operands = 8 : i64, tpu.core_type = #tpu.core_type<tc>, window_params = [{transform_indices = @transform_0, window_bounds = array<i64: 8, 2, 128>}, {transform_indices = @transform_1, window_bounds = array<i64: 8, 2, 128>}, {pipeline_mode = #tpu.pipeline_mode<synchronous>, transform_indices = @transform_2, window_bounds = array<i64: 32, 128>}, {pipeline_mode = #tpu.pipeline_mode<synchronous>, transform_indices = @transform_3, window_bounds = array<i64: 32, 128>}, {transform_indices = @transform_4, window_bounds = array<i64: 2, 128>}]} {
    %c0_i32 = arith.constant 0 : i32
    %0 = arith.cmpi eq, %arg1, %c0_i32 : i32
    %1 = arith.extui %0 : i1 to i32
    %c0_i32_0 = arith.constant 0 : i32
    %2 = arith.cmpi ne, %1, %c0_i32_0 : i32
    scf.if %2 {
      %cst_394 = arith.constant 0.000000e+00 : f32
      %670 = vector.broadcast %cst_394 : f32 to vector<2x32xf32>
      %c0_395 = arith.constant 0 : index
      %c0_396 = arith.constant 0 : index
      %671 = vector.load %arg7[%c0_395, %c0_396] : memref<2x32xf32, #tpu.memory_space<vmem>>, vector<2x32xf32>
      tpu.vector_store %arg7[%c0_395, %c0_396], %670 {strides = array<i32>} : memref<2x32xf32, #tpu.memory_space<vmem>>, vector<2x32xf32>,
      %cst_397 = arith.constant 0.000000e+00 : f32
      %672 = vector.broadcast %cst_397 : f32 to vector<2x32xf32>
      %c0_398 = arith.constant 0 : index
      %c0_399 = arith.constant 0 : index
      %673 = vector.load %arg8[%c0_398, %c0_399] : memref<2x32xf32, #tpu.memory_space<vmem>>, vector<2x32xf32>
      tpu.vector_store %arg8[%c0_398, %c0_399], %672 {strides = array<i32>} : memref<2x32xf32, #tpu.memory_space<vmem>>, vector<2x32xf32>,
      %cst_400 = arith.constant 0.000000e+00 : f32
      %674 = vector.broadcast %cst_400 : f32 to vector<2x32xf32>
      %c0_401 = arith.constant 0 : index
      %c0_402 = arith.constant 0 : index
      %675 = vector.load %arg9[%c0_401, %c0_402] : memref<2x32xf32, #tpu.memory_space<vmem>>, vector<2x32xf32>
      tpu.vector_store %arg9[%c0_401, %c0_402], %674 {strides = array<i32>} : memref<2x32xf32, #tpu.memory_space<vmem>>, vector<2x32xf32>,
      %cst_403 = arith.constant 0.000000e+00 : f32
      %676 = vector.broadcast %cst_403 : f32 to vector<2x32xf32>
      %c0_404 = arith.constant 0 : index
      %c0_405 = arith.constant 0 : index
      %677 = vector.load %arg10[%c0_404, %c0_405] : memref<2x32xf32, #tpu.memory_space<vmem>>, vector<2x32xf32>
      tpu.vector_store %arg10[%c0_404, %c0_405], %676 {strides = array<i32>} : memref<2x32xf32, #tpu.memory_space<vmem>>, vector<2x32xf32>,
      %cst_406 = arith.constant 0.000000e+00 : f32
      %678 = vector.broadcast %cst_406 : f32 to vector<2x32xf32>
      %c0_407 = arith.constant 0 : index
      %c0_408 = arith.constant 0 : index
      %679 = vector.load %arg11[%c0_407, %c0_408] : memref<2x32xf32, #tpu.memory_space<vmem>>, vector<2x32xf32>
      tpu.vector_store %arg11[%c0_407, %c0_408], %678 {strides = array<i32>} : memref<2x32xf32, #tpu.memory_space<vmem>>, vector<2x32xf32>,
      %cst_409 = arith.constant 0.000000e+00 : f32
      %680 = vector.broadcast %cst_409 : f32 to vector<2x32xf32>
      %c0_410 = arith.constant 0 : index
      %c0_411 = arith.constant 0 : index
      %681 = vector.load %arg12[%c0_410, %c0_411] : memref<2x32xf32, #tpu.memory_space<vmem>>, vector<2x32xf32>
      tpu.vector_store %arg12[%c0_410, %c0_411], %680 {strides = array<i32>} : memref<2x32xf32, #tpu.memory_space<vmem>>, vector<2x32xf32>,
      %cst_412 = arith.constant 0xFF800000 : f32
      %682 = vector.broadcast %cst_412 : f32 to vector<2x32xf32>
      %c0_413 = arith.constant 0 : index
      %c0_414 = arith.constant 0 : index
      %683 = vector.load %arg13[%c0_413, %c0_414] : memref<2x32xf32, #tpu.memory_space<vmem>>, vector<2x32xf32>
      tpu.vector_store %arg13[%c0_413, %c0_414], %682 {strides = array<i32>} : memref<2x32xf32, #tpu.memory_space<vmem>>, vector<2x32xf32>,
      %cst_415 = arith.constant 0xFF800000 : f32
      %684 = vector.broadcast %cst_415 : f32 to vector<2x32xf32>
      %c0_416 = arith.constant 0 : index
      %c0_417 = arith.constant 0 : index
      %685 = vector.load %arg14[%c0_416, %c0_417] : memref<2x32xf32, #tpu.memory_space<vmem>>, vector<2x32xf32>
      tpu.vector_store %arg14[%c0_416, %c0_417], %684 {strides = array<i32>} : memref<2x32xf32, #tpu.memory_space<vmem>>, vector<2x32xf32>,
    } else {
    }
    %c0_i32_1 = arith.constant 0 : i32
    %3 = arith.index_cast %c0_i32_1 : i32 to index
    %c0 = arith.constant 0 : index
    %c0_2 = arith.constant 0 : index
    %4 = vector.load %arg2[%3, %c0, %c0_2] : memref<8x2x128xf32, #tpu.memory_space<vmem>>, vector<1x2x128xf32>
    %5 = vector.shape_cast %4 : vector<1x2x128xf32> to vector<2x128xf32>
    %c0_3 = arith.constant 0 : index
    %c0_4 = arith.constant 0 : index
    %6 = vector.load %arg7[%c0_3, %c0_4] : memref<2x32xf32, #tpu.memory_space<vmem>>, vector<2x32xf32>
    %c0_5 = arith.constant 0 : index
    %c0_6 = arith.constant 0 : index
    %7 = vector.load %arg4[%c0_5, %c0_6] : memref<32x128xf32, #tpu.memory_space<vmem>>, vector<32x128xf32>
    %cst = arith.constant dense<0.000000e+00> : vector<2x128xf32>
    %8 = tpu.matmul %6, %7, %cst {dimension_numbers = #tpu.dot_dimension_numbers<[1], [0], [0], [1], [0, 0, 1, 1], [], []>} : vector<2x32xf32>, vector<32x128xf32>, vector<2x128xf32> -> vector<2x128xf32>
    %9 = arith.addf %5, %8 : vector<2x128xf32>
    %c0_7 = arith.constant 0 : index
    %c0_8 = arith.constant 0 : index
    %10 = vector.load %arg8[%c0_7, %c0_8] : memref<2x32xf32, #tpu.memory_space<vmem>>, vector<2x32xf32>
    %11 = vector.extract_strided_slice %9 {offsets = [0, 0], sizes = [2, 32], strides = [1, 1]} : vector<2x128xf32> to vector<2x32xf32>
    %12 = arith.negf %11 : vector<2x32xf32>
    %13 = math.exp %12 : vector<2x32xf32>
    %cst_9 = arith.constant 1.000000e+00 : f32
    %14 = vector.broadcast %cst_9 : f32 to vector<2x32xf32>
    %15 = arith.addf %14, %13 : vector<2x32xf32>
    %16 = arith.divf %14, %15 : vector<2x32xf32>
    %17 = vector.extract_strided_slice %9 {offsets = [0, 32], sizes = [2, 32], strides = [1, 1]} : vector<2x128xf32> to vector<2x32xf32>
    %18 = arith.negf %17 : vector<2x32xf32>
    %19 = math.exp %18 : vector<2x32xf32>
    %cst_10 = arith.constant 1.000000e+00 : f32
    %20 = vector.broadcast %cst_10 : f32 to vector<2x32xf32>
    %21 = arith.addf %20, %19 : vector<2x32xf32>
    %22 = arith.divf %20, %21 : vector<2x32xf32>
    %23 = vector.extract_strided_slice %9 {offsets = [0, 64], sizes = [2, 32], strides = [1, 1]} : vector<2x128xf32> to vector<2x32xf32>
    %24 = math.tanh %23 : vector<2x32xf32>
    %25 = vector.extract_strided_slice %9 {offsets = [0, 96], sizes = [2, 32], strides = [1, 1]} : vector<2x128xf32> to vector<2x32xf32>
    %26 = arith.negf %25 : vector<2x32xf32>
    %27 = math.exp %26 : vector<2x32xf32>
    %cst_11 = arith.constant 1.000000e+00 : f32
    %28 = vector.broadcast %cst_11 : f32 to vector<2x32xf32>
    %29 = arith.addf %28, %27 : vector<2x32xf32>
    %30 = arith.divf %28, %29 : vector<2x32xf32>
    %31 = arith.mulf %22, %10 : vector<2x32xf32>
    %32 = arith.mulf %16, %24 : vector<2x32xf32>
    %33 = arith.addf %31, %32 : vector<2x32xf32>
    %34 = math.tanh %33 : vector<2x32xf32>
    %35 = arith.mulf %30, %34 : vector<2x32xf32>
    %c0_12 = arith.constant 0 : index
    %c0_13 = arith.constant 0 : index
    %36 = vector.load %arg7[%c0_12, %c0_13] : memref<2x32xf32, #tpu.memory_space<vmem>>, vector<2x32xf32>
    tpu.vector_store %arg7[%c0_12, %c0_13], %35 {strides = array<i32>} : memref<2x32xf32, #tpu.memory_space<vmem>>, vector<2x32xf32>,
    %c0_14 = arith.constant 0 : index
    %c0_15 = arith.constant 0 : index
    %37 = vector.load %arg8[%c0_14, %c0_15] : memref<2x32xf32, #tpu.memory_space<vmem>>, vector<2x32xf32>
    tpu.vector_store %arg8[%c0_14, %c0_15], %33 {strides = array<i32>} : memref<2x32xf32, #tpu.memory_space<vmem>>, vector<2x32xf32>,
    %c0_16 = arith.constant 0 : index
    %c0_17 = arith.constant 0 : index
    %38 = vector.load %arg11[%c0_16, %c0_17] : memref<2x32xf32, #tpu.memory_space<vmem>>, vector<2x32xf32>
    %39 = arith.addf %38, %35 : vector<2x32xf32>
    %c0_18 = arith.constant 0 : index
    %c0_19 = arith.constant 0 : index
    %40 = vector.load %arg11[%c0_18, %c0_19] : memref<2x32xf32, #tpu.memory_space<vmem>>, vector<2x32xf32>
    tpu.vector_store %arg11[%c0_18, %c0_19], %39 {strides = array<i32>} : memref<2x32xf32, #tpu.memory_space<vmem>>, vector<2x32xf32>,
    %c0_20 = arith.constant 0 : index
    %c0_21 = arith.constant 0 : index
    %41 = vector.load %arg13[%c0_20, %c0_21] : memref<2x32xf32, #tpu.memory_space<vmem>>, vector<2x32xf32>
    %42 = arith.maximumf %41, %35 : vector<2x32xf32>
    %c0_22 = arith.constant 0 : index
    %c0_23 = arith.constant 0 : index
    %43 = vector.load %arg13[%c0_22, %c0_23] : memref<2x32xf32, #tpu.memory_space<vmem>>, vector<2x32xf32>
    tpu.vector_store %arg13[%c0_22, %c0_23], %42 {strides = array<i32>} : memref<2x32xf32, #tpu.memory_space<vmem>>, vector<2x32xf32>,
    %c7_i32 = arith.constant 7 : i32
    %44 = arith.subi %c7_i32, %c0_i32_1 : i32
    %45 = arith.index_cast %44 : i32 to index
    %c0_24 = arith.constant 0 : index
    %c0_25 = arith.constant 0 : index
    %46 = vector.load %arg3[%45, %c0_24, %c0_25] : memref<8x2x128xf32, #tpu.memory_space<vmem>>, vector<1x2x128xf32>
    %47 = vector.shape_cast %46 : vector<1x2x128xf32> to vector<2x128xf32>
    %c0_26 = arith.constant 0 : index
    %c0_27 = arith.constant 0 : index
    %48 = vector.load %arg9[%c0_26, %c0_27] : memref<2x32xf32, #tpu.memory_space<vmem>>, vector<2x32xf32>
    %c0_28 = arith.constant 0 : index
    %c0_29 = arith.constant 0 : index
    %49 = vector.load %arg5[%c0_28, %c0_29] : memref<32x128xf32, #tpu.memory_space<vmem>>, vector<32x128xf32>
    %cst_30 = arith.constant dense<0.000000e+00> : vector<2x128xf32>
    %50 = tpu.matmul %48, %49, %cst_30 {dimension_numbers = #tpu.dot_dimension_numbers<[1], [0], [0], [1], [0, 0, 1, 1], [], []>} : vector<2x32xf32>, vector<32x128xf32>, vector<2x128xf32> -> vector<2x128xf32>
    %51 = arith.addf %47, %50 : vector<2x128xf32>
    %c0_31 = arith.constant 0 : index
    %c0_32 = arith.constant 0 : index
    %52 = vector.load %arg10[%c0_31, %c0_32] : memref<2x32xf32, #tpu.memory_space<vmem>>, vector<2x32xf32>
    %53 = vector.extract_strided_slice %51 {offsets = [0, 0], sizes = [2, 32], strides = [1, 1]} : vector<2x128xf32> to vector<2x32xf32>
    %54 = arith.negf %53 : vector<2x32xf32>
    %55 = math.exp %54 : vector<2x32xf32>
    %cst_33 = arith.constant 1.000000e+00 : f32
    %56 = vector.broadcast %cst_33 : f32 to vector<2x32xf32>
    %57 = arith.addf %56, %55 : vector<2x32xf32>
    %58 = arith.divf %56, %57 : vector<2x32xf32>
    %59 = vector.extract_strided_slice %51 {offsets = [0, 32], sizes = [2, 32], strides = [1, 1]} : vector<2x128xf32> to vector<2x32xf32>
    %60 = arith.negf %59 : vector<2x32xf32>
    %61 = math.exp %60 : vector<2x32xf32>
    %cst_34 = arith.constant 1.000000e+00 : f32
    %62 = vector.broadcast %cst_34 : f32 to vector<2x32xf32>
    %63 = arith.addf %62, %61 : vector<2x32xf32>
    %64 = arith.divf %62, %63 : vector<2x32xf32>
    %65 = vector.extract_strided_slice %51 {offsets = [0, 64], sizes = [2, 32], strides = [1, 1]} : vector<2x128xf32> to vector<2x32xf32>
    %66 = math.tanh %65 : vector<2x32xf32>
    %67 = vector.extract_strided_slice %51 {offsets = [0, 96], sizes = [2, 32], strides = [1, 1]} : vector<2x128xf32> to vector<2x32xf32>
    %68 = arith.negf %67 : vector<2x32xf32>
    %69 = math.exp %68 : vector<2x32xf32>
    %cst_35 = arith.constant 1.000000e+00 : f32
    %70 = vector.broadcast %cst_35 : f32 to vector<2x32xf32>
    %71 = arith.addf %70, %69 : vector<2x32xf32>
    %72 = arith.divf %70, %71 : vector<2x32xf32>
    %73 = arith.mulf %64, %52 : vector<2x32xf32>
    %74 = arith.mulf %58, %66 : vector<2x32xf32>
    %75 = arith.addf %73, %74 : vector<2x32xf32>
    %76 = math.tanh %75 : vector<2x32xf32>
    %77 = arith.mulf %72, %76 : vector<2x32xf32>
    %c0_36 = arith.constant 0 : index
    %c0_37 = arith.constant 0 : index
    %78 = vector.load %arg9[%c0_36, %c0_37] : memref<2x32xf32, #tpu.memory_space<vmem>>, vector<2x32xf32>
    tpu.vector_store %arg9[%c0_36, %c0_37], %77 {strides = array<i32>} : memref<2x32xf32, #tpu.memory_space<vmem>>, vector<2x32xf32>,
    %c0_38 = arith.constant 0 : index
    %c0_39 = arith.constant 0 : index
    %79 = vector.load %arg10[%c0_38, %c0_39] : memref<2x32xf32, #tpu.memory_space<vmem>>, vector<2x32xf32>
    tpu.vector_store %arg10[%c0_38, %c0_39], %75 {strides = array<i32>} : memref<2x32xf32, #tpu.memory_space<vmem>>, vector<2x32xf32>,
    %c0_40 = arith.constant 0 : index
    %c0_41 = arith.constant 0 : index
    %80 = vector.load %arg12[%c0_40, %c0_41] : memref<2x32xf32, #tpu.memory_space<vmem>>, vector<2x32xf32>
    %81 = arith.addf %80, %77 : vector<2x32xf32>
    %c0_42 = arith.constant 0 : index
    %c0_43 = arith.constant 0 : index
    %82 = vector.load %arg12[%c0_42, %c0_43] : memref<2x32xf32, #tpu.memory_space<vmem>>, vector<2x32xf32>
    tpu.vector_store %arg12[%c0_42, %c0_43], %81 {strides = array<i32>} : memref<2x32xf32, #tpu.memory_space<vmem>>, vector<2x32xf32>,
    %c0_44 = arith.constant 0 : index
    %c0_45 = arith.constant 0 : index
    %83 = vector.load %arg14[%c0_44, %c0_45] : memref<2x32xf32, #tpu.memory_space<vmem>>, vector<2x32xf32>
    %84 = arith.maximumf %83, %77 : vector<2x32xf32>
    %c0_46 = arith.constant 0 : index
    %c0_47 = arith.constant 0 : index
    %85 = vector.load %arg14[%c0_46, %c0_47] : memref<2x32xf32, #tpu.memory_space<vmem>>, vector<2x32xf32>
    tpu.vector_store %arg14[%c0_46, %c0_47], %84 {strides = array<i32>} : memref<2x32xf32, #tpu.memory_space<vmem>>, vector<2x32xf32>,
    %c1_i32 = arith.constant 1 : i32
    %86 = arith.index_cast %c1_i32 : i32 to index
    %c0_48 = arith.constant 0 : index
    %c0_49 = arith.constant 0 : index
    %87 = vector.load %arg2[%86, %c0_48, %c0_49] : memref<8x2x128xf32, #tpu.memory_space<vmem>>, vector<1x2x128xf32>
    %88 = vector.shape_cast %87 : vector<1x2x128xf32> to vector<2x128xf32>
    %c0_50 = arith.constant 0 : index
    %c0_51 = arith.constant 0 : index
    %89 = vector.load %arg7[%c0_50, %c0_51] : memref<2x32xf32, #tpu.memory_space<vmem>>, vector<2x32xf32>
    %c0_52 = arith.constant 0 : index
    %c0_53 = arith.constant 0 : index
    %90 = vector.load %arg4[%c0_52, %c0_53] : memref<32x128xf32, #tpu.memory_space<vmem>>, vector<32x128xf32>
    %cst_54 = arith.constant dense<0.000000e+00> : vector<2x128xf32>
    %91 = tpu.matmul %89, %90, %cst_54 {dimension_numbers = #tpu.dot_dimension_numbers<[1], [0], [0], [1], [0, 0, 1, 1], [], []>} : vector<2x32xf32>, vector<32x128xf32>, vector<2x128xf32> -> vector<2x128xf32>
    %92 = arith.addf %88, %91 : vector<2x128xf32>
    %c0_55 = arith.constant 0 : index
    %c0_56 = arith.constant 0 : index
    %93 = vector.load %arg8[%c0_55, %c0_56] : memref<2x32xf32, #tpu.memory_space<vmem>>, vector<2x32xf32>
    %94 = vector.extract_strided_slice %92 {offsets = [0, 0], sizes = [2, 32], strides = [1, 1]} : vector<2x128xf32> to vector<2x32xf32>
    %95 = arith.negf %94 : vector<2x32xf32>
    %96 = math.exp %95 : vector<2x32xf32>
    %cst_57 = arith.constant 1.000000e+00 : f32
    %97 = vector.broadcast %cst_57 : f32 to vector<2x32xf32>
    %98 = arith.addf %97, %96 : vector<2x32xf32>
    %99 = arith.divf %97, %98 : vector<2x32xf32>
    %100 = vector.extract_strided_slice %92 {offsets = [0, 32], sizes = [2, 32], strides = [1, 1]} : vector<2x128xf32> to vector<2x32xf32>
    %101 = arith.negf %100 : vector<2x32xf32>
    %102 = math.exp %101 : vector<2x32xf32>
    %cst_58 = arith.constant 1.000000e+00 : f32
    %103 = vector.broadcast %cst_58 : f32 to vector<2x32xf32>
    %104 = arith.addf %103, %102 : vector<2x32xf32>
    %105 = arith.divf %103, %104 : vector<2x32xf32>
    %106 = vector.extract_strided_slice %92 {offsets = [0, 64], sizes = [2, 32], strides = [1, 1]} : vector<2x128xf32> to vector<2x32xf32>
    %107 = math.tanh %106 : vector<2x32xf32>
    %108 = vector.extract_strided_slice %92 {offsets = [0, 96], sizes = [2, 32], strides = [1, 1]} : vector<2x128xf32> to vector<2x32xf32>
    %109 = arith.negf %108 : vector<2x32xf32>
    %110 = math.exp %109 : vector<2x32xf32>
    %cst_59 = arith.constant 1.000000e+00 : f32
    %111 = vector.broadcast %cst_59 : f32 to vector<2x32xf32>
    %112 = arith.addf %111, %110 : vector<2x32xf32>
    %113 = arith.divf %111, %112 : vector<2x32xf32>
    %114 = arith.mulf %105, %93 : vector<2x32xf32>
    %115 = arith.mulf %99, %107 : vector<2x32xf32>
    %116 = arith.addf %114, %115 : vector<2x32xf32>
    %117 = math.tanh %116 : vector<2x32xf32>
    %118 = arith.mulf %113, %117 : vector<2x32xf32>
    %c0_60 = arith.constant 0 : index
    %c0_61 = arith.constant 0 : index
    %119 = vector.load %arg7[%c0_60, %c0_61] : memref<2x32xf32, #tpu.memory_space<vmem>>, vector<2x32xf32>
    tpu.vector_store %arg7[%c0_60, %c0_61], %118 {strides = array<i32>} : memref<2x32xf32, #tpu.memory_space<vmem>>, vector<2x32xf32>,
    %c0_62 = arith.constant 0 : index
    %c0_63 = arith.constant 0 : index
    %120 = vector.load %arg8[%c0_62, %c0_63] : memref<2x32xf32, #tpu.memory_space<vmem>>, vector<2x32xf32>
    tpu.vector_store %arg8[%c0_62, %c0_63], %116 {strides = array<i32>} : memref<2x32xf32, #tpu.memory_space<vmem>>, vector<2x32xf32>,
    %c0_64 = arith.constant 0 : index
    %c0_65 = arith.constant 0 : index
    %121 = vector.load %arg11[%c0_64, %c0_65] : memref<2x32xf32, #tpu.memory_space<vmem>>, vector<2x32xf32>
    %122 = arith.addf %121, %118 : vector<2x32xf32>
    %c0_66 = arith.constant 0 : index
    %c0_67 = arith.constant 0 : index
    %123 = vector.load %arg11[%c0_66, %c0_67] : memref<2x32xf32, #tpu.memory_space<vmem>>, vector<2x32xf32>
    tpu.vector_store %arg11[%c0_66, %c0_67], %122 {strides = array<i32>} : memref<2x32xf32, #tpu.memory_space<vmem>>, vector<2x32xf32>,
    %c0_68 = arith.constant 0 : index
    %c0_69 = arith.constant 0 : index
    %124 = vector.load %arg13[%c0_68, %c0_69] : memref<2x32xf32, #tpu.memory_space<vmem>>, vector<2x32xf32>
    %125 = arith.maximumf %124, %118 : vector<2x32xf32>
    %c0_70 = arith.constant 0 : index
    %c0_71 = arith.constant 0 : index
    %126 = vector.load %arg13[%c0_70, %c0_71] : memref<2x32xf32, #tpu.memory_space<vmem>>, vector<2x32xf32>
    tpu.vector_store %arg13[%c0_70, %c0_71], %125 {strides = array<i32>} : memref<2x32xf32, #tpu.memory_space<vmem>>, vector<2x32xf32>,
    %c7_i32_72 = arith.constant 7 : i32
    %127 = arith.subi %c7_i32_72, %c1_i32 : i32
    %128 = arith.index_cast %127 : i32 to index
    %c0_73 = arith.constant 0 : index
    %c0_74 = arith.constant 0 : index
    %129 = vector.load %arg3[%128, %c0_73, %c0_74] : memref<8x2x128xf32, #tpu.memory_space<vmem>>, vector<1x2x128xf32>
    %130 = vector.shape_cast %129 : vector<1x2x128xf32> to vector<2x128xf32>
    %c0_75 = arith.constant 0 : index
    %c0_76 = arith.constant 0 : index
    %131 = vector.load %arg9[%c0_75, %c0_76] : memref<2x32xf32, #tpu.memory_space<vmem>>, vector<2x32xf32>
    %c0_77 = arith.constant 0 : index
    %c0_78 = arith.constant 0 : index
    %132 = vector.load %arg5[%c0_77, %c0_78] : memref<32x128xf32, #tpu.memory_space<vmem>>, vector<32x128xf32>
    %cst_79 = arith.constant dense<0.000000e+00> : vector<2x128xf32>
    %133 = tpu.matmul %131, %132, %cst_79 {dimension_numbers = #tpu.dot_dimension_numbers<[1], [0], [0], [1], [0, 0, 1, 1], [], []>} : vector<2x32xf32>, vector<32x128xf32>, vector<2x128xf32> -> vector<2x128xf32>
    %134 = arith.addf %130, %133 : vector<2x128xf32>
    %c0_80 = arith.constant 0 : index
    %c0_81 = arith.constant 0 : index
    %135 = vector.load %arg10[%c0_80, %c0_81] : memref<2x32xf32, #tpu.memory_space<vmem>>, vector<2x32xf32>
    %136 = vector.extract_strided_slice %134 {offsets = [0, 0], sizes = [2, 32], strides = [1, 1]} : vector<2x128xf32> to vector<2x32xf32>
    %137 = arith.negf %136 : vector<2x32xf32>
    %138 = math.exp %137 : vector<2x32xf32>
    %cst_82 = arith.constant 1.000000e+00 : f32
    %139 = vector.broadcast %cst_82 : f32 to vector<2x32xf32>
    %140 = arith.addf %139, %138 : vector<2x32xf32>
    %141 = arith.divf %139, %140 : vector<2x32xf32>
    %142 = vector.extract_strided_slice %134 {offsets = [0, 32], sizes = [2, 32], strides = [1, 1]} : vector<2x128xf32> to vector<2x32xf32>
    %143 = arith.negf %142 : vector<2x32xf32>
    %144 = math.exp %143 : vector<2x32xf32>
    %cst_83 = arith.constant 1.000000e+00 : f32
    %145 = vector.broadcast %cst_83 : f32 to vector<2x32xf32>
    %146 = arith.addf %145, %144 : vector<2x32xf32>
    %147 = arith.divf %145, %146 : vector<2x32xf32>
    %148 = vector.extract_strided_slice %134 {offsets = [0, 64], sizes = [2, 32], strides = [1, 1]} : vector<2x128xf32> to vector<2x32xf32>
    %149 = math.tanh %148 : vector<2x32xf32>
    %150 = vector.extract_strided_slice %134 {offsets = [0, 96], sizes = [2, 32], strides = [1, 1]} : vector<2x128xf32> to vector<2x32xf32>
    %151 = arith.negf %150 : vector<2x32xf32>
    %152 = math.exp %151 : vector<2x32xf32>
    %cst_84 = arith.constant 1.000000e+00 : f32
    %153 = vector.broadcast %cst_84 : f32 to vector<2x32xf32>
    %154 = arith.addf %153, %152 : vector<2x32xf32>
    %155 = arith.divf %153, %154 : vector<2x32xf32>
    %156 = arith.mulf %147, %135 : vector<2x32xf32>
    %157 = arith.mulf %141, %149 : vector<2x32xf32>
    %158 = arith.addf %156, %157 : vector<2x32xf32>
    %159 = math.tanh %158 : vector<2x32xf32>
    %160 = arith.mulf %155, %159 : vector<2x32xf32>
    %c0_85 = arith.constant 0 : index
    %c0_86 = arith.constant 0 : index
    %161 = vector.load %arg9[%c0_85, %c0_86] : memref<2x32xf32, #tpu.memory_space<vmem>>, vector<2x32xf32>
    tpu.vector_store %arg9[%c0_85, %c0_86], %160 {strides = array<i32>} : memref<2x32xf32, #tpu.memory_space<vmem>>, vector<2x32xf32>,
    %c0_87 = arith.constant 0 : index
    %c0_88 = arith.constant 0 : index
    %162 = vector.load %arg10[%c0_87, %c0_88] : memref<2x32xf32, #tpu.memory_space<vmem>>, vector<2x32xf32>
    tpu.vector_store %arg10[%c0_87, %c0_88], %158 {strides = array<i32>} : memref<2x32xf32, #tpu.memory_space<vmem>>, vector<2x32xf32>,
    %c0_89 = arith.constant 0 : index
    %c0_90 = arith.constant 0 : index
    %163 = vector.load %arg12[%c0_89, %c0_90] : memref<2x32xf32, #tpu.memory_space<vmem>>, vector<2x32xf32>
    %164 = arith.addf %163, %160 : vector<2x32xf32>
    %c0_91 = arith.constant 0 : index
    %c0_92 = arith.constant 0 : index
    %165 = vector.load %arg12[%c0_91, %c0_92] : memref<2x32xf32, #tpu.memory_space<vmem>>, vector<2x32xf32>
    tpu.vector_store %arg12[%c0_91, %c0_92], %164 {strides = array<i32>} : memref<2x32xf32, #tpu.memory_space<vmem>>, vector<2x32xf32>,
    %c0_93 = arith.constant 0 : index
    %c0_94 = arith.constant 0 : index
    %166 = vector.load %arg14[%c0_93, %c0_94] : memref<2x32xf32, #tpu.memory_space<vmem>>, vector<2x32xf32>
    %167 = arith.maximumf %166, %160 : vector<2x32xf32>
    %c0_95 = arith.constant 0 : index
    %c0_96 = arith.constant 0 : index
    %168 = vector.load %arg14[%c0_95, %c0_96] : memref<2x32xf32, #tpu.memory_space<vmem>>, vector<2x32xf32>
    tpu.vector_store %arg14[%c0_95, %c0_96], %167 {strides = array<i32>} : memref<2x32xf32, #tpu.memory_space<vmem>>, vector<2x32xf32>,
    %c2_i32 = arith.constant 2 : i32
    %169 = arith.index_cast %c2_i32 : i32 to index
    %c0_97 = arith.constant 0 : index
    %c0_98 = arith.constant 0 : index
    %170 = vector.load %arg2[%169, %c0_97, %c0_98] : memref<8x2x128xf32, #tpu.memory_space<vmem>>, vector<1x2x128xf32>
    %171 = vector.shape_cast %170 : vector<1x2x128xf32> to vector<2x128xf32>
    %c0_99 = arith.constant 0 : index
    %c0_100 = arith.constant 0 : index
    %172 = vector.load %arg7[%c0_99, %c0_100] : memref<2x32xf32, #tpu.memory_space<vmem>>, vector<2x32xf32>
    %c0_101 = arith.constant 0 : index
    %c0_102 = arith.constant 0 : index
    %173 = vector.load %arg4[%c0_101, %c0_102] : memref<32x128xf32, #tpu.memory_space<vmem>>, vector<32x128xf32>
    %cst_103 = arith.constant dense<0.000000e+00> : vector<2x128xf32>
    %174 = tpu.matmul %172, %173, %cst_103 {dimension_numbers = #tpu.dot_dimension_numbers<[1], [0], [0], [1], [0, 0, 1, 1], [], []>} : vector<2x32xf32>, vector<32x128xf32>, vector<2x128xf32> -> vector<2x128xf32>
    %175 = arith.addf %171, %174 : vector<2x128xf32>
    %c0_104 = arith.constant 0 : index
    %c0_105 = arith.constant 0 : index
    %176 = vector.load %arg8[%c0_104, %c0_105] : memref<2x32xf32, #tpu.memory_space<vmem>>, vector<2x32xf32>
    %177 = vector.extract_strided_slice %175 {offsets = [0, 0], sizes = [2, 32], strides = [1, 1]} : vector<2x128xf32> to vector<2x32xf32>
    %178 = arith.negf %177 : vector<2x32xf32>
    %179 = math.exp %178 : vector<2x32xf32>
    %cst_106 = arith.constant 1.000000e+00 : f32
    %180 = vector.broadcast %cst_106 : f32 to vector<2x32xf32>
    %181 = arith.addf %180, %179 : vector<2x32xf32>
    %182 = arith.divf %180, %181 : vector<2x32xf32>
    %183 = vector.extract_strided_slice %175 {offsets = [0, 32], sizes = [2, 32], strides = [1, 1]} : vector<2x128xf32> to vector<2x32xf32>
    %184 = arith.negf %183 : vector<2x32xf32>
    %185 = math.exp %184 : vector<2x32xf32>
    %cst_107 = arith.constant 1.000000e+00 : f32
    %186 = vector.broadcast %cst_107 : f32 to vector<2x32xf32>
    %187 = arith.addf %186, %185 : vector<2x32xf32>
    %188 = arith.divf %186, %187 : vector<2x32xf32>
    %189 = vector.extract_strided_slice %175 {offsets = [0, 64], sizes = [2, 32], strides = [1, 1]} : vector<2x128xf32> to vector<2x32xf32>
    %190 = math.tanh %189 : vector<2x32xf32>
    %191 = vector.extract_strided_slice %175 {offsets = [0, 96], sizes = [2, 32], strides = [1, 1]} : vector<2x128xf32> to vector<2x32xf32>
    %192 = arith.negf %191 : vector<2x32xf32>
    %193 = math.exp %192 : vector<2x32xf32>
    %cst_108 = arith.constant 1.000000e+00 : f32
    %194 = vector.broadcast %cst_108 : f32 to vector<2x32xf32>
    %195 = arith.addf %194, %193 : vector<2x32xf32>
    %196 = arith.divf %194, %195 : vector<2x32xf32>
    %197 = arith.mulf %188, %176 : vector<2x32xf32>
    %198 = arith.mulf %182, %190 : vector<2x32xf32>
    %199 = arith.addf %197, %198 : vector<2x32xf32>
    %200 = math.tanh %199 : vector<2x32xf32>
    %201 = arith.mulf %196, %200 : vector<2x32xf32>
    %c0_109 = arith.constant 0 : index
    %c0_110 = arith.constant 0 : index
    %202 = vector.load %arg7[%c0_109, %c0_110] : memref<2x32xf32, #tpu.memory_space<vmem>>, vector<2x32xf32>
    tpu.vector_store %arg7[%c0_109, %c0_110], %201 {strides = array<i32>} : memref<2x32xf32, #tpu.memory_space<vmem>>, vector<2x32xf32>,
    %c0_111 = arith.constant 0 : index
    %c0_112 = arith.constant 0 : index
    %203 = vector.load %arg8[%c0_111, %c0_112] : memref<2x32xf32, #tpu.memory_space<vmem>>, vector<2x32xf32>
    tpu.vector_store %arg8[%c0_111, %c0_112], %199 {strides = array<i32>} : memref<2x32xf32, #tpu.memory_space<vmem>>, vector<2x32xf32>,
    %c0_113 = arith.constant 0 : index
    %c0_114 = arith.constant 0 : index
    %204 = vector.load %arg11[%c0_113, %c0_114] : memref<2x32xf32, #tpu.memory_space<vmem>>, vector<2x32xf32>
    %205 = arith.addf %204, %201 : vector<2x32xf32>
    %c0_115 = arith.constant 0 : index
    %c0_116 = arith.constant 0 : index
    %206 = vector.load %arg11[%c0_115, %c0_116] : memref<2x32xf32, #tpu.memory_space<vmem>>, vector<2x32xf32>
    tpu.vector_store %arg11[%c0_115, %c0_116], %205 {strides = array<i32>} : memref<2x32xf32, #tpu.memory_space<vmem>>, vector<2x32xf32>,
    %c0_117 = arith.constant 0 : index
    %c0_118 = arith.constant 0 : index
    %207 = vector.load %arg13[%c0_117, %c0_118] : memref<2x32xf32, #tpu.memory_space<vmem>>, vector<2x32xf32>
    %208 = arith.maximumf %207, %201 : vector<2x32xf32>
    %c0_119 = arith.constant 0 : index
    %c0_120 = arith.constant 0 : index
    %209 = vector.load %arg13[%c0_119, %c0_120] : memref<2x32xf32, #tpu.memory_space<vmem>>, vector<2x32xf32>
    tpu.vector_store %arg13[%c0_119, %c0_120], %208 {strides = array<i32>} : memref<2x32xf32, #tpu.memory_space<vmem>>, vector<2x32xf32>,
    %c7_i32_121 = arith.constant 7 : i32
    %210 = arith.subi %c7_i32_121, %c2_i32 : i32
    %211 = arith.index_cast %210 : i32 to index
    %c0_122 = arith.constant 0 : index
    %c0_123 = arith.constant 0 : index
    %212 = vector.load %arg3[%211, %c0_122, %c0_123] : memref<8x2x128xf32, #tpu.memory_space<vmem>>, vector<1x2x128xf32>
    %213 = vector.shape_cast %212 : vector<1x2x128xf32> to vector<2x128xf32>
    %c0_124 = arith.constant 0 : index
    %c0_125 = arith.constant 0 : index
    %214 = vector.load %arg9[%c0_124, %c0_125] : memref<2x32xf32, #tpu.memory_space<vmem>>, vector<2x32xf32>
    %c0_126 = arith.constant 0 : index
    %c0_127 = arith.constant 0 : index
    %215 = vector.load %arg5[%c0_126, %c0_127] : memref<32x128xf32, #tpu.memory_space<vmem>>, vector<32x128xf32>
    %cst_128 = arith.constant dense<0.000000e+00> : vector<2x128xf32>
    %216 = tpu.matmul %214, %215, %cst_128 {dimension_numbers = #tpu.dot_dimension_numbers<[1], [0], [0], [1], [0, 0, 1, 1], [], []>} : vector<2x32xf32>, vector<32x128xf32>, vector<2x128xf32> -> vector<2x128xf32>
    %217 = arith.addf %213, %216 : vector<2x128xf32>
    %c0_129 = arith.constant 0 : index
    %c0_130 = arith.constant 0 : index
    %218 = vector.load %arg10[%c0_129, %c0_130] : memref<2x32xf32, #tpu.memory_space<vmem>>, vector<2x32xf32>
    %219 = vector.extract_strided_slice %217 {offsets = [0, 0], sizes = [2, 32], strides = [1, 1]} : vector<2x128xf32> to vector<2x32xf32>
    %220 = arith.negf %219 : vector<2x32xf32>
    %221 = math.exp %220 : vector<2x32xf32>
    %cst_131 = arith.constant 1.000000e+00 : f32
    %222 = vector.broadcast %cst_131 : f32 to vector<2x32xf32>
    %223 = arith.addf %222, %221 : vector<2x32xf32>
    %224 = arith.divf %222, %223 : vector<2x32xf32>
    %225 = vector.extract_strided_slice %217 {offsets = [0, 32], sizes = [2, 32], strides = [1, 1]} : vector<2x128xf32> to vector<2x32xf32>
    %226 = arith.negf %225 : vector<2x32xf32>
    %227 = math.exp %226 : vector<2x32xf32>
    %cst_132 = arith.constant 1.000000e+00 : f32
    %228 = vector.broadcast %cst_132 : f32 to vector<2x32xf32>
    %229 = arith.addf %228, %227 : vector<2x32xf32>
    %230 = arith.divf %228, %229 : vector<2x32xf32>
    %231 = vector.extract_strided_slice %217 {offsets = [0, 64], sizes = [2, 32], strides = [1, 1]} : vector<2x128xf32> to vector<2x32xf32>
    %232 = math.tanh %231 : vector<2x32xf32>
    %233 = vector.extract_strided_slice %217 {offsets = [0, 96], sizes = [2, 32], strides = [1, 1]} : vector<2x128xf32> to vector<2x32xf32>
    %234 = arith.negf %233 : vector<2x32xf32>
    %235 = math.exp %234 : vector<2x32xf32>
    %cst_133 = arith.constant 1.000000e+00 : f32
    %236 = vector.broadcast %cst_133 : f32 to vector<2x32xf32>
    %237 = arith.addf %236, %235 : vector<2x32xf32>
    %238 = arith.divf %236, %237 : vector<2x32xf32>
    %239 = arith.mulf %230, %218 : vector<2x32xf32>
    %240 = arith.mulf %224, %232 : vector<2x32xf32>
    %241 = arith.addf %239, %240 : vector<2x32xf32>
    %242 = math.tanh %241 : vector<2x32xf32>
    %243 = arith.mulf %238, %242 : vector<2x32xf32>
    %c0_134 = arith.constant 0 : index
    %c0_135 = arith.constant 0 : index
    %244 = vector.load %arg9[%c0_134, %c0_135] : memref<2x32xf32, #tpu.memory_space<vmem>>, vector<2x32xf32>
    tpu.vector_store %arg9[%c0_134, %c0_135], %243 {strides = array<i32>} : memref<2x32xf32, #tpu.memory_space<vmem>>, vector<2x32xf32>,
    %c0_136 = arith.constant 0 : index
    %c0_137 = arith.constant 0 : index
    %245 = vector.load %arg10[%c0_136, %c0_137] : memref<2x32xf32, #tpu.memory_space<vmem>>, vector<2x32xf32>
    tpu.vector_store %arg10[%c0_136, %c0_137], %241 {strides = array<i32>} : memref<2x32xf32, #tpu.memory_space<vmem>>, vector<2x32xf32>,
    %c0_138 = arith.constant 0 : index
    %c0_139 = arith.constant 0 : index
    %246 = vector.load %arg12[%c0_138, %c0_139] : memref<2x32xf32, #tpu.memory_space<vmem>>, vector<2x32xf32>
    %247 = arith.addf %246, %243 : vector<2x32xf32>
    %c0_140 = arith.constant 0 : index
    %c0_141 = arith.constant 0 : index
    %248 = vector.load %arg12[%c0_140, %c0_141] : memref<2x32xf32, #tpu.memory_space<vmem>>, vector<2x32xf32>
    tpu.vector_store %arg12[%c0_140, %c0_141], %247 {strides = array<i32>} : memref<2x32xf32, #tpu.memory_space<vmem>>, vector<2x32xf32>,
    %c0_142 = arith.constant 0 : index
    %c0_143 = arith.constant 0 : index
    %249 = vector.load %arg14[%c0_142, %c0_143] : memref<2x32xf32, #tpu.memory_space<vmem>>, vector<2x32xf32>
    %250 = arith.maximumf %249, %243 : vector<2x32xf32>
    %c0_144 = arith.constant 0 : index
    %c0_145 = arith.constant 0 : index
    %251 = vector.load %arg14[%c0_144, %c0_145] : memref<2x32xf32, #tpu.memory_space<vmem>>, vector<2x32xf32>
    tpu.vector_store %arg14[%c0_144, %c0_145], %250 {strides = array<i32>} : memref<2x32xf32, #tpu.memory_space<vmem>>, vector<2x32xf32>,
    %c3_i32 = arith.constant 3 : i32
    %252 = arith.index_cast %c3_i32 : i32 to index
    %c0_146 = arith.constant 0 : index
    %c0_147 = arith.constant 0 : index
    %253 = vector.load %arg2[%252, %c0_146, %c0_147] : memref<8x2x128xf32, #tpu.memory_space<vmem>>, vector<1x2x128xf32>
    %254 = vector.shape_cast %253 : vector<1x2x128xf32> to vector<2x128xf32>
    %c0_148 = arith.constant 0 : index
    %c0_149 = arith.constant 0 : index
    %255 = vector.load %arg7[%c0_148, %c0_149] : memref<2x32xf32, #tpu.memory_space<vmem>>, vector<2x32xf32>
    %c0_150 = arith.constant 0 : index
    %c0_151 = arith.constant 0 : index
    %256 = vector.load %arg4[%c0_150, %c0_151] : memref<32x128xf32, #tpu.memory_space<vmem>>, vector<32x128xf32>
    %cst_152 = arith.constant dense<0.000000e+00> : vector<2x128xf32>
    %257 = tpu.matmul %255, %256, %cst_152 {dimension_numbers = #tpu.dot_dimension_numbers<[1], [0], [0], [1], [0, 0, 1, 1], [], []>} : vector<2x32xf32>, vector<32x128xf32>, vector<2x128xf32> -> vector<2x128xf32>
    %258 = arith.addf %254, %257 : vector<2x128xf32>
    %c0_153 = arith.constant 0 : index
    %c0_154 = arith.constant 0 : index
    %259 = vector.load %arg8[%c0_153, %c0_154] : memref<2x32xf32, #tpu.memory_space<vmem>>, vector<2x32xf32>
    %260 = vector.extract_strided_slice %258 {offsets = [0, 0], sizes = [2, 32], strides = [1, 1]} : vector<2x128xf32> to vector<2x32xf32>
    %261 = arith.negf %260 : vector<2x32xf32>
    %262 = math.exp %261 : vector<2x32xf32>
    %cst_155 = arith.constant 1.000000e+00 : f32
    %263 = vector.broadcast %cst_155 : f32 to vector<2x32xf32>
    %264 = arith.addf %263, %262 : vector<2x32xf32>
    %265 = arith.divf %263, %264 : vector<2x32xf32>
    %266 = vector.extract_strided_slice %258 {offsets = [0, 32], sizes = [2, 32], strides = [1, 1]} : vector<2x128xf32> to vector<2x32xf32>
    %267 = arith.negf %266 : vector<2x32xf32>
    %268 = math.exp %267 : vector<2x32xf32>
    %cst_156 = arith.constant 1.000000e+00 : f32
    %269 = vector.broadcast %cst_156 : f32 to vector<2x32xf32>
    %270 = arith.addf %269, %268 : vector<2x32xf32>
    %271 = arith.divf %269, %270 : vector<2x32xf32>
    %272 = vector.extract_strided_slice %258 {offsets = [0, 64], sizes = [2, 32], strides = [1, 1]} : vector<2x128xf32> to vector<2x32xf32>
    %273 = math.tanh %272 : vector<2x32xf32>
    %274 = vector.extract_strided_slice %258 {offsets = [0, 96], sizes = [2, 32], strides = [1, 1]} : vector<2x128xf32> to vector<2x32xf32>
    %275 = arith.negf %274 : vector<2x32xf32>
    %276 = math.exp %275 : vector<2x32xf32>
    %cst_157 = arith.constant 1.000000e+00 : f32
    %277 = vector.broadcast %cst_157 : f32 to vector<2x32xf32>
    %278 = arith.addf %277, %276 : vector<2x32xf32>
    %279 = arith.divf %277, %278 : vector<2x32xf32>
    %280 = arith.mulf %271, %259 : vector<2x32xf32>
    %281 = arith.mulf %265, %273 : vector<2x32xf32>
    %282 = arith.addf %280, %281 : vector<2x32xf32>
    %283 = math.tanh %282 : vector<2x32xf32>
    %284 = arith.mulf %279, %283 : vector<2x32xf32>
    %c0_158 = arith.constant 0 : index
    %c0_159 = arith.constant 0 : index
    %285 = vector.load %arg7[%c0_158, %c0_159] : memref<2x32xf32, #tpu.memory_space<vmem>>, vector<2x32xf32>
    tpu.vector_store %arg7[%c0_158, %c0_159], %284 {strides = array<i32>} : memref<2x32xf32, #tpu.memory_space<vmem>>, vector<2x32xf32>,
    %c0_160 = arith.constant 0 : index
    %c0_161 = arith.constant 0 : index
    %286 = vector.load %arg8[%c0_160, %c0_161] : memref<2x32xf32, #tpu.memory_space<vmem>>, vector<2x32xf32>
    tpu.vector_store %arg8[%c0_160, %c0_161], %282 {strides = array<i32>} : memref<2x32xf32, #tpu.memory_space<vmem>>, vector<2x32xf32>,
    %c0_162 = arith.constant 0 : index
    %c0_163 = arith.constant 0 : index
    %287 = vector.load %arg11[%c0_162, %c0_163] : memref<2x32xf32, #tpu.memory_space<vmem>>, vector<2x32xf32>
    %288 = arith.addf %287, %284 : vector<2x32xf32>
    %c0_164 = arith.constant 0 : index
    %c0_165 = arith.constant 0 : index
    %289 = vector.load %arg11[%c0_164, %c0_165] : memref<2x32xf32, #tpu.memory_space<vmem>>, vector<2x32xf32>
    tpu.vector_store %arg11[%c0_164, %c0_165], %288 {strides = array<i32>} : memref<2x32xf32, #tpu.memory_space<vmem>>, vector<2x32xf32>,
    %c0_166 = arith.constant 0 : index
    %c0_167 = arith.constant 0 : index
    %290 = vector.load %arg13[%c0_166, %c0_167] : memref<2x32xf32, #tpu.memory_space<vmem>>, vector<2x32xf32>
    %291 = arith.maximumf %290, %284 : vector<2x32xf32>
    %c0_168 = arith.constant 0 : index
    %c0_169 = arith.constant 0 : index
    %292 = vector.load %arg13[%c0_168, %c0_169] : memref<2x32xf32, #tpu.memory_space<vmem>>, vector<2x32xf32>
    tpu.vector_store %arg13[%c0_168, %c0_169], %291 {strides = array<i32>} : memref<2x32xf32, #tpu.memory_space<vmem>>, vector<2x32xf32>,
    %c7_i32_170 = arith.constant 7 : i32
    %293 = arith.subi %c7_i32_170, %c3_i32 : i32
    %294 = arith.index_cast %293 : i32 to index
    %c0_171 = arith.constant 0 : index
    %c0_172 = arith.constant 0 : index
    %295 = vector.load %arg3[%294, %c0_171, %c0_172] : memref<8x2x128xf32, #tpu.memory_space<vmem>>, vector<1x2x128xf32>
    %296 = vector.shape_cast %295 : vector<1x2x128xf32> to vector<2x128xf32>
    %c0_173 = arith.constant 0 : index
    %c0_174 = arith.constant 0 : index
    %297 = vector.load %arg9[%c0_173, %c0_174] : memref<2x32xf32, #tpu.memory_space<vmem>>, vector<2x32xf32>
    %c0_175 = arith.constant 0 : index
    %c0_176 = arith.constant 0 : index
    %298 = vector.load %arg5[%c0_175, %c0_176] : memref<32x128xf32, #tpu.memory_space<vmem>>, vector<32x128xf32>
    %cst_177 = arith.constant dense<0.000000e+00> : vector<2x128xf32>
    %299 = tpu.matmul %297, %298, %cst_177 {dimension_numbers = #tpu.dot_dimension_numbers<[1], [0], [0], [1], [0, 0, 1, 1], [], []>} : vector<2x32xf32>, vector<32x128xf32>, vector<2x128xf32> -> vector<2x128xf32>
    %300 = arith.addf %296, %299 : vector<2x128xf32>
    %c0_178 = arith.constant 0 : index
    %c0_179 = arith.constant 0 : index
    %301 = vector.load %arg10[%c0_178, %c0_179] : memref<2x32xf32, #tpu.memory_space<vmem>>, vector<2x32xf32>
    %302 = vector.extract_strided_slice %300 {offsets = [0, 0], sizes = [2, 32], strides = [1, 1]} : vector<2x128xf32> to vector<2x32xf32>
    %303 = arith.negf %302 : vector<2x32xf32>
    %304 = math.exp %303 : vector<2x32xf32>
    %cst_180 = arith.constant 1.000000e+00 : f32
    %305 = vector.broadcast %cst_180 : f32 to vector<2x32xf32>
    %306 = arith.addf %305, %304 : vector<2x32xf32>
    %307 = arith.divf %305, %306 : vector<2x32xf32>
    %308 = vector.extract_strided_slice %300 {offsets = [0, 32], sizes = [2, 32], strides = [1, 1]} : vector<2x128xf32> to vector<2x32xf32>
    %309 = arith.negf %308 : vector<2x32xf32>
    %310 = math.exp %309 : vector<2x32xf32>
    %cst_181 = arith.constant 1.000000e+00 : f32
    %311 = vector.broadcast %cst_181 : f32 to vector<2x32xf32>
    %312 = arith.addf %311, %310 : vector<2x32xf32>
    %313 = arith.divf %311, %312 : vector<2x32xf32>
    %314 = vector.extract_strided_slice %300 {offsets = [0, 64], sizes = [2, 32], strides = [1, 1]} : vector<2x128xf32> to vector<2x32xf32>
    %315 = math.tanh %314 : vector<2x32xf32>
    %316 = vector.extract_strided_slice %300 {offsets = [0, 96], sizes = [2, 32], strides = [1, 1]} : vector<2x128xf32> to vector<2x32xf32>
    %317 = arith.negf %316 : vector<2x32xf32>
    %318 = math.exp %317 : vector<2x32xf32>
    %cst_182 = arith.constant 1.000000e+00 : f32
    %319 = vector.broadcast %cst_182 : f32 to vector<2x32xf32>
    %320 = arith.addf %319, %318 : vector<2x32xf32>
    %321 = arith.divf %319, %320 : vector<2x32xf32>
    %322 = arith.mulf %313, %301 : vector<2x32xf32>
    %323 = arith.mulf %307, %315 : vector<2x32xf32>
    %324 = arith.addf %322, %323 : vector<2x32xf32>
    %325 = math.tanh %324 : vector<2x32xf32>
    %326 = arith.mulf %321, %325 : vector<2x32xf32>
    %c0_183 = arith.constant 0 : index
    %c0_184 = arith.constant 0 : index
    %327 = vector.load %arg9[%c0_183, %c0_184] : memref<2x32xf32, #tpu.memory_space<vmem>>, vector<2x32xf32>
    tpu.vector_store %arg9[%c0_183, %c0_184], %326 {strides = array<i32>} : memref<2x32xf32, #tpu.memory_space<vmem>>, vector<2x32xf32>,
    %c0_185 = arith.constant 0 : index
    %c0_186 = arith.constant 0 : index
    %328 = vector.load %arg10[%c0_185, %c0_186] : memref<2x32xf32, #tpu.memory_space<vmem>>, vector<2x32xf32>
    tpu.vector_store %arg10[%c0_185, %c0_186], %324 {strides = array<i32>} : memref<2x32xf32, #tpu.memory_space<vmem>>, vector<2x32xf32>,
    %c0_187 = arith.constant 0 : index
    %c0_188 = arith.constant 0 : index
    %329 = vector.load %arg12[%c0_187, %c0_188] : memref<2x32xf32, #tpu.memory_space<vmem>>, vector<2x32xf32>
    %330 = arith.addf %329, %326 : vector<2x32xf32>
    %c0_189 = arith.constant 0 : index
    %c0_190 = arith.constant 0 : index
    %331 = vector.load %arg12[%c0_189, %c0_190] : memref<2x32xf32, #tpu.memory_space<vmem>>, vector<2x32xf32>
    tpu.vector_store %arg12[%c0_189, %c0_190], %330 {strides = array<i32>} : memref<2x32xf32, #tpu.memory_space<vmem>>, vector<2x32xf32>,
    %c0_191 = arith.constant 0 : index
    %c0_192 = arith.constant 0 : index
    %332 = vector.load %arg14[%c0_191, %c0_192] : memref<2x32xf32, #tpu.memory_space<vmem>>, vector<2x32xf32>
    %333 = arith.maximumf %332, %326 : vector<2x32xf32>
    %c0_193 = arith.constant 0 : index
    %c0_194 = arith.constant 0 : index
    %334 = vector.load %arg14[%c0_193, %c0_194] : memref<2x32xf32, #tpu.memory_space<vmem>>, vector<2x32xf32>
    tpu.vector_store %arg14[%c0_193, %c0_194], %333 {strides = array<i32>} : memref<2x32xf32, #tpu.memory_space<vmem>>, vector<2x32xf32>,
    %c4_i32 = arith.constant 4 : i32
    %335 = arith.index_cast %c4_i32 : i32 to index
    %c0_195 = arith.constant 0 : index
    %c0_196 = arith.constant 0 : index
    %336 = vector.load %arg2[%335, %c0_195, %c0_196] : memref<8x2x128xf32, #tpu.memory_space<vmem>>, vector<1x2x128xf32>
    %337 = vector.shape_cast %336 : vector<1x2x128xf32> to vector<2x128xf32>
    %c0_197 = arith.constant 0 : index
    %c0_198 = arith.constant 0 : index
    %338 = vector.load %arg7[%c0_197, %c0_198] : memref<2x32xf32, #tpu.memory_space<vmem>>, vector<2x32xf32>
    %c0_199 = arith.constant 0 : index
    %c0_200 = arith.constant 0 : index
    %339 = vector.load %arg4[%c0_199, %c0_200] : memref<32x128xf32, #tpu.memory_space<vmem>>, vector<32x128xf32>
    %cst_201 = arith.constant dense<0.000000e+00> : vector<2x128xf32>
    %340 = tpu.matmul %338, %339, %cst_201 {dimension_numbers = #tpu.dot_dimension_numbers<[1], [0], [0], [1], [0, 0, 1, 1], [], []>} : vector<2x32xf32>, vector<32x128xf32>, vector<2x128xf32> -> vector<2x128xf32>
    %341 = arith.addf %337, %340 : vector<2x128xf32>
    %c0_202 = arith.constant 0 : index
    %c0_203 = arith.constant 0 : index
    %342 = vector.load %arg8[%c0_202, %c0_203] : memref<2x32xf32, #tpu.memory_space<vmem>>, vector<2x32xf32>
    %343 = vector.extract_strided_slice %341 {offsets = [0, 0], sizes = [2, 32], strides = [1, 1]} : vector<2x128xf32> to vector<2x32xf32>
    %344 = arith.negf %343 : vector<2x32xf32>
    %345 = math.exp %344 : vector<2x32xf32>
    %cst_204 = arith.constant 1.000000e+00 : f32
    %346 = vector.broadcast %cst_204 : f32 to vector<2x32xf32>
    %347 = arith.addf %346, %345 : vector<2x32xf32>
    %348 = arith.divf %346, %347 : vector<2x32xf32>
    %349 = vector.extract_strided_slice %341 {offsets = [0, 32], sizes = [2, 32], strides = [1, 1]} : vector<2x128xf32> to vector<2x32xf32>
    %350 = arith.negf %349 : vector<2x32xf32>
    %351 = math.exp %350 : vector<2x32xf32>
    %cst_205 = arith.constant 1.000000e+00 : f32
    %352 = vector.broadcast %cst_205 : f32 to vector<2x32xf32>
    %353 = arith.addf %352, %351 : vector<2x32xf32>
    %354 = arith.divf %352, %353 : vector<2x32xf32>
    %355 = vector.extract_strided_slice %341 {offsets = [0, 64], sizes = [2, 32], strides = [1, 1]} : vector<2x128xf32> to vector<2x32xf32>
    %356 = math.tanh %355 : vector<2x32xf32>
    %357 = vector.extract_strided_slice %341 {offsets = [0, 96], sizes = [2, 32], strides = [1, 1]} : vector<2x128xf32> to vector<2x32xf32>
    %358 = arith.negf %357 : vector<2x32xf32>
    %359 = math.exp %358 : vector<2x32xf32>
    %cst_206 = arith.constant 1.000000e+00 : f32
    %360 = vector.broadcast %cst_206 : f32 to vector<2x32xf32>
    %361 = arith.addf %360, %359 : vector<2x32xf32>
    %362 = arith.divf %360, %361 : vector<2x32xf32>
    %363 = arith.mulf %354, %342 : vector<2x32xf32>
    %364 = arith.mulf %348, %356 : vector<2x32xf32>
    %365 = arith.addf %363, %364 : vector<2x32xf32>
    %366 = math.tanh %365 : vector<2x32xf32>
    %367 = arith.mulf %362, %366 : vector<2x32xf32>
    %c0_207 = arith.constant 0 : index
    %c0_208 = arith.constant 0 : index
    %368 = vector.load %arg7[%c0_207, %c0_208] : memref<2x32xf32, #tpu.memory_space<vmem>>, vector<2x32xf32>
    tpu.vector_store %arg7[%c0_207, %c0_208], %367 {strides = array<i32>} : memref<2x32xf32, #tpu.memory_space<vmem>>, vector<2x32xf32>,
    %c0_209 = arith.constant 0 : index
    %c0_210 = arith.constant 0 : index
    %369 = vector.load %arg8[%c0_209, %c0_210] : memref<2x32xf32, #tpu.memory_space<vmem>>, vector<2x32xf32>
    tpu.vector_store %arg8[%c0_209, %c0_210], %365 {strides = array<i32>} : memref<2x32xf32, #tpu.memory_space<vmem>>, vector<2x32xf32>,
    %c0_211 = arith.constant 0 : index
    %c0_212 = arith.constant 0 : index
    %370 = vector.load %arg11[%c0_211, %c0_212] : memref<2x32xf32, #tpu.memory_space<vmem>>, vector<2x32xf32>
    %371 = arith.addf %370, %367 : vector<2x32xf32>
    %c0_213 = arith.constant 0 : index
    %c0_214 = arith.constant 0 : index
    %372 = vector.load %arg11[%c0_213, %c0_214] : memref<2x32xf32, #tpu.memory_space<vmem>>, vector<2x32xf32>
    tpu.vector_store %arg11[%c0_213, %c0_214], %371 {strides = array<i32>} : memref<2x32xf32, #tpu.memory_space<vmem>>, vector<2x32xf32>,
    %c0_215 = arith.constant 0 : index
    %c0_216 = arith.constant 0 : index
    %373 = vector.load %arg13[%c0_215, %c0_216] : memref<2x32xf32, #tpu.memory_space<vmem>>, vector<2x32xf32>
    %374 = arith.maximumf %373, %367 : vector<2x32xf32>
    %c0_217 = arith.constant 0 : index
    %c0_218 = arith.constant 0 : index
    %375 = vector.load %arg13[%c0_217, %c0_218] : memref<2x32xf32, #tpu.memory_space<vmem>>, vector<2x32xf32>
    tpu.vector_store %arg13[%c0_217, %c0_218], %374 {strides = array<i32>} : memref<2x32xf32, #tpu.memory_space<vmem>>, vector<2x32xf32>,
    %c7_i32_219 = arith.constant 7 : i32
    %376 = arith.subi %c7_i32_219, %c4_i32 : i32
    %377 = arith.index_cast %376 : i32 to index
    %c0_220 = arith.constant 0 : index
    %c0_221 = arith.constant 0 : index
    %378 = vector.load %arg3[%377, %c0_220, %c0_221] : memref<8x2x128xf32, #tpu.memory_space<vmem>>, vector<1x2x128xf32>
    %379 = vector.shape_cast %378 : vector<1x2x128xf32> to vector<2x128xf32>
    %c0_222 = arith.constant 0 : index
    %c0_223 = arith.constant 0 : index
    %380 = vector.load %arg9[%c0_222, %c0_223] : memref<2x32xf32, #tpu.memory_space<vmem>>, vector<2x32xf32>
    %c0_224 = arith.constant 0 : index
    %c0_225 = arith.constant 0 : index
    %381 = vector.load %arg5[%c0_224, %c0_225] : memref<32x128xf32, #tpu.memory_space<vmem>>, vector<32x128xf32>
    %cst_226 = arith.constant dense<0.000000e+00> : vector<2x128xf32>
    %382 = tpu.matmul %380, %381, %cst_226 {dimension_numbers = #tpu.dot_dimension_numbers<[1], [0], [0], [1], [0, 0, 1, 1], [], []>} : vector<2x32xf32>, vector<32x128xf32>, vector<2x128xf32> -> vector<2x128xf32>
    %383 = arith.addf %379, %382 : vector<2x128xf32>
    %c0_227 = arith.constant 0 : index
    %c0_228 = arith.constant 0 : index
    %384 = vector.load %arg10[%c0_227, %c0_228] : memref<2x32xf32, #tpu.memory_space<vmem>>, vector<2x32xf32>
    %385 = vector.extract_strided_slice %383 {offsets = [0, 0], sizes = [2, 32], strides = [1, 1]} : vector<2x128xf32> to vector<2x32xf32>
    %386 = arith.negf %385 : vector<2x32xf32>
    %387 = math.exp %386 : vector<2x32xf32>
    %cst_229 = arith.constant 1.000000e+00 : f32
    %388 = vector.broadcast %cst_229 : f32 to vector<2x32xf32>
    %389 = arith.addf %388, %387 : vector<2x32xf32>
    %390 = arith.divf %388, %389 : vector<2x32xf32>
    %391 = vector.extract_strided_slice %383 {offsets = [0, 32], sizes = [2, 32], strides = [1, 1]} : vector<2x128xf32> to vector<2x32xf32>
    %392 = arith.negf %391 : vector<2x32xf32>
    %393 = math.exp %392 : vector<2x32xf32>
    %cst_230 = arith.constant 1.000000e+00 : f32
    %394 = vector.broadcast %cst_230 : f32 to vector<2x32xf32>
    %395 = arith.addf %394, %393 : vector<2x32xf32>
    %396 = arith.divf %394, %395 : vector<2x32xf32>
    %397 = vector.extract_strided_slice %383 {offsets = [0, 64], sizes = [2, 32], strides = [1, 1]} : vector<2x128xf32> to vector<2x32xf32>
    %398 = math.tanh %397 : vector<2x32xf32>
    %399 = vector.extract_strided_slice %383 {offsets = [0, 96], sizes = [2, 32], strides = [1, 1]} : vector<2x128xf32> to vector<2x32xf32>
    %400 = arith.negf %399 : vector<2x32xf32>
    %401 = math.exp %400 : vector<2x32xf32>
    %cst_231 = arith.constant 1.000000e+00 : f32
    %402 = vector.broadcast %cst_231 : f32 to vector<2x32xf32>
    %403 = arith.addf %402, %401 : vector<2x32xf32>
    %404 = arith.divf %402, %403 : vector<2x32xf32>
    %405 = arith.mulf %396, %384 : vector<2x32xf32>
    %406 = arith.mulf %390, %398 : vector<2x32xf32>
    %407 = arith.addf %405, %406 : vector<2x32xf32>
    %408 = math.tanh %407 : vector<2x32xf32>
    %409 = arith.mulf %404, %408 : vector<2x32xf32>
    %c0_232 = arith.constant 0 : index
    %c0_233 = arith.constant 0 : index
    %410 = vector.load %arg9[%c0_232, %c0_233] : memref<2x32xf32, #tpu.memory_space<vmem>>, vector<2x32xf32>
    tpu.vector_store %arg9[%c0_232, %c0_233], %409 {strides = array<i32>} : memref<2x32xf32, #tpu.memory_space<vmem>>, vector<2x32xf32>,
    %c0_234 = arith.constant 0 : index
    %c0_235 = arith.constant 0 : index
    %411 = vector.load %arg10[%c0_234, %c0_235] : memref<2x32xf32, #tpu.memory_space<vmem>>, vector<2x32xf32>
    tpu.vector_store %arg10[%c0_234, %c0_235], %407 {strides = array<i32>} : memref<2x32xf32, #tpu.memory_space<vmem>>, vector<2x32xf32>,
    %c0_236 = arith.constant 0 : index
    %c0_237 = arith.constant 0 : index
    %412 = vector.load %arg12[%c0_236, %c0_237] : memref<2x32xf32, #tpu.memory_space<vmem>>, vector<2x32xf32>
    %413 = arith.addf %412, %409 : vector<2x32xf32>
    %c0_238 = arith.constant 0 : index
    %c0_239 = arith.constant 0 : index
    %414 = vector.load %arg12[%c0_238, %c0_239] : memref<2x32xf32, #tpu.memory_space<vmem>>, vector<2x32xf32>
    tpu.vector_store %arg12[%c0_238, %c0_239], %413 {strides = array<i32>} : memref<2x32xf32, #tpu.memory_space<vmem>>, vector<2x32xf32>,
    %c0_240 = arith.constant 0 : index
    %c0_241 = arith.constant 0 : index
    %415 = vector.load %arg14[%c0_240, %c0_241] : memref<2x32xf32, #tpu.memory_space<vmem>>, vector<2x32xf32>
    %416 = arith.maximumf %415, %409 : vector<2x32xf32>
    %c0_242 = arith.constant 0 : index
    %c0_243 = arith.constant 0 : index
    %417 = vector.load %arg14[%c0_242, %c0_243] : memref<2x32xf32, #tpu.memory_space<vmem>>, vector<2x32xf32>
    tpu.vector_store %arg14[%c0_242, %c0_243], %416 {strides = array<i32>} : memref<2x32xf32, #tpu.memory_space<vmem>>, vector<2x32xf32>,
    %c5_i32 = arith.constant 5 : i32
    %418 = arith.index_cast %c5_i32 : i32 to index
    %c0_244 = arith.constant 0 : index
    %c0_245 = arith.constant 0 : index
    %419 = vector.load %arg2[%418, %c0_244, %c0_245] : memref<8x2x128xf32, #tpu.memory_space<vmem>>, vector<1x2x128xf32>
    %420 = vector.shape_cast %419 : vector<1x2x128xf32> to vector<2x128xf32>
    %c0_246 = arith.constant 0 : index
    %c0_247 = arith.constant 0 : index
    %421 = vector.load %arg7[%c0_246, %c0_247] : memref<2x32xf32, #tpu.memory_space<vmem>>, vector<2x32xf32>
    %c0_248 = arith.constant 0 : index
    %c0_249 = arith.constant 0 : index
    %422 = vector.load %arg4[%c0_248, %c0_249] : memref<32x128xf32, #tpu.memory_space<vmem>>, vector<32x128xf32>
    %cst_250 = arith.constant dense<0.000000e+00> : vector<2x128xf32>
    %423 = tpu.matmul %421, %422, %cst_250 {dimension_numbers = #tpu.dot_dimension_numbers<[1], [0], [0], [1], [0, 0, 1, 1], [], []>} : vector<2x32xf32>, vector<32x128xf32>, vector<2x128xf32> -> vector<2x128xf32>
    %424 = arith.addf %420, %423 : vector<2x128xf32>
    %c0_251 = arith.constant 0 : index
    %c0_252 = arith.constant 0 : index
    %425 = vector.load %arg8[%c0_251, %c0_252] : memref<2x32xf32, #tpu.memory_space<vmem>>, vector<2x32xf32>
    %426 = vector.extract_strided_slice %424 {offsets = [0, 0], sizes = [2, 32], strides = [1, 1]} : vector<2x128xf32> to vector<2x32xf32>
    %427 = arith.negf %426 : vector<2x32xf32>
    %428 = math.exp %427 : vector<2x32xf32>
    %cst_253 = arith.constant 1.000000e+00 : f32
    %429 = vector.broadcast %cst_253 : f32 to vector<2x32xf32>
    %430 = arith.addf %429, %428 : vector<2x32xf32>
    %431 = arith.divf %429, %430 : vector<2x32xf32>
    %432 = vector.extract_strided_slice %424 {offsets = [0, 32], sizes = [2, 32], strides = [1, 1]} : vector<2x128xf32> to vector<2x32xf32>
    %433 = arith.negf %432 : vector<2x32xf32>
    %434 = math.exp %433 : vector<2x32xf32>
    %cst_254 = arith.constant 1.000000e+00 : f32
    %435 = vector.broadcast %cst_254 : f32 to vector<2x32xf32>
    %436 = arith.addf %435, %434 : vector<2x32xf32>
    %437 = arith.divf %435, %436 : vector<2x32xf32>
    %438 = vector.extract_strided_slice %424 {offsets = [0, 64], sizes = [2, 32], strides = [1, 1]} : vector<2x128xf32> to vector<2x32xf32>
    %439 = math.tanh %438 : vector<2x32xf32>
    %440 = vector.extract_strided_slice %424 {offsets = [0, 96], sizes = [2, 32], strides = [1, 1]} : vector<2x128xf32> to vector<2x32xf32>
    %441 = arith.negf %440 : vector<2x32xf32>
    %442 = math.exp %441 : vector<2x32xf32>
    %cst_255 = arith.constant 1.000000e+00 : f32
    %443 = vector.broadcast %cst_255 : f32 to vector<2x32xf32>
    %444 = arith.addf %443, %442 : vector<2x32xf32>
    %445 = arith.divf %443, %444 : vector<2x32xf32>
    %446 = arith.mulf %437, %425 : vector<2x32xf32>
    %447 = arith.mulf %431, %439 : vector<2x32xf32>
    %448 = arith.addf %446, %447 : vector<2x32xf32>
    %449 = math.tanh %448 : vector<2x32xf32>
    %450 = arith.mulf %445, %449 : vector<2x32xf32>
    %c0_256 = arith.constant 0 : index
    %c0_257 = arith.constant 0 : index
    %451 = vector.load %arg7[%c0_256, %c0_257] : memref<2x32xf32, #tpu.memory_space<vmem>>, vector<2x32xf32>
    tpu.vector_store %arg7[%c0_256, %c0_257], %450 {strides = array<i32>} : memref<2x32xf32, #tpu.memory_space<vmem>>, vector<2x32xf32>,
    %c0_258 = arith.constant 0 : index
    %c0_259 = arith.constant 0 : index
    %452 = vector.load %arg8[%c0_258, %c0_259] : memref<2x32xf32, #tpu.memory_space<vmem>>, vector<2x32xf32>
    tpu.vector_store %arg8[%c0_258, %c0_259], %448 {strides = array<i32>} : memref<2x32xf32, #tpu.memory_space<vmem>>, vector<2x32xf32>,
    %c0_260 = arith.constant 0 : index
    %c0_261 = arith.constant 0 : index
    %453 = vector.load %arg11[%c0_260, %c0_261] : memref<2x32xf32, #tpu.memory_space<vmem>>, vector<2x32xf32>
    %454 = arith.addf %453, %450 : vector<2x32xf32>
    %c0_262 = arith.constant 0 : index
    %c0_263 = arith.constant 0 : index
    %455 = vector.load %arg11[%c0_262, %c0_263] : memref<2x32xf32, #tpu.memory_space<vmem>>, vector<2x32xf32>
    tpu.vector_store %arg11[%c0_262, %c0_263], %454 {strides = array<i32>} : memref<2x32xf32, #tpu.memory_space<vmem>>, vector<2x32xf32>,
    %c0_264 = arith.constant 0 : index
    %c0_265 = arith.constant 0 : index
    %456 = vector.load %arg13[%c0_264, %c0_265] : memref<2x32xf32, #tpu.memory_space<vmem>>, vector<2x32xf32>
    %457 = arith.maximumf %456, %450 : vector<2x32xf32>
    %c0_266 = arith.constant 0 : index
    %c0_267 = arith.constant 0 : index
    %458 = vector.load %arg13[%c0_266, %c0_267] : memref<2x32xf32, #tpu.memory_space<vmem>>, vector<2x32xf32>
    tpu.vector_store %arg13[%c0_266, %c0_267], %457 {strides = array<i32>} : memref<2x32xf32, #tpu.memory_space<vmem>>, vector<2x32xf32>,
    %c7_i32_268 = arith.constant 7 : i32
    %459 = arith.subi %c7_i32_268, %c5_i32 : i32
    %460 = arith.index_cast %459 : i32 to index
    %c0_269 = arith.constant 0 : index
    %c0_270 = arith.constant 0 : index
    %461 = vector.load %arg3[%460, %c0_269, %c0_270] : memref<8x2x128xf32, #tpu.memory_space<vmem>>, vector<1x2x128xf32>
    %462 = vector.shape_cast %461 : vector<1x2x128xf32> to vector<2x128xf32>
    %c0_271 = arith.constant 0 : index
    %c0_272 = arith.constant 0 : index
    %463 = vector.load %arg9[%c0_271, %c0_272] : memref<2x32xf32, #tpu.memory_space<vmem>>, vector<2x32xf32>
    %c0_273 = arith.constant 0 : index
    %c0_274 = arith.constant 0 : index
    %464 = vector.load %arg5[%c0_273, %c0_274] : memref<32x128xf32, #tpu.memory_space<vmem>>, vector<32x128xf32>
    %cst_275 = arith.constant dense<0.000000e+00> : vector<2x128xf32>
    %465 = tpu.matmul %463, %464, %cst_275 {dimension_numbers = #tpu.dot_dimension_numbers<[1], [0], [0], [1], [0, 0, 1, 1], [], []>} : vector<2x32xf32>, vector<32x128xf32>, vector<2x128xf32> -> vector<2x128xf32>
    %466 = arith.addf %462, %465 : vector<2x128xf32>
    %c0_276 = arith.constant 0 : index
    %c0_277 = arith.constant 0 : index
    %467 = vector.load %arg10[%c0_276, %c0_277] : memref<2x32xf32, #tpu.memory_space<vmem>>, vector<2x32xf32>
    %468 = vector.extract_strided_slice %466 {offsets = [0, 0], sizes = [2, 32], strides = [1, 1]} : vector<2x128xf32> to vector<2x32xf32>
    %469 = arith.negf %468 : vector<2x32xf32>
    %470 = math.exp %469 : vector<2x32xf32>
    %cst_278 = arith.constant 1.000000e+00 : f32
    %471 = vector.broadcast %cst_278 : f32 to vector<2x32xf32>
    %472 = arith.addf %471, %470 : vector<2x32xf32>
    %473 = arith.divf %471, %472 : vector<2x32xf32>
    %474 = vector.extract_strided_slice %466 {offsets = [0, 32], sizes = [2, 32], strides = [1, 1]} : vector<2x128xf32> to vector<2x32xf32>
    %475 = arith.negf %474 : vector<2x32xf32>
    %476 = math.exp %475 : vector<2x32xf32>
    %cst_279 = arith.constant 1.000000e+00 : f32
    %477 = vector.broadcast %cst_279 : f32 to vector<2x32xf32>
    %478 = arith.addf %477, %476 : vector<2x32xf32>
    %479 = arith.divf %477, %478 : vector<2x32xf32>
    %480 = vector.extract_strided_slice %466 {offsets = [0, 64], sizes = [2, 32], strides = [1, 1]} : vector<2x128xf32> to vector<2x32xf32>
    %481 = math.tanh %480 : vector<2x32xf32>
    %482 = vector.extract_strided_slice %466 {offsets = [0, 96], sizes = [2, 32], strides = [1, 1]} : vector<2x128xf32> to vector<2x32xf32>
    %483 = arith.negf %482 : vector<2x32xf32>
    %484 = math.exp %483 : vector<2x32xf32>
    %cst_280 = arith.constant 1.000000e+00 : f32
    %485 = vector.broadcast %cst_280 : f32 to vector<2x32xf32>
    %486 = arith.addf %485, %484 : vector<2x32xf32>
    %487 = arith.divf %485, %486 : vector<2x32xf32>
    %488 = arith.mulf %479, %467 : vector<2x32xf32>
    %489 = arith.mulf %473, %481 : vector<2x32xf32>
    %490 = arith.addf %488, %489 : vector<2x32xf32>
    %491 = math.tanh %490 : vector<2x32xf32>
    %492 = arith.mulf %487, %491 : vector<2x32xf32>
    %c0_281 = arith.constant 0 : index
    %c0_282 = arith.constant 0 : index
    %493 = vector.load %arg9[%c0_281, %c0_282] : memref<2x32xf32, #tpu.memory_space<vmem>>, vector<2x32xf32>
    tpu.vector_store %arg9[%c0_281, %c0_282], %492 {strides = array<i32>} : memref<2x32xf32, #tpu.memory_space<vmem>>, vector<2x32xf32>,
    %c0_283 = arith.constant 0 : index
    %c0_284 = arith.constant 0 : index
    %494 = vector.load %arg10[%c0_283, %c0_284] : memref<2x32xf32, #tpu.memory_space<vmem>>, vector<2x32xf32>
    tpu.vector_store %arg10[%c0_283, %c0_284], %490 {strides = array<i32>} : memref<2x32xf32, #tpu.memory_space<vmem>>, vector<2x32xf32>,
    %c0_285 = arith.constant 0 : index
    %c0_286 = arith.constant 0 : index
    %495 = vector.load %arg12[%c0_285, %c0_286] : memref<2x32xf32, #tpu.memory_space<vmem>>, vector<2x32xf32>
    %496 = arith.addf %495, %492 : vector<2x32xf32>
    %c0_287 = arith.constant 0 : index
    %c0_288 = arith.constant 0 : index
    %497 = vector.load %arg12[%c0_287, %c0_288] : memref<2x32xf32, #tpu.memory_space<vmem>>, vector<2x32xf32>
    tpu.vector_store %arg12[%c0_287, %c0_288], %496 {strides = array<i32>} : memref<2x32xf32, #tpu.memory_space<vmem>>, vector<2x32xf32>,
    %c0_289 = arith.constant 0 : index
    %c0_290 = arith.constant 0 : index
    %498 = vector.load %arg14[%c0_289, %c0_290] : memref<2x32xf32, #tpu.memory_space<vmem>>, vector<2x32xf32>
    %499 = arith.maximumf %498, %492 : vector<2x32xf32>
    %c0_291 = arith.constant 0 : index
    %c0_292 = arith.constant 0 : index
    %500 = vector.load %arg14[%c0_291, %c0_292] : memref<2x32xf32, #tpu.memory_space<vmem>>, vector<2x32xf32>
    tpu.vector_store %arg14[%c0_291, %c0_292], %499 {strides = array<i32>} : memref<2x32xf32, #tpu.memory_space<vmem>>, vector<2x32xf32>,
    %c6_i32 = arith.constant 6 : i32
    %501 = arith.index_cast %c6_i32 : i32 to index
    %c0_293 = arith.constant 0 : index
    %c0_294 = arith.constant 0 : index
    %502 = vector.load %arg2[%501, %c0_293, %c0_294] : memref<8x2x128xf32, #tpu.memory_space<vmem>>, vector<1x2x128xf32>
    %503 = vector.shape_cast %502 : vector<1x2x128xf32> to vector<2x128xf32>
    %c0_295 = arith.constant 0 : index
    %c0_296 = arith.constant 0 : index
    %504 = vector.load %arg7[%c0_295, %c0_296] : memref<2x32xf32, #tpu.memory_space<vmem>>, vector<2x32xf32>
    %c0_297 = arith.constant 0 : index
    %c0_298 = arith.constant 0 : index
    %505 = vector.load %arg4[%c0_297, %c0_298] : memref<32x128xf32, #tpu.memory_space<vmem>>, vector<32x128xf32>
    %cst_299 = arith.constant dense<0.000000e+00> : vector<2x128xf32>
    %506 = tpu.matmul %504, %505, %cst_299 {dimension_numbers = #tpu.dot_dimension_numbers<[1], [0], [0], [1], [0, 0, 1, 1], [], []>} : vector<2x32xf32>, vector<32x128xf32>, vector<2x128xf32> -> vector<2x128xf32>
    %507 = arith.addf %503, %506 : vector<2x128xf32>
    %c0_300 = arith.constant 0 : index
    %c0_301 = arith.constant 0 : index
    %508 = vector.load %arg8[%c0_300, %c0_301] : memref<2x32xf32, #tpu.memory_space<vmem>>, vector<2x32xf32>
    %509 = vector.extract_strided_slice %507 {offsets = [0, 0], sizes = [2, 32], strides = [1, 1]} : vector<2x128xf32> to vector<2x32xf32>
    %510 = arith.negf %509 : vector<2x32xf32>
    %511 = math.exp %510 : vector<2x32xf32>
    %cst_302 = arith.constant 1.000000e+00 : f32
    %512 = vector.broadcast %cst_302 : f32 to vector<2x32xf32>
    %513 = arith.addf %512, %511 : vector<2x32xf32>
    %514 = arith.divf %512, %513 : vector<2x32xf32>
    %515 = vector.extract_strided_slice %507 {offsets = [0, 32], sizes = [2, 32], strides = [1, 1]} : vector<2x128xf32> to vector<2x32xf32>
    %516 = arith.negf %515 : vector<2x32xf32>
    %517 = math.exp %516 : vector<2x32xf32>
    %cst_303 = arith.constant 1.000000e+00 : f32
    %518 = vector.broadcast %cst_303 : f32 to vector<2x32xf32>
    %519 = arith.addf %518, %517 : vector<2x32xf32>
    %520 = arith.divf %518, %519 : vector<2x32xf32>
    %521 = vector.extract_strided_slice %507 {offsets = [0, 64], sizes = [2, 32], strides = [1, 1]} : vector<2x128xf32> to vector<2x32xf32>
    %522 = math.tanh %521 : vector<2x32xf32>
    %523 = vector.extract_strided_slice %507 {offsets = [0, 96], sizes = [2, 32], strides = [1, 1]} : vector<2x128xf32> to vector<2x32xf32>
    %524 = arith.negf %523 : vector<2x32xf32>
    %525 = math.exp %524 : vector<2x32xf32>
    %cst_304 = arith.constant 1.000000e+00 : f32
    %526 = vector.broadcast %cst_304 : f32 to vector<2x32xf32>
    %527 = arith.addf %526, %525 : vector<2x32xf32>
    %528 = arith.divf %526, %527 : vector<2x32xf32>
    %529 = arith.mulf %520, %508 : vector<2x32xf32>
    %530 = arith.mulf %514, %522 : vector<2x32xf32>
    %531 = arith.addf %529, %530 : vector<2x32xf32>
    %532 = math.tanh %531 : vector<2x32xf32>
    %533 = arith.mulf %528, %532 : vector<2x32xf32>
    %c0_305 = arith.constant 0 : index
    %c0_306 = arith.constant 0 : index
    %534 = vector.load %arg7[%c0_305, %c0_306] : memref<2x32xf32, #tpu.memory_space<vmem>>, vector<2x32xf32>
    tpu.vector_store %arg7[%c0_305, %c0_306], %533 {strides = array<i32>} : memref<2x32xf32, #tpu.memory_space<vmem>>, vector<2x32xf32>,
    %c0_307 = arith.constant 0 : index
    %c0_308 = arith.constant 0 : index
    %535 = vector.load %arg8[%c0_307, %c0_308] : memref<2x32xf32, #tpu.memory_space<vmem>>, vector<2x32xf32>
    tpu.vector_store %arg8[%c0_307, %c0_308], %531 {strides = array<i32>} : memref<2x32xf32, #tpu.memory_space<vmem>>, vector<2x32xf32>,
    %c0_309 = arith.constant 0 : index
    %c0_310 = arith.constant 0 : index
    %536 = vector.load %arg11[%c0_309, %c0_310] : memref<2x32xf32, #tpu.memory_space<vmem>>, vector<2x32xf32>
    %537 = arith.addf %536, %533 : vector<2x32xf32>
    %c0_311 = arith.constant 0 : index
    %c0_312 = arith.constant 0 : index
    %538 = vector.load %arg11[%c0_311, %c0_312] : memref<2x32xf32, #tpu.memory_space<vmem>>, vector<2x32xf32>
    tpu.vector_store %arg11[%c0_311, %c0_312], %537 {strides = array<i32>} : memref<2x32xf32, #tpu.memory_space<vmem>>, vector<2x32xf32>,
    %c0_313 = arith.constant 0 : index
    %c0_314 = arith.constant 0 : index
    %539 = vector.load %arg13[%c0_313, %c0_314] : memref<2x32xf32, #tpu.memory_space<vmem>>, vector<2x32xf32>
    %540 = arith.maximumf %539, %533 : vector<2x32xf32>
    %c0_315 = arith.constant 0 : index
    %c0_316 = arith.constant 0 : index
    %541 = vector.load %arg13[%c0_315, %c0_316] : memref<2x32xf32, #tpu.memory_space<vmem>>, vector<2x32xf32>
    tpu.vector_store %arg13[%c0_315, %c0_316], %540 {strides = array<i32>} : memref<2x32xf32, #tpu.memory_space<vmem>>, vector<2x32xf32>,
    %c7_i32_317 = arith.constant 7 : i32
    %542 = arith.subi %c7_i32_317, %c6_i32 : i32
    %543 = arith.index_cast %542 : i32 to index
    %c0_318 = arith.constant 0 : index
    %c0_319 = arith.constant 0 : index
    %544 = vector.load %arg3[%543, %c0_318, %c0_319] : memref<8x2x128xf32, #tpu.memory_space<vmem>>, vector<1x2x128xf32>
    %545 = vector.shape_cast %544 : vector<1x2x128xf32> to vector<2x128xf32>
    %c0_320 = arith.constant 0 : index
    %c0_321 = arith.constant 0 : index
    %546 = vector.load %arg9[%c0_320, %c0_321] : memref<2x32xf32, #tpu.memory_space<vmem>>, vector<2x32xf32>
    %c0_322 = arith.constant 0 : index
    %c0_323 = arith.constant 0 : index
    %547 = vector.load %arg5[%c0_322, %c0_323] : memref<32x128xf32, #tpu.memory_space<vmem>>, vector<32x128xf32>
    %cst_324 = arith.constant dense<0.000000e+00> : vector<2x128xf32>
    %548 = tpu.matmul %546, %547, %cst_324 {dimension_numbers = #tpu.dot_dimension_numbers<[1], [0], [0], [1], [0, 0, 1, 1], [], []>} : vector<2x32xf32>, vector<32x128xf32>, vector<2x128xf32> -> vector<2x128xf32>
    %549 = arith.addf %545, %548 : vector<2x128xf32>
    %c0_325 = arith.constant 0 : index
    %c0_326 = arith.constant 0 : index
    %550 = vector.load %arg10[%c0_325, %c0_326] : memref<2x32xf32, #tpu.memory_space<vmem>>, vector<2x32xf32>
    %551 = vector.extract_strided_slice %549 {offsets = [0, 0], sizes = [2, 32], strides = [1, 1]} : vector<2x128xf32> to vector<2x32xf32>
    %552 = arith.negf %551 : vector<2x32xf32>
    %553 = math.exp %552 : vector<2x32xf32>
    %cst_327 = arith.constant 1.000000e+00 : f32
    %554 = vector.broadcast %cst_327 : f32 to vector<2x32xf32>
    %555 = arith.addf %554, %553 : vector<2x32xf32>
    %556 = arith.divf %554, %555 : vector<2x32xf32>
    %557 = vector.extract_strided_slice %549 {offsets = [0, 32], sizes = [2, 32], strides = [1, 1]} : vector<2x128xf32> to vector<2x32xf32>
    %558 = arith.negf %557 : vector<2x32xf32>
    %559 = math.exp %558 : vector<2x32xf32>
    %cst_328 = arith.constant 1.000000e+00 : f32
    %560 = vector.broadcast %cst_328 : f32 to vector<2x32xf32>
    %561 = arith.addf %560, %559 : vector<2x32xf32>
    %562 = arith.divf %560, %561 : vector<2x32xf32>
    %563 = vector.extract_strided_slice %549 {offsets = [0, 64], sizes = [2, 32], strides = [1, 1]} : vector<2x128xf32> to vector<2x32xf32>
    %564 = math.tanh %563 : vector<2x32xf32>
    %565 = vector.extract_strided_slice %549 {offsets = [0, 96], sizes = [2, 32], strides = [1, 1]} : vector<2x128xf32> to vector<2x32xf32>
    %566 = arith.negf %565 : vector<2x32xf32>
    %567 = math.exp %566 : vector<2x32xf32>
    %cst_329 = arith.constant 1.000000e+00 : f32
    %568 = vector.broadcast %cst_329 : f32 to vector<2x32xf32>
    %569 = arith.addf %568, %567 : vector<2x32xf32>
    %570 = arith.divf %568, %569 : vector<2x32xf32>
    %571 = arith.mulf %562, %550 : vector<2x32xf32>
    %572 = arith.mulf %556, %564 : vector<2x32xf32>
    %573 = arith.addf %571, %572 : vector<2x32xf32>
    %574 = math.tanh %573 : vector<2x32xf32>
    %575 = arith.mulf %570, %574 : vector<2x32xf32>
    %c0_330 = arith.constant 0 : index
    %c0_331 = arith.constant 0 : index
    %576 = vector.load %arg9[%c0_330, %c0_331] : memref<2x32xf32, #tpu.memory_space<vmem>>, vector<2x32xf32>
    tpu.vector_store %arg9[%c0_330, %c0_331], %575 {strides = array<i32>} : memref<2x32xf32, #tpu.memory_space<vmem>>, vector<2x32xf32>,
    %c0_332 = arith.constant 0 : index
    %c0_333 = arith.constant 0 : index
    %577 = vector.load %arg10[%c0_332, %c0_333] : memref<2x32xf32, #tpu.memory_space<vmem>>, vector<2x32xf32>
    tpu.vector_store %arg10[%c0_332, %c0_333], %573 {strides = array<i32>} : memref<2x32xf32, #tpu.memory_space<vmem>>, vector<2x32xf32>,
    %c0_334 = arith.constant 0 : index
    %c0_335 = arith.constant 0 : index
    %578 = vector.load %arg12[%c0_334, %c0_335] : memref<2x32xf32, #tpu.memory_space<vmem>>, vector<2x32xf32>
    %579 = arith.addf %578, %575 : vector<2x32xf32>
    %c0_336 = arith.constant 0 : index
    %c0_337 = arith.constant 0 : index
    %580 = vector.load %arg12[%c0_336, %c0_337] : memref<2x32xf32, #tpu.memory_space<vmem>>, vector<2x32xf32>
    tpu.vector_store %arg12[%c0_336, %c0_337], %579 {strides = array<i32>} : memref<2x32xf32, #tpu.memory_space<vmem>>, vector<2x32xf32>,
    %c0_338 = arith.constant 0 : index
    %c0_339 = arith.constant 0 : index
    %581 = vector.load %arg14[%c0_338, %c0_339] : memref<2x32xf32, #tpu.memory_space<vmem>>, vector<2x32xf32>
    %582 = arith.maximumf %581, %575 : vector<2x32xf32>
    %c0_340 = arith.constant 0 : index
    %c0_341 = arith.constant 0 : index
    %583 = vector.load %arg14[%c0_340, %c0_341] : memref<2x32xf32, #tpu.memory_space<vmem>>, vector<2x32xf32>
    tpu.vector_store %arg14[%c0_340, %c0_341], %582 {strides = array<i32>} : memref<2x32xf32, #tpu.memory_space<vmem>>, vector<2x32xf32>,
    %c7_i32_342 = arith.constant 7 : i32
    %584 = arith.index_cast %c7_i32_342 : i32 to index
    %c0_343 = arith.constant 0 : index
    %c0_344 = arith.constant 0 : index
    %585 = vector.load %arg2[%584, %c0_343, %c0_344] : memref<8x2x128xf32, #tpu.memory_space<vmem>>, vector<1x2x128xf32>
    %586 = vector.shape_cast %585 : vector<1x2x128xf32> to vector<2x128xf32>
    %c0_345 = arith.constant 0 : index
    %c0_346 = arith.constant 0 : index
    %587 = vector.load %arg7[%c0_345, %c0_346] : memref<2x32xf32, #tpu.memory_space<vmem>>, vector<2x32xf32>
    %c0_347 = arith.constant 0 : index
    %c0_348 = arith.constant 0 : index
    %588 = vector.load %arg4[%c0_347, %c0_348] : memref<32x128xf32, #tpu.memory_space<vmem>>, vector<32x128xf32>
    %cst_349 = arith.constant dense<0.000000e+00> : vector<2x128xf32>
    %589 = tpu.matmul %587, %588, %cst_349 {dimension_numbers = #tpu.dot_dimension_numbers<[1], [0], [0], [1], [0, 0, 1, 1], [], []>} : vector<2x32xf32>, vector<32x128xf32>, vector<2x128xf32> -> vector<2x128xf32>
    %590 = arith.addf %586, %589 : vector<2x128xf32>
    %c0_350 = arith.constant 0 : index
    %c0_351 = arith.constant 0 : index
    %591 = vector.load %arg8[%c0_350, %c0_351] : memref<2x32xf32, #tpu.memory_space<vmem>>, vector<2x32xf32>
    %592 = vector.extract_strided_slice %590 {offsets = [0, 0], sizes = [2, 32], strides = [1, 1]} : vector<2x128xf32> to vector<2x32xf32>
    %593 = arith.negf %592 : vector<2x32xf32>
    %594 = math.exp %593 : vector<2x32xf32>
    %cst_352 = arith.constant 1.000000e+00 : f32
    %595 = vector.broadcast %cst_352 : f32 to vector<2x32xf32>
    %596 = arith.addf %595, %594 : vector<2x32xf32>
    %597 = arith.divf %595, %596 : vector<2x32xf32>
    %598 = vector.extract_strided_slice %590 {offsets = [0, 32], sizes = [2, 32], strides = [1, 1]} : vector<2x128xf32> to vector<2x32xf32>
    %599 = arith.negf %598 : vector<2x32xf32>
    %600 = math.exp %599 : vector<2x32xf32>
    %cst_353 = arith.constant 1.000000e+00 : f32
    %601 = vector.broadcast %cst_353 : f32 to vector<2x32xf32>
    %602 = arith.addf %601, %600 : vector<2x32xf32>
    %603 = arith.divf %601, %602 : vector<2x32xf32>
    %604 = vector.extract_strided_slice %590 {offsets = [0, 64], sizes = [2, 32], strides = [1, 1]} : vector<2x128xf32> to vector<2x32xf32>
    %605 = math.tanh %604 : vector<2x32xf32>
    %606 = vector.extract_strided_slice %590 {offsets = [0, 96], sizes = [2, 32], strides = [1, 1]} : vector<2x128xf32> to vector<2x32xf32>
    %607 = arith.negf %606 : vector<2x32xf32>
    %608 = math.exp %607 : vector<2x32xf32>
    %cst_354 = arith.constant 1.000000e+00 : f32
    %609 = vector.broadcast %cst_354 : f32 to vector<2x32xf32>
    %610 = arith.addf %609, %608 : vector<2x32xf32>
    %611 = arith.divf %609, %610 : vector<2x32xf32>
    %612 = arith.mulf %603, %591 : vector<2x32xf32>
    %613 = arith.mulf %597, %605 : vector<2x32xf32>
    %614 = arith.addf %612, %613 : vector<2x32xf32>
    %615 = math.tanh %614 : vector<2x32xf32>
    %616 = arith.mulf %611, %615 : vector<2x32xf32>
    %c0_355 = arith.constant 0 : index
    %c0_356 = arith.constant 0 : index
    %617 = vector.load %arg7[%c0_355, %c0_356] : memref<2x32xf32, #tpu.memory_space<vmem>>, vector<2x32xf32>
    tpu.vector_store %arg7[%c0_355, %c0_356], %616 {strides = array<i32>} : memref<2x32xf32, #tpu.memory_space<vmem>>, vector<2x32xf32>,
    %c0_357 = arith.constant 0 : index
    %c0_358 = arith.constant 0 : index
    %618 = vector.load %arg8[%c0_357, %c0_358] : memref<2x32xf32, #tpu.memory_space<vmem>>, vector<2x32xf32>
    tpu.vector_store %arg8[%c0_357, %c0_358], %614 {strides = array<i32>} : memref<2x32xf32, #tpu.memory_space<vmem>>, vector<2x32xf32>,
    %c0_359 = arith.constant 0 : index
    %c0_360 = arith.constant 0 : index
    %619 = vector.load %arg11[%c0_359, %c0_360] : memref<2x32xf32, #tpu.memory_space<vmem>>, vector<2x32xf32>
    %620 = arith.addf %619, %616 : vector<2x32xf32>
    %c0_361 = arith.constant 0 : index
    %c0_362 = arith.constant 0 : index
    %621 = vector.load %arg11[%c0_361, %c0_362] : memref<2x32xf32, #tpu.memory_space<vmem>>, vector<2x32xf32>
    tpu.vector_store %arg11[%c0_361, %c0_362], %620 {strides = array<i32>} : memref<2x32xf32, #tpu.memory_space<vmem>>, vector<2x32xf32>,
    %c0_363 = arith.constant 0 : index
    %c0_364 = arith.constant 0 : index
    %622 = vector.load %arg13[%c0_363, %c0_364] : memref<2x32xf32, #tpu.memory_space<vmem>>, vector<2x32xf32>
    %623 = arith.maximumf %622, %616 : vector<2x32xf32>
    %c0_365 = arith.constant 0 : index
    %c0_366 = arith.constant 0 : index
    %624 = vector.load %arg13[%c0_365, %c0_366] : memref<2x32xf32, #tpu.memory_space<vmem>>, vector<2x32xf32>
    tpu.vector_store %arg13[%c0_365, %c0_366], %623 {strides = array<i32>} : memref<2x32xf32, #tpu.memory_space<vmem>>, vector<2x32xf32>,
    %c7_i32_367 = arith.constant 7 : i32
    %625 = arith.subi %c7_i32_367, %c7_i32_342 : i32
    %626 = arith.index_cast %625 : i32 to index
    %c0_368 = arith.constant 0 : index
    %c0_369 = arith.constant 0 : index
    %627 = vector.load %arg3[%626, %c0_368, %c0_369] : memref<8x2x128xf32, #tpu.memory_space<vmem>>, vector<1x2x128xf32>
    %628 = vector.shape_cast %627 : vector<1x2x128xf32> to vector<2x128xf32>
    %c0_370 = arith.constant 0 : index
    %c0_371 = arith.constant 0 : index
    %629 = vector.load %arg9[%c0_370, %c0_371] : memref<2x32xf32, #tpu.memory_space<vmem>>, vector<2x32xf32>
    %c0_372 = arith.constant 0 : index
    %c0_373 = arith.constant 0 : index
    %630 = vector.load %arg5[%c0_372, %c0_373] : memref<32x128xf32, #tpu.memory_space<vmem>>, vector<32x128xf32>
    %cst_374 = arith.constant dense<0.000000e+00> : vector<2x128xf32>
    %631 = tpu.matmul %629, %630, %cst_374 {dimension_numbers = #tpu.dot_dimension_numbers<[1], [0], [0], [1], [0, 0, 1, 1], [], []>} : vector<2x32xf32>, vector<32x128xf32>, vector<2x128xf32> -> vector<2x128xf32>
    %632 = arith.addf %628, %631 : vector<2x128xf32>
    %c0_375 = arith.constant 0 : index
    %c0_376 = arith.constant 0 : index
    %633 = vector.load %arg10[%c0_375, %c0_376] : memref<2x32xf32, #tpu.memory_space<vmem>>, vector<2x32xf32>
    %634 = vector.extract_strided_slice %632 {offsets = [0, 0], sizes = [2, 32], strides = [1, 1]} : vector<2x128xf32> to vector<2x32xf32>
    %635 = arith.negf %634 : vector<2x32xf32>
    %636 = math.exp %635 : vector<2x32xf32>
    %cst_377 = arith.constant 1.000000e+00 : f32
    %637 = vector.broadcast %cst_377 : f32 to vector<2x32xf32>
    %638 = arith.addf %637, %636 : vector<2x32xf32>
    %639 = arith.divf %637, %638 : vector<2x32xf32>
    %640 = vector.extract_strided_slice %632 {offsets = [0, 32], sizes = [2, 32], strides = [1, 1]} : vector<2x128xf32> to vector<2x32xf32>
    %641 = arith.negf %640 : vector<2x32xf32>
    %642 = math.exp %641 : vector<2x32xf32>
    %cst_378 = arith.constant 1.000000e+00 : f32
    %643 = vector.broadcast %cst_378 : f32 to vector<2x32xf32>
    %644 = arith.addf %643, %642 : vector<2x32xf32>
    %645 = arith.divf %643, %644 : vector<2x32xf32>
    %646 = vector.extract_strided_slice %632 {offsets = [0, 64], sizes = [2, 32], strides = [1, 1]} : vector<2x128xf32> to vector<2x32xf32>
    %647 = math.tanh %646 : vector<2x32xf32>
    %648 = vector.extract_strided_slice %632 {offsets = [0, 96], sizes = [2, 32], strides = [1, 1]} : vector<2x128xf32> to vector<2x32xf32>
    %649 = arith.negf %648 : vector<2x32xf32>
    %650 = math.exp %649 : vector<2x32xf32>
    %cst_379 = arith.constant 1.000000e+00 : f32
    %651 = vector.broadcast %cst_379 : f32 to vector<2x32xf32>
    %652 = arith.addf %651, %650 : vector<2x32xf32>
    %653 = arith.divf %651, %652 : vector<2x32xf32>
    %654 = arith.mulf %645, %633 : vector<2x32xf32>
    %655 = arith.mulf %639, %647 : vector<2x32xf32>
    %656 = arith.addf %654, %655 : vector<2x32xf32>
    %657 = math.tanh %656 : vector<2x32xf32>
    %658 = arith.mulf %653, %657 : vector<2x32xf32>
    %c0_380 = arith.constant 0 : index
    %c0_381 = arith.constant 0 : index
    %659 = vector.load %arg9[%c0_380, %c0_381] : memref<2x32xf32, #tpu.memory_space<vmem>>, vector<2x32xf32>
    tpu.vector_store %arg9[%c0_380, %c0_381], %658 {strides = array<i32>} : memref<2x32xf32, #tpu.memory_space<vmem>>, vector<2x32xf32>,
    %c0_382 = arith.constant 0 : index
    %c0_383 = arith.constant 0 : index
    %660 = vector.load %arg10[%c0_382, %c0_383] : memref<2x32xf32, #tpu.memory_space<vmem>>, vector<2x32xf32>
    tpu.vector_store %arg10[%c0_382, %c0_383], %656 {strides = array<i32>} : memref<2x32xf32, #tpu.memory_space<vmem>>, vector<2x32xf32>,
    %c0_384 = arith.constant 0 : index
    %c0_385 = arith.constant 0 : index
    %661 = vector.load %arg12[%c0_384, %c0_385] : memref<2x32xf32, #tpu.memory_space<vmem>>, vector<2x32xf32>
    %662 = arith.addf %661, %658 : vector<2x32xf32>
    %c0_386 = arith.constant 0 : index
    %c0_387 = arith.constant 0 : index
    %663 = vector.load %arg12[%c0_386, %c0_387] : memref<2x32xf32, #tpu.memory_space<vmem>>, vector<2x32xf32>
    tpu.vector_store %arg12[%c0_386, %c0_387], %662 {strides = array<i32>} : memref<2x32xf32, #tpu.memory_space<vmem>>, vector<2x32xf32>,
    %c0_388 = arith.constant 0 : index
    %c0_389 = arith.constant 0 : index
    %664 = vector.load %arg14[%c0_388, %c0_389] : memref<2x32xf32, #tpu.memory_space<vmem>>, vector<2x32xf32>
    %665 = arith.maximumf %664, %658 : vector<2x32xf32>
    %c0_390 = arith.constant 0 : index
    %c0_391 = arith.constant 0 : index
    %666 = vector.load %arg14[%c0_390, %c0_391] : memref<2x32xf32, #tpu.memory_space<vmem>>, vector<2x32xf32>
    tpu.vector_store %arg14[%c0_390, %c0_391], %665 {strides = array<i32>} : memref<2x32xf32, #tpu.memory_space<vmem>>, vector<2x32xf32>,
    %c8_i32 = arith.constant 8 : i32
    %c0_i32_392 = arith.constant 0 : i32
    %667 = arith.cmpi eq, %arg1, %c0_i32_392 : i32
    %668 = arith.extui %667 : i1 to i32
    %c0_i32_393 = arith.constant 0 : i32
    %669 = arith.cmpi ne, %668, %c0_i32_393 : i32
    scf.if %669 {
      %c0_394 = arith.constant 0 : index
      %c0_395 = arith.constant 0 : index
      %670 = vector.load %arg11[%c0_394, %c0_395] : memref<2x32xf32, #tpu.memory_space<vmem>>, vector<2x32xf32>
      %cst_396 = arith.constant 1.250000e-01 : f32
      %671 = vector.broadcast %cst_396 : f32 to vector<2x32xf32>
      %672 = arith.mulf %670, %671 : vector<2x32xf32>
      %c0_397 = arith.constant 0 : index
      %c0_398 = arith.constant 0 : index
      %673 = vector.load %arg12[%c0_397, %c0_398] : memref<2x32xf32, #tpu.memory_space<vmem>>, vector<2x32xf32>
      %cst_399 = arith.constant 1.250000e-01 : f32
      %674 = vector.broadcast %cst_399 : f32 to vector<2x32xf32>
      %675 = arith.mulf %673, %674 : vector<2x32xf32>
      %c0_400 = arith.constant 0 : index
      %c0_401 = arith.constant 0 : index
      %676 = vector.load %arg13[%c0_400, %c0_401] : memref<2x32xf32, #tpu.memory_space<vmem>>, vector<2x32xf32>
      %c0_402 = arith.constant 0 : index
      %c0_403 = arith.constant 0 : index
      %677 = vector.load %arg14[%c0_402, %c0_403] : memref<2x32xf32, #tpu.memory_space<vmem>>, vector<2x32xf32>
      %678 = tpu.concatenate %672, %675, %676, %677 in 1 : vector<2x32xf32>, vector<2x32xf32>, vector<2x32xf32>, vector<2x32xf32> -> vector<2x128xf32>
      %c0_404 = arith.constant 0 : index
      %c0_405 = arith.constant 0 : index
      %679 = vector.load %arg6[%c0_404, %c0_405] : memref<2x128xf32, #tpu.memory_space<vmem>>, vector<2x128xf32>
      tpu.vector_store %arg6[%c0_404, %c0_405], %678 {strides = array<i32>} : memref<2x128xf32, #tpu.memory_space<vmem>>, vector<2x128xf32>,
    } else {
    }
    return
  }
  func.func @transform_0(%arg0: i32, %arg1: i32) -> (i32, i32, i32) {
    %c0_i32 = arith.constant 0 : i32
    %c0_i32_0 = arith.constant 0 : i32
    return %arg1, %arg0, %c0_i32 : i32, i32, i32
  }
  func.func @transform_1(%arg0: i32, %arg1: i32) -> (i32, i32, i32) {
    %c0_i32 = arith.constant 0 : i32
    %0 = arith.subi %c0_i32, %arg1 : i32
    %c1_i32 = arith.constant 1 : i32
    %c0_i32_0 = arith.constant 0 : i32
    return %0, %arg0, %c1_i32 : i32, i32, i32
  }
  func.func @transform_2(%arg0: i32, %arg1: i32) -> (i32, i32) {
    %c0_i32 = arith.constant 0 : i32
    %c0_i32_0 = arith.constant 0 : i32
    %c0_i32_1 = arith.constant 0 : i32
    return %c0_i32, %c0_i32_0 : i32, i32
  }
  func.func @transform_3(%arg0: i32, %arg1: i32) -> (i32, i32) {
    %c0_i32 = arith.constant 0 : i32
    %c0_i32_0 = arith.constant 0 : i32
    %c0_i32_1 = arith.constant 0 : i32
    return %c0_i32, %c0_i32_0 : i32, i32
  }
  func.func @transform_4(%arg0: i32, %arg1: i32) -> (i32, i32) {
    %c0_i32 = arith.constant 0 : i32
    %c0_i32_0 = arith.constant 0 : i32
    return %arg0, %c0_i32 : i32, i32
  }
}

</mosaic_0001>

<bundles_post_ra>
// kernel: lstm_extractor_forward.2
= control target key start
LH: loop header
LB: loop body
LE: loop exit
PB: predicated region body
PF: predicated region fallthrough
CT: control target
= control target key end

     0   :  { %vm187_vm0 = vcmask 254976   ;;  %v1778_v4 = vmov 0.0   ;;  %vm198_vm1 = vcmask 261120   ;;  %s1779_s11 = smov 32   ;;  %s1780_s14 = smov 64   ;;  %s2120_s0 = inlined_call_operand.vmem [shape: f32[8,2,256], index: 0, kind: input, shape index: {}, may-alias: {0,1}]   ;;  %s2121_s1 = inlined_call_operand.vmem [shape: f32[8,2,256], index: 1, kind: input, shape index: {}, may-alias: {0,1}]   ;;  %s2122_s2 = inlined_call_operand.vmem [shape: f32[32,128], index: 2, kind: input, shape index: {}]   ;;  %s2123_s3 = inlined_call_operand.vmem [shape: f32[32,128], index: 3, kind: input, shape index: {}]   ;;  %s2124_s4 = inlined_call_operand.vmem [shape: f32[8,2,32], index: 4, kind: output, shape index: {0}]   ;;  %s2125_s5 = inlined_call_operand.vmem [shape: f32[8,2,32], index: 5, kind: output, shape index: {1}]  }
   0x1   :  { %v197_v0 = vld [vmem:[%s2122_s2 + $0x18] sm:$0xff]  ;;  %v196_v2 = vld [vmem:[%s2122_s2 + $0x10] sm:$0xff]  ;;  %188 = vst.msk [vmem:[#allocation2] sm:$0x3] %vm187_vm0, %v1778_v4  ;;  %v195_v5 = vld [vmem:[%s2122_s2 + $0x8] sm:$0xff]  ;;  %s1781_s15 = smov 96  }
   0x2   :  { %v283_v1 = vld [vmem:[%s2123_s3 + $0x18] sm:$0xff]  ;;  %214 = vmatpush.msra.mxu0 %v197_v0  ;;  %v282_v3 = vld [vmem:[%s2123_s3 + $0x10] sm:$0xff]  ;;  %v281_v6 = vld [vmem:[%s2123_s3 + $0x8] sm:$0xff]  ;;  %189 = vst.msk [vmem:[#allocation3] sm:$0x3] %vm187_vm0, %v1778_v4  ;;  %384 = vmatpush.msra.mxu2 %v197_v0 }
   0x3   :  { %299 = vmatpush.msra.mxu1 %v283_v1  ;;  %v29_v7 = vld [vmem:[%s2120_s0] sm:$0x3]  ;;  %469 = vmatpush.msra.mxu3 %v283_v1  ;;  %190 = vst.msk [vmem:[#allocation4] sm:$0x3] %vm187_vm0, %v1778_v4  ;;  %v1599_v14 = vld [vmem:[%s2121_s1 + $0x1e] sm:$0x3] }
   0x4   :  { %215 = vmatpush.msra.mxu0 %v196_v2  ;;  %v194_v8 = vld [vmem:[%s2122_s2] sm:$0xff]  ;;  %191 = vst.msk [vmem:[#allocation5] sm:$0x3] %vm187_vm0, %v1778_v4  ;;  %385 = vmatpush.msra.mxu2 %v196_v2 }
   0x5   :  { %300 = vmatpush.msra.mxu1 %v282_v3  ;;  %v280_v9 = vld [vmem:[%s2123_s3] sm:$0xff]  ;;  %470 = vmatpush.msra.mxu3 %v282_v3  ;;  %30 = vst [vmem:[#allocation6] sm:$0x3] %v29_v7 }
   0x6   :  { %216 = vmatpush.msra.mxu0 %v195_v5  ;;  %386 = vmatpush.msra.mxu2 %v195_v5  ;;  %121 = vst [vmem:[#allocation7 + $0xe] sm:$0x3] %v1599_v14 }
   0x7   :  { %301 = vmatpush.msra.mxu1 %v281_v6  ;;  %471 = vmatpush.msra.mxu3 %v281_v6 }
   0x8   :  { %217 = vmatpush.msra.mxu0 %v194_v8  ;;  %v193_v10 = vld [vmem:[#allocation2] sm:$0x3]  ;;  %387 = vmatpush.msra.mxu2 %v194_v8 }
   0x9   :  { %302 = vmatpush.msra.mxu1 %v280_v9  ;;  %472 = vmatpush.msra.mxu3 %v280_v9  ;;  %v223_v11 = vld [vmem:[#allocation3] sm:$0x3] }
   0xa   :  { %1600 = vmatmul.msk.f32.vlgmr.msra.gmra.mxu0 %vm198_vm1, %v193_v10  ;;  %v279_v12 = vld [vmem:[#allocation4] sm:$0x3]  ;;  %245 = vrot.lane.b32.xlu1 %v223_v11, %s1779_s11  ;;  %v1598_v11 = vld [vmem:[%s2121_s1 + $0x1a] sm:$0x3] }
   0xb   :  { %639 = vmatpush.msrb.mxu1 %v283_v1  ;;  %554 = vmatpush.msrb.mxu0 %v197_v0  ;;  %v308_v13 = vld [vmem:[#allocation5] sm:$0x3]  ;;  %119 = vst [vmem:[#allocation7 + $0xc] sm:$0x3] %v1598_v11 }
   0xc   :  { %1602 = vmatmul.msk.f32.vlgmr.msra.gmra.mxu1 %vm198_vm1, %v279_v12  ;;  %724 = vmatpush.msrb.mxu2 %v197_v0  ;;  %v192_v15 = vld [vmem:[#allocation6] sm:$0x3] }
   0xd   :  { %555 = vmatpush.msrb.mxu0 %v196_v2  ;;  %640 = vmatpush.msrb.mxu1 %v282_v3  ;;  %v278_v18 = vld [vmem:[#allocation7 + $0xe] sm:$0x3] }
   0xe   :  { %725 = vmatpush.msrb.mxu2 %v196_v2  ;;  %809 = vmatpush.msrb.mxu3 %v283_v1 }
   0xf   :  { %556 = vmatpush.msrb.mxu0 %v195_v5  ;;  %641 = vmatpush.msrb.mxu1 %v281_v6 }
  0x10   :  { %726 = vmatpush.msrb.mxu2 %v195_v5  ;;  %810 = vmatpush.msrb.mxu3 %v282_v3 }
  0x11   :  { %557 = vmatpush.msrb.mxu0 %v194_v8  ;;  %642 = vmatpush.msrb.mxu1 %v280_v9 }
  0x12   :  { %727 = vmatpush.msrb.mxu2 %v194_v8  ;;  %811 = vmatpush.msrb.mxu3 %v281_v6 }
  0x13   :  { %330 = vrot.lane.b32.xlu1 %v308_v13, %s1779_s11  ;;  %894 = vmatpush.msra.mxu0 %v197_v0 }
  0x14   :  { %812 = vmatpush.msrb.mxu3 %v280_v9  ;;  %979 = vmatpush.msra.mxu1 %v283_v1 }
  0x15   :  { %895 = vmatpush.msra.mxu0 %v196_v2 }
  0x16   :  { %980 = vmatpush.msra.mxu1 %v282_v3 }
  0x17   :  { %896 = vmatpush.msra.mxu0 %v195_v5 }
  0x18   :  { %981 = vmatpush.msra.mxu1 %v281_v6 }
  0x19   :  { %897 = vmatpush.msra.mxu0 %v194_v8  ;;  %v31_v8 = vld [vmem:[%s2120_s0 + $0x4] sm:$0x3] }
  0x1a   :  { %982 = vmatpush.msra.mxu1 %v280_v9  ;;  %32 = vst [vmem:[#allocation6 + $0x2] sm:$0x3] %v31_v8 }
  0x21   :  { %v363_v12 = vld [vmem:[#allocation6 + $0x2] sm:$0x3] }
  0x7c   :  { %v246_v53 = vpop.permute.xlu1 %245 }
  0x85   :  { %v331_v57 = vpop.permute.xlu1 %330 }
  0x87   :  { %v219_v16 = vpop.f32.mrf.mxu0 }
  0x88   :  { %v222_v17 = vadd.f32 %v219_v16, %v192_v15 }
  0x89   :  { %v304_v19 = vpop.f32.mrf.mxu1 }
  0x8a   :  { %1650 = vtanh.f32 %v222_v17  ;;  %v307_v20 = vadd.f32 %v304_v19, %v278_v18  ;;  %v1601_v23 = vmul.f32 -1.442695, %v222_v17  ;;  %v448_v17 = vld [vmem:[#allocation7 + $0xc] sm:$0x3] }
  0x8c   :  { %1652 = vtanh.f32 %v307_v20  ;;  %v1603_v24 = vmul.f32 -1.442695, %v307_v20 }
  0x8d   :  { %1654 = vpow2.f32 %v1601_v23 }
  0x8e   :  { %1656 = vpow2.f32 %v1603_v24 }
  0x90   :  { %v1651_v21 = vpop.eup %1650 }
  0x91   :  { %250 = vrot.lane.b32.xlu0 %v1651_v21, %s1780_s14 }
  0x92   :  { %v1653_v22 = vpop.eup %1652 }
  0x93   :  { %v1655_v25 = vpop.eup %1654 }
  0x94   :  { %v227_v26 = vadd.f32 1.0, %v1655_v25  ;;  %v1657_v27 = vpop.eup %1656 }
  0x95   :  { %v312_v28 = vadd.f32 1.0, %v1657_v27 }
  0x96   :  { %1658 = vrcp.f32 %v227_v26  ;;  %v239_v37 = vand.u32 2147483648, %v227_v26  ;;  %vm233_vm3 = vweird.f32 %v227_v26  ;;  %v237_v38 = vand.u32 2147483647, %v227_v26 }
  0x97   :  { %1660 = vrcp.f32 %v312_v28  ;;  %vm318_vm6 = vweird.f32 %v312_v28  ;;  %v324_v46 = vand.u32 2147483648, %v312_v28  ;;  %v322_v47 = vand.u32 2147483647, %v312_v28 }
  0x98   :  { %v240_v41 = vor.u32 1.1754944e-38, %v239_v37  ;;  %vm238_vm5 = vcmp.eq.f32.partialorder %v237_v38, 8.507059e+37 }
  0x99   :  { %335 = vrot.lane.b32.xlu0 %v1653_v22, %s1780_s14  ;;  %v325_v49 = vor.u32 1.1754944e-38, %v324_v46  ;;  %vm323_vm9 = vcmp.eq.f32.partialorder %v322_v47, 8.507059e+37 }
  0x9c   :  { %v1659_v29 = vpop.eup %1658 }
  0x9d   :  { %v229_v30 = vmul.f32 %v1659_v29, %v227_v26  ;;  %v1661_v32 = vpop.eup %1660  ;;  %vm234_vm2 = vweird.f32 %v1659_v29 }
  0x9e   :  { %v314_v34 = vmul.f32 %v1661_v32, %v312_v28  ;;  %vm235_vm4 = vmor %vm233_vm3, %vm234_vm2  ;;  %vm319_vm7 = vweird.f32 %v1661_v32 }
  0x9f   :  { %v230_v31 = vsub.f32 1.0, %v229_v30  ;;  %vm320_vm8 = vmor %vm318_vm6, %vm319_vm7 }
  0xa0   :  { %v315_v36 = vsub.f32 1.0, %v314_v34 }
  0xa1   :  { %v231_v33 = vmul.f32 %v1659_v29, %v230_v31 }
  0xa2   :  { %v316_v40 = vmul.f32 %v1661_v32, %v315_v36 }
  0xa3   :  { %v232_v35 = vadd.f32 %v1659_v29, %v231_v33 }
  0xa4   :  { %v317_v44 = vadd.f32 %v1661_v32, %v316_v40 }
  0xa5   :  { %v236_v39 = vsel %vm235_vm4, %v1659_v29, %v232_v35 }
  0xa6   :  { %v241_v42 = vsel %vm238_vm5, %v240_v41, %v236_v39  ;;  %v321_v48 = vsel %vm320_vm8, %v1661_v32, %v317_v44 }
  0xa7   :  { %v326_v50 = vsel %vm323_vm9, %v325_v49, %v321_v48  ;;  %v248_v54 = vmul.f32 %v246_v53, %v241_v42 }
  0xa8   :  { %v333_v58 = vmul.f32 %v331_v57, %v326_v50 }
 0x103   :  { %v251_v43 = vpop.permute.xlu0 %250 }
 0x104   :  { %v253_v45 = vmul.f32 %v251_v43, %v241_v42 }
 0x106   :  { %255 = vrot.lane.b32.xlu2 %v253_v45, %s1779_s11 }
 0x10b   :  { %v336_v51 = vpop.permute.xlu0 %335 }
 0x10c   :  { %v338_v52 = vmul.f32 %v336_v51, %v326_v50 }
 0x10e   :  { %340 = vrot.lane.b32.xlu2 %v338_v52, %s1779_s11 }
 0x160   :  { %v256_v55 = vpop.permute.xlu2 %255 }
 0x161   :  { %v258_v56 = vadd.f32 %v256_v55, %v248_v54 }
 0x163   :  { %1662 = vtanh.f32 %v258_v56 }
 0x168   :  { %v341_v59 = vpop.permute.xlu2 %340 }
 0x169   :  { %v1663_v60 = vpop.eup %1662  ;;  %v343_v61 = vadd.f32 %v341_v59, %v333_v58 }
 0x16a   :  { %261 = vrot.lane.b32.xlu0 %v1663_v60, %s1780_s14 }
 0x16b   :  { %1664 = vtanh.f32 %v343_v61 }
 0x171   :  { %v1665_v62 = vpop.eup %1664 }
 0x172   :  { %346 = vrot.lane.b32.xlu1 %v1665_v62, %s1780_s14 }
 0x17a   :  { %272 = vrot.lane.b32.xlu1 %v258_v56, %s1781_s15 }
 0x1dc   :  { %v262_v63 = vpop.permute.xlu0 %261 }
 0x1dd   :  { %v264_v0 = vmul.f32 %v262_v63, %v241_v42 }
 0x1df   :  { %266 = vrot.lane.b32.xlu2 %v264_v0, %s1779_s11 }
 0x1e4   :  { %v347_v1 = vpop.permute.xlu1 %346 }
 0x1e5   :  { %v349_v2 = vmul.f32 %v347_v1, %v326_v50 }
 0x1e7   :  { %351 = vrot.lane.b32.xlu0 %v349_v2, %s1779_s11  ;;  %356 = vrot.lane.b32.xlu2 %v343_v61, %s1781_s15 }
 0x1ec   :  { %v273_v3 = vpop.permute.xlu1 %272 }
 0x1ed   :  { %275 = vst.msk [vmem:[#allocation3] sm:$0x3] %vm187_vm0, %v273_v3 }
 0x1f4   :  { %v393_v4 = vld [vmem:[#allocation3] sm:$0x3] }
 0x1f5   :  { %415 = vrot.lane.b32.xlu2 %v393_v4, %s1779_s11 }
 0x239   :  { %v267_v5 = vpop.permute.xlu2 %266 }
 0x23a   :  { %270 = vst.msk [vmem:[#allocation2] sm:$0x3] %vm187_vm0, %v267_v5 }
 0x23b   :  { %276 = vst.msk [vmem:[%s2124_s4] sm:$0x3] %vm187_vm0, %v267_v5 }
 0x241   :  { %v357_v6 = vpop.permute.xlu2 %356  ;;  %v364_v7 = vld [vmem:[#allocation2] sm:$0x3] }
 0x242   :  { %359 = vst.msk [vmem:[#allocation5] sm:$0x3] %vm187_vm0, %v357_v6  ;;  %1605 = vmatmul.msk.f32.vlgmr.msra.gmra.mxu2 %vm198_vm1, %v364_v7  ;;  %v33_v6 = vld [vmem:[%s2120_s0 + $0x8] sm:$0x3] }
 0x243   :  { %34 = vst [vmem:[#allocation6 + $0x4] sm:$0x3] %v33_v6 }
 0x249   :  { %v478_v16 = vld [vmem:[#allocation5] sm:$0x3] }
 0x24f   :  { %v416_v51 = vpop.permute.xlu2 %415 }
 0x259   :  { %v352_v9 = vpop.permute.xlu0 %351 }
 0x25a   :  { %354 = vst.msk [vmem:[#allocation4] sm:$0x3] %vm187_vm0, %v352_v9 }
 0x25b   :  { %1604 = vst.msk [vmem:[%s2125_s5 + $0xe] sm:$0x3] %vm187_vm0, %v352_v9  ;;  %v1597_v9 = vld [vmem:[%s2121_s1 + $0x16] sm:$0x3] }
 0x25c   :  { %117 = vst [vmem:[#allocation7 + $0xa] sm:$0x3] %v1597_v9 }
 0x261   :  { %v449_v10 = vld [vmem:[#allocation4] sm:$0x3] }
 0x262   :  { %1608 = vmatmul.msk.f32.vlgmr.msra.gmra.mxu3 %vm198_vm1, %v449_v10  ;;  %v533_v10 = vld [vmem:[#allocation6 + $0x4] sm:$0x3] }
 0x2c5   :  { %v389_v13 = vpop.f32.mrf.mxu2 }
 0x2c6   :  { %v392_v14 = vadd.f32 %v389_v13, %v363_v12 }
 0x2c8   :  { %1666 = vtanh.f32 %v392_v14  ;;  %v1606_v21 = vmul.f32 -1.442695, %v392_v14 }
 0x2ce   :  { %v1667_v15 = vpop.eup %1666 }
 0x2cf   :  { %420 = vrot.lane.b32.xlu0 %v1667_v15, %s1780_s14  ;;  %v618_v15 = vld [vmem:[#allocation7 + $0xa] sm:$0x3] }
 0x2d7   :  { %500 = vrot.lane.b32.xlu0 %v478_v16, %s1779_s11 }
 0x2e5   :  { %v474_v18 = vpop.f32.mrf.mxu3 }
 0x2e6   :  { %v477_v19 = vadd.f32 %v474_v18, %v448_v17 }
 0x2e8   :  { %1668 = vtanh.f32 %v477_v19  ;;  %v1609_v27 = vmul.f32 -1.442695, %v477_v19 }
 0x2e9   :  { %1670 = vpow2.f32 %v1606_v21 }
 0x2ee   :  { %v1669_v20 = vpop.eup %1668 }
 0x2ef   :  { %505 = vrot.lane.b32.xlu1 %v1669_v20, %s1780_s14  ;;  %v1671_v22 = vpop.eup %1670 }
 0x2f0   :  { %v397_v23 = vadd.f32 1.0, %v1671_v22 }
 0x2f2   :  { %1672 = vrcp.f32 %v397_v23  ;;  %v409_v30 = vand.u32 2147483648, %v397_v23  ;;  %vm403_vm11 = vweird.f32 %v397_v23  ;;  %v407_v31 = vand.u32 2147483647, %v397_v23 }
 0x2f3   :  { %1674 = vpow2.f32 %v1609_v27 }
 0x2f4   :  { %v410_v34 = vor.u32 1.1754944e-38, %v409_v30  ;;  %vm408_vm13 = vcmp.eq.f32.partialorder %v407_v31, 8.507059e+37 }
 0x2f8   :  { %v1673_v24 = vpop.eup %1672 }
 0x2f9   :  { %v399_v25 = vmul.f32 %v1673_v24, %v397_v23  ;;  %vm404_vm10 = vweird.f32 %v1673_v24  ;;  %v1675_v32 = vpop.eup %1674 }
 0x2fa   :  { %vm405_vm12 = vmor %vm403_vm11, %vm404_vm10  ;;  %v482_v35 = vadd.f32 1.0, %v1675_v32 }
 0x2fb   :  { %v400_v26 = vsub.f32 1.0, %v399_v25 }
 0x2fc   :  { %1676 = vrcp.f32 %v482_v35  ;;  %v494_v44 = vand.u32 2147483648, %v482_v35  ;;  %vm488_vm15 = vweird.f32 %v482_v35  ;;  %v492_v45 = vand.u32 2147483647, %v482_v35 }
 0x2fd   :  { %v401_v28 = vmul.f32 %v1673_v24, %v400_v26 }
 0x2fe   :  { %v495_v47 = vor.u32 1.1754944e-38, %v494_v44  ;;  %vm493_vm3 = vcmp.eq.f32.partialorder %v492_v45, 8.507059e+37 }
 0x2ff   :  { %v402_v29 = vadd.f32 %v1673_v24, %v401_v28 }
 0x301   :  { %v406_v33 = vsel %vm405_vm12, %v1673_v24, %v402_v29 }
 0x302   :  { %v411_v36 = vsel %vm408_vm13, %v410_v34, %v406_v33  ;;  %v1677_v39 = vpop.eup %1676 }
 0x303   :  { %v484_v40 = vmul.f32 %v1677_v39, %v482_v35  ;;  %vm489_vm14 = vweird.f32 %v1677_v39  ;;  %v418_v52 = vmul.f32 %v416_v51, %v411_v36 }
 0x304   :  { %vm490_vm2 = vmor %vm488_vm15, %vm489_vm14 }
 0x305   :  { %v485_v41 = vsub.f32 1.0, %v484_v40 }
 0x307   :  { %v486_v42 = vmul.f32 %v1677_v39, %v485_v41 }
 0x309   :  { %v487_v43 = vadd.f32 %v1677_v39, %v486_v42 }
 0x30b   :  { %v491_v46 = vsel %vm490_vm2, %v1677_v39, %v487_v43 }
 0x30c   :  { %v496_v48 = vsel %vm493_vm3, %v495_v47, %v491_v46 }
 0x341   :  { %v421_v37 = vpop.permute.xlu0 %420 }
 0x342   :  { %v423_v38 = vmul.f32 %v421_v37, %v411_v36 }
 0x344   :  { %425 = vrot.lane.b32.xlu1 %v423_v38, %s1779_s11 }
 0x349   :  { %v501_v55 = vpop.permute.xlu0 %500 }
 0x34a   :  { %v503_v56 = vmul.f32 %v501_v55, %v496_v48 }
 0x361   :  { %v506_v49 = vpop.permute.xlu1 %505 }
 0x362   :  { %v508_v50 = vmul.f32 %v506_v49, %v496_v48 }
 0x364   :  { %510 = vrot.lane.b32.xlu2 %v508_v50, %s1779_s11 }
 0x3b6   :  { %v426_v53 = vpop.permute.xlu1 %425 }
 0x3b7   :  { %v428_v54 = vadd.f32 %v426_v53, %v418_v52 }
 0x3b9   :  { %1678 = vtanh.f32 %v428_v54 }
 0x3be   :  { %v511_v57 = vpop.permute.xlu2 %510 }
 0x3bf   :  { %v1679_v58 = vpop.eup %1678  ;;  %v513_v59 = vadd.f32 %v511_v57, %v503_v56 }
 0x3c0   :  { %431 = vrot.lane.b32.xlu0 %v1679_v58, %s1780_s14 }
 0x3c1   :  { %1680 = vtanh.f32 %v513_v59 }
 0x3c7   :  { %v1681_v60 = vpop.eup %1680 }
 0x3c8   :  { %516 = vrot.lane.b32.xlu1 %v1681_v60, %s1780_s14 }
 0x3d0   :  { %441 = vrot.lane.b32.xlu1 %v428_v54, %s1781_s15 }
 0x432   :  { %v432_v61 = vpop.permute.xlu0 %431 }
 0x433   :  { %v434_v62 = vmul.f32 %v432_v61, %v411_v36 }
 0x435   :  { %436 = vrot.lane.b32.xlu2 %v434_v62, %s1779_s11 }
 0x43a   :  { %v517_v63 = vpop.permute.xlu1 %516 }
 0x43b   :  { %v519_v0 = vmul.f32 %v517_v63, %v496_v48 }
 0x43d   :  { %521 = vrot.lane.b32.xlu0 %v519_v0, %s1779_s11  ;;  %526 = vrot.lane.b32.xlu2 %v513_v59, %s1781_s15 }
 0x442   :  { %v442_v1 = vpop.permute.xlu1 %441 }
 0x443   :  { %444 = vst.msk [vmem:[#allocation3] sm:$0x3] %vm187_vm0, %v442_v1 }
 0x44a   :  { %v563_v2 = vld [vmem:[#allocation3] sm:$0x3] }
 0x44b   :  { %585 = vrot.lane.b32.xlu2 %v563_v2, %s1779_s11 }
 0x48f   :  { %v437_v3 = vpop.permute.xlu2 %436 }
 0x490   :  { %439 = vst.msk [vmem:[#allocation2] sm:$0x3] %vm187_vm0, %v437_v3 }
 0x491   :  { %1607 = vst.msk [vmem:[%s2124_s4 + $0x2] sm:$0x3] %vm187_vm0, %v437_v3 }
 0x497   :  { %v527_v4 = vpop.permute.xlu2 %526  ;;  %v534_v5 = vld [vmem:[#allocation2] sm:$0x3] }
 0x498   :  { %529 = vst.msk [vmem:[#allocation5] sm:$0x3] %vm187_vm0, %v527_v4  ;;  %1611 = vmatmul.msk.f32.vlgmr.msrb.gmra.mxu0 %vm198_vm1, %v534_v5  ;;  %v35_v4 = vld [vmem:[%s2120_s0 + $0xc] sm:$0x3] }
 0x499   :  { %36 = vst [vmem:[#allocation6 + $0x6] sm:$0x3] %v35_v4 }
 0x49f   :  { %v648_v14 = vld [vmem:[#allocation5] sm:$0x3] }
 0x4a5   :  { %v586_v49 = vpop.permute.xlu2 %585 }
 0x4af   :  { %v522_v7 = vpop.permute.xlu0 %521 }
 0x4b0   :  { %524 = vst.msk [vmem:[#allocation4] sm:$0x3] %vm187_vm0, %v522_v7 }
 0x4b1   :  { %1610 = vst.msk [vmem:[%s2125_s5 + $0xc] sm:$0x3] %vm187_vm0, %v522_v7  ;;  %v1596_v7 = vld [vmem:[%s2121_s1 + $0x12] sm:$0x3] }
 0x4b2   :  { %115 = vst [vmem:[#allocation7 + $0x8] sm:$0x3] %v1596_v7 }
 0x4b7   :  { %v619_v8 = vld [vmem:[#allocation4] sm:$0x3] }
 0x4b8   :  { %1614 = vmatmul.msk.f32.vlgmr.msrb.gmra.mxu1 %vm198_vm1, %v619_v8  ;;  %v703_v8 = vld [vmem:[#allocation6 + $0x6] sm:$0x3] }
 0x515   :  { %v559_v11 = vpop.f32.mrf.mxu0 }
 0x516   :  { %v562_v12 = vadd.f32 %v559_v11, %v533_v10 }
 0x518   :  { %1682 = vtanh.f32 %v562_v12  ;;  %v1612_v19 = vmul.f32 -1.442695, %v562_v12 }
 0x51e   :  { %v1683_v13 = vpop.eup %1682 }
 0x51f   :  { %590 = vrot.lane.b32.xlu0 %v1683_v13, %s1780_s14  ;;  %v788_v13 = vld [vmem:[#allocation7 + $0x8] sm:$0x3] }
 0x527   :  { %670 = vrot.lane.b32.xlu0 %v648_v14, %s1779_s11 }
 0x535   :  { %v644_v16 = vpop.f32.mrf.mxu1 }
 0x536   :  { %v647_v17 = vadd.f32 %v644_v16, %v618_v15 }
 0x538   :  { %1684 = vtanh.f32 %v647_v17  ;;  %v1615_v25 = vmul.f32 -1.442695, %v647_v17 }
 0x539   :  { %1686 = vpow2.f32 %v1612_v19 }
 0x53e   :  { %v1685_v18 = vpop.eup %1684 }
 0x53f   :  { %675 = vrot.lane.b32.xlu1 %v1685_v18, %s1780_s14  ;;  %v1687_v20 = vpop.eup %1686 }
 0x540   :  { %v567_v21 = vadd.f32 1.0, %v1687_v20 }
 0x542   :  { %1688 = vrcp.f32 %v567_v21  ;;  %v579_v28 = vand.u32 2147483648, %v567_v21  ;;  %vm573_vm5 = vweird.f32 %v567_v21  ;;  %v577_v29 = vand.u32 2147483647, %v567_v21 }
 0x543   :  { %1690 = vpow2.f32 %v1615_v25 }
 0x544   :  { %v580_v32 = vor.u32 1.1754944e-38, %v579_v28  ;;  %vm578_vm7 = vcmp.eq.f32.partialorder %v577_v29, 8.507059e+37 }
 0x548   :  { %v1689_v22 = vpop.eup %1688 }
 0x549   :  { %v569_v23 = vmul.f32 %v1689_v22, %v567_v21  ;;  %vm574_vm4 = vweird.f32 %v1689_v22  ;;  %v1691_v30 = vpop.eup %1690 }
 0x54a   :  { %vm575_vm6 = vmor %vm573_vm5, %vm574_vm4  ;;  %v652_v33 = vadd.f32 1.0, %v1691_v30 }
 0x54b   :  { %v570_v24 = vsub.f32 1.0, %v569_v23 }
 0x54c   :  { %1692 = vrcp.f32 %v652_v33  ;;  %v664_v42 = vand.u32 2147483648, %v652_v33  ;;  %vm658_vm9 = vweird.f32 %v652_v33  ;;  %v662_v43 = vand.u32 2147483647, %v652_v33 }
 0x54d   :  { %v571_v26 = vmul.f32 %v1689_v22, %v570_v24 }
 0x54e   :  { %v665_v45 = vor.u32 1.1754944e-38, %v664_v42  ;;  %vm663_vm11 = vcmp.eq.f32.partialorder %v662_v43, 8.507059e+37 }
 0x54f   :  { %v572_v27 = vadd.f32 %v1689_v22, %v571_v26 }
 0x551   :  { %v576_v31 = vsel %vm575_vm6, %v1689_v22, %v572_v27 }
 0x552   :  { %v581_v34 = vsel %vm578_vm7, %v580_v32, %v576_v31  ;;  %v1693_v37 = vpop.eup %1692 }
 0x553   :  { %v654_v38 = vmul.f32 %v1693_v37, %v652_v33  ;;  %vm659_vm8 = vweird.f32 %v1693_v37  ;;  %v588_v50 = vmul.f32 %v586_v49, %v581_v34 }
 0x554   :  { %vm660_vm10 = vmor %vm658_vm9, %vm659_vm8 }
 0x555   :  { %v655_v39 = vsub.f32 1.0, %v654_v38 }
 0x557   :  { %v656_v40 = vmul.f32 %v1693_v37, %v655_v39 }
 0x559   :  { %v657_v41 = vadd.f32 %v1693_v37, %v656_v40 }
 0x55b   :  { %v661_v44 = vsel %vm660_vm10, %v1693_v37, %v657_v41 }
 0x55c   :  { %v666_v46 = vsel %vm663_vm11, %v665_v45, %v661_v44 }
 0x591   :  { %v591_v35 = vpop.permute.xlu0 %590 }
 0x592   :  { %v593_v36 = vmul.f32 %v591_v35, %v581_v34 }
 0x594   :  { %595 = vrot.lane.b32.xlu1 %v593_v36, %s1779_s11 }
 0x599   :  { %v671_v53 = vpop.permute.xlu0 %670 }
 0x59a   :  { %v673_v54 = vmul.f32 %v671_v53, %v666_v46 }
 0x5b1   :  { %v676_v47 = vpop.permute.xlu1 %675 }
 0x5b2   :  { %v678_v48 = vmul.f32 %v676_v47, %v666_v46 }
 0x5b4   :  { %680 = vrot.lane.b32.xlu2 %v678_v48, %s1779_s11 }
 0x606   :  { %v596_v51 = vpop.permute.xlu1 %595 }
 0x607   :  { %v598_v52 = vadd.f32 %v596_v51, %v588_v50 }
 0x609   :  { %1694 = vtanh.f32 %v598_v52 }
 0x60e   :  { %v681_v55 = vpop.permute.xlu2 %680 }
 0x60f   :  { %v1695_v56 = vpop.eup %1694  ;;  %v683_v57 = vadd.f32 %v681_v55, %v673_v54 }
 0x610   :  { %601 = vrot.lane.b32.xlu0 %v1695_v56, %s1780_s14 }
 0x611   :  { %1696 = vtanh.f32 %v683_v57 }
 0x617   :  { %v1697_v58 = vpop.eup %1696 }
 0x618   :  { %686 = vrot.lane.b32.xlu1 %v1697_v58, %s1780_s14 }
 0x620   :  { %611 = vrot.lane.b32.xlu1 %v598_v52, %s1781_s15 }
 0x682   :  { %v602_v59 = vpop.permute.xlu0 %601 }
 0x683   :  { %v604_v60 = vmul.f32 %v602_v59, %v581_v34 }
 0x685   :  { %606 = vrot.lane.b32.xlu2 %v604_v60, %s1779_s11 }
 0x68a   :  { %v687_v61 = vpop.permute.xlu1 %686 }
 0x68b   :  { %v689_v62 = vmul.f32 %v687_v61, %v666_v46 }
 0x68d   :  { %691 = vrot.lane.b32.xlu0 %v689_v62, %s1779_s11  ;;  %696 = vrot.lane.b32.xlu2 %v683_v57, %s1781_s15 }
 0x692   :  { %v612_v63 = vpop.permute.xlu1 %611 }
 0x693   :  { %614 = vst.msk [vmem:[#allocation3] sm:$0x3] %vm187_vm0, %v612_v63 }
 0x69a   :  { %v733_v0 = vld [vmem:[#allocation3] sm:$0x3] }
 0x69b   :  { %755 = vrot.lane.b32.xlu2 %v733_v0, %s1779_s11 }
 0x6df   :  { %v607_v1 = vpop.permute.xlu2 %606 }
 0x6e0   :  { %609 = vst.msk [vmem:[#allocation2] sm:$0x3] %vm187_vm0, %v607_v1 }
 0x6e1   :  { %1613 = vst.msk [vmem:[%s2124_s4 + $0x4] sm:$0x3] %vm187_vm0, %v607_v1 }
 0x6e7   :  { %v697_v2 = vpop.permute.xlu2 %696  ;;  %v704_v3 = vld [vmem:[#allocation2] sm:$0x3] }
 0x6e8   :  { %699 = vst.msk [vmem:[#allocation5] sm:$0x3] %vm187_vm0, %v697_v2  ;;  %1617 = vmatmul.msk.f32.vlgmr.msrb.gmra.mxu2 %vm198_vm1, %v704_v3  ;;  %v37_v2 = vld [vmem:[%s2120_s0 + $0x10] sm:$0x3] }
 0x6e9   :  { %38 = vst [vmem:[#allocation6 + $0x8] sm:$0x3] %v37_v2  ;;  %v1133_v2 = vld [vmem:[%s2123_s3 + $0x18] sm:$0xff] }
 0x6ea   :  { %1149 = vmatpush.msra.mxu3 %v1133_v2  ;;  %1319 = vmatpush.msrb.mxu1 %v1133_v2 }
 0x6ef   :  { %v818_v12 = vld [vmem:[#allocation5] sm:$0x3] }
 0x6f5   :  { %v756_v47 = vpop.permute.xlu2 %755 }
 0x6ff   :  { %v692_v5 = vpop.permute.xlu0 %691 }
 0x700   :  { %694 = vst.msk [vmem:[#allocation4] sm:$0x3] %vm187_vm0, %v692_v5 }
 0x701   :  { %1616 = vst.msk [vmem:[%s2125_s5 + $0xa] sm:$0x3] %vm187_vm0, %v692_v5  ;;  %v1595_v5 = vld [vmem:[%s2121_s1 + $0xe] sm:$0x3] }
 0x702   :  { %113 = vst [vmem:[#allocation7 + $0x6] sm:$0x3] %v1595_v5  ;;  %v1130_v5 = vld [vmem:[%s2123_s3] sm:$0xff] }
 0x707   :  { %v789_v6 = vld [vmem:[#allocation4] sm:$0x3] }
 0x708   :  { %1620 = vmatmul.msk.f32.vlgmr.msrb.gmra.mxu3 %vm198_vm1, %v789_v6  ;;  %v873_v6 = vld [vmem:[#allocation6 + $0x8] sm:$0x3] }
 0x76b   :  { %v729_v9 = vpop.f32.mrf.mxu2 }
 0x76c   :  { %v732_v10 = vadd.f32 %v729_v9, %v703_v8 }
 0x76e   :  { %1698 = vtanh.f32 %v732_v10  ;;  %v1618_v17 = vmul.f32 -1.442695, %v732_v10 }
 0x774   :  { %v1699_v11 = vpop.eup %1698 }
 0x775   :  { %760 = vrot.lane.b32.xlu0 %v1699_v11, %s1780_s14  ;;  %v958_v11 = vld [vmem:[#allocation7 + $0x6] sm:$0x3] }
 0x77d   :  { %840 = vrot.lane.b32.xlu0 %v818_v12, %s1779_s11 }
 0x78b   :  { %v814_v14 = vpop.f32.mrf.mxu3 }
 0x78c   :  { %v817_v15 = vadd.f32 %v814_v14, %v788_v13 }
 0x78e   :  { %1700 = vtanh.f32 %v817_v15  ;;  %v1621_v23 = vmul.f32 -1.442695, %v817_v15 }
 0x78f   :  { %1702 = vpow2.f32 %v1618_v17 }
 0x794   :  { %v1701_v16 = vpop.eup %1700 }
 0x795   :  { %845 = vrot.lane.b32.xlu1 %v1701_v16, %s1780_s14  ;;  %v1703_v18 = vpop.eup %1702 }
 0x796   :  { %v737_v19 = vadd.f32 1.0, %v1703_v18 }
 0x798   :  { %1704 = vrcp.f32 %v737_v19  ;;  %v749_v26 = vand.u32 2147483648, %v737_v19  ;;  %vm743_vm13 = vweird.f32 %v737_v19  ;;  %v747_v27 = vand.u32 2147483647, %v737_v19 }
 0x799   :  { %1706 = vpow2.f32 %v1621_v23 }
 0x79a   :  { %v750_v30 = vor.u32 1.1754944e-38, %v749_v26  ;;  %vm748_vm15 = vcmp.eq.f32.partialorder %v747_v27, 8.507059e+37 }
 0x79e   :  { %v1705_v20 = vpop.eup %1704 }
 0x79f   :  { %v739_v21 = vmul.f32 %v1705_v20, %v737_v19  ;;  %vm744_vm12 = vweird.f32 %v1705_v20  ;;  %v1707_v28 = vpop.eup %1706 }
 0x7a0   :  { %vm745_vm14 = vmor %vm743_vm13, %vm744_vm12  ;;  %v822_v31 = vadd.f32 1.0, %v1707_v28 }
 0x7a1   :  { %v740_v22 = vsub.f32 1.0, %v739_v21 }
 0x7a2   :  { %1708 = vrcp.f32 %v822_v31  ;;  %v834_v40 = vand.u32 2147483648, %v822_v31  ;;  %vm828_vm3 = vweird.f32 %v822_v31  ;;  %v832_v41 = vand.u32 2147483647, %v822_v31 }
 0x7a3   :  { %v741_v24 = vmul.f32 %v1705_v20, %v740_v22 }
 0x7a4   :  { %v835_v43 = vor.u32 1.1754944e-38, %v834_v40  ;;  %vm833_vm5 = vcmp.eq.f32.partialorder %v832_v41, 8.507059e+37 }
 0x7a5   :  { %v742_v25 = vadd.f32 %v1705_v20, %v741_v24 }
 0x7a7   :  { %v746_v29 = vsel %vm745_vm14, %v1705_v20, %v742_v25 }
 0x7a8   :  { %v751_v32 = vsel %vm748_vm15, %v750_v30, %v746_v29  ;;  %v1709_v35 = vpop.eup %1708 }
 0x7a9   :  { %v824_v36 = vmul.f32 %v1709_v35, %v822_v31  ;;  %vm829_vm2 = vweird.f32 %v1709_v35  ;;  %v758_v48 = vmul.f32 %v756_v47, %v751_v32 }
 0x7aa   :  { %vm830_vm4 = vmor %vm828_vm3, %vm829_vm2 }
 0x7ab   :  { %v825_v37 = vsub.f32 1.0, %v824_v36 }
 0x7ad   :  { %v826_v38 = vmul.f32 %v1709_v35, %v825_v37 }
 0x7af   :  { %v827_v39 = vadd.f32 %v1709_v35, %v826_v38 }
 0x7b1   :  { %v831_v42 = vsel %vm830_vm4, %v1709_v35, %v827_v39 }
 0x7b2   :  { %v836_v44 = vsel %vm833_vm5, %v835_v43, %v831_v42 }
 0x7e7   :  { %v761_v33 = vpop.permute.xlu0 %760 }
 0x7e8   :  { %v763_v34 = vmul.f32 %v761_v33, %v751_v32 }
 0x7ea   :  { %765 = vrot.lane.b32.xlu1 %v763_v34, %s1779_s11 }
 0x7ef   :  { %v841_v51 = vpop.permute.xlu0 %840 }
 0x7f0   :  { %v843_v52 = vmul.f32 %v841_v51, %v836_v44 }
 0x807   :  { %v846_v45 = vpop.permute.xlu1 %845 }
 0x808   :  { %v848_v46 = vmul.f32 %v846_v45, %v836_v44 }
 0x80a   :  { %850 = vrot.lane.b32.xlu2 %v848_v46, %s1779_s11 }
 0x85c   :  { %v766_v49 = vpop.permute.xlu1 %765 }
 0x85d   :  { %v768_v50 = vadd.f32 %v766_v49, %v758_v48 }
 0x85f   :  { %1710 = vtanh.f32 %v768_v50 }
 0x864   :  { %v851_v53 = vpop.permute.xlu2 %850 }
 0x865   :  { %v1711_v54 = vpop.eup %1710  ;;  %v853_v55 = vadd.f32 %v851_v53, %v843_v52 }
 0x866   :  { %771 = vrot.lane.b32.xlu0 %v1711_v54, %s1780_s14 }
 0x867   :  { %1712 = vtanh.f32 %v853_v55 }
 0x86d   :  { %v1713_v56 = vpop.eup %1712 }
 0x86e   :  { %856 = vrot.lane.b32.xlu1 %v1713_v56, %s1780_s14 }
 0x876   :  { %781 = vrot.lane.b32.xlu1 %v768_v50, %s1781_s15 }
 0x8d8   :  { %v772_v57 = vpop.permute.xlu0 %771 }
 0x8d9   :  { %v774_v58 = vmul.f32 %v772_v57, %v751_v32 }
 0x8db   :  { %776 = vrot.lane.b32.xlu2 %v774_v58, %s1779_s11 }
 0x8e0   :  { %v857_v59 = vpop.permute.xlu1 %856 }
 0x8e1   :  { %v859_v60 = vmul.f32 %v857_v59, %v836_v44 }
 0x8e3   :  { %861 = vrot.lane.b32.xlu0 %v859_v60, %s1779_s11  ;;  %866 = vrot.lane.b32.xlu2 %v853_v55, %s1781_s15 }
 0x8e8   :  { %v782_v61 = vpop.permute.xlu1 %781 }
 0x8e9   :  { %784 = vst.msk [vmem:[#allocation3] sm:$0x3] %vm187_vm0, %v782_v61  ;;  %v1048_v61 = vld [vmem:[%s2122_s2 + $0x18] sm:$0xff] }
 0x8ea   :  { %1064 = vmatpush.msra.mxu2 %v1048_v61  ;;  %1234 = vmatpush.msrb.mxu0 %v1048_v61 }
 0x8f0   :  { %v903_v62 = vld [vmem:[#allocation3] sm:$0x3] }
 0x8f1   :  { %925 = vrot.lane.b32.xlu2 %v903_v62, %s1779_s11  ;;  %v1047_v62 = vld [vmem:[%s2122_s2 + $0x10] sm:$0xff] }
 0x8f2   :  { %1065 = vmatpush.msra.mxu2 %v1047_v62  ;;  %1235 = vmatpush.msrb.mxu0 %v1047_v62 }
 0x935   :  { %v777_v63 = vpop.permute.xlu2 %776 }
 0x936   :  { %779 = vst.msk [vmem:[#allocation2] sm:$0x3] %vm187_vm0, %v777_v63 }
 0x937   :  { %1619 = vst.msk [vmem:[%s2124_s4 + $0x6] sm:$0x3] %vm187_vm0, %v777_v63  ;;  %v1046_v63 = vld [vmem:[%s2122_s2 + $0x8] sm:$0xff] }
 0x938   :  { %1066 = vmatpush.msra.mxu2 %v1046_v63  ;;  %1236 = vmatpush.msrb.mxu0 %v1046_v63 }
 0x93d   :  { %v867_v0 = vpop.permute.xlu2 %866  ;;  %v874_v1 = vld [vmem:[#allocation2] sm:$0x3] }
 0x93e   :  { %869 = vst.msk [vmem:[#allocation5] sm:$0x3] %vm187_vm0, %v867_v0  ;;  %1623 = vmatmul.msk.f32.vlgmr.msra.gmra.mxu0 %vm198_vm1, %v874_v1  ;;  %v1045_v0 = vld [vmem:[%s2122_s2] sm:$0xff] }
 0x93f   :  { %1067 = vmatpush.msra.mxu2 %v1045_v0  ;;  %1237 = vmatpush.msrb.mxu0 %v1045_v0 }
 0x941   :  { %1404 = vmatpush.msrb.mxu2 %v1048_v61 }
 0x943   :  { %1405 = vmatpush.msrb.mxu2 %v1047_v62 }
 0x945   :  { %v988_v10 = vld [vmem:[#allocation5] sm:$0x3]  ;;  %1406 = vmatpush.msrb.mxu2 %v1046_v63 }
 0x947   :  { %1407 = vmatpush.msrb.mxu2 %v1045_v0 }
 0x94b   :  { %v926_v45 = vpop.permute.xlu2 %925 }
 0x955   :  { %v862_v3 = vpop.permute.xlu0 %861 }
 0x956   :  { %864 = vst.msk [vmem:[#allocation4] sm:$0x3] %vm187_vm0, %v862_v3 }
 0x957   :  { %1622 = vst.msk [vmem:[%s2125_s5 + $0x8] sm:$0x3] %vm187_vm0, %v862_v3  ;;  %v1132_v3 = vld [vmem:[%s2123_s3 + $0x10] sm:$0xff] }
 0x958   :  { %1150 = vmatpush.msra.mxu3 %v1132_v3  ;;  %1320 = vmatpush.msrb.mxu1 %v1132_v3 }
 0x95d   :  { %v959_v4 = vld [vmem:[#allocation4] sm:$0x3] }
 0x95e   :  { %1626 = vmatmul.msk.f32.vlgmr.msra.gmra.mxu1 %vm198_vm1, %v959_v4  ;;  %v1131_v4 = vld [vmem:[%s2123_s3 + $0x8] sm:$0xff] }
 0x95f   :  { %1151 = vmatpush.msra.mxu3 %v1131_v4  ;;  %1321 = vmatpush.msrb.mxu1 %v1131_v4 }
 0x961   :  { %1152 = vmatpush.msra.mxu3 %v1130_v5  ;;  %1322 = vmatpush.msrb.mxu1 %v1130_v5 }
 0x963   :  { %1488 = vmatpush.msrb.mxu3 %v1133_v2 }
 0x965   :  { %1489 = vmatpush.msrb.mxu3 %v1132_v3 }
 0x967   :  { %1490 = vmatpush.msrb.mxu3 %v1131_v4 }
 0x969   :  { %1491 = vmatpush.msrb.mxu3 %v1130_v5 }
 0x9bb   :  { %v899_v7 = vpop.f32.mrf.mxu0 }
 0x9bc   :  { %v902_v8 = vadd.f32 %v899_v7, %v873_v6 }
 0x9be   :  { %1714 = vtanh.f32 %v902_v8  ;;  %v1624_v15 = vmul.f32 -1.442695, %v902_v8  ;;  %v39_v8 = vld [vmem:[%s2120_s0 + $0x14] sm:$0x3] }
 0x9bf   :  { %40 = vst [vmem:[#allocation6 + $0xa] sm:$0x3] %v39_v8 }
 0x9c4   :  { %v1715_v9 = vpop.eup %1714 }
 0x9c5   :  { %930 = vrot.lane.b32.xlu0 %v1715_v9, %s1780_s14 }
 0x9cd   :  { %1010 = vrot.lane.b32.xlu0 %v988_v10, %s1779_s11 }
 0x9db   :  { %v984_v12 = vpop.f32.mrf.mxu1 }
 0x9dc   :  { %v987_v13 = vadd.f32 %v984_v12, %v958_v11  ;;  %v1594_v11 = vld [vmem:[%s2121_s1 + $0xa] sm:$0x3]  ;;  %v1043_v12 = vld [vmem:[#allocation6 + $0xa] sm:$0x3] }
 0x9dd   :  { %111 = vst [vmem:[#allocation7 + $0x4] sm:$0x3] %v1594_v11 }
 0x9de   :  { %1716 = vtanh.f32 %v987_v13  ;;  %v1627_v21 = vmul.f32 -1.442695, %v987_v13 }
 0x9df   :  { %1718 = vpow2.f32 %v1624_v15 }
 0x9e4   :  { %v1717_v14 = vpop.eup %1716 }
 0x9e5   :  { %1015 = vrot.lane.b32.xlu1 %v1717_v14, %s1780_s14  ;;  %v1719_v16 = vpop.eup %1718 }
 0x9e6   :  { %v907_v17 = vadd.f32 1.0, %v1719_v16 }
 0x9e8   :  { %1720 = vrcp.f32 %v907_v17  ;;  %v919_v24 = vand.u32 2147483648, %v907_v17  ;;  %vm913_vm7 = vweird.f32 %v907_v17  ;;  %v917_v25 = vand.u32 2147483647, %v907_v17 }
 0x9e9   :  { %1722 = vpow2.f32 %v1627_v21 }
 0x9ea   :  { %v920_v28 = vor.u32 1.1754944e-38, %v919_v24  ;;  %vm918_vm9 = vcmp.eq.f32.partialorder %v917_v25, 8.507059e+37 }
 0x9ee   :  { %v1721_v18 = vpop.eup %1720 }
 0x9ef   :  { %v909_v19 = vmul.f32 %v1721_v18, %v907_v17  ;;  %vm914_vm6 = vweird.f32 %v1721_v18  ;;  %v1723_v26 = vpop.eup %1722  ;;  %v1128_v17 = vld [vmem:[#allocation7 + $0x4] sm:$0x3] }
 0x9f0   :  { %vm915_vm8 = vmor %vm913_vm7, %vm914_vm6  ;;  %v992_v29 = vadd.f32 1.0, %v1723_v26 }
 0x9f1   :  { %v910_v20 = vsub.f32 1.0, %v909_v19 }
 0x9f2   :  { %1724 = vrcp.f32 %v992_v29  ;;  %v1004_v38 = vand.u32 2147483648, %v992_v29  ;;  %vm998_vm11 = vweird.f32 %v992_v29  ;;  %v1002_v39 = vand.u32 2147483647, %v992_v29 }
 0x9f3   :  { %v911_v22 = vmul.f32 %v1721_v18, %v910_v20 }
 0x9f4   :  { %v1005_v41 = vor.u32 1.1754944e-38, %v1004_v38  ;;  %vm1003_vm13 = vcmp.eq.f32.partialorder %v1002_v39, 8.507059e+37 }
 0x9f5   :  { %v912_v23 = vadd.f32 %v1721_v18, %v911_v22 }
 0x9f7   :  { %v916_v27 = vsel %vm915_vm8, %v1721_v18, %v912_v23 }
 0x9f8   :  { %v921_v30 = vsel %vm918_vm9, %v920_v28, %v916_v27  ;;  %v1725_v33 = vpop.eup %1724 }
 0x9f9   :  { %v994_v34 = vmul.f32 %v1725_v33, %v992_v29  ;;  %vm999_vm10 = vweird.f32 %v1725_v33  ;;  %v928_v46 = vmul.f32 %v926_v45, %v921_v30 }
 0x9fa   :  { %vm1000_vm12 = vmor %vm998_vm11, %vm999_vm10 }
 0x9fb   :  { %v995_v35 = vsub.f32 1.0, %v994_v34 }
 0x9fd   :  { %v996_v36 = vmul.f32 %v1725_v33, %v995_v35 }
 0x9ff   :  { %v997_v37 = vadd.f32 %v1725_v33, %v996_v36 }
 0xa01   :  { %v1001_v40 = vsel %vm1000_vm12, %v1725_v33, %v997_v37 }
 0xa02   :  { %v1006_v42 = vsel %vm1003_vm13, %v1005_v41, %v1001_v40 }
 0xa37   :  { %v931_v31 = vpop.permute.xlu0 %930 }
 0xa38   :  { %v933_v32 = vmul.f32 %v931_v31, %v921_v30 }
 0xa3a   :  { %935 = vrot.lane.b32.xlu1 %v933_v32, %s1779_s11 }
 0xa3f   :  { %v1011_v49 = vpop.permute.xlu0 %1010 }
 0xa40   :  { %v1013_v50 = vmul.f32 %v1011_v49, %v1006_v42 }
 0xa57   :  { %v1016_v43 = vpop.permute.xlu1 %1015 }
 0xa58   :  { %v1018_v44 = vmul.f32 %v1016_v43, %v1006_v42 }
 0xa5a   :  { %1020 = vrot.lane.b32.xlu2 %v1018_v44, %s1779_s11 }
 0xaac   :  { %v936_v47 = vpop.permute.xlu1 %935 }
 0xaad   :  { %v938_v48 = vadd.f32 %v936_v47, %v928_v46 }
 0xaaf   :  { %1726 = vtanh.f32 %v938_v48 }
 0xab4   :  { %v1021_v51 = vpop.permute.xlu2 %1020 }
 0xab5   :  { %v1727_v52 = vpop.eup %1726  ;;  %v1023_v53 = vadd.f32 %v1021_v51, %v1013_v50 }
 0xab6   :  { %941 = vrot.lane.b32.xlu0 %v1727_v52, %s1780_s14 }
 0xab7   :  { %1728 = vtanh.f32 %v1023_v53 }
 0xabd   :  { %v1729_v54 = vpop.eup %1728 }
 0xabe   :  { %1026 = vrot.lane.b32.xlu1 %v1729_v54, %s1780_s14 }
 0xac6   :  { %951 = vrot.lane.b32.xlu1 %v938_v48, %s1781_s15 }
 0xb28   :  { %v942_v55 = vpop.permute.xlu0 %941 }
 0xb29   :  { %v944_v56 = vmul.f32 %v942_v55, %v921_v30 }
 0xb2b   :  { %946 = vrot.lane.b32.xlu2 %v944_v56, %s1779_s11 }
 0xb30   :  { %v1027_v57 = vpop.permute.xlu1 %1026 }
 0xb31   :  { %v1029_v58 = vmul.f32 %v1027_v57, %v1006_v42 }
 0xb33   :  { %1031 = vrot.lane.b32.xlu0 %v1029_v58, %s1779_s11  ;;  %1036 = vrot.lane.b32.xlu2 %v1023_v53, %s1781_s15 }
 0xb38   :  { %v952_v59 = vpop.permute.xlu1 %951 }
 0xb39   :  { %954 = vst.msk [vmem:[#allocation3] sm:$0x3] %vm187_vm0, %v952_v59 }
 0xb40   :  { %v1073_v60 = vld [vmem:[#allocation3] sm:$0x3] }
 0xb41   :  { %1095 = vrot.lane.b32.xlu2 %v1073_v60, %s1779_s11 }
 0xb85   :  { %v947_v1 = vpop.permute.xlu2 %946 }
 0xb86   :  { %949 = vst.msk [vmem:[#allocation2] sm:$0x3] %vm187_vm0, %v947_v1 }
 0xb87   :  { %1625 = vst.msk [vmem:[%s2124_s4 + $0x8] sm:$0x3] %vm187_vm0, %v947_v1 }
 0xb8d   :  { %v1037_v6 = vpop.permute.xlu2 %1036  ;;  %v1044_v7 = vld [vmem:[#allocation2] sm:$0x3] }
 0xb8e   :  { %1039 = vst.msk [vmem:[#allocation5] sm:$0x3] %vm187_vm0, %v1037_v6  ;;  %1629 = vmatmul.msk.f32.vlgmr.msra.gmra.mxu2 %vm198_vm1, %v1044_v7  ;;  %v41_v6 = vld [vmem:[%s2120_s0 + $0x18] sm:$0x3] }
 0xb8f   :  { %42 = vst [vmem:[#allocation6 + $0xc] sm:$0x3] %v41_v6 }
 0xb95   :  { %v1158_v16 = vld [vmem:[#allocation5] sm:$0x3] }
 0xb9b   :  { %v1096_v51 = vpop.permute.xlu2 %1095 }
 0xba5   :  { %v1032_v9 = vpop.permute.xlu0 %1031 }
 0xba6   :  { %1034 = vst.msk [vmem:[#allocation4] sm:$0x3] %vm187_vm0, %v1032_v9 }
 0xba7   :  { %1628 = vst.msk [vmem:[%s2125_s5 + $0x6] sm:$0x3] %vm187_vm0, %v1032_v9  ;;  %v1593_v9 = vld [vmem:[%s2121_s1 + $0x6] sm:$0x3] }
 0xba8   :  { %109 = vst [vmem:[#allocation7 + $0x2] sm:$0x3] %v1593_v9 }
 0xbad   :  { %v1129_v10 = vld [vmem:[#allocation4] sm:$0x3] }
 0xbae   :  { %1632 = vmatmul.msk.f32.vlgmr.msra.gmra.mxu3 %vm198_vm1, %v1129_v10  ;;  %v1213_v10 = vld [vmem:[#allocation6 + $0xc] sm:$0x3] }
 0xc11   :  { %v1069_v13 = vpop.f32.mrf.mxu2 }
 0xc12   :  { %v1072_v14 = vadd.f32 %v1069_v13, %v1043_v12 }
 0xc14   :  { %1730 = vtanh.f32 %v1072_v14  ;;  %v1630_v21 = vmul.f32 -1.442695, %v1072_v14 }
 0xc1a   :  { %v1731_v15 = vpop.eup %1730 }
 0xc1b   :  { %1100 = vrot.lane.b32.xlu0 %v1731_v15, %s1780_s14  ;;  %v1298_v15 = vld [vmem:[#allocation7 + $0x2] sm:$0x3] }
 0xc23   :  { %1180 = vrot.lane.b32.xlu0 %v1158_v16, %s1779_s11 }
 0xc31   :  { %v1154_v18 = vpop.f32.mrf.mxu3 }
 0xc32   :  { %v1157_v19 = vadd.f32 %v1154_v18, %v1128_v17 }
 0xc34   :  { %1732 = vtanh.f32 %v1157_v19  ;;  %v1633_v27 = vmul.f32 -1.442695, %v1157_v19 }
 0xc35   :  { %1734 = vpow2.f32 %v1630_v21 }
 0xc3a   :  { %v1733_v20 = vpop.eup %1732 }
 0xc3b   :  { %1185 = vrot.lane.b32.xlu1 %v1733_v20, %s1780_s14  ;;  %v1735_v22 = vpop.eup %1734 }
 0xc3c   :  { %v1077_v23 = vadd.f32 1.0, %v1735_v22 }
 0xc3e   :  { %1736 = vrcp.f32 %v1077_v23  ;;  %v1089_v30 = vand.u32 2147483648, %v1077_v23  ;;  %vm1083_vm15 = vweird.f32 %v1077_v23  ;;  %v1087_v31 = vand.u32 2147483647, %v1077_v23 }
 0xc3f   :  { %1738 = vpow2.f32 %v1633_v27 }
 0xc40   :  { %v1090_v34 = vor.u32 1.1754944e-38, %v1089_v30  ;;  %vm1088_vm3 = vcmp.eq.f32.partialorder %v1087_v31, 8.507059e+37 }
 0xc44   :  { %v1737_v24 = vpop.eup %1736 }
 0xc45   :  { %v1079_v25 = vmul.f32 %v1737_v24, %v1077_v23  ;;  %vm1084_vm14 = vweird.f32 %v1737_v24  ;;  %v1739_v32 = vpop.eup %1738 }
 0xc46   :  { %vm1085_vm2 = vmor %vm1083_vm15, %vm1084_vm14  ;;  %v1162_v35 = vadd.f32 1.0, %v1739_v32 }
 0xc47   :  { %v1080_v26 = vsub.f32 1.0, %v1079_v25 }
 0xc48   :  { %1740 = vrcp.f32 %v1162_v35  ;;  %v1174_v44 = vand.u32 2147483648, %v1162_v35  ;;  %vm1168_vm5 = vweird.f32 %v1162_v35  ;;  %v1172_v45 = vand.u32 2147483647, %v1162_v35 }
 0xc49   :  { %v1081_v28 = vmul.f32 %v1737_v24, %v1080_v26 }
 0xc4a   :  { %v1175_v47 = vor.u32 1.1754944e-38, %v1174_v44  ;;  %vm1173_vm7 = vcmp.eq.f32.partialorder %v1172_v45, 8.507059e+37 }
 0xc4b   :  { %v1082_v29 = vadd.f32 %v1737_v24, %v1081_v28 }
 0xc4d   :  { %v1086_v33 = vsel %vm1085_vm2, %v1737_v24, %v1082_v29 }
 0xc4e   :  { %v1091_v36 = vsel %vm1088_vm3, %v1090_v34, %v1086_v33  ;;  %v1741_v39 = vpop.eup %1740 }
 0xc4f   :  { %v1164_v40 = vmul.f32 %v1741_v39, %v1162_v35  ;;  %vm1169_vm4 = vweird.f32 %v1741_v39  ;;  %v1098_v52 = vmul.f32 %v1096_v51, %v1091_v36 }
 0xc50   :  { %vm1170_vm6 = vmor %vm1168_vm5, %vm1169_vm4 }
 0xc51   :  { %v1165_v41 = vsub.f32 1.0, %v1164_v40 }
 0xc53   :  { %v1166_v42 = vmul.f32 %v1741_v39, %v1165_v41 }
 0xc55   :  { %v1167_v43 = vadd.f32 %v1741_v39, %v1166_v42 }
 0xc57   :  { %v1171_v46 = vsel %vm1170_vm6, %v1741_v39, %v1167_v43 }
 0xc58   :  { %v1176_v48 = vsel %vm1173_vm7, %v1175_v47, %v1171_v46 }
 0xc8d   :  { %v1101_v37 = vpop.permute.xlu0 %1100 }
 0xc8e   :  { %v1103_v38 = vmul.f32 %v1101_v37, %v1091_v36 }
 0xc90   :  { %1105 = vrot.lane.b32.xlu1 %v1103_v38, %s1779_s11 }
 0xc95   :  { %v1181_v55 = vpop.permute.xlu0 %1180 }
 0xc96   :  { %v1183_v56 = vmul.f32 %v1181_v55, %v1176_v48 }
 0xcad   :  { %v1186_v49 = vpop.permute.xlu1 %1185 }
 0xcae   :  { %v1188_v50 = vmul.f32 %v1186_v49, %v1176_v48 }
 0xcb0   :  { %1190 = vrot.lane.b32.xlu2 %v1188_v50, %s1779_s11 }
 0xd02   :  { %v1106_v53 = vpop.permute.xlu1 %1105 }
 0xd03   :  { %v1108_v54 = vadd.f32 %v1106_v53, %v1098_v52 }
 0xd05   :  { %1742 = vtanh.f32 %v1108_v54 }
 0xd0a   :  { %v1191_v57 = vpop.permute.xlu2 %1190 }
 0xd0b   :  { %v1743_v58 = vpop.eup %1742  ;;  %v1193_v59 = vadd.f32 %v1191_v57, %v1183_v56 }
 0xd0c   :  { %1111 = vrot.lane.b32.xlu0 %v1743_v58, %s1780_s14 }
 0xd0d   :  { %1744 = vtanh.f32 %v1193_v59 }
 0xd13   :  { %v1745_v60 = vpop.eup %1744 }
 0xd14   :  { %1196 = vrot.lane.b32.xlu1 %v1745_v60, %s1780_s14 }
 0xd1c   :  { %1121 = vrot.lane.b32.xlu1 %v1108_v54, %s1781_s15 }
 0xd7e   :  { %v1112_v61 = vpop.permute.xlu0 %1111 }
 0xd7f   :  { %v1114_v62 = vmul.f32 %v1112_v61, %v1091_v36 }
 0xd81   :  { %1116 = vrot.lane.b32.xlu2 %v1114_v62, %s1779_s11 }
 0xd86   :  { %v1197_v63 = vpop.permute.xlu1 %1196 }
 0xd87   :  { %v1199_v0 = vmul.f32 %v1197_v63, %v1176_v48 }
 0xd89   :  { %1201 = vrot.lane.b32.xlu0 %v1199_v0, %s1779_s11  ;;  %1206 = vrot.lane.b32.xlu2 %v1193_v59, %s1781_s15 }
 0xd8e   :  { %v1122_v1 = vpop.permute.xlu1 %1121 }
 0xd8f   :  { %1124 = vst.msk [vmem:[#allocation3] sm:$0x3] %vm187_vm0, %v1122_v1 }
 0xd96   :  { %v1243_v2 = vld [vmem:[#allocation3] sm:$0x3] }
 0xd97   :  { %1265 = vrot.lane.b32.xlu2 %v1243_v2, %s1779_s11 }
 0xddb   :  { %v1117_v3 = vpop.permute.xlu2 %1116 }
 0xddc   :  { %1119 = vst.msk [vmem:[#allocation2] sm:$0x3] %vm187_vm0, %v1117_v3 }
 0xddd   :  { %1631 = vst.msk [vmem:[%s2124_s4 + $0xa] sm:$0x3] %vm187_vm0, %v1117_v3 }
 0xde3   :  { %v1207_v4 = vpop.permute.xlu2 %1206  ;;  %v1214_v5 = vld [vmem:[#allocation2] sm:$0x3] }
 0xde4   :  { %1209 = vst.msk [vmem:[#allocation5] sm:$0x3] %vm187_vm0, %v1207_v4  ;;  %1635 = vmatmul.msk.f32.vlgmr.msrb.gmra.mxu0 %vm198_vm1, %v1214_v5  ;;  %v43_v4 = vld [vmem:[%s2120_s0 + $0x1c] sm:$0x3] }
 0xde5   :  { %44 = vst [vmem:[#allocation6 + $0xe] sm:$0x3] %v43_v4 }
 0xdeb   :  { %v1328_v14 = vld [vmem:[#allocation5] sm:$0x3] }
 0xdf1   :  { %v1266_v49 = vpop.permute.xlu2 %1265 }
 0xdfb   :  { %v1202_v7 = vpop.permute.xlu0 %1201 }
 0xdfc   :  { %1204 = vst.msk [vmem:[#allocation4] sm:$0x3] %vm187_vm0, %v1202_v7 }
 0xdfd   :  { %1634 = vst.msk [vmem:[%s2125_s5 + $0x4] sm:$0x3] %vm187_vm0, %v1202_v7  ;;  %v1592_v7 = vld [vmem:[%s2121_s1 + $0x2] sm:$0x3] }
 0xdfe   :  { %107 = vst [vmem:[#allocation7] sm:$0x3] %v1592_v7 }
 0xe03   :  { %v1299_v8 = vld [vmem:[#allocation4] sm:$0x3] }
 0xe04   :  { %1638 = vmatmul.msk.f32.vlgmr.msrb.gmra.mxu1 %vm198_vm1, %v1299_v8  ;;  %v1383_v8 = vld [vmem:[#allocation6 + $0xe] sm:$0x3] }
 0xe61   :  { %v1239_v11 = vpop.f32.mrf.mxu0 }
 0xe62   :  { %v1242_v12 = vadd.f32 %v1239_v11, %v1213_v10 }
 0xe64   :  { %1746 = vtanh.f32 %v1242_v12  ;;  %v1636_v19 = vmul.f32 -1.442695, %v1242_v12 }
 0xe6a   :  { %v1747_v13 = vpop.eup %1746 }
 0xe6b   :  { %1270 = vrot.lane.b32.xlu0 %v1747_v13, %s1780_s14  ;;  %v1467_v13 = vld [vmem:[#allocation7] sm:$0x3] }
 0xe73   :  { %1350 = vrot.lane.b32.xlu0 %v1328_v14, %s1779_s11 }
 0xe81   :  { %v1324_v16 = vpop.f32.mrf.mxu1 }
 0xe82   :  { %v1327_v17 = vadd.f32 %v1324_v16, %v1298_v15 }
 0xe84   :  { %1748 = vtanh.f32 %v1327_v17  ;;  %v1639_v25 = vmul.f32 -1.442695, %v1327_v17 }
 0xe85   :  { %1750 = vpow2.f32 %v1636_v19 }
 0xe8a   :  { %v1749_v18 = vpop.eup %1748 }
 0xe8b   :  { %1355 = vrot.lane.b32.xlu1 %v1749_v18, %s1780_s14  ;;  %v1751_v20 = vpop.eup %1750 }
 0xe8c   :  { %v1247_v21 = vadd.f32 1.0, %v1751_v20 }
 0xe8e   :  { %1752 = vrcp.f32 %v1247_v21  ;;  %v1259_v28 = vand.u32 2147483648, %v1247_v21  ;;  %vm1253_vm9 = vweird.f32 %v1247_v21  ;;  %v1257_v29 = vand.u32 2147483647, %v1247_v21 }
 0xe8f   :  { %1754 = vpow2.f32 %v1639_v25 }
 0xe90   :  { %v1260_v32 = vor.u32 1.1754944e-38, %v1259_v28  ;;  %vm1258_vm11 = vcmp.eq.f32.partialorder %v1257_v29, 8.507059e+37 }
 0xe94   :  { %v1753_v22 = vpop.eup %1752 }
 0xe95   :  { %v1249_v23 = vmul.f32 %v1753_v22, %v1247_v21  ;;  %vm1254_vm8 = vweird.f32 %v1753_v22  ;;  %v1755_v30 = vpop.eup %1754 }
 0xe96   :  { %vm1255_vm10 = vmor %vm1253_vm9, %vm1254_vm8  ;;  %v1332_v33 = vadd.f32 1.0, %v1755_v30 }
 0xe97   :  { %v1250_v24 = vsub.f32 1.0, %v1249_v23 }
 0xe98   :  { %1756 = vrcp.f32 %v1332_v33  ;;  %v1344_v42 = vand.u32 2147483648, %v1332_v33  ;;  %vm1338_vm13 = vweird.f32 %v1332_v33  ;;  %v1342_v43 = vand.u32 2147483647, %v1332_v33 }
 0xe99   :  { %v1251_v26 = vmul.f32 %v1753_v22, %v1250_v24 }
 0xe9a   :  { %v1345_v45 = vor.u32 1.1754944e-38, %v1344_v42  ;;  %vm1343_vm15 = vcmp.eq.f32.partialorder %v1342_v43, 8.507059e+37 }
 0xe9b   :  { %v1252_v27 = vadd.f32 %v1753_v22, %v1251_v26 }
 0xe9d   :  { %v1256_v31 = vsel %vm1255_vm10, %v1753_v22, %v1252_v27 }
 0xe9e   :  { %v1261_v34 = vsel %vm1258_vm11, %v1260_v32, %v1256_v31  ;;  %v1757_v37 = vpop.eup %1756 }
 0xe9f   :  { %v1334_v38 = vmul.f32 %v1757_v37, %v1332_v33  ;;  %vm1339_vm12 = vweird.f32 %v1757_v37  ;;  %v1268_v50 = vmul.f32 %v1266_v49, %v1261_v34 }
 0xea0   :  { %vm1340_vm14 = vmor %vm1338_vm13, %vm1339_vm12 }
 0xea1   :  { %v1335_v39 = vsub.f32 1.0, %v1334_v38 }
 0xea3   :  { %v1336_v40 = vmul.f32 %v1757_v37, %v1335_v39 }
 0xea5   :  { %v1337_v41 = vadd.f32 %v1757_v37, %v1336_v40 }
 0xea7   :  { %v1341_v44 = vsel %vm1340_vm14, %v1757_v37, %v1337_v41 }
 0xea8   :  { %v1346_v46 = vsel %vm1343_vm15, %v1345_v45, %v1341_v44 }
 0xedd   :  { %v1271_v35 = vpop.permute.xlu0 %1270 }
 0xede   :  { %v1273_v36 = vmul.f32 %v1271_v35, %v1261_v34 }
 0xee0   :  { %1275 = vrot.lane.b32.xlu1 %v1273_v36, %s1779_s11 }
 0xee5   :  { %v1351_v53 = vpop.permute.xlu0 %1350 }
 0xee6   :  { %v1353_v54 = vmul.f32 %v1351_v53, %v1346_v46 }
 0xefd   :  { %v1356_v47 = vpop.permute.xlu1 %1355 }
 0xefe   :  { %v1358_v48 = vmul.f32 %v1356_v47, %v1346_v46 }
 0xf00   :  { %1360 = vrot.lane.b32.xlu2 %v1358_v48, %s1779_s11 }
 0xf52   :  { %v1276_v51 = vpop.permute.xlu1 %1275 }
 0xf53   :  { %v1278_v52 = vadd.f32 %v1276_v51, %v1268_v50 }
 0xf55   :  { %1758 = vtanh.f32 %v1278_v52 }
 0xf5a   :  { %v1361_v55 = vpop.permute.xlu2 %1360 }
 0xf5b   :  { %v1759_v56 = vpop.eup %1758  ;;  %v1363_v57 = vadd.f32 %v1361_v55, %v1353_v54 }
 0xf5c   :  { %1281 = vrot.lane.b32.xlu0 %v1759_v56, %s1780_s14 }
 0xf5d   :  { %1760 = vtanh.f32 %v1363_v57 }
 0xf63   :  { %v1761_v58 = vpop.eup %1760 }
 0xf64   :  { %1366 = vrot.lane.b32.xlu1 %v1761_v58, %s1780_s14 }
 0xf6c   :  { %1291 = vrot.lane.b32.xlu1 %v1278_v52, %s1781_s15 }
 0xfce   :  { %v1282_v59 = vpop.permute.xlu0 %1281 }
 0xfcf   :  { %v1284_v60 = vmul.f32 %v1282_v59, %v1261_v34 }
 0xfd1   :  { %1286 = vrot.lane.b32.xlu2 %v1284_v60, %s1779_s11 }
 0xfd6   :  { %v1367_v61 = vpop.permute.xlu1 %1366 }
 0xfd7   :  { %v1369_v62 = vmul.f32 %v1367_v61, %v1346_v46 }
 0xfd9   :  { %1371 = vrot.lane.b32.xlu0 %v1369_v62, %s1779_s11  ;;  %1376 = vrot.lane.b32.xlu2 %v1363_v57, %s1781_s15 }
 0xfde   :  { %v1292_v63 = vpop.permute.xlu1 %1291 }
 0xfdf   :  { %1294 = vst.msk [vmem:[#allocation3] sm:$0x3] %vm187_vm0, %v1292_v63 }
 0xfe6   :  { %v1413_v0 = vld [vmem:[#allocation3] sm:$0x3] }
 0xfe7   :  { %1435 = vrot.lane.b32.xlu2 %v1413_v0, %s1779_s11 }
0x102b   :  { %v1287_v1 = vpop.permute.xlu2 %1286 }
0x102c   :  { %1289 = vst.msk [vmem:[#allocation2] sm:$0x3] %vm187_vm0, %v1287_v1 }
0x102d   :  { %1637 = vst.msk [vmem:[%s2124_s4 + $0xc] sm:$0x3] %vm187_vm0, %v1287_v1 }
0x1033   :  { %v1377_v2 = vpop.permute.xlu2 %1376  ;;  %v1384_v3 = vld [vmem:[#allocation2] sm:$0x3] }
0x1034   :  { %1379 = vst.msk [vmem:[#allocation5] sm:$0x3] %vm187_vm0, %v1377_v2  ;;  %1641 = vmatmul.msk.f32.vlgmr.msrb.gmra.mxu2 %vm198_vm1, %v1384_v3 }
0x103b   :  { %v1497_v12 = vld [vmem:[#allocation5] sm:$0x3] }
0x1041   :  { %v1436_v47 = vpop.permute.xlu2 %1435 }
0x104b   :  { %v1372_v5 = vpop.permute.xlu0 %1371 }
0x104c   :  { %1374 = vst.msk [vmem:[#allocation4] sm:$0x3] %vm187_vm0, %v1372_v5 }
0x104d   :  { %1640 = vst.msk [vmem:[%s2125_s5 + $0x2] sm:$0x3] %vm187_vm0, %v1372_v5 }
0x1053   :  { %v1468_v6 = vld [vmem:[#allocation4] sm:$0x3] }
0x1054   :  { %1644 = vmatmul.msk.f32.vlgmr.msrb.gmra.mxu3 %vm198_vm1, %v1468_v6 }
0x10b7   :  { %v1409_v9 = vpop.f32.mrf.mxu2 }
0x10b8   :  { %v1412_v10 = vadd.f32 %v1409_v9, %v1383_v8 }
0x10ba   :  { %1762 = vtanh.f32 %v1412_v10  ;;  %v1642_v17 = vmul.f32 -1.442695, %v1412_v10 }
0x10c0   :  { %v1763_v11 = vpop.eup %1762 }
0x10c1   :  { %1440 = vrot.lane.b32.xlu0 %v1763_v11, %s1780_s14 }
0x10c9   :  { %1519 = vrot.lane.b32.xlu0 %v1497_v12, %s1779_s11 }
0x10d7   :  { %v1493_v14 = vpop.f32.mrf.mxu3 }
0x10d8   :  { %v1496_v15 = vadd.f32 %v1493_v14, %v1467_v13 }
0x10da   :  { %1764 = vtanh.f32 %v1496_v15  ;;  %v1645_v23 = vmul.f32 -1.442695, %v1496_v15 }
0x10db   :  { %1766 = vpow2.f32 %v1642_v17 }
0x10e0   :  { %v1765_v16 = vpop.eup %1764 }
0x10e1   :  { %1524 = vrot.lane.b32.xlu1 %v1765_v16, %s1780_s14  ;;  %v1767_v18 = vpop.eup %1766 }
0x10e2   :  { %v1417_v19 = vadd.f32 1.0, %v1767_v18 }
0x10e4   :  { %1768 = vrcp.f32 %v1417_v19  ;;  %v1429_v26 = vand.u32 2147483648, %v1417_v19  ;;  %vm1423_vm2 = vweird.f32 %v1417_v19  ;;  %v1427_v27 = vand.u32 2147483647, %v1417_v19 }
0x10e5   :  { %1770 = vpow2.f32 %v1645_v23 }
0x10e6   :  { %v1430_v30 = vor.u32 1.1754944e-38, %v1429_v26  ;;  %vm1428_vm4 = vcmp.eq.f32.partialorder %v1427_v27, 8.507059e+37 }
0x10ea   :  { %v1769_v20 = vpop.eup %1768 }
0x10eb   :  { %v1419_v21 = vmul.f32 %v1769_v20, %v1417_v19  ;;  %vm1424_vm1 = vweird.f32 %v1769_v20  ;;  %v1771_v28 = vpop.eup %1770 }
0x10ec   :  { %vm1425_vm3 = vmor %vm1423_vm2, %vm1424_vm1  ;;  %v1501_v31 = vadd.f32 1.0, %v1771_v28 }
0x10ed   :  { %v1420_v22 = vsub.f32 1.0, %v1419_v21 }
0x10ee   :  { %1772 = vrcp.f32 %v1501_v31  ;;  %v1513_v40 = vand.u32 2147483648, %v1501_v31  ;;  %vm1507_vm6 = vweird.f32 %v1501_v31  ;;  %v1511_v41 = vand.u32 2147483647, %v1501_v31 }
0x10ef   :  { %v1421_v24 = vmul.f32 %v1769_v20, %v1420_v22 }
0x10f0   :  { %v1514_v43 = vor.u32 1.1754944e-38, %v1513_v40  ;;  %vm1512_vm8 = vcmp.eq.f32.partialorder %v1511_v41, 8.507059e+37 }
0x10f1   :  { %v1422_v25 = vadd.f32 %v1769_v20, %v1421_v24 }
0x10f3   :  { %v1426_v29 = vsel %vm1425_vm3, %v1769_v20, %v1422_v25 }
0x10f4   :  { %v1431_v32 = vsel %vm1428_vm4, %v1430_v30, %v1426_v29  ;;  %v1773_v35 = vpop.eup %1772 }
0x10f5   :  { %v1503_v36 = vmul.f32 %v1773_v35, %v1501_v31  ;;  %vm1508_vm5 = vweird.f32 %v1773_v35  ;;  %v1438_v48 = vmul.f32 %v1436_v47, %v1431_v32 }
0x10f6   :  { %vm1509_vm7 = vmor %vm1507_vm6, %vm1508_vm5 }
0x10f7   :  { %v1504_v37 = vsub.f32 1.0, %v1503_v36 }
0x10f9   :  { %v1505_v38 = vmul.f32 %v1773_v35, %v1504_v37 }
0x10fb   :  { %v1506_v39 = vadd.f32 %v1773_v35, %v1505_v38 }
0x10fd   :  { %v1510_v42 = vsel %vm1509_vm7, %v1773_v35, %v1506_v39 }
0x10fe   :  { %v1515_v44 = vsel %vm1512_vm8, %v1514_v43, %v1510_v42 }
0x1133   :  { %v1441_v33 = vpop.permute.xlu0 %1440 }
0x1134   :  { %v1443_v34 = vmul.f32 %v1441_v33, %v1431_v32 }
0x1136   :  { %1445 = vrot.lane.b32.xlu1 %v1443_v34, %s1779_s11 }
0x113b   :  { %v1520_v51 = vpop.permute.xlu0 %1519 }
0x113c   :  { %v1522_v52 = vmul.f32 %v1520_v51, %v1515_v44 }
0x1153   :  { %v1525_v45 = vpop.permute.xlu1 %1524 }
0x1154   :  { %v1527_v46 = vmul.f32 %v1525_v45, %v1515_v44 }
0x1156   :  { %1529 = vrot.lane.b32.xlu2 %v1527_v46, %s1779_s11 }
0x11a8   :  { %v1446_v49 = vpop.permute.xlu1 %1445 }
0x11a9   :  { %v1448_v50 = vadd.f32 %v1446_v49, %v1438_v48 }
0x11ab   :  { %1774 = vtanh.f32 %v1448_v50 }
0x11b0   :  { %v1530_v53 = vpop.permute.xlu2 %1529 }
0x11b1   :  { %v1775_v54 = vpop.eup %1774  ;;  %v1532_v55 = vadd.f32 %v1530_v53, %v1522_v52 }
0x11b2   :  { %1451 = vrot.lane.b32.xlu0 %v1775_v54, %s1780_s14 }
0x11b3   :  { %1776 = vtanh.f32 %v1532_v55 }
0x11b9   :  { %v1777_v56 = vpop.eup %1776 }
0x11ba   :  { %1461 = vrot.lane.b32.xlu0 %v1448_v50, %s1781_s15  ;;  %1535 = vrot.lane.b32.xlu1 %v1777_v56, %s1780_s14 }
0x1224   :  { %v1452_v57 = vpop.permute.xlu0 %1451 }
0x1225   :  { %v1454_v58 = vmul.f32 %v1452_v57, %v1431_v32 }
0x1227   :  { %1456 = vrot.lane.b32.xlu2 %v1454_v58, %s1779_s11 }
0x122c   :  { %v1536_v59 = vpop.permute.xlu1 %1535  ;;  %v1462_v60 = vpop.permute.xlu0 %1461 }
0x122d   :  { %v1538_v61 = vmul.f32 %v1536_v59, %v1515_v44  ;;  %1464 = vst.msk [vmem:[#allocation3] sm:$0x3] %vm187_vm0, %v1462_v60 }
0x122f   :  { %1540 = vrot.lane.b32.xlu1 %v1538_v61, %s1779_s11  ;;  %1545 = vrot.lane.b32.xlu2 %v1532_v55, %s1781_s15 }
0x1281   :  { %v1457_v62 = vpop.permute.xlu2 %1456 }
0x1282   :  { %1459 = vst.msk [vmem:[#allocation2] sm:$0x3] %vm187_vm0, %v1457_v62 }
0x1283   :  { %1643 = vst.msk [vmem:[%s2124_s4 + $0xe] sm:$0x3] %vm187_vm0, %v1457_v62 }
0x1289   :  { %v1546_v63 = vpop.permute.xlu2 %1545 }
0x128a   :  { %1548 = vst.msk [vmem:[#allocation5] sm:$0x3] %vm187_vm0, %v1546_v63 }
0x12a1   :  { %v1541_v0 = vpop.permute.xlu1 %1540 }
0x12a2   :  { %1543 = vst.msk [vmem:[#allocation4] sm:$0x3] %vm187_vm0, %v1541_v0 }
0x12a3   :  { %1549 = vst.msk [vmem:[%s2125_s5] sm:$0x3] %vm187_vm0, %v1541_v0 }

// kernel: lstm_extractor_forward.3
= control target key start
LH: loop header
LB: loop body
LE: loop exit
PB: predicated region body
PF: predicated region fallthrough
CT: control target
= control target key end

     0   :  { %vm172_vm0 = vcmask 254976   ;;  %v1860_v2 = vmov 0.0   ;;  %s2178_s0 = inlined_call_operand.vmem [shape: f32[8,2,256], index: 0, kind: input, shape index: {}, may-alias: {0,1}]   ;;  %s2179_s1 = inlined_call_operand.vmem [shape: f32[8,2,256], index: 1, kind: input, shape index: {}, may-alias: {0,1}]   ;;  %s2180_s2 = inlined_call_operand.vmem [shape: f32[32,128], index: 2, kind: input, shape index: {}]   ;;  %s2181_s3 = inlined_call_operand.vmem [shape: f32[32,128], index: 3, kind: input, shape index: {}]   ;;  %s2182_s4 = inlined_call_operand.hbm [shape: f32[2,128], index: 4, kind: output, shape index: {}]  }
   0x1   :  { %v277_v0 = vld [vmem:[%s2181_s3 + $0x18] sm:$0xff]  ;;  %v276_v1 = vld [vmem:[%s2181_s3 + $0x10] sm:$0xff]  ;;  %175 = vst.msk [vmem:[#allocation4] sm:$0x3] %vm172_vm0, %v1860_v2  ;;  %v275_v5 = vld [vmem:[%s2181_s3 + $0x8] sm:$0xff] }
   0x2   :  { %293 = vmatpush.msra.mxu1 %v277_v0  ;;  %v186_v3 = vld [vmem:[%s2180_s2 + $0x18] sm:$0xff]  ;;  %v185_v4 = vld [vmem:[%s2180_s2 + $0x10] sm:$0xff]  ;;  %471 = vmatpush.msra.mxu3 %v277_v0  ;;  %173 = vst.msk [vmem:[#allocation2] sm:$0x3] %vm172_vm0, %v1860_v2  ;;  %v184_v6 = vld [vmem:[%s2180_s2 + $0x8] sm:$0xff] }
   0x3   :  { %203 = vmatpush.msra.mxu0 %v186_v3  ;;  %382 = vmatpush.msra.mxu2 %v186_v3  ;;  %174 = vst.msk [vmem:[#allocation3] sm:$0x3] %vm172_vm0, %v1860_v2 }
   0x4   :  { %294 = vmatpush.msra.mxu1 %v276_v1  ;;  %472 = vmatpush.msra.mxu3 %v276_v1 }
   0x5   :  { %9 = vsyncpa [#allocation13], 0  ;;  %v274_v7 = vld [vmem:[%s2181_s3] sm:$0xff]  ;;  %176 = vst.msk [vmem:[#allocation5] sm:$0x3] %vm172_vm0, %v1860_v2  ;;  %204 = vmatpush.msra.mxu0 %v185_v4  ;;  %383 = vmatpush.msra.mxu2 %v185_v4  ;;  %vm187_vm1 = vcmask 261120  }
   0x6   :  { %v1667_v8 = vld [vmem:[%s2179_s1 + $0x1e] sm:$0x3]  ;;  %295 = vmatpush.msra.mxu1 %v275_v5  ;;  %177 = vst.msk [vmem:[#allocation6] sm:$0x3] %vm172_vm0, %v1860_v2  ;;  %v183_v9 = vld [vmem:[%s2180_s2] sm:$0xff]  ;;  %473 = vmatpush.msra.mxu3 %v275_v5  ;;  %s1861_s7 = smov 32  }
   0x7   :  { %178 = vst.msk [vmem:[#allocation7] sm:$0x3] %vm172_vm0, %v1860_v2  ;;  %205 = vmatpush.msra.mxu0 %v184_v6  ;;  %384 = vmatpush.msra.mxu2 %v184_v6  ;;  %v28_v14 = vld [vmem:[%s2178_s0] sm:$0x3]  ;;  %s1862_s10 = smov 64   ;;  %s1863_s11 = smov 96  }
   0x8   :  { %296 = vmatpush.msra.mxu1 %v274_v7  ;;  %120 = vst [vmem:[#allocation11 + $0xe] sm:$0x3] %v1667_v8  ;;  %474 = vmatpush.msra.mxu3 %v274_v7  ;;  %v273_v10 = vld [vmem:[#allocation4] sm:$0x3] }
   0x9   :  { %206 = vmatpush.msra.mxu0 %v183_v9  ;;  %385 = vmatpush.msra.mxu2 %v183_v9  ;;  %v182_v11 = vld [vmem:[#allocation2] sm:$0x3]  ;;  %29 = vst [vmem:[#allocation10] sm:$0x3] %v28_v14 }
   0xa   :  { %1670 = vmatmul.msk.f32.vlgmr.msra.gmra.mxu1 %vm187_vm1, %v273_v10  ;;  %1668 = vmatmul.msk.f32.vlgmr.msra.gmra.mxu0 %vm187_vm1, %v182_v11  ;;  %v212_v12 = vld [vmem:[#allocation3] sm:$0x3] }
   0xb   :  { %560 = vmatpush.msrb.mxu0 %v186_v3  ;;  %649 = vmatpush.msrb.mxu1 %v277_v0 }
   0xc   :  { %v302_v13 = vld [vmem:[#allocation5] sm:$0x3]  ;;  %234 = vrot.lane.b32.xlu2 %v212_v12, %s1861_s7  ;;  %827 = vmatpush.msrb.mxu3 %v277_v0 }
   0xd   :  { %561 = vmatpush.msrb.mxu0 %v185_v4  ;;  %324 = vrot.lane.b32.xlu1 %v302_v13, %s1861_s7  ;;  %v265_v12 = vld [vmem:[#allocation6] sm:$0x3] }
   0xe   :  { %650 = vmatpush.msrb.mxu1 %v276_v1  ;;  %738 = vmatpush.msrb.mxu2 %v186_v3 }
   0xf   :  { %562 = vmatpush.msrb.mxu0 %v184_v6  ;;  %828 = vmatpush.msrb.mxu3 %v276_v1  ;;  %v272_v15 = vld [vmem:[#allocation11 + $0xe] sm:$0x3] }
  0x10   :  { %651 = vmatpush.msrb.mxu1 %v275_v5  ;;  %739 = vmatpush.msrb.mxu2 %v185_v4  ;;  %v181_v18 = vld [vmem:[#allocation10] sm:$0x3] }
  0x11   :  { %563 = vmatpush.msrb.mxu0 %v183_v9  ;;  %829 = vmatpush.msrb.mxu3 %v275_v5 }
  0x12   :  { %652 = vmatpush.msrb.mxu1 %v274_v7  ;;  %740 = vmatpush.msrb.mxu2 %v184_v6 }
  0x13   :  { %916 = vmatpush.msra.mxu0 %v186_v3  ;;  %830 = vmatpush.msrb.mxu3 %v274_v7 }
  0x14   :  { %1005 = vmatpush.msra.mxu1 %v277_v0  ;;  %741 = vmatpush.msrb.mxu2 %v183_v9 }
  0x15   :  { %917 = vmatpush.msra.mxu0 %v185_v4 }
  0x16   :  { %1006 = vmatpush.msra.mxu1 %v276_v1  ;;  %v1864_v1 = vmov -inf  }
  0x17   :  { %918 = vmatpush.msra.mxu0 %v184_v6  ;;  %180 = vst.msk [vmem:[#allocation9] sm:$0x3] %vm172_vm0, %v1864_v1  ;;  %v1666_v6 = vld [vmem:[%s2179_s1 + $0x1a] sm:$0x3] }
  0x18   :  { %1007 = vmatpush.msra.mxu1 %v275_v5  ;;  %179 = vst.msk [vmem:[#allocation8] sm:$0x3] %vm172_vm0, %v1864_v1 }
  0x19   :  { %919 = vmatpush.msra.mxu0 %v183_v9  ;;  %118 = vst [vmem:[#allocation11 + $0xc] sm:$0x3] %v1666_v6 }
  0x1a   :  { %1008 = vmatpush.msra.mxu1 %v274_v7  ;;  %v354_v7 = vld [vmem:[#allocation7] sm:$0x3] }
  0x1e   :  { %v357_v8 = vld [vmem:[#allocation9] sm:$0x3] }
  0x1f   :  { %v268_v13 = vld [vmem:[#allocation8] sm:$0x3] }
  0x66   :  { %v235_v53 = vpop.permute.xlu2 %234 }
  0x7f   :  { %v325_v57 = vpop.permute.xlu1 %324 }
  0x87   :  { %v298_v16 = vpop.f32.mrf.mxu1  ;;  %v208_v19 = vpop.f32.mrf.mxu0 }
  0x88   :  { %v301_v17 = vadd.f32 %v298_v16, %v272_v15  ;;  %v211_v20 = vadd.f32 %v208_v19, %v181_v18 }
  0x8a   :  { %1706 = vtanh.f32 %v301_v17  ;;  %v1671_v23 = vmul.f32 -1.442695, %v301_v17  ;;  %v1669_v24 = vmul.f32 -1.442695, %v211_v20 }
  0x8b   :  { %1708 = vtanh.f32 %v211_v20  ;;  %v30_v20 = vld [vmem:[%s2178_s0 + $0x4] sm:$0x3] }
  0x8c   :  { %1710 = vpow2.f32 %v1671_v23  ;;  %31 = vst [vmem:[#allocation10 + $0x2] sm:$0x3] %v30_v20 }
  0x8d   :  { %1712 = vpow2.f32 %v1669_v24 }
  0x90   :  { %v1707_v21 = vpop.eup %1706 }
  0x91   :  { %329 = vrot.lane.b32.xlu0 %v1707_v21, %s1862_s10  ;;  %v1709_v22 = vpop.eup %1708  ;;  %v450_v21 = vld [vmem:[#allocation11 + $0xc] sm:$0x3] }
  0x92   :  { %v1711_v25 = vpop.eup %1710 }
  0x93   :  { %v306_v26 = vadd.f32 1.0, %v1711_v25  ;;  %v1713_v27 = vpop.eup %1712  ;;  %v361_v24 = vld [vmem:[#allocation10 + $0x2] sm:$0x3] }
  0x94   :  { %v216_v28 = vadd.f32 1.0, %v1713_v27 }
  0x95   :  { %1714 = vrcp.f32 %v306_v26  ;;  %v318_v37 = vand.u32 2147483648, %v306_v26  ;;  %vm312_vm3 = vweird.f32 %v306_v26  ;;  %v316_v38 = vand.u32 2147483647, %v306_v26 }
  0x96   :  { %1716 = vrcp.f32 %v216_v28  ;;  %vm222_vm6 = vweird.f32 %v216_v28  ;;  %v228_v43 = vand.u32 2147483648, %v216_v28  ;;  %v226_v46 = vand.u32 2147483647, %v216_v28 }
  0x97   :  { %v319_v41 = vor.u32 1.1754944e-38, %v318_v37  ;;  %vm317_vm5 = vcmp.eq.f32.partialorder %v316_v38, 8.507059e+37 }
  0x98   :  { %v229_v48 = vor.u32 1.1754944e-38, %v228_v43  ;;  %vm227_vm9 = vcmp.eq.f32.partialorder %v226_v46, 8.507059e+37 }
  0x99   :  { %239 = vrot.lane.b32.xlu0 %v1709_v22, %s1862_s10 }
  0x9b   :  { %v1715_v29 = vpop.eup %1714 }
  0x9c   :  { %v308_v30 = vmul.f32 %v1715_v29, %v306_v26  ;;  %v1717_v32 = vpop.eup %1716  ;;  %vm313_vm2 = vweird.f32 %v1715_v29 }
  0x9d   :  { %v218_v34 = vmul.f32 %v1717_v32, %v216_v28  ;;  %vm314_vm4 = vmor %vm312_vm3, %vm313_vm2  ;;  %vm223_vm7 = vweird.f32 %v1717_v32 }
  0x9e   :  { %v309_v31 = vsub.f32 1.0, %v308_v30  ;;  %vm224_vm8 = vmor %vm222_vm6, %vm223_vm7 }
  0x9f   :  { %v219_v36 = vsub.f32 1.0, %v218_v34 }
  0xa0   :  { %v310_v33 = vmul.f32 %v1715_v29, %v309_v31 }
  0xa1   :  { %v220_v40 = vmul.f32 %v1717_v32, %v219_v36 }
  0xa2   :  { %v311_v35 = vadd.f32 %v1715_v29, %v310_v33 }
  0xa3   :  { %v221_v45 = vadd.f32 %v1717_v32, %v220_v40 }
  0xa4   :  { %v315_v39 = vsel %vm314_vm4, %v1715_v29, %v311_v35 }
  0xa5   :  { %v320_v42 = vsel %vm317_vm5, %v319_v41, %v315_v39  ;;  %v225_v49 = vsel %vm224_vm8, %v1717_v32, %v221_v45 }
  0xa6   :  { %v230_v50 = vsel %vm227_vm9, %v229_v48, %v225_v49  ;;  %v327_v59 = vmul.f32 %v325_v57, %v320_v42 }
  0xa7   :  { %v237_v54 = vmul.f32 %v235_v53, %v230_v50 }
 0x103   :  { %v330_v44 = vpop.permute.xlu0 %329 }
 0x104   :  { %v332_v47 = vmul.f32 %v330_v44, %v320_v42 }
 0x106   :  { %334 = vrot.lane.b32.xlu1 %v332_v47, %s1861_s7 }
 0x10b   :  { %v240_v51 = vpop.permute.xlu0 %239 }
 0x10c   :  { %v242_v52 = vmul.f32 %v240_v51, %v230_v50 }
 0x10e   :  { %244 = vrot.lane.b32.xlu2 %v242_v52, %s1861_s7 }
 0x168   :  { %v245_v55 = vpop.permute.xlu2 %244 }
 0x169   :  { %v247_v56 = vadd.f32 %v245_v55, %v237_v54 }
 0x16b   :  { %1718 = vtanh.f32 %v247_v56 }
 0x171   :  { %v1719_v58 = vpop.eup %1718 }
 0x172   :  { %250 = vrot.lane.b32.xlu1 %v1719_v58, %s1862_s10 }
 0x178   :  { %v335_v60 = vpop.permute.xlu1 %334 }
 0x179   :  { %v337_v61 = vadd.f32 %v335_v60, %v327_v59 }
 0x17b   :  { %1720 = vtanh.f32 %v337_v61  ;;  %350 = vrot.lane.b32.xlu1 %v337_v61, %s1863_s11 }
 0x181   :  { %v1721_v62 = vpop.eup %1720 }
 0x182   :  { %340 = vrot.lane.b32.xlu0 %v1721_v62, %s1862_s10 }
 0x1e4   :  { %v251_v63 = vpop.permute.xlu1 %250 }
 0x1e5   :  { %v253_v0 = vmul.f32 %v251_v63, %v230_v50 }
 0x1e7   :  { %255 = vrot.lane.b32.xlu0 %v253_v0, %s1861_s7 }
 0x1ed   :  { %v351_v2 = vpop.permute.xlu1 %350 }
 0x1ee   :  { %353 = vst.msk [vmem:[#allocation5] sm:$0x3] %vm172_vm0, %v351_v2 }
 0x1f4   :  { %v341_v3 = vpop.permute.xlu0 %340 }
 0x1f5   :  { %v343_v4 = vmul.f32 %v341_v3, %v320_v42  ;;  %v480_v5 = vld [vmem:[#allocation5] sm:$0x3] }
 0x1f7   :  { %345 = vrot.lane.b32.xlu2 %v343_v4, %s1861_s7 }
 0x1ff   :  { %261 = vrot.lane.b32.xlu2 %v247_v56, %s1863_s11 }
 0x207   :  { %502 = vrot.lane.b32.xlu2 %v480_v5, %s1861_s7 }
 0x251   :  { %v346_v9 = vpop.permute.xlu2 %345 }
 0x252   :  { %348 = vst.msk [vmem:[#allocation4] sm:$0x3] %vm172_vm0, %v346_v9  ;;  %v355_v10 = vadd.f32 %v354_v7, %v346_v9  ;;  %v358_v11 = vmax.f32 %v357_v8, %v346_v9 }
 0x254   :  { %356 = vst.msk [vmem:[#allocation7] sm:$0x3] %vm172_vm0, %v355_v10 }
 0x255   :  { %359 = vst.msk [vmem:[#allocation9] sm:$0x3] %vm172_vm0, %v358_v11 }
 0x259   :  { %v262_v14 = vpop.permute.xlu2 %261  ;;  %v256_v15 = vpop.permute.xlu0 %255  ;;  %v451_v16 = vld [vmem:[#allocation4] sm:$0x3] }
 0x25a   :  { %264 = vst.msk [vmem:[#allocation3] sm:$0x3] %vm172_vm0, %v262_v14  ;;  %v266_v17 = vadd.f32 %v265_v12, %v256_v15  ;;  %v269_v18 = vmax.f32 %v268_v13, %v256_v15  ;;  %1674 = vmatmul.msk.f32.vlgmr.msra.gmra.mxu3 %vm187_vm1, %v451_v16  ;;  %v1665_v12 = vld [vmem:[%s2179_s1 + $0x16] sm:$0x3] }
 0x25b   :  { %259 = vst.msk [vmem:[#allocation2] sm:$0x3] %vm172_vm0, %v256_v15  ;;  %v532_v13 = vld [vmem:[#allocation7] sm:$0x3] }
 0x25c   :  { %267 = vst.msk [vmem:[#allocation6] sm:$0x3] %vm172_vm0, %v266_v17  ;;  %v535_v14 = vld [vmem:[#allocation9] sm:$0x3] }
 0x25d   :  { %270 = vst.msk [vmem:[#allocation8] sm:$0x3] %vm172_vm0, %v269_v18 }
 0x25e   :  { %116 = vst [vmem:[#allocation11 + $0xa] sm:$0x3] %v1665_v12 }
 0x261   :  { %v391_v29 = vld [vmem:[#allocation3] sm:$0x3]  ;;  %v503_v60 = vpop.permute.xlu2 %502 }
 0x262   :  { %v362_v19 = vld [vmem:[#allocation2] sm:$0x3] }
 0x263   :  { %1672 = vmatmul.msk.f32.vlgmr.msra.gmra.mxu2 %vm187_vm1, %v362_v19  ;;  %v443_v20 = vld [vmem:[#allocation6] sm:$0x3] }
 0x2dd   :  { %v476_v22 = vpop.f32.mrf.mxu3 }
 0x2de   :  { %v479_v23 = vadd.f32 %v476_v22, %v450_v21  ;;  %v446_v21 = vld [vmem:[#allocation8] sm:$0x3] }
 0x2e0   :  { %1722 = vtanh.f32 %v479_v23  ;;  %v1675_v30 = vmul.f32 -1.442695, %v479_v23 }
 0x2e6   :  { %v1723_v25 = vpop.eup %1722  ;;  %v387_v26 = vpop.f32.mrf.mxu2 }
 0x2e7   :  { %v390_v27 = vadd.f32 %v387_v26, %v361_v24  ;;  %507 = vrot.lane.b32.xlu0 %v1723_v25, %s1862_s10  ;;  %v32_v26 = vld [vmem:[%s2178_s0 + $0x8] sm:$0x3] }
 0x2e8   :  { %33 = vst [vmem:[#allocation10 + $0x4] sm:$0x3] %v32_v26 }
 0x2e9   :  { %1724 = vtanh.f32 %v390_v27  ;;  %v1673_v31 = vmul.f32 -1.442695, %v390_v27  ;;  %v628_v27 = vld [vmem:[#allocation11 + $0xa] sm:$0x3] }
 0x2ea   :  { %1726 = vpow2.f32 %v1675_v30 }
 0x2eb   :  { %1728 = vpow2.f32 %v1673_v31 }
 0x2ef   :  { %v1725_v28 = vpop.eup %1724  ;;  %v539_v30 = vld [vmem:[#allocation10 + $0x4] sm:$0x3] }
 0x2f0   :  { %418 = vrot.lane.b32.xlu1 %v1725_v28, %s1862_s10  ;;  %v1727_v32 = vpop.eup %1726 }
 0x2f1   :  { %v484_v33 = vadd.f32 1.0, %v1727_v32  ;;  %v1729_v34 = vpop.eup %1728 }
 0x2f2   :  { %v395_v35 = vadd.f32 1.0, %v1729_v34 }
 0x2f3   :  { %1730 = vrcp.f32 %v484_v33  ;;  %v496_v43 = vand.u32 2147483648, %v484_v33  ;;  %vm490_vm11 = vweird.f32 %v484_v33  ;;  %v494_v45 = vand.u32 2147483647, %v484_v33 }
 0x2f4   :  { %1732 = vrcp.f32 %v395_v35  ;;  %v407_v53 = vand.u32 2147483648, %v395_v35  ;;  %vm401_vm15 = vweird.f32 %v395_v35  ;;  %v405_v54 = vand.u32 2147483647, %v395_v35 }
 0x2f5   :  { %v497_v47 = vor.u32 1.1754944e-38, %v496_v43  ;;  %vm495_vm13 = vcmp.eq.f32.partialorder %v494_v45, 8.507059e+37 }
 0x2f6   :  { %v408_v56 = vor.u32 1.1754944e-38, %v407_v53  ;;  %vm406_vm3 = vcmp.eq.f32.partialorder %v405_v54, 8.507059e+37 }
 0x2f8   :  { %413 = vrot.lane.b32.xlu1 %v391_v29, %s1861_s7 }
 0x2f9   :  { %v1731_v36 = vpop.eup %1730 }
 0x2fa   :  { %v486_v37 = vmul.f32 %v1731_v36, %v484_v33  ;;  %v1733_v39 = vpop.eup %1732  ;;  %vm491_vm10 = vweird.f32 %v1731_v36 }
 0x2fb   :  { %v397_v41 = vmul.f32 %v1733_v39, %v395_v35  ;;  %vm492_vm12 = vmor %vm490_vm11, %vm491_vm10  ;;  %vm402_vm14 = vweird.f32 %v1733_v39 }
 0x2fc   :  { %v487_v38 = vsub.f32 1.0, %v486_v37  ;;  %vm403_vm2 = vmor %vm401_vm15, %vm402_vm14 }
 0x2fd   :  { %v398_v44 = vsub.f32 1.0, %v397_v41 }
 0x2fe   :  { %v488_v40 = vmul.f32 %v1731_v36, %v487_v38 }
 0x2ff   :  { %v399_v48 = vmul.f32 %v1733_v39, %v398_v44 }
 0x300   :  { %v489_v42 = vadd.f32 %v1731_v36, %v488_v40 }
 0x301   :  { %v400_v52 = vadd.f32 %v1733_v39, %v399_v48 }
 0x302   :  { %v493_v46 = vsel %vm492_vm12, %v1731_v36, %v489_v42 }
 0x303   :  { %v498_v49 = vsel %vm495_vm13, %v497_v47, %v493_v46  ;;  %v404_v55 = vsel %vm403_vm2, %v1733_v39, %v400_v52 }
 0x304   :  { %v409_v57 = vsel %vm406_vm3, %v408_v56, %v404_v55  ;;  %v505_v2 = vmul.f32 %v503_v60, %v498_v49 }
 0x359   :  { %v508_v50 = vpop.permute.xlu0 %507 }
 0x35a   :  { %v510_v51 = vmul.f32 %v508_v50, %v498_v49 }
 0x35c   :  { %512 = vrot.lane.b32.xlu0 %v510_v51, %s1861_s7 }
 0x362   :  { %v419_v58 = vpop.permute.xlu1 %418 }
 0x363   :  { %v421_v59 = vmul.f32 %v419_v58, %v409_v57 }
 0x365   :  { %423 = vrot.lane.b32.xlu2 %v421_v59, %s1861_s7 }
 0x36a   :  { %v414_v61 = vpop.permute.xlu1 %413 }
 0x36b   :  { %v416_v62 = vmul.f32 %v414_v61, %v409_v57 }
 0x3bf   :  { %v424_v63 = vpop.permute.xlu2 %423 }
 0x3c0   :  { %v426_v0 = vadd.f32 %v424_v63, %v416_v62 }
 0x3c2   :  { %1734 = vtanh.f32 %v426_v0 }
 0x3c8   :  { %v1735_v1 = vpop.eup %1734 }
 0x3c9   :  { %429 = vrot.lane.b32.xlu1 %v1735_v1, %s1862_s10 }
 0x3ce   :  { %v513_v3 = vpop.permute.xlu0 %512 }
 0x3cf   :  { %v515_v4 = vadd.f32 %v513_v3, %v505_v2 }
 0x3d1   :  { %1736 = vtanh.f32 %v515_v4  ;;  %528 = vrot.lane.b32.xlu1 %v515_v4, %s1863_s11 }
 0x3d7   :  { %v1737_v5 = vpop.eup %1736 }
 0x3d8   :  { %518 = vrot.lane.b32.xlu0 %v1737_v5, %s1862_s10 }
 0x43b   :  { %v430_v6 = vpop.permute.xlu1 %429 }
 0x43c   :  { %v432_v7 = vmul.f32 %v430_v6, %v409_v57 }
 0x43e   :  { %434 = vrot.lane.b32.xlu0 %v432_v7, %s1861_s7 }
 0x443   :  { %v529_v8 = vpop.permute.xlu1 %528 }
 0x444   :  { %531 = vst.msk [vmem:[#allocation5] sm:$0x3] %vm172_vm0, %v529_v8 }
 0x44a   :  { %v519_v9 = vpop.permute.xlu0 %518 }
 0x44b   :  { %v521_v10 = vmul.f32 %v519_v9, %v498_v49  ;;  %v658_v11 = vld [vmem:[#allocation5] sm:$0x3] }
 0x44d   :  { %523 = vrot.lane.b32.xlu2 %v521_v10, %s1861_s7 }
 0x455   :  { %439 = vrot.lane.b32.xlu2 %v426_v0, %s1863_s11 }
 0x45d   :  { %680 = vrot.lane.b32.xlu2 %v658_v11, %s1861_s7 }
 0x4a7   :  { %v524_v15 = vpop.permute.xlu2 %523 }
 0x4a8   :  { %526 = vst.msk [vmem:[#allocation4] sm:$0x3] %vm172_vm0, %v524_v15  ;;  %v533_v16 = vadd.f32 %v532_v13, %v524_v15  ;;  %v536_v17 = vmax.f32 %v535_v14, %v524_v15 }
 0x4aa   :  { %534 = vst.msk [vmem:[#allocation7] sm:$0x3] %vm172_vm0, %v533_v16 }
 0x4ab   :  { %537 = vst.msk [vmem:[#allocation9] sm:$0x3] %vm172_vm0, %v536_v17 }
 0x4af   :  { %v440_v18 = vpop.permute.xlu2 %439  ;;  %v629_v19 = vld [vmem:[#allocation4] sm:$0x3] }
 0x4b0   :  { %442 = vst.msk [vmem:[#allocation3] sm:$0x3] %vm172_vm0, %v440_v18  ;;  %v435_v22 = vpop.permute.xlu0 %434  ;;  %1678 = vmatmul.msk.f32.vlgmr.msrb.gmra.mxu1 %vm187_vm1, %v629_v19  ;;  %v1664_v18 = vld [vmem:[%s2179_s1 + $0x12] sm:$0x3] }
 0x4b1   :  { %437 = vst.msk [vmem:[#allocation2] sm:$0x3] %vm172_vm0, %v435_v22  ;;  %v444_v23 = vadd.f32 %v443_v20, %v435_v22  ;;  %v447_v24 = vmax.f32 %v446_v21, %v435_v22  ;;  %v710_v19 = vld [vmem:[#allocation7] sm:$0x3] }
 0x4b2   :  { %114 = vst [vmem:[#allocation11 + $0x8] sm:$0x3] %v1664_v18  ;;  %v713_v20 = vld [vmem:[#allocation9] sm:$0x3] }
 0x4b3   :  { %445 = vst.msk [vmem:[#allocation6] sm:$0x3] %vm172_vm0, %v444_v23 }
 0x4b4   :  { %448 = vst.msk [vmem:[#allocation8] sm:$0x3] %vm172_vm0, %v447_v24 }
 0x4b7   :  { %v569_v35 = vld [vmem:[#allocation3] sm:$0x3]  ;;  %v681_v2 = vpop.permute.xlu2 %680 }
 0x4b8   :  { %v540_v25 = vld [vmem:[#allocation2] sm:$0x3] }
 0x4b9   :  { %1676 = vmatmul.msk.f32.vlgmr.msrb.gmra.mxu0 %vm187_vm1, %v540_v25 }
 0x4ba   :  { %v621_v26 = vld [vmem:[#allocation6] sm:$0x3] }
 0x52d   :  { %v654_v28 = vpop.f32.mrf.mxu1 }
 0x52e   :  { %v657_v29 = vadd.f32 %v654_v28, %v628_v27  ;;  %v624_v27 = vld [vmem:[#allocation8] sm:$0x3] }
 0x530   :  { %1738 = vtanh.f32 %v657_v29  ;;  %v1679_v36 = vmul.f32 -1.442695, %v657_v29 }
 0x536   :  { %v1739_v31 = vpop.eup %1738  ;;  %v565_v32 = vpop.f32.mrf.mxu0 }
 0x537   :  { %v568_v33 = vadd.f32 %v565_v32, %v539_v30  ;;  %685 = vrot.lane.b32.xlu0 %v1739_v31, %s1862_s10  ;;  %v34_v32 = vld [vmem:[%s2178_s0 + $0xc] sm:$0x3] }
 0x538   :  { %35 = vst [vmem:[#allocation10 + $0x6] sm:$0x3] %v34_v32 }
 0x539   :  { %1740 = vtanh.f32 %v568_v33  ;;  %v1677_v37 = vmul.f32 -1.442695, %v568_v33  ;;  %v806_v33 = vld [vmem:[#allocation11 + $0x8] sm:$0x3] }
 0x53a   :  { %1742 = vpow2.f32 %v1679_v36 }
 0x53b   :  { %1744 = vpow2.f32 %v1677_v37 }
 0x53f   :  { %v1741_v34 = vpop.eup %1740  ;;  %v717_v36 = vld [vmem:[#allocation10 + $0x6] sm:$0x3] }
 0x540   :  { %596 = vrot.lane.b32.xlu1 %v1741_v34, %s1862_s10  ;;  %v1743_v38 = vpop.eup %1742 }
 0x541   :  { %v662_v39 = vadd.f32 1.0, %v1743_v38  ;;  %v1745_v40 = vpop.eup %1744 }
 0x542   :  { %v573_v41 = vadd.f32 1.0, %v1745_v40 }
 0x543   :  { %1746 = vrcp.f32 %v662_v39  ;;  %v674_v49 = vand.u32 2147483648, %v662_v39  ;;  %vm668_vm5 = vweird.f32 %v662_v39  ;;  %v672_v51 = vand.u32 2147483647, %v662_v39 }
 0x544   :  { %1748 = vrcp.f32 %v573_v41  ;;  %v585_v59 = vand.u32 2147483648, %v573_v41  ;;  %vm579_vm9 = vweird.f32 %v573_v41  ;;  %v583_v60 = vand.u32 2147483647, %v573_v41 }
 0x545   :  { %v675_v53 = vor.u32 1.1754944e-38, %v674_v49  ;;  %vm673_vm7 = vcmp.eq.f32.partialorder %v672_v51, 8.507059e+37 }
 0x546   :  { %v586_v62 = vor.u32 1.1754944e-38, %v585_v59  ;;  %vm584_vm11 = vcmp.eq.f32.partialorder %v583_v60, 8.507059e+37 }
 0x548   :  { %591 = vrot.lane.b32.xlu1 %v569_v35, %s1861_s7 }
 0x549   :  { %v1747_v42 = vpop.eup %1746 }
 0x54a   :  { %v664_v43 = vmul.f32 %v1747_v42, %v662_v39  ;;  %v1749_v45 = vpop.eup %1748  ;;  %vm669_vm4 = vweird.f32 %v1747_v42 }
 0x54b   :  { %v575_v47 = vmul.f32 %v1749_v45, %v573_v41  ;;  %vm670_vm6 = vmor %vm668_vm5, %vm669_vm4  ;;  %vm580_vm8 = vweird.f32 %v1749_v45 }
 0x54c   :  { %v665_v44 = vsub.f32 1.0, %v664_v43  ;;  %vm581_vm10 = vmor %vm579_vm9, %vm580_vm8 }
 0x54d   :  { %v576_v50 = vsub.f32 1.0, %v575_v47 }
 0x54e   :  { %v666_v46 = vmul.f32 %v1747_v42, %v665_v44 }
 0x54f   :  { %v577_v54 = vmul.f32 %v1749_v45, %v576_v50 }
 0x550   :  { %v667_v48 = vadd.f32 %v1747_v42, %v666_v46 }
 0x551   :  { %v578_v58 = vadd.f32 %v1749_v45, %v577_v54 }
 0x552   :  { %v671_v52 = vsel %vm670_vm6, %v1747_v42, %v667_v48 }
 0x553   :  { %v676_v55 = vsel %vm673_vm7, %v675_v53, %v671_v52  ;;  %v582_v61 = vsel %vm581_vm10, %v1749_v45, %v578_v58 }
 0x554   :  { %v587_v63 = vsel %vm584_vm11, %v586_v62, %v582_v61  ;;  %v683_v8 = vmul.f32 %v681_v2, %v676_v55 }
 0x5a9   :  { %v686_v56 = vpop.permute.xlu0 %685 }
 0x5aa   :  { %v688_v57 = vmul.f32 %v686_v56, %v676_v55 }
 0x5ac   :  { %690 = vrot.lane.b32.xlu0 %v688_v57, %s1861_s7 }
 0x5b2   :  { %v597_v0 = vpop.permute.xlu1 %596 }
 0x5b3   :  { %v599_v1 = vmul.f32 %v597_v0, %v587_v63 }
 0x5b5   :  { %601 = vrot.lane.b32.xlu2 %v599_v1, %s1861_s7 }
 0x5ba   :  { %v592_v3 = vpop.permute.xlu1 %591 }
 0x5bb   :  { %v594_v4 = vmul.f32 %v592_v3, %v587_v63 }
 0x60f   :  { %v602_v5 = vpop.permute.xlu2 %601 }
 0x610   :  { %v604_v6 = vadd.f32 %v602_v5, %v594_v4 }
 0x612   :  { %1750 = vtanh.f32 %v604_v6 }
 0x618   :  { %v1751_v7 = vpop.eup %1750 }
 0x619   :  { %607 = vrot.lane.b32.xlu1 %v1751_v7, %s1862_s10 }
 0x61e   :  { %v691_v9 = vpop.permute.xlu0 %690 }
 0x61f   :  { %v693_v10 = vadd.f32 %v691_v9, %v683_v8 }
 0x621   :  { %1752 = vtanh.f32 %v693_v10  ;;  %706 = vrot.lane.b32.xlu1 %v693_v10, %s1863_s11 }
 0x627   :  { %v1753_v11 = vpop.eup %1752 }
 0x628   :  { %696 = vrot.lane.b32.xlu0 %v1753_v11, %s1862_s10 }
 0x68b   :  { %v608_v12 = vpop.permute.xlu1 %607 }
 0x68c   :  { %v610_v13 = vmul.f32 %v608_v12, %v587_v63 }
 0x68e   :  { %612 = vrot.lane.b32.xlu0 %v610_v13, %s1861_s7 }
 0x693   :  { %v707_v14 = vpop.permute.xlu1 %706 }
 0x694   :  { %709 = vst.msk [vmem:[#allocation5] sm:$0x3] %vm172_vm0, %v707_v14 }
 0x69a   :  { %v697_v15 = vpop.permute.xlu0 %696 }
 0x69b   :  { %v699_v16 = vmul.f32 %v697_v15, %v676_v55  ;;  %v836_v17 = vld [vmem:[#allocation5] sm:$0x3] }
 0x69d   :  { %701 = vrot.lane.b32.xlu2 %v699_v16, %s1861_s7 }
 0x6a5   :  { %617 = vrot.lane.b32.xlu2 %v604_v6, %s1863_s11 }
 0x6ad   :  { %858 = vrot.lane.b32.xlu2 %v836_v17, %s1861_s7 }
 0x6f7   :  { %v702_v21 = vpop.permute.xlu2 %701 }
 0x6f8   :  { %704 = vst.msk [vmem:[#allocation4] sm:$0x3] %vm172_vm0, %v702_v21  ;;  %v711_v22 = vadd.f32 %v710_v19, %v702_v21  ;;  %v714_v23 = vmax.f32 %v713_v20, %v702_v21 }
 0x6fa   :  { %712 = vst.msk [vmem:[#allocation7] sm:$0x3] %vm172_vm0, %v711_v22 }
 0x6fb   :  { %715 = vst.msk [vmem:[#allocation9] sm:$0x3] %vm172_vm0, %v714_v23 }
 0x6ff   :  { %v618_v24 = vpop.permute.xlu2 %617  ;;  %v807_v25 = vld [vmem:[#allocation4] sm:$0x3] }
 0x700   :  { %620 = vst.msk [vmem:[#allocation3] sm:$0x3] %vm172_vm0, %v618_v24  ;;  %v613_v28 = vpop.permute.xlu0 %612  ;;  %1682 = vmatmul.msk.f32.vlgmr.msrb.gmra.mxu3 %vm187_vm1, %v807_v25  ;;  %v1663_v24 = vld [vmem:[%s2179_s1 + $0xe] sm:$0x3] }
 0x701   :  { %615 = vst.msk [vmem:[#allocation2] sm:$0x3] %vm172_vm0, %v613_v28  ;;  %v622_v29 = vadd.f32 %v621_v26, %v613_v28  ;;  %v625_v30 = vmax.f32 %v624_v27, %v613_v28  ;;  %v888_v25 = vld [vmem:[#allocation7] sm:$0x3] }
 0x702   :  { %112 = vst [vmem:[#allocation11 + $0x6] sm:$0x3] %v1663_v24  ;;  %v891_v26 = vld [vmem:[#allocation9] sm:$0x3] }
 0x703   :  { %623 = vst.msk [vmem:[#allocation6] sm:$0x3] %vm172_vm0, %v622_v29 }
 0x704   :  { %626 = vst.msk [vmem:[#allocation8] sm:$0x3] %vm172_vm0, %v625_v30 }
 0x707   :  { %v747_v41 = vld [vmem:[#allocation3] sm:$0x3]  ;;  %v859_v8 = vpop.permute.xlu2 %858 }
 0x708   :  { %v718_v31 = vld [vmem:[#allocation2] sm:$0x3] }
 0x709   :  { %1680 = vmatmul.msk.f32.vlgmr.msrb.gmra.mxu2 %vm187_vm1, %v718_v31 }
 0x70a   :  { %v799_v32 = vld [vmem:[#allocation6] sm:$0x3] }
 0x783   :  { %v832_v34 = vpop.f32.mrf.mxu3 }
 0x784   :  { %v835_v35 = vadd.f32 %v832_v34, %v806_v33  ;;  %v802_v33 = vld [vmem:[#allocation8] sm:$0x3] }
 0x786   :  { %1754 = vtanh.f32 %v835_v35  ;;  %v1683_v42 = vmul.f32 -1.442695, %v835_v35 }
 0x78c   :  { %v1755_v37 = vpop.eup %1754  ;;  %v743_v38 = vpop.f32.mrf.mxu2 }
 0x78d   :  { %v746_v39 = vadd.f32 %v743_v38, %v717_v36  ;;  %863 = vrot.lane.b32.xlu0 %v1755_v37, %s1862_s10  ;;  %v36_v38 = vld [vmem:[%s2178_s0 + $0x10] sm:$0x3] }
 0x78e   :  { %37 = vst [vmem:[#allocation10 + $0x8] sm:$0x3] %v36_v38  ;;  %v1662_v38 = vld [vmem:[%s2179_s1 + $0xa] sm:$0x3] }
 0x78f   :  { %1756 = vtanh.f32 %v746_v39  ;;  %v1681_v43 = vmul.f32 -1.442695, %v746_v39  ;;  %v984_v39 = vld [vmem:[#allocation11 + $0x6] sm:$0x3]  ;;  %110 = vst [vmem:[#allocation11 + $0x4] sm:$0x3] %v1662_v38 }
 0x790   :  { %1758 = vpow2.f32 %v1683_v42 }
 0x791   :  { %1760 = vpow2.f32 %v1681_v43 }
 0x795   :  { %v1757_v40 = vpop.eup %1756  ;;  %v895_v42 = vld [vmem:[#allocation10 + $0x8] sm:$0x3] }
 0x796   :  { %774 = vrot.lane.b32.xlu1 %v1757_v40, %s1862_s10  ;;  %v1759_v44 = vpop.eup %1758 }
 0x797   :  { %v840_v45 = vadd.f32 1.0, %v1759_v44  ;;  %v1761_v46 = vpop.eup %1760 }
 0x798   :  { %v751_v47 = vadd.f32 1.0, %v1761_v46 }
 0x799   :  { %1762 = vrcp.f32 %v840_v45  ;;  %v852_v55 = vand.u32 2147483648, %v840_v45  ;;  %vm846_vm13 = vweird.f32 %v840_v45  ;;  %v850_v57 = vand.u32 2147483647, %v840_v45 }
 0x79a   :  { %1764 = vrcp.f32 %v751_v47  ;;  %v763_v1 = vand.u32 2147483648, %v751_v47  ;;  %vm757_vm3 = vweird.f32 %v751_v47  ;;  %v761_v2 = vand.u32 2147483647, %v751_v47 }
 0x79b   :  { %v853_v59 = vor.u32 1.1754944e-38, %v852_v55  ;;  %vm851_vm15 = vcmp.eq.f32.partialorder %v850_v57, 8.507059e+37 }
 0x79c   :  { %v764_v4 = vor.u32 1.1754944e-38, %v763_v1  ;;  %vm762_vm5 = vcmp.eq.f32.partialorder %v761_v2, 8.507059e+37 }
 0x79e   :  { %769 = vrot.lane.b32.xlu1 %v747_v41, %s1861_s7 }
 0x79f   :  { %v1763_v48 = vpop.eup %1762 }
 0x7a0   :  { %v842_v49 = vmul.f32 %v1763_v48, %v840_v45  ;;  %v1765_v51 = vpop.eup %1764  ;;  %vm847_vm12 = vweird.f32 %v1763_v48 }
 0x7a1   :  { %v753_v53 = vmul.f32 %v1765_v51, %v751_v47  ;;  %vm848_vm14 = vmor %vm846_vm13, %vm847_vm12  ;;  %vm758_vm2 = vweird.f32 %v1765_v51 }
 0x7a2   :  { %v843_v50 = vsub.f32 1.0, %v842_v49  ;;  %vm759_vm4 = vmor %vm757_vm3, %vm758_vm2 }
 0x7a3   :  { %v754_v56 = vsub.f32 1.0, %v753_v53 }
 0x7a4   :  { %v844_v52 = vmul.f32 %v1763_v48, %v843_v50 }
 0x7a5   :  { %v755_v60 = vmul.f32 %v1765_v51, %v754_v56 }
 0x7a6   :  { %v845_v54 = vadd.f32 %v1763_v48, %v844_v52 }
 0x7a7   :  { %v756_v0 = vadd.f32 %v1765_v51, %v755_v60 }
 0x7a8   :  { %v849_v58 = vsel %vm848_vm14, %v1763_v48, %v845_v54 }
 0x7a9   :  { %v854_v61 = vsel %vm851_vm15, %v853_v59, %v849_v58  ;;  %v760_v3 = vsel %vm759_vm4, %v1765_v51, %v756_v0 }
 0x7aa   :  { %v765_v5 = vsel %vm762_vm5, %v764_v4, %v760_v3  ;;  %v861_v14 = vmul.f32 %v859_v8, %v854_v61 }
 0x7ff   :  { %v864_v62 = vpop.permute.xlu0 %863 }
 0x800   :  { %v866_v63 = vmul.f32 %v864_v62, %v854_v61 }
 0x802   :  { %868 = vrot.lane.b32.xlu0 %v866_v63, %s1861_s7 }
 0x808   :  { %v775_v6 = vpop.permute.xlu1 %774 }
 0x809   :  { %v777_v7 = vmul.f32 %v775_v6, %v765_v5 }
 0x80b   :  { %779 = vrot.lane.b32.xlu2 %v777_v7, %s1861_s7 }
 0x810   :  { %v770_v9 = vpop.permute.xlu1 %769 }
 0x811   :  { %v772_v10 = vmul.f32 %v770_v9, %v765_v5 }
 0x865   :  { %v780_v11 = vpop.permute.xlu2 %779 }
 0x866   :  { %v782_v12 = vadd.f32 %v780_v11, %v772_v10 }
 0x868   :  { %1766 = vtanh.f32 %v782_v12 }
 0x86e   :  { %v1767_v13 = vpop.eup %1766 }
 0x86f   :  { %785 = vrot.lane.b32.xlu1 %v1767_v13, %s1862_s10 }
 0x874   :  { %v869_v15 = vpop.permute.xlu0 %868 }
 0x875   :  { %v871_v16 = vadd.f32 %v869_v15, %v861_v14 }
 0x877   :  { %1768 = vtanh.f32 %v871_v16  ;;  %884 = vrot.lane.b32.xlu1 %v871_v16, %s1863_s11 }
 0x87d   :  { %v1769_v17 = vpop.eup %1768 }
 0x87e   :  { %874 = vrot.lane.b32.xlu0 %v1769_v17, %s1862_s10 }
 0x8e1   :  { %v786_v18 = vpop.permute.xlu1 %785 }
 0x8e2   :  { %v788_v19 = vmul.f32 %v786_v18, %v765_v5 }
 0x8e4   :  { %790 = vrot.lane.b32.xlu0 %v788_v19, %s1861_s7 }
 0x8e9   :  { %v885_v20 = vpop.permute.xlu1 %884 }
 0x8ea   :  { %887 = vst.msk [vmem:[#allocation5] sm:$0x3] %vm172_vm0, %v885_v20 }
 0x8f0   :  { %v875_v21 = vpop.permute.xlu0 %874 }
 0x8f1   :  { %v877_v22 = vmul.f32 %v875_v21, %v854_v61  ;;  %v1014_v23 = vld [vmem:[#allocation5] sm:$0x3] }
 0x8f3   :  { %879 = vrot.lane.b32.xlu2 %v877_v22, %s1861_s7 }
 0x8fb   :  { %795 = vrot.lane.b32.xlu2 %v782_v12, %s1863_s11 }
 0x903   :  { %1036 = vrot.lane.b32.xlu2 %v1014_v23, %s1861_s7 }
 0x94d   :  { %v880_v27 = vpop.permute.xlu2 %879 }
 0x94e   :  { %882 = vst.msk [vmem:[#allocation4] sm:$0x3] %vm172_vm0, %v880_v27  ;;  %v889_v28 = vadd.f32 %v888_v25, %v880_v27  ;;  %v892_v29 = vmax.f32 %v891_v26, %v880_v27 }
 0x950   :  { %890 = vst.msk [vmem:[#allocation7] sm:$0x3] %vm172_vm0, %v889_v28 }
 0x951   :  { %893 = vst.msk [vmem:[#allocation9] sm:$0x3] %vm172_vm0, %v892_v29 }
 0x955   :  { %v796_v30 = vpop.permute.xlu2 %795  ;;  %v985_v31 = vld [vmem:[#allocation4] sm:$0x3] }
 0x956   :  { %798 = vst.msk [vmem:[#allocation3] sm:$0x3] %vm172_vm0, %v796_v30  ;;  %v791_v34 = vpop.permute.xlu0 %790  ;;  %1686 = vmatmul.msk.f32.vlgmr.msra.gmra.mxu1 %vm187_vm1, %v985_v31  ;;  %v1167_v30 = vld [vmem:[%s2181_s3 + $0x18] sm:$0xff]  ;;  %v1166_v31 = vld [vmem:[%s2181_s3 + $0x10] sm:$0xff] }
 0x957   :  { %793 = vst.msk [vmem:[#allocation2] sm:$0x3] %vm172_vm0, %v791_v34  ;;  %v800_v35 = vadd.f32 %v799_v32, %v791_v34  ;;  %v803_v36 = vmax.f32 %v802_v33, %v791_v34  ;;  %1183 = vmatpush.msra.mxu3 %v1167_v30  ;;  %1361 = vmatpush.msrb.mxu1 %v1167_v30  ;;  %v1165_v32 = vld [vmem:[%s2181_s3 + $0x8] sm:$0xff]  ;;  %v1164_v33 = vld [vmem:[%s2181_s3] sm:$0xff]  ;;  %v1078_v34 = vld [vmem:[%s2180_s2 + $0x18] sm:$0xff] }
 0x958   :  { %1094 = vmatpush.msra.mxu2 %v1078_v34  ;;  %1272 = vmatpush.msrb.mxu0 %v1078_v34 }
 0x959   :  { %801 = vst.msk [vmem:[#allocation6] sm:$0x3] %vm172_vm0, %v800_v35  ;;  %1184 = vmatpush.msra.mxu3 %v1166_v31  ;;  %1362 = vmatpush.msrb.mxu1 %v1166_v31  ;;  %v1077_v35 = vld [vmem:[%s2180_s2 + $0x10] sm:$0xff] }
 0x95a   :  { %804 = vst.msk [vmem:[#allocation8] sm:$0x3] %vm172_vm0, %v803_v36  ;;  %v1076_v36 = vld [vmem:[%s2180_s2 + $0x8] sm:$0xff]  ;;  %1095 = vmatpush.msra.mxu2 %v1077_v35  ;;  %1273 = vmatpush.msrb.mxu0 %v1077_v35 }
 0x95b   :  { %1185 = vmatpush.msra.mxu3 %v1165_v32  ;;  %1363 = vmatpush.msrb.mxu1 %v1165_v32 }
 0x95c   :  { %1096 = vmatpush.msra.mxu2 %v1076_v36  ;;  %1274 = vmatpush.msrb.mxu0 %v1076_v36 }
 0x95d   :  { %v925_v47 = vld [vmem:[#allocation3] sm:$0x3]  ;;  %v1037_v14 = vpop.permute.xlu2 %1036  ;;  %1186 = vmatpush.msra.mxu3 %v1164_v33  ;;  %1364 = vmatpush.msrb.mxu1 %v1164_v33 }
 0x95e   :  { %v896_v37 = vld [vmem:[#allocation2] sm:$0x3] }
 0x95f   :  { %1684 = vmatmul.msk.f32.vlgmr.msra.gmra.mxu0 %vm187_vm1, %v896_v37  ;;  %1538 = vmatpush.msrb.mxu3 %v1167_v30  ;;  %v1075_v37 = vld [vmem:[%s2180_s2] sm:$0xff] }
 0x960   :  { %1097 = vmatpush.msra.mxu2 %v1075_v37  ;;  %1275 = vmatpush.msrb.mxu0 %v1075_v37 }
 0x961   :  { %1539 = vmatpush.msrb.mxu3 %v1166_v31 }
 0x962   :  { %1450 = vmatpush.msrb.mxu2 %v1078_v34 }
 0x963   :  { %1540 = vmatpush.msrb.mxu3 %v1165_v32 }
 0x964   :  { %1451 = vmatpush.msrb.mxu2 %v1077_v35 }
 0x965   :  { %1541 = vmatpush.msrb.mxu3 %v1164_v33 }
 0x966   :  { %1452 = vmatpush.msrb.mxu2 %v1076_v36 }
 0x968   :  { %1453 = vmatpush.msrb.mxu2 %v1075_v37 }
 0x9d3   :  { %v1010_v40 = vpop.f32.mrf.mxu1 }
 0x9d4   :  { %v1013_v41 = vadd.f32 %v1010_v40, %v984_v39  ;;  %v1066_v39 = vld [vmem:[#allocation7] sm:$0x3]  ;;  %v1069_v40 = vld [vmem:[#allocation9] sm:$0x3] }
 0x9d6   :  { %1770 = vtanh.f32 %v1013_v41  ;;  %v1687_v48 = vmul.f32 -1.442695, %v1013_v41 }
 0x9dc   :  { %v1771_v43 = vpop.eup %1770  ;;  %v921_v44 = vpop.f32.mrf.mxu0 }
 0x9dd   :  { %v924_v45 = vadd.f32 %v921_v44, %v895_v42  ;;  %1041 = vrot.lane.b32.xlu0 %v1771_v43, %s1862_s10 }
 0x9df   :  { %1772 = vtanh.f32 %v924_v45  ;;  %v1685_v49 = vmul.f32 -1.442695, %v924_v45 }
 0x9e0   :  { %1774 = vpow2.f32 %v1687_v48 }
 0x9e1   :  { %1776 = vpow2.f32 %v1685_v49 }
 0x9e5   :  { %v1773_v46 = vpop.eup %1772 }
 0x9e6   :  { %952 = vrot.lane.b32.xlu1 %v1773_v46, %s1862_s10  ;;  %v1775_v50 = vpop.eup %1774  ;;  %v977_v46 = vld [vmem:[#allocation6] sm:$0x3] }
 0x9e7   :  { %v1018_v51 = vadd.f32 1.0, %v1775_v50  ;;  %v1777_v52 = vpop.eup %1776 }
 0x9e8   :  { %v929_v53 = vadd.f32 1.0, %v1777_v52  ;;  %v38_v52 = vld [vmem:[%s2178_s0 + $0x14] sm:$0x3] }
 0x9e9   :  { %1778 = vrcp.f32 %v1018_v51  ;;  %v1030_v61 = vand.u32 2147483648, %v1018_v51  ;;  %vm1024_vm7 = vweird.f32 %v1018_v51  ;;  %v1028_v63 = vand.u32 2147483647, %v1018_v51  ;;  %39 = vst [vmem:[#allocation10 + $0xa] sm:$0x3] %v38_v52 }
 0x9ea   :  { %1780 = vrcp.f32 %v929_v53  ;;  %v941_v7 = vand.u32 2147483648, %v929_v53  ;;  %vm935_vm11 = vweird.f32 %v929_v53  ;;  %v939_v8 = vand.u32 2147483647, %v929_v53 }
 0x9eb   :  { %v1031_v1 = vor.u32 1.1754944e-38, %v1030_v61  ;;  %vm1029_vm9 = vcmp.eq.f32.partialorder %v1028_v63, 8.507059e+37 }
 0x9ec   :  { %v942_v10 = vor.u32 1.1754944e-38, %v941_v7  ;;  %vm940_vm13 = vcmp.eq.f32.partialorder %v939_v8, 8.507059e+37 }
 0x9ee   :  { %947 = vrot.lane.b32.xlu1 %v925_v47, %s1861_s7  ;;  %v980_v47 = vld [vmem:[#allocation8] sm:$0x3] }
 0x9ef   :  { %v1779_v54 = vpop.eup %1778 }
 0x9f0   :  { %v1020_v55 = vmul.f32 %v1779_v54, %v1018_v51  ;;  %v1781_v57 = vpop.eup %1780  ;;  %vm1025_vm6 = vweird.f32 %v1779_v54 }
 0x9f1   :  { %v931_v59 = vmul.f32 %v1781_v57, %v929_v53  ;;  %vm1026_vm8 = vmor %vm1024_vm7, %vm1025_vm6  ;;  %vm936_vm10 = vweird.f32 %v1781_v57  ;;  %v1162_v53 = vld [vmem:[#allocation11 + $0x4] sm:$0x3] }
 0x9f2   :  { %v1021_v56 = vsub.f32 1.0, %v1020_v55  ;;  %vm937_vm12 = vmor %vm935_vm11, %vm936_vm10 }
 0x9f3   :  { %v932_v62 = vsub.f32 1.0, %v931_v59 }
 0x9f4   :  { %v1022_v58 = vmul.f32 %v1779_v54, %v1021_v56  ;;  %v1073_v56 = vld [vmem:[#allocation10 + $0xa] sm:$0x3] }
 0x9f5   :  { %v933_v2 = vmul.f32 %v1781_v57, %v932_v62 }
 0x9f6   :  { %v1023_v60 = vadd.f32 %v1779_v54, %v1022_v58 }
 0x9f7   :  { %v934_v6 = vadd.f32 %v1781_v57, %v933_v2 }
 0x9f8   :  { %v1027_v0 = vsel %vm1026_vm8, %v1779_v54, %v1023_v60 }
 0x9f9   :  { %v1032_v3 = vsel %vm1029_vm9, %v1031_v1, %v1027_v0  ;;  %v938_v9 = vsel %vm937_vm12, %v1781_v57, %v934_v6 }
 0x9fa   :  { %v943_v11 = vsel %vm940_vm13, %v942_v10, %v938_v9  ;;  %v1039_v20 = vmul.f32 %v1037_v14, %v1032_v3 }
 0xa4f   :  { %v1042_v4 = vpop.permute.xlu0 %1041 }
 0xa50   :  { %v1044_v5 = vmul.f32 %v1042_v4, %v1032_v3 }
 0xa52   :  { %1046 = vrot.lane.b32.xlu0 %v1044_v5, %s1861_s7 }
 0xa58   :  { %v953_v12 = vpop.permute.xlu1 %952 }
 0xa59   :  { %v955_v13 = vmul.f32 %v953_v12, %v943_v11 }
 0xa5b   :  { %957 = vrot.lane.b32.xlu2 %v955_v13, %s1861_s7 }
 0xa60   :  { %v948_v15 = vpop.permute.xlu1 %947 }
 0xa61   :  { %v950_v16 = vmul.f32 %v948_v15, %v943_v11 }
 0xab5   :  { %v958_v17 = vpop.permute.xlu2 %957 }
 0xab6   :  { %v960_v18 = vadd.f32 %v958_v17, %v950_v16 }
 0xab8   :  { %1782 = vtanh.f32 %v960_v18 }
 0xabe   :  { %v1783_v19 = vpop.eup %1782 }
 0xabf   :  { %963 = vrot.lane.b32.xlu1 %v1783_v19, %s1862_s10 }
 0xac4   :  { %v1047_v21 = vpop.permute.xlu0 %1046 }
 0xac5   :  { %v1049_v22 = vadd.f32 %v1047_v21, %v1039_v20 }
 0xac7   :  { %1784 = vtanh.f32 %v1049_v22  ;;  %1062 = vrot.lane.b32.xlu1 %v1049_v22, %s1863_s11 }
 0xacd   :  { %v1785_v23 = vpop.eup %1784 }
 0xace   :  { %1052 = vrot.lane.b32.xlu0 %v1785_v23, %s1862_s10 }
 0xb31   :  { %v964_v24 = vpop.permute.xlu1 %963 }
 0xb32   :  { %v966_v25 = vmul.f32 %v964_v24, %v943_v11 }
 0xb34   :  { %968 = vrot.lane.b32.xlu0 %v966_v25, %s1861_s7 }
 0xb39   :  { %v1063_v26 = vpop.permute.xlu1 %1062 }
 0xb3a   :  { %1065 = vst.msk [vmem:[#allocation5] sm:$0x3] %vm172_vm0, %v1063_v26 }
 0xb40   :  { %v1053_v27 = vpop.permute.xlu0 %1052 }
 0xb41   :  { %v1055_v28 = vmul.f32 %v1053_v27, %v1032_v3  ;;  %v1192_v29 = vld [vmem:[#allocation5] sm:$0x3] }
 0xb43   :  { %1057 = vrot.lane.b32.xlu2 %v1055_v28, %s1861_s7 }
 0xb4b   :  { %973 = vrot.lane.b32.xlu2 %v960_v18, %s1863_s11 }
 0xb53   :  { %1214 = vrot.lane.b32.xlu2 %v1192_v29, %s1861_s7 }
 0xb9d   :  { %v1058_v41 = vpop.permute.xlu2 %1057 }
 0xb9e   :  { %1060 = vst.msk [vmem:[#allocation4] sm:$0x3] %vm172_vm0, %v1058_v41  ;;  %v1067_v42 = vadd.f32 %v1066_v39, %v1058_v41  ;;  %v1070_v43 = vmax.f32 %v1069_v40, %v1058_v41 }
 0xba0   :  { %1068 = vst.msk [vmem:[#allocation7] sm:$0x3] %vm172_vm0, %v1067_v42 }
 0xba1   :  { %1071 = vst.msk [vmem:[#allocation9] sm:$0x3] %vm172_vm0, %v1070_v43 }
 0xba5   :  { %v974_v44 = vpop.permute.xlu2 %973  ;;  %v1163_v45 = vld [vmem:[#allocation4] sm:$0x3] }
 0xba6   :  { %976 = vst.msk [vmem:[#allocation3] sm:$0x3] %vm172_vm0, %v974_v44  ;;  %v969_v48 = vpop.permute.xlu0 %968  ;;  %1690 = vmatmul.msk.f32.vlgmr.msra.gmra.mxu3 %vm187_vm1, %v1163_v45  ;;  %v1661_v44 = vld [vmem:[%s2179_s1 + $0x6] sm:$0x3] }
 0xba7   :  { %971 = vst.msk [vmem:[#allocation2] sm:$0x3] %vm172_vm0, %v969_v48  ;;  %v978_v49 = vadd.f32 %v977_v46, %v969_v48  ;;  %v981_v50 = vmax.f32 %v980_v47, %v969_v48  ;;  %v1244_v45 = vld [vmem:[#allocation7] sm:$0x3] }
 0xba8   :  { %108 = vst [vmem:[#allocation11 + $0x2] sm:$0x3] %v1661_v44  ;;  %v1247_v46 = vld [vmem:[#allocation9] sm:$0x3] }
 0xba9   :  { %979 = vst.msk [vmem:[#allocation6] sm:$0x3] %vm172_vm0, %v978_v49 }
 0xbaa   :  { %982 = vst.msk [vmem:[#allocation8] sm:$0x3] %vm172_vm0, %v981_v50 }
 0xbad   :  { %v1103_v61 = vld [vmem:[#allocation3] sm:$0x3]  ;;  %v1215_v28 = vpop.permute.xlu2 %1214 }
 0xbae   :  { %v1074_v51 = vld [vmem:[#allocation2] sm:$0x3] }
 0xbaf   :  { %1688 = vmatmul.msk.f32.vlgmr.msra.gmra.mxu2 %vm187_vm1, %v1074_v51 }
 0xbb0   :  { %v1155_v52 = vld [vmem:[#allocation6] sm:$0x3] }
 0xc29   :  { %v1188_v54 = vpop.f32.mrf.mxu3 }
 0xc2a   :  { %v1191_v55 = vadd.f32 %v1188_v54, %v1162_v53  ;;  %v1158_v53 = vld [vmem:[#allocation8] sm:$0x3] }
 0xc2c   :  { %1786 = vtanh.f32 %v1191_v55  ;;  %v1691_v62 = vmul.f32 -1.442695, %v1191_v55 }
 0xc32   :  { %v1787_v57 = vpop.eup %1786  ;;  %v1099_v58 = vpop.f32.mrf.mxu2 }
 0xc33   :  { %v1102_v59 = vadd.f32 %v1099_v58, %v1073_v56  ;;  %1219 = vrot.lane.b32.xlu0 %v1787_v57, %s1862_s10  ;;  %v40_v58 = vld [vmem:[%s2178_s0 + $0x18] sm:$0x3] }
 0xc34   :  { %41 = vst [vmem:[#allocation10 + $0xc] sm:$0x3] %v40_v58 }
 0xc35   :  { %1788 = vtanh.f32 %v1102_v59  ;;  %v1689_v63 = vmul.f32 -1.442695, %v1102_v59  ;;  %v1340_v59 = vld [vmem:[#allocation11 + $0x2] sm:$0x3] }
 0xc36   :  { %1790 = vpow2.f32 %v1691_v62 }
 0xc37   :  { %1792 = vpow2.f32 %v1689_v63 }
 0xc3b   :  { %v1789_v60 = vpop.eup %1788  ;;  %v1251_v62 = vld [vmem:[#allocation10 + $0xc] sm:$0x3] }
 0xc3c   :  { %1130 = vrot.lane.b32.xlu1 %v1789_v60, %s1862_s10  ;;  %v1791_v0 = vpop.eup %1790 }
 0xc3d   :  { %v1196_v1 = vadd.f32 1.0, %v1791_v0  ;;  %v1793_v2 = vpop.eup %1792 }
 0xc3e   :  { %v1107_v3 = vadd.f32 1.0, %v1793_v2 }
 0xc3f   :  { %1794 = vrcp.f32 %v1196_v1  ;;  %v1208_v11 = vand.u32 2147483648, %v1196_v1  ;;  %vm1202_vm15 = vweird.f32 %v1196_v1  ;;  %v1206_v13 = vand.u32 2147483647, %v1196_v1 }
 0xc40   :  { %1796 = vrcp.f32 %v1107_v3  ;;  %v1119_v21 = vand.u32 2147483648, %v1107_v3  ;;  %vm1113_vm5 = vweird.f32 %v1107_v3  ;;  %v1117_v22 = vand.u32 2147483647, %v1107_v3 }
 0xc41   :  { %v1209_v15 = vor.u32 1.1754944e-38, %v1208_v11  ;;  %vm1207_vm3 = vcmp.eq.f32.partialorder %v1206_v13, 8.507059e+37 }
 0xc42   :  { %v1120_v24 = vor.u32 1.1754944e-38, %v1119_v21  ;;  %vm1118_vm7 = vcmp.eq.f32.partialorder %v1117_v22, 8.507059e+37 }
 0xc44   :  { %1125 = vrot.lane.b32.xlu1 %v1103_v61, %s1861_s7 }
 0xc45   :  { %v1795_v4 = vpop.eup %1794 }
 0xc46   :  { %v1198_v5 = vmul.f32 %v1795_v4, %v1196_v1  ;;  %v1797_v7 = vpop.eup %1796  ;;  %vm1203_vm14 = vweird.f32 %v1795_v4 }
 0xc47   :  { %v1109_v9 = vmul.f32 %v1797_v7, %v1107_v3  ;;  %vm1204_vm2 = vmor %vm1202_vm15, %vm1203_vm14  ;;  %vm1114_vm4 = vweird.f32 %v1797_v7 }
 0xc48   :  { %v1199_v6 = vsub.f32 1.0, %v1198_v5  ;;  %vm1115_vm6 = vmor %vm1113_vm5, %vm1114_vm4 }
 0xc49   :  { %v1110_v12 = vsub.f32 1.0, %v1109_v9 }
 0xc4a   :  { %v1200_v8 = vmul.f32 %v1795_v4, %v1199_v6 }
 0xc4b   :  { %v1111_v16 = vmul.f32 %v1797_v7, %v1110_v12 }
 0xc4c   :  { %v1201_v10 = vadd.f32 %v1795_v4, %v1200_v8 }
 0xc4d   :  { %v1112_v20 = vadd.f32 %v1797_v7, %v1111_v16 }
 0xc4e   :  { %v1205_v14 = vsel %vm1204_vm2, %v1795_v4, %v1201_v10 }
 0xc4f   :  { %v1210_v17 = vsel %vm1207_vm3, %v1209_v15, %v1205_v14  ;;  %v1116_v23 = vsel %vm1115_vm6, %v1797_v7, %v1112_v20 }
 0xc50   :  { %v1121_v25 = vsel %vm1118_vm7, %v1120_v24, %v1116_v23  ;;  %v1217_v34 = vmul.f32 %v1215_v28, %v1210_v17 }
 0xca5   :  { %v1220_v18 = vpop.permute.xlu0 %1219 }
 0xca6   :  { %v1222_v19 = vmul.f32 %v1220_v18, %v1210_v17 }
 0xca8   :  { %1224 = vrot.lane.b32.xlu0 %v1222_v19, %s1861_s7 }
 0xcae   :  { %v1131_v26 = vpop.permute.xlu1 %1130 }
 0xcaf   :  { %v1133_v27 = vmul.f32 %v1131_v26, %v1121_v25 }
 0xcb1   :  { %1135 = vrot.lane.b32.xlu2 %v1133_v27, %s1861_s7 }
 0xcb6   :  { %v1126_v29 = vpop.permute.xlu1 %1125 }
 0xcb7   :  { %v1128_v30 = vmul.f32 %v1126_v29, %v1121_v25 }
 0xd0b   :  { %v1136_v31 = vpop.permute.xlu2 %1135 }
 0xd0c   :  { %v1138_v32 = vadd.f32 %v1136_v31, %v1128_v30 }
 0xd0e   :  { %1798 = vtanh.f32 %v1138_v32 }
 0xd14   :  { %v1799_v33 = vpop.eup %1798 }
 0xd15   :  { %1141 = vrot.lane.b32.xlu1 %v1799_v33, %s1862_s10 }
 0xd1a   :  { %v1225_v35 = vpop.permute.xlu0 %1224 }
 0xd1b   :  { %v1227_v36 = vadd.f32 %v1225_v35, %v1217_v34 }
 0xd1d   :  { %1800 = vtanh.f32 %v1227_v36  ;;  %1240 = vrot.lane.b32.xlu1 %v1227_v36, %s1863_s11 }
 0xd23   :  { %v1801_v37 = vpop.eup %1800 }
 0xd24   :  { %1230 = vrot.lane.b32.xlu0 %v1801_v37, %s1862_s10 }
 0xd87   :  { %v1142_v38 = vpop.permute.xlu1 %1141 }
 0xd88   :  { %v1144_v39 = vmul.f32 %v1142_v38, %v1121_v25 }
 0xd8a   :  { %1146 = vrot.lane.b32.xlu0 %v1144_v39, %s1861_s7 }
 0xd8f   :  { %v1241_v40 = vpop.permute.xlu1 %1240 }
 0xd90   :  { %1243 = vst.msk [vmem:[#allocation5] sm:$0x3] %vm172_vm0, %v1241_v40 }
 0xd96   :  { %v1231_v41 = vpop.permute.xlu0 %1230 }
 0xd97   :  { %v1233_v42 = vmul.f32 %v1231_v41, %v1210_v17  ;;  %v1370_v43 = vld [vmem:[#allocation5] sm:$0x3] }
 0xd99   :  { %1235 = vrot.lane.b32.xlu2 %v1233_v42, %s1861_s7 }
 0xda1   :  { %1151 = vrot.lane.b32.xlu2 %v1138_v32, %s1863_s11 }
 0xda9   :  { %1392 = vrot.lane.b32.xlu2 %v1370_v43, %s1861_s7 }
 0xdf3   :  { %v1236_v47 = vpop.permute.xlu2 %1235 }
 0xdf4   :  { %1238 = vst.msk [vmem:[#allocation4] sm:$0x3] %vm172_vm0, %v1236_v47  ;;  %v1245_v48 = vadd.f32 %v1244_v45, %v1236_v47  ;;  %v1248_v49 = vmax.f32 %v1247_v46, %v1236_v47 }
 0xdf6   :  { %1246 = vst.msk [vmem:[#allocation7] sm:$0x3] %vm172_vm0, %v1245_v48 }
 0xdf7   :  { %1249 = vst.msk [vmem:[#allocation9] sm:$0x3] %vm172_vm0, %v1248_v49 }
 0xdfb   :  { %v1152_v50 = vpop.permute.xlu2 %1151  ;;  %v1341_v51 = vld [vmem:[#allocation4] sm:$0x3] }
 0xdfc   :  { %1154 = vst.msk [vmem:[#allocation3] sm:$0x3] %vm172_vm0, %v1152_v50  ;;  %v1147_v54 = vpop.permute.xlu0 %1146  ;;  %1694 = vmatmul.msk.f32.vlgmr.msrb.gmra.mxu1 %vm187_vm1, %v1341_v51  ;;  %v1660_v50 = vld [vmem:[%s2179_s1 + $0x2] sm:$0x3] }
 0xdfd   :  { %1149 = vst.msk [vmem:[#allocation2] sm:$0x3] %vm172_vm0, %v1147_v54  ;;  %v1156_v55 = vadd.f32 %v1155_v52, %v1147_v54  ;;  %v1159_v56 = vmax.f32 %v1158_v53, %v1147_v54  ;;  %v1422_v51 = vld [vmem:[#allocation7] sm:$0x3] }
 0xdfe   :  { %106 = vst [vmem:[#allocation11] sm:$0x3] %v1660_v50  ;;  %v1425_v52 = vld [vmem:[#allocation9] sm:$0x3] }
 0xdff   :  { %1157 = vst.msk [vmem:[#allocation6] sm:$0x3] %vm172_vm0, %v1156_v55 }
 0xe00   :  { %1160 = vst.msk [vmem:[#allocation8] sm:$0x3] %vm172_vm0, %v1159_v56 }
 0xe03   :  { %v1281_v3 = vld [vmem:[#allocation3] sm:$0x3]  ;;  %v1393_v34 = vpop.permute.xlu2 %1392 }
 0xe04   :  { %v1252_v57 = vld [vmem:[#allocation2] sm:$0x3] }
 0xe05   :  { %1692 = vmatmul.msk.f32.vlgmr.msrb.gmra.mxu0 %vm187_vm1, %v1252_v57 }
 0xe06   :  { %v1333_v58 = vld [vmem:[#allocation6] sm:$0x3] }
 0xe79   :  { %v1366_v60 = vpop.f32.mrf.mxu1 }
 0xe7a   :  { %v1369_v61 = vadd.f32 %v1366_v60, %v1340_v59  ;;  %v1336_v59 = vld [vmem:[#allocation8] sm:$0x3] }
 0xe7c   :  { %1802 = vtanh.f32 %v1369_v61  ;;  %v1695_v4 = vmul.f32 -1.442695, %v1369_v61 }
 0xe82   :  { %v1803_v63 = vpop.eup %1802  ;;  %v1277_v0 = vpop.f32.mrf.mxu0 }
 0xe83   :  { %v1280_v1 = vadd.f32 %v1277_v0, %v1251_v62  ;;  %1397 = vrot.lane.b32.xlu0 %v1803_v63, %s1862_s10  ;;  %v42_v0 = vld [vmem:[%s2178_s0 + $0x1c] sm:$0x3]  ;;  %s1865_s0 = smov [#allocation12]  }
 0xe84   :  { %43 = vst [vmem:[#allocation10 + $0xe] sm:$0x3] %v42_v0  ;;  %s1637_s30 = sshll.u32 %s1865_s0, 4  ;;  %s1638_s30 = int_to_ptr.vmem [resolvable:$true] %s1637_s30 }
 0xe85   :  { %1804 = vtanh.f32 %v1280_v1  ;;  %v1693_v5 = vmul.f32 -1.442695, %v1280_v1  ;;  %v1517_v1 = vld [vmem:[#allocation11] sm:$0x3] }
 0xe86   :  { %1806 = vpow2.f32 %v1695_v4 }
 0xe87   :  { %1808 = vpow2.f32 %v1693_v5 }
 0xe8b   :  { %v1805_v2 = vpop.eup %1804  ;;  %v1429_v4 = vld [vmem:[#allocation10 + $0xe] sm:$0x3] }
 0xe8c   :  { %1308 = vrot.lane.b32.xlu1 %v1805_v2, %s1862_s10  ;;  %v1807_v6 = vpop.eup %1806 }
 0xe8d   :  { %v1374_v7 = vadd.f32 1.0, %v1807_v6  ;;  %v1809_v8 = vpop.eup %1808 }
 0xe8e   :  { %v1285_v9 = vadd.f32 1.0, %v1809_v8 }
 0xe8f   :  { %1810 = vrcp.f32 %v1374_v7  ;;  %v1386_v17 = vand.u32 2147483648, %v1374_v7  ;;  %vm1380_vm9 = vweird.f32 %v1374_v7  ;;  %v1384_v19 = vand.u32 2147483647, %v1374_v7 }
 0xe90   :  { %1812 = vrcp.f32 %v1285_v9  ;;  %v1297_v27 = vand.u32 2147483648, %v1285_v9  ;;  %vm1291_vm13 = vweird.f32 %v1285_v9  ;;  %v1295_v28 = vand.u32 2147483647, %v1285_v9 }
 0xe91   :  { %v1387_v21 = vor.u32 1.1754944e-38, %v1386_v17  ;;  %vm1385_vm11 = vcmp.eq.f32.partialorder %v1384_v19, 8.507059e+37 }
 0xe92   :  { %v1298_v30 = vor.u32 1.1754944e-38, %v1297_v27  ;;  %vm1296_vm15 = vcmp.eq.f32.partialorder %v1295_v28, 8.507059e+37 }
 0xe94   :  { %1303 = vrot.lane.b32.xlu1 %v1281_v3, %s1861_s7 }
 0xe95   :  { %v1811_v10 = vpop.eup %1810 }
 0xe96   :  { %v1376_v11 = vmul.f32 %v1811_v10, %v1374_v7  ;;  %v1813_v13 = vpop.eup %1812  ;;  %vm1381_vm8 = vweird.f32 %v1811_v10 }
 0xe97   :  { %v1287_v15 = vmul.f32 %v1813_v13, %v1285_v9  ;;  %vm1382_vm10 = vmor %vm1380_vm9, %vm1381_vm8  ;;  %vm1292_vm12 = vweird.f32 %v1813_v13 }
 0xe98   :  { %v1377_v12 = vsub.f32 1.0, %v1376_v11  ;;  %vm1293_vm14 = vmor %vm1291_vm13, %vm1292_vm12 }
 0xe99   :  { %v1288_v18 = vsub.f32 1.0, %v1287_v15 }
 0xe9a   :  { %v1378_v14 = vmul.f32 %v1811_v10, %v1377_v12 }
 0xe9b   :  { %v1289_v22 = vmul.f32 %v1813_v13, %v1288_v18 }
 0xe9c   :  { %v1379_v16 = vadd.f32 %v1811_v10, %v1378_v14 }
 0xe9d   :  { %v1290_v26 = vadd.f32 %v1813_v13, %v1289_v22 }
 0xe9e   :  { %v1383_v20 = vsel %vm1382_vm10, %v1811_v10, %v1379_v16  ;;  %vm1627_vm10 = vcmask 523264  }
 0xe9f   :  { %v1388_v23 = vsel %vm1385_vm11, %v1387_v21, %v1383_v20  ;;  %v1294_v29 = vsel %vm1293_vm14, %v1813_v13, %v1290_v26  ;;  %vm1629_vm11 = vcmask 785408  }
 0xea0   :  { %v1299_v31 = vsel %vm1296_vm15, %v1298_v30, %v1294_v29  ;;  %v1395_v40 = vmul.f32 %v1393_v34, %v1388_v23 }
 0xef5   :  { %v1398_v24 = vpop.permute.xlu0 %1397 }
 0xef6   :  { %v1400_v25 = vmul.f32 %v1398_v24, %v1388_v23 }
 0xef8   :  { %1402 = vrot.lane.b32.xlu0 %v1400_v25, %s1861_s7 }
 0xefe   :  { %v1309_v32 = vpop.permute.xlu1 %1308 }
 0xeff   :  { %v1311_v33 = vmul.f32 %v1309_v32, %v1299_v31 }
 0xf01   :  { %1313 = vrot.lane.b32.xlu2 %v1311_v33, %s1861_s7 }
 0xf06   :  { %v1304_v35 = vpop.permute.xlu1 %1303 }
 0xf07   :  { %v1306_v36 = vmul.f32 %v1304_v35, %v1299_v31 }
 0xf5b   :  { %v1314_v37 = vpop.permute.xlu2 %1313 }
 0xf5c   :  { %v1316_v38 = vadd.f32 %v1314_v37, %v1306_v36 }
 0xf5e   :  { %1814 = vtanh.f32 %v1316_v38 }
 0xf64   :  { %v1815_v39 = vpop.eup %1814 }
 0xf65   :  { %1319 = vrot.lane.b32.xlu1 %v1815_v39, %s1862_s10 }
 0xf6a   :  { %v1403_v41 = vpop.permute.xlu0 %1402 }
 0xf6b   :  { %v1405_v42 = vadd.f32 %v1403_v41, %v1395_v40 }
 0xf6d   :  { %1816 = vtanh.f32 %v1405_v42  ;;  %1418 = vrot.lane.b32.xlu1 %v1405_v42, %s1863_s11 }
 0xf73   :  { %v1817_v43 = vpop.eup %1816 }
 0xf74   :  { %1408 = vrot.lane.b32.xlu0 %v1817_v43, %s1862_s10 }
 0xfd7   :  { %v1320_v44 = vpop.permute.xlu1 %1319 }
 0xfd8   :  { %v1322_v45 = vmul.f32 %v1320_v44, %v1299_v31 }
 0xfda   :  { %1324 = vrot.lane.b32.xlu0 %v1322_v45, %s1861_s7 }
 0xfdf   :  { %v1419_v46 = vpop.permute.xlu1 %1418 }
 0xfe0   :  { %1421 = vst.msk [vmem:[#allocation5] sm:$0x3] %vm172_vm0, %v1419_v46 }
 0xfe6   :  { %v1409_v47 = vpop.permute.xlu0 %1408 }
 0xfe7   :  { %v1411_v48 = vmul.f32 %v1409_v47, %v1388_v23  ;;  %v1547_v49 = vld [vmem:[#allocation5] sm:$0x3] }
 0xfe9   :  { %1413 = vrot.lane.b32.xlu2 %v1411_v48, %s1861_s7 }
 0xff1   :  { %1329 = vrot.lane.b32.xlu2 %v1316_v38, %s1863_s11 }
 0xff9   :  { %1569 = vrot.lane.b32.xlu2 %v1547_v49, %s1861_s7 }
0x1043   :  { %v1414_v53 = vpop.permute.xlu2 %1413 }
0x1044   :  { %1416 = vst.msk [vmem:[#allocation4] sm:$0x3] %vm172_vm0, %v1414_v53  ;;  %v1423_v54 = vadd.f32 %v1422_v51, %v1414_v53  ;;  %v1426_v55 = vmax.f32 %v1425_v52, %v1414_v53 }
0x1046   :  { %1424 = vst.msk [vmem:[#allocation7] sm:$0x3] %vm172_vm0, %v1423_v54 }
0x1047   :  { %1427 = vst.msk [vmem:[#allocation9] sm:$0x3] %vm172_vm0, %v1426_v55 }
0x104b   :  { %v1330_v56 = vpop.permute.xlu2 %1329  ;;  %v1518_v57 = vld [vmem:[#allocation4] sm:$0x3] }
0x104c   :  { %1332 = vst.msk [vmem:[#allocation3] sm:$0x3] %vm172_vm0, %v1330_v56  ;;  %v1325_v60 = vpop.permute.xlu0 %1324  ;;  %1698 = vmatmul.msk.f32.vlgmr.msrb.gmra.mxu3 %vm187_vm1, %v1518_v57 }
0x104d   :  { %1327 = vst.msk [vmem:[#allocation2] sm:$0x3] %vm172_vm0, %v1325_v60  ;;  %v1334_v61 = vadd.f32 %v1333_v58, %v1325_v60  ;;  %v1337_v62 = vmax.f32 %v1336_v59, %v1325_v60  ;;  %v1599_v54 = vld [vmem:[#allocation7] sm:$0x3] }
0x104e   :  { %v1602_v55 = vld [vmem:[#allocation9] sm:$0x3] }
0x104f   :  { %1335 = vst.msk [vmem:[#allocation6] sm:$0x3] %vm172_vm0, %v1334_v61 }
0x1050   :  { %1338 = vst.msk [vmem:[#allocation8] sm:$0x3] %vm172_vm0, %v1337_v62 }
0x1053   :  { %v1459_v9 = vld [vmem:[#allocation3] sm:$0x3]  ;;  %v1570_v40 = vpop.permute.xlu2 %1569 }
0x1054   :  { %v1430_v63 = vld [vmem:[#allocation2] sm:$0x3] }
0x1055   :  { %1696 = vmatmul.msk.f32.vlgmr.msrb.gmra.mxu2 %vm187_vm1, %v1430_v63 }
0x1056   :  { %v1511_v59 = vld [vmem:[#allocation6] sm:$0x3] }
0x1057   :  { %v1514_v60 = vld [vmem:[#allocation8] sm:$0x3] }
0x10cf   :  { %v1543_v2 = vpop.f32.mrf.mxu3 }
0x10d0   :  { %v1546_v3 = vadd.f32 %v1543_v2, %v1517_v1 }
0x10d2   :  { %1818 = vtanh.f32 %v1546_v3  ;;  %v1699_v10 = vmul.f32 -1.442695, %v1546_v3 }
0x10d8   :  { %v1819_v5 = vpop.eup %1818  ;;  %v1455_v6 = vpop.f32.mrf.mxu2 }
0x10d9   :  { %v1458_v7 = vadd.f32 %v1455_v6, %v1429_v4  ;;  %1574 = vrot.lane.b32.xlu0 %v1819_v5, %s1862_s10 }
0x10db   :  { %1820 = vtanh.f32 %v1458_v7  ;;  %v1697_v11 = vmul.f32 -1.442695, %v1458_v7 }
0x10dc   :  { %1822 = vpow2.f32 %v1699_v10 }
0x10dd   :  { %1824 = vpow2.f32 %v1697_v11 }
0x10e1   :  { %v1821_v8 = vpop.eup %1820 }
0x10e2   :  { %1486 = vrot.lane.b32.xlu1 %v1821_v8, %s1862_s10  ;;  %v1823_v12 = vpop.eup %1822 }
0x10e3   :  { %v1551_v13 = vadd.f32 1.0, %v1823_v12  ;;  %v1825_v14 = vpop.eup %1824 }
0x10e4   :  { %v1463_v15 = vadd.f32 1.0, %v1825_v14 }
0x10e5   :  { %1826 = vrcp.f32 %v1551_v13  ;;  %v1563_v23 = vand.u32 2147483648, %v1551_v13  ;;  %vm1557_vm3 = vweird.f32 %v1551_v13  ;;  %v1561_v25 = vand.u32 2147483647, %v1551_v13 }
0x10e6   :  { %1828 = vrcp.f32 %v1463_v15  ;;  %v1475_v33 = vand.u32 2147483648, %v1463_v15  ;;  %vm1469_vm7 = vweird.f32 %v1463_v15  ;;  %v1473_v34 = vand.u32 2147483647, %v1463_v15 }
0x10e7   :  { %v1564_v27 = vor.u32 1.1754944e-38, %v1563_v23  ;;  %vm1562_vm5 = vcmp.eq.f32.partialorder %v1561_v25, 8.507059e+37 }
0x10e8   :  { %v1476_v36 = vor.u32 1.1754944e-38, %v1475_v33  ;;  %vm1474_vm9 = vcmp.eq.f32.partialorder %v1473_v34, 8.507059e+37 }
0x10ea   :  { %1481 = vrot.lane.b32.xlu1 %v1459_v9, %s1861_s7 }
0x10eb   :  { %v1827_v16 = vpop.eup %1826 }
0x10ec   :  { %v1553_v17 = vmul.f32 %v1827_v16, %v1551_v13  ;;  %v1829_v19 = vpop.eup %1828  ;;  %vm1558_vm2 = vweird.f32 %v1827_v16 }
0x10ed   :  { %v1465_v21 = vmul.f32 %v1829_v19, %v1463_v15  ;;  %vm1559_vm4 = vmor %vm1557_vm3, %vm1558_vm2  ;;  %vm1470_vm6 = vweird.f32 %v1829_v19 }
0x10ee   :  { %v1554_v18 = vsub.f32 1.0, %v1553_v17  ;;  %vm1471_vm8 = vmor %vm1469_vm7, %vm1470_vm6 }
0x10ef   :  { %v1466_v24 = vsub.f32 1.0, %v1465_v21 }
0x10f0   :  { %v1555_v20 = vmul.f32 %v1827_v16, %v1554_v18 }
0x10f1   :  { %v1467_v28 = vmul.f32 %v1829_v19, %v1466_v24 }
0x10f2   :  { %v1556_v22 = vadd.f32 %v1827_v16, %v1555_v20 }
0x10f3   :  { %v1468_v32 = vadd.f32 %v1829_v19, %v1467_v28 }
0x10f4   :  { %v1560_v26 = vsel %vm1559_vm4, %v1827_v16, %v1556_v22 }
0x10f5   :  { %v1565_v29 = vsel %vm1562_vm5, %v1564_v27, %v1560_v26  ;;  %v1472_v35 = vsel %vm1471_vm8, %v1829_v19, %v1468_v32 }
0x10f6   :  { %v1477_v37 = vsel %vm1474_vm9, %v1476_v36, %v1472_v35  ;;  %v1572_v46 = vmul.f32 %v1570_v40, %v1565_v29 }
0x114b   :  { %v1575_v30 = vpop.permute.xlu0 %1574 }
0x114c   :  { %v1577_v31 = vmul.f32 %v1575_v30, %v1565_v29 }
0x114e   :  { %1579 = vrot.lane.b32.xlu0 %v1577_v31, %s1861_s7 }
0x1154   :  { %v1487_v38 = vpop.permute.xlu1 %1486 }
0x1155   :  { %v1489_v39 = vmul.f32 %v1487_v38, %v1477_v37 }
0x1157   :  { %1491 = vrot.lane.b32.xlu2 %v1489_v39, %s1861_s7 }
0x115c   :  { %v1482_v41 = vpop.permute.xlu1 %1481 }
0x115d   :  { %v1484_v42 = vmul.f32 %v1482_v41, %v1477_v37 }
0x11b1   :  { %v1492_v43 = vpop.permute.xlu2 %1491 }
0x11b2   :  { %v1494_v44 = vadd.f32 %v1492_v43, %v1484_v42 }
0x11b4   :  { %1830 = vtanh.f32 %v1494_v44 }
0x11ba   :  { %v1831_v45 = vpop.eup %1830 }
0x11bb   :  { %1497 = vrot.lane.b32.xlu1 %v1831_v45, %s1862_s10 }
0x11c0   :  { %v1580_v47 = vpop.permute.xlu0 %1579 }
0x11c1   :  { %v1582_v48 = vadd.f32 %v1580_v47, %v1572_v46 }
0x11c3   :  { %1832 = vtanh.f32 %v1582_v48 }
0x11c9   :  { %v1833_v49 = vpop.eup %1832 }
0x11ca   :  { %1585 = vrot.lane.b32.xlu0 %v1833_v49, %s1862_s10 }
0x122d   :  { %v1498_v50 = vpop.permute.xlu1 %1497 }
0x122e   :  { %v1500_v51 = vmul.f32 %v1498_v50, %v1477_v37 }
0x1230   :  { %1502 = vrot.lane.b32.xlu0 %v1500_v51, %s1861_s7 }
0x123c   :  { %v1586_v52 = vpop.permute.xlu0 %1585 }
0x123d   :  { %v1588_v53 = vmul.f32 %v1586_v52, %v1565_v29 }
0x123f   :  { %1590 = vrot.lane.b32.xlu2 %v1588_v53, %s1861_s7 }
0x1299   :  { %v1591_v56 = vpop.permute.xlu2 %1590 }
0x129a   :  { %1593 = vst.msk [vmem:[#allocation4] sm:$0x3] %vm172_vm0, %v1591_v56  ;;  %v1600_v57 = vadd.f32 %v1599_v54, %v1591_v56  ;;  %v1603_v58 = vmax.f32 %v1602_v55, %v1591_v56 }
0x129c   :  { %1601 = vst.msk [vmem:[#allocation7] sm:$0x3] %vm172_vm0, %v1600_v57 }
0x129d   :  { %1604 = vst.msk [vmem:[#allocation9] sm:$0x3] %vm172_vm0, %v1603_v58 }
0x12a2   :  { %v1503_v61 = vpop.permute.xlu0 %1502 }
0x12a3   :  { %1505 = vst.msk [vmem:[#allocation2] sm:$0x3] %vm172_vm0, %v1503_v61  ;;  %v1512_v62 = vadd.f32 %v1511_v59, %v1503_v61  ;;  %v1515_v63 = vmax.f32 %v1514_v60, %v1503_v61  ;;  %v1610_v0 = vld [vmem:[#allocation7] sm:$0x3] }
0x12a4   :  { %v1613_v1 = vld [vmem:[#allocation9] sm:$0x3]  ;;  %v1611_v2 = vmul.f32 0.125, %v1610_v0 }
0x12a5   :  { %1513 = vst.msk [vmem:[#allocation6] sm:$0x3] %vm172_vm0, %v1512_v62  ;;  %1623 = vrot.lane.b32.xlu0 %v1613_v1, %s1863_s11 }
0x12a6   :  { %1516 = vst.msk [vmem:[#allocation8] sm:$0x3] %vm172_vm0, %v1515_v63  ;;  %1615 = vrot.lane.b32.xlu1 %v1611_v2, %s1861_s7  ;;  %s1639_s7 = sshll.u32 %s2182_s4, 4  ;;  %s1640_s7 = int_to_ptr.hbm [resolvable:$true] %s1639_s7 }
0x12ac   :  { %v1608_v6 = vld [vmem:[#allocation6] sm:$0x3] }
0x12ad   :  { %v1612_v3 = vld [vmem:[#allocation8] sm:$0x3]  ;;  %v1609_v7 = vmul.f32 0.125, %v1608_v6 }
0x12ae   :  { %1619 = vrot.lane.b32.xlu2 %v1612_v3, %s1862_s10  ;;  %1507 = vrot.lane.b32.xlu1 %v1494_v44, %s1863_s11 }
0x12b6   :  { %1595 = vrot.lane.b32.xlu2 %v1582_v48, %s1863_s11 }
0x1308   :  { %v1620_v4 = vpop.permute.xlu2 %1619 }
0x1310   :  { %v1596_v5 = vpop.permute.xlu2 %1595 }
0x1311   :  { %1598 = vst.msk [vmem:[#allocation5] sm:$0x3] %vm172_vm0, %v1596_v5 }
0x1317   :  { %v1624_v10 = vpop.permute.xlu0 %1623 }
0x1318   :  { %v1616_v8 = vpop.permute.xlu1 %1615 }
0x1319   :  { %v1626_v9 = vsel %vm187_vm1, %v1609_v7, %v1616_v8 }
0x131a   :  { %v1628_v11 = vsel %vm1627_vm10, %v1626_v9, %v1620_v4 }
0x131b   :  { %v1630_v12 = vsel %vm1629_vm11, %v1628_v11, %v1624_v10 }
0x131c   :  { %1631 = vst [vmem:[#allocation12] sm:$0x3] %v1630_v12 }
0x131d   :  { %1642 = dma.vmem_to_hbm [thread:$0]  %s1638_s30, 32, %s1640_s7, [#allocation13]  }
0x1320   :  { %v1508_v13 = vpop.permute.xlu1 %1507 }
0x1321   :  { %1510 = vst.msk [vmem:[#allocation3] sm:$0x3] %vm172_vm0, %v1508_v13 }
0x1322   :  { %1858 = dma.done.wait [#allocation13], 32  }
0x1323   :  { %1859 = vsyncadd [#allocation13], 4294967264 }
0x1324   :  { %1647 = vsyncpa [#allocation13], 1 }

</bundles_post_ra>
